<compile_context>
chip_gen: v6e
topology: v6e:2x2x1
jax: 0.10.0
libtpu: 0.0.40
codegen_flags: <defaults>
</compile_context>

<pallas_src>
import functools

import jax
import jax.numpy as jnp
from jax import lax
from jax.experimental import pallas as pl
from jax.experimental.pallas import tpu as pltpu

# ----------------------------- config (small, synthetic) -----------------------------
VOCAB = 100
HIDDEN = 32
N_HEADS = 2
HEAD_DIM = HIDDEN // N_HEADS
FFN = 64
N_LAYERS = 2
MAX_POS = 16
NUM_LABELS = 15
LN_EPS = 1e-12

CLS_PAD = 128        # classifier output padded to full lane width (unmasked stores)
_ROW_TARGET = 128    # target matmul row count per grid step (BLK_B*S)

TAGS = ['B-APL', 'B-CMT', 'B-DSC', 'B-MAT', 'B-PRO', 'B-SMT', 'B-SPL',
        'I-APL', 'I-CMT', 'I-DSC', 'I-MAT', 'I-PRO', 'I-SMT', 'I-SPL', 'O']


# ----------------------------- fused forward kernel -----------------------------
def fused_forward_kernel(
        lens_ref,                                   # SMEM (B_pad,) int32 (scalar prefetch)
        x_ref,                                      # (1, R, H) f32, time-major rows
        emb_ln_g_ref, emb_ln_b_ref,                 # (1, H) f32
        wq_ref, wk_ref, wv_ref,                     # (NL, NH, H, DH) bf16
        wo_ref,                                     # (NL, NH, DH, H) bf16
        o_b_ref,                                    # (NL, 1, H) f32
        ln1_g_ref, ln1_b_ref,                       # (NL, 1, H) f32
        ff1_w_ref, ff1_b_ref,                       # (NL, H, F) bf16, (NL, 1, F) f32
        ff2_w_ref, ff2_b_ref,                       # (NL, F, H) bf16, (NL, 1, H) f32
        ln2_g_ref, ln2_b_ref,                       # (NL, 1, H) f32
        cls_w_ref, cls_b_ref,                       # (H, CP) bf16, (1, CP) f32
        cls_wT_ref, cls_bT_ref,                     # (L, H) bf16, (L, 1) f32
        trans3_ref,                                 # (L, L, 1) f32: [prev][cur, 0]
        start_ref, end_ref,                         # (L, 1) f32
        tags_ref,                                   # out: (1, S, BLK_B) int32
        em_out_ref,                                 # out: (1, R, CP) f32
        *, S, BLK_B):
    blk = pl.program_id(0)
    base = blk * BLK_B
    R = S * BLK_B
    L = NUM_LABELS
    f32 = jnp.float32
    bf16 = jnp.bfloat16

    # ---- per-block sequence lengths as a lane vector (batch on lanes) ----
    lane_b = lax.broadcasted_iota(jnp.int32, (1, BLK_B), 1)
    lens_lane = jnp.zeros((1, BLK_B), jnp.int32)
    for j in range(BLK_B):                          # BLK_B scalar SMEM reads, once per block
        lens_lane = jnp.where(lane_b == j, lens_ref[base + j], lens_lane)
    seq_end = lens_lane - 1                         # (1, BLK_B)

    # ---- block-diagonal attention bias over the flattened time-major rows ----
    # row i <-> (t = i // BLK_B, b = i % BLK_B); built with selects (no vector div/rem).
    col_pos = lax.broadcasted_iota(jnp.int32, (1, R), 1)
    row_pos = lax.broadcasted_iota(jnp.int32, (R, 1), 0)
    col_t = jnp.zeros((1, R), jnp.int32)
    row_t = jnp.zeros((R, 1), jnp.int32)
    for t in range(1, S):
        col_t = jnp.where(col_pos >= t * BLK_B, t, col_t)
        row_t = jnp.where(row_pos >= t * BLK_B, t, row_t)
    col_b = col_pos - col_t * BLK_B
    row_b = row_pos - row_t * BLK_B
    col_len = jnp.zeros((1, R), jnp.int32)
    for j in range(BLK_B):
        col_len = jnp.where(col_b == j, lens_ref[base + j], col_len)
    bias = jnp.where((row_b == col_b) & (col_t < col_len), 0.0, -1e9)   # (R, R) f32

    def ln(x, g, beta):
        # independent reductions (sum, sum of squares) -> back-to-back XLU issues
        s1 = jnp.sum(x, axis=-1, keepdims=True)
        s2 = jnp.sum(x * x, axis=-1, keepdims=True)
        mu = s1 * (1.0 / HIDDEN)
        var = jnp.maximum(s2 * (1.0 / HIDDEN) - mu * mu, 0.0)
        return (x - mu) * lax.rsqrt(var + LN_EPS) * g + beta

    # ---------------- BERT encoder on the flattened (R, H) row slab ----------------
    x = ln(x_ref[0], emb_ln_g_ref[...], emb_ln_b_ref[...])              # (R, H) f32
    scale = 1.0 / float(HEAD_DIM) ** 0.5
    # TODO(synk): for real BERT dims, add a layer grid axis ("arbitrary") and stream
    # per-layer weights with double buffering instead of keeping all layers resident.
    for layer in range(N_LAYERS):
        xb = x.astype(bf16)
        attn = jnp.zeros((R, HIDDEN), f32)
        for h in range(N_HEADS):
            # per-head weights indexed only on leading dims -> no lane-offset slices
            q = jnp.dot(xb, wq_ref[layer, h], preferred_element_type=f32)
            k = jnp.dot(xb, wk_ref[layer, h], preferred_element_type=f32)
            v = jnp.dot(xb, wv_ref[layer, h], preferred_element_type=f32)
            qb = (q * scale).astype(bf16)
            s = lax.dot_general(qb, k.astype(bf16), (((1,), (1,)), ((), ())),
                                preferred_element_type=f32) + bias      # (R, R)
            m = jnp.max(s, axis=-1, keepdims=True)
            e = jnp.exp(s - m)
            p = e * pl.reciprocal(jnp.sum(e, axis=-1, keepdims=True), approx=True)
            ctx = jnp.dot(p.astype(bf16), v.astype(bf16),
                          preferred_element_type=f32)                   # (R, DH)
            # per-head slice of the output projection; summing over heads is
            # identical to concat(heads) @ W_O and avoids a lane-offset scatter.
            attn = attn + jnp.dot(ctx.astype(bf16), wo_ref[layer, h],
                                  preferred_element_type=f32)
        attn = attn + o_b_ref[layer]
        x = ln(x + attn, ln1_g_ref[layer], ln1_b_ref[layer])

        xb = x.astype(bf16)
        hmid = jnp.dot(xb, ff1_w_ref[layer],
                       preferred_element_type=f32) + ff1_b_ref[layer]
        # TODO(synk): HF BERT uses erf-gelu; tanh approximation kept (EUP friendly).
        hmid = jax.nn.gelu(hmid, approximate=True)
        ff = jnp.dot(hmid.astype(bf16), ff2_w_ref[layer],
                     preferred_element_type=f32) + ff2_b_ref[layer]
        x = ln(x + ff, ln2_g_ref[layer], ln2_b_ref[layer])

    # ---- token classifier: lane-padded (R, 128) logits -> unmasked stores ----
    xb = x.astype(bf16)
    logits = jnp.dot(xb, cls_w_ref[...], preferred_element_type=f32) + cls_b_ref[...]
    em_out_ref[0] = logits                                              # (R, CP)

    # Transposed emissions (L, R) straight from the MXU (pre-transposed classifier
    # weight) -- no in-kernel transpose; columns are time-major so the per-step
    # (L, BLK_B) slices below are contiguous lane ranges.
    emT = lax.dot_general(cls_wT_ref[...], xb, (((1,), (1,)), ((), ())),
                          preferred_element_type=f32) + cls_bT_ref[...]

    # ---------------- CRF Viterbi decode (torchcrf semantics), batched ----------------
    # score: (L, BLK_B) -- current tag on sublanes, sequence (batch) on lanes.
    def em_t(t):
        return emT[:, t * BLK_B:(t + 1) * BLK_B]                        # (L, BLK_B)

    score = start_ref[...] + em_t(0)
    final = score                                                       # frozen at seq_end
    bp = {}                                                             # (L, BLK_B) int32 per step
    # TODO(synk): for larger S, spill backpointers to a VMEM scratch and backtrack
    # with lax.fori_loop instead of keeping S-1 live vregs per block.
    for t in range(1, S):
        best = jnp.full((L, BLK_B), -jnp.inf, f32)
        bp_t = jnp.zeros((L, BLK_B), jnp.int32)
        for prev in range(L):
            # (1, BLK_B) previous-tag score row + (L, 1) transition column, then a
            # pure-VPU compare/select chain for max/argmax over `prev`, shared by
            # the whole block (no per-step XLU reduce, no transpose).
            cand = score[prev:prev + 1, :] + trans3_ref[prev]
            better = cand > best              # strict '>' keeps lowest prev on ties
            best = jnp.where(better, cand, best)
            bp_t = jnp.where(better, prev, bp_t)
        bp[t] = bp_t
        score = best + em_t(t)
        final = jnp.where(seq_end == t, score, final)

    # end transitions + argmax over tags (2 sublane reduces per block, not per step)
    cand = final + end_ref[...]                                         # (L, BLK_B)
    mx = jnp.max(cand, axis=0, keepdims=True)                           # (1, BLK_B)
    sub_l = lax.broadcasted_iota(jnp.int32, (L, BLK_B), 0)
    best_last = jnp.min(jnp.where(cand == mx, sub_l, L),
                        axis=0, keepdims=True)                          # (1, BLK_B)

    # backtrack, vectorized across the lane (batch) axis; pads past seq_end stay 0
    out_rows = lax.broadcasted_iota(jnp.int32, (S, BLK_B), 0)
    tag_mat = jnp.where(out_rows == seq_end, best_last, 0)              # (S, BLK_B)
    cur = best_last
    for t in range(S - 1, 0, -1):
        prev_tag = jnp.sum(jnp.where(sub_l == cur, bp[t], 0),
                           axis=0, keepdims=True)                       # (1, BLK_B)
        tpos = t - 1
        valid = tpos < seq_end
        cur = jnp.where(valid, prev_tag, cur)
        tag_mat = jnp.where((out_rows == tpos) & valid, cur, tag_mat)
    tags_ref[0] = tag_mat


# ----------------------------- wrapper (single pallas_call) -----------------------------
def ner_forward(input_ids, lengths, params):
    """BERT encoder + token classifier + CRF Viterbi decode, one fused Pallas kernel."""
    B, S = input_ids.shape
    H, L = HIDDEN, NUM_LABELS

    # batch blocking: BLK_B sequences per grid step -> (BLK_B*S, H) matmul rows
    BLK_B = max(1, min(_ROW_TARGET // S, B))
    nb = (B + BLK_B - 1) // BLK_B
    B_pad = nb * BLK_B
    R = S * BLK_B

    lengths = lengths.astype(jnp.int32)
    if B_pad != B:
        input_ids = jnp.pad(input_ids, ((0, B_pad - B), (0, 0)))
        lengths = jnp.pad(lengths, (0, B_pad - B), constant_values=1)

    # TODO(synk): the HF tokenizer / BertNormalizer string pipeline of
    # Tokenizer_RC.forward (normalize, wordpiece, entity-marker insertion,
    # convert_tokens_to_ids) is host-side Python with no Pallas equivalent; the
    # kernel consumes its numeric output (input_ids / lengths).  The embedding
    # table gather stays as one XLA op here (optional fusion, negligible bytes).
    x = (params["word_emb"][input_ids]
         + params["pos_emb"][None, :S, :]
         + params["type_emb"][None, 0:1, :]).astype(jnp.float32)         # (B_pad, S, H)
    # time-major rows per block: row i of a block is (t = i // BLK_B, b = i % BLK_B)
    x = x.reshape(nb, BLK_B, S, H).transpose(0, 2, 1, 3).reshape(nb, R, H)

    kernel = functools.partial(fused_forward_kernel, S=S, BLK_B=BLK_B)
    full2 = lambda b, lens: (0, 0)
    full3 = lambda b, lens: (0, 0, 0)
    full4 = lambda b, lens: (0, 0, 0, 0)

    tags_pad, em_pad = pl.pallas_call(
        kernel,
        out_shape=(jax.ShapeDtypeStruct((nb, S, BLK_B), jnp.int32),
                   jax.ShapeDtypeStruct((nb, R, CLS_PAD), jnp.float32)),
        grid_spec=pltpu.PrefetchScalarGridSpec(
            num_scalar_prefetch=1,
            grid=(nb,),
            in_specs=[
                pl.BlockSpec((1, R, H), lambda b, lens: (b, 0, 0)),        # embeddings
                pl.BlockSpec((1, H), full2), pl.BlockSpec((1, H), full2),  # emb LN g,b
                pl.BlockSpec((N_LAYERS, N_HEADS, H, HEAD_DIM), full4),     # wq
                pl.BlockSpec((N_LAYERS, N_HEADS, H, HEAD_DIM), full4),     # wk
                pl.BlockSpec((N_LAYERS, N_HEADS, H, HEAD_DIM), full4),     # wv
                pl.BlockSpec((N_LAYERS, N_HEADS, HEAD_DIM, H), full4),     # wo
                pl.BlockSpec((N_LAYERS, 1, H), full3),                     # o_b
                pl.BlockSpec((N_LAYERS, 1, H), full3),                     # ln1_g
                pl.BlockSpec((N_LAYERS, 1, H), full3),                     # ln1_b
                pl.BlockSpec((N_LAYERS, H, FFN), full3),                   # ff1_w
                pl.BlockSpec((N_LAYERS, 1, FFN), full3),                   # ff1_b
                pl.BlockSpec((N_LAYERS, FFN, H), full3),                   # ff2_w
                pl.BlockSpec((N_LAYERS, 1, H), full3),                     # ff2_b
                pl.BlockSpec((N_LAYERS, 1, H), full3),                     # ln2_g
                pl.BlockSpec((N_LAYERS, 1, H), full3),                     # ln2_b
                pl.BlockSpec((H, CLS_PAD), full2),                         # cls_w (padded)
                pl.BlockSpec((1, CLS_PAD), full2),                         # cls_b (padded)
                pl.BlockSpec((L, H), full2),                               # cls_wT
                pl.BlockSpec((L, 1), full2),                               # cls_bT
                pl.BlockSpec((L, L, 1), full3),                            # trans3 [prev][cur,0]
                pl.BlockSpec((L, 1), full2),                               # start (column)
                pl.BlockSpec((L, 1), full2),                               # end (column)
            ],
            out_specs=[pl.BlockSpec((1, S, BLK_B), lambda b, lens: (b, 0, 0)),
                       pl.BlockSpec((1, R, CLS_PAD), lambda b, lens: (b, 0, 0))]),
        compiler_params=pltpu.CompilerParams(
            dimension_semantics=("parallel",)),   # blocks shard across TCs on v7x
    )(lengths, x,
      params["emb_ln_g"], params["emb_ln_b"],
      params["wq"], params["wk"], params["wv"], params["wo"], params["o_b"],
      params["ln1_g"], params["ln1_b"], params["ff1_w"], params["ff1_b"],
      params["ff2_w"], params["ff2_b"], params["ln2_g"], params["ln2_b"],
      params["cls_w"], params["cls_b"], params["cls_wT"], params["cls_bT"],
      params["trans3"], params["start"], params["end"])

    # undo the time-major block layout on the host (tiny XLA reshapes)
    tags = tags_pad.transpose(0, 2, 1).reshape(B_pad, S)[:B]             # (B, S) int32
    em = em_pad.reshape(nb, S, BLK_B, CLS_PAD).transpose(0, 2, 1, 3)
    # NOTE: emission rows at positions >= length are unmasked; consumers must ignore
    # them (decoded tags already handle padding via seq_end).
    emissions = em.reshape(B_pad, S, CLS_PAD)[:B, :, :L]                 # (B, S, L) f32
    return tags, emissions


# ----------------------------- deterministic synthetic params -----------------------------
def init_params(key):
    keys = iter(jax.random.split(key, 64))

    def nrm(shape, s=0.02):
        return jax.random.normal(next(keys), shape, jnp.float32) * s

    H, L, F, NL = HIDDEN, NUM_LABELS, FFN, N_LAYERS
    NH, DH = N_HEADS, HEAD_DIM
    bf16 = jnp.bfloat16

    # Per-head Q/K/V/O weights on leading dims (no lane-offset slicing in-kernel);
    # all MXU operands stored in bf16 (native MXU dtype, halves weight DMA bytes).
    wq = nrm((NL, NH, H, DH)).astype(bf16)
    wk = nrm((NL, NH, H, DH)).astype(bf16)
    wv = nrm((NL, NH, H, DH)).astype(bf16)
    wo = nrm((NL, NH, DH, H)).astype(bf16)
    o_b = jnp.zeros((NL, 1, H), jnp.float32)
    ln1_g = jnp.ones((NL, 1, H), jnp.float32); ln1_b = jnp.zeros((NL, 1, H), jnp.float32)
    ff1_w = nrm((NL, H, F)).astype(bf16); ff1_b = jnp.zeros((NL, 1, F), jnp.float32)
    ff2_w = nrm((NL, F, H)).astype(bf16); ff2_b = jnp.zeros((NL, 1, H), jnp.float32)
    ln2_g = jnp.ones((NL, 1, H), jnp.float32); ln2_b = jnp.zeros((NL, 1, H), jnp.float32)

    cls_w = nrm((H, L)).astype(bf16)
    cls_b = jnp.zeros((1, L), jnp.float32)
    cls_w_pad = jnp.zeros((H, CLS_PAD), bf16).at[:, :L].set(cls_w)
    cls_b_pad = jnp.zeros((1, CLS_PAD), jnp.float32).at[:, :L].set(cls_b)
    cls_wT = jnp.transpose(cls_w)                       # (L, H) bf16, same values
    cls_bT = jnp.transpose(cls_b)                       # (L, 1) f32

    trans = nrm((L, L), 0.1)                            # trans[prev, cur]
    start = nrm((L, 1), 0.1)
    end = nrm((L, 1), 0.1)

    return dict(
        word_emb=nrm((VOCAB, H)), pos_emb=nrm((MAX_POS, H)), type_emb=nrm((2, H)),
        emb_ln_g=jnp.ones((1, H), jnp.float32), emb_ln_b=jnp.zeros((1, H), jnp.float32),
        wq=wq, wk=wk, wv=wv, wo=wo, o_b=o_b,
        ln1_g=ln1_g, ln1_b=ln1_b, ff1_w=ff1_w, ff1_b=ff1_b,
        ff2_w=ff2_w, ff2_b=ff2_b, ln2_g=ln2_g, ln2_b=ln2_b,
        cls_w=cls_w_pad, cls_b=cls_b_pad, cls_wT=cls_wT, cls_bT=cls_bT,
        trans3=trans.reshape(L, L, 1), start=start, end=end)


# ----------------------------- main -----------------------------
if __name__ == "__main__":
    key = jax.random.PRNGKey(0)
    pkey, dkey = jax.random.split(key)
    params = init_params(pkey)

    B, S = 2, 8
    input_ids = jax.random.randint(dkey, (B, S), 0, VOCAB, dtype=jnp.int32)
    lengths = jnp.array([8, 5], dtype=jnp.int32)      # variable-length batch (padding)

    fwd = jax.jit(ner_forward)
    tags, emissions = fwd(input_ids, lengths, params)
    jax.block_until_ready((tags, emissions))

    # TODO(synk): tokenizer / checkpoint loading / BIO span string parsing are
    # host-side Python; map decoded tag indices via TAGS on the host.
    _ = [[TAGS[int(t)] for t in tags[b, :int(lengths[b])]] for b in range(B)]

    print("KERNEL_OK")
</pallas_src>

<mosaic_0001>
module attributes {stable_mosaic.version = 11 : i64} {
  func.func @fused_forward_kernel(%arg0: i32, %arg1: memref<2xi32, #tpu.memory_space<smem>>, %arg2: memref<1x16x32xf32, #tpu.memory_space<vmem>>, %arg3: memref<1x32xf32, #tpu.memory_space<vmem>>, %arg4: memref<1x32xf32, #tpu.memory_space<vmem>>, %arg5: memref<2x2x32x16xbf16, #tpu.memory_space<vmem>>, %arg6: memref<2x2x32x16xbf16, #tpu.memory_space<vmem>>, %arg7: memref<2x2x32x16xbf16, #tpu.memory_space<vmem>>, %arg8: memref<2x2x16x32xbf16, #tpu.memory_space<vmem>>, %arg9: memref<2x1x32xf32, #tpu.memory_space<vmem>>, %arg10: memref<2x1x32xf32, #tpu.memory_space<vmem>>, %arg11: memref<2x1x32xf32, #tpu.memory_space<vmem>>, %arg12: memref<2x32x64xbf16, #tpu.memory_space<vmem>>, %arg13: memref<2x1x64xf32, #tpu.memory_space<vmem>>, %arg14: memref<2x64x32xbf16, #tpu.memory_space<vmem>>, %arg15: memref<2x1x32xf32, #tpu.memory_space<vmem>>, %arg16: memref<2x1x32xf32, #tpu.memory_space<vmem>>, %arg17: memref<2x1x32xf32, #tpu.memory_space<vmem>>, %arg18: memref<32x128xbf16, #tpu.memory_space<vmem>>, %arg19: memref<1x128xf32, #tpu.memory_space<vmem>>, %arg20: memref<15x32xbf16, #tpu.memory_space<vmem>>, %arg21: memref<15x1xf32, #tpu.memory_space<vmem>>, %arg22: memref<15x15x1xf32, #tpu.memory_space<vmem>>, %arg23: memref<15x1xf32, #tpu.memory_space<vmem>>, %arg24: memref<15x1xf32, #tpu.memory_space<vmem>>, %arg25: memref<1x8x2xi32, #tpu.memory_space<vmem>>, %arg26: memref<1x16x128xf32, #tpu.memory_space<vmem>>) attributes {dimension_semantics = [#tpu.dimension_semantics<parallel>], iteration_bounds = array<i64: 1>, scalar_prefetch = 1 : i64, scratch_operands = 0 : i64, tpu.core_type = #tpu.core_type<tc>, window_params = [{transform_indices = @transform_0, window_bounds = array<i64: 1, 16, 32>}, {pipeline_mode = #tpu.pipeline_mode<synchronous>, transform_indices = @transform_1, window_bounds = array<i64: 1, 32>}, {pipeline_mode = #tpu.pipeline_mode<synchronous>, transform_indices = @transform_2, window_bounds = array<i64: 1, 32>}, {pipeline_mode = #tpu.pipeline_mode<synchronous>, transform_indices = @transform_3, window_bounds = array<i64: 2, 2, 32, 16>}, {pipeline_mode = #tpu.pipeline_mode<synchronous>, transform_indices = @transform_4, window_bounds = array<i64: 2, 2, 32, 16>}, {pipeline_mode = #tpu.pipeline_mode<synchronous>, transform_indices = @transform_5, window_bounds = array<i64: 2, 2, 32, 16>}, {pipeline_mode = #tpu.pipeline_mode<synchronous>, transform_indices = @transform_6, window_bounds = array<i64: 2, 2, 16, 32>}, {pipeline_mode = #tpu.pipeline_mode<synchronous>, transform_indices = @transform_7, window_bounds = array<i64: 2, 1, 32>}, {pipeline_mode = #tpu.pipeline_mode<synchronous>, transform_indices = @transform_8, window_bounds = array<i64: 2, 1, 32>}, {pipeline_mode = #tpu.pipeline_mode<synchronous>, transform_indices = @transform_9, window_bounds = array<i64: 2, 1, 32>}, {pipeline_mode = #tpu.pipeline_mode<synchronous>, transform_indices = @transform_10, window_bounds = array<i64: 2, 32, 64>}, {pipeline_mode = #tpu.pipeline_mode<synchronous>, transform_indices = @transform_11, window_bounds = array<i64: 2, 1, 64>}, {pipeline_mode = #tpu.pipeline_mode<synchronous>, transform_indices = @transform_12, window_bounds = array<i64: 2, 64, 32>}, {pipeline_mode = #tpu.pipeline_mode<synchronous>, transform_indices = @transform_13, window_bounds = array<i64: 2, 1, 32>}, {pipeline_mode = #tpu.pipeline_mode<synchronous>, transform_indices = @transform_14, window_bounds = array<i64: 2, 1, 32>}, {pipeline_mode = #tpu.pipeline_mode<synchronous>, transform_indices = @transform_15, window_bounds = array<i64: 2, 1, 32>}, {pipeline_mode = #tpu.pipeline_mode<synchronous>, transform_indices = @transform_16, window_bounds = array<i64: 32, 128>}, {pipeline_mode = #tpu.pipeline_mode<synchronous>, transform_indices = @transform_17, window_bounds = array<i64: 1, 128>}, {pipeline_mode = #tpu.pipeline_mode<synchronous>, transform_indices = @transform_18, window_bounds = array<i64: 15, 32>}, {pipeline_mode = #tpu.pipeline_mode<synchronous>, transform_indices = @transform_19, window_bounds = array<i64: 15, 1>}, {pipeline_mode = #tpu.pipeline_mode<synchronous>, transform_indices = @transform_20, window_bounds = array<i64: 15, 15, 1>}, {pipeline_mode = #tpu.pipeline_mode<synchronous>, transform_indices = @transform_21, window_bounds = array<i64: 15, 1>}, {pipeline_mode = #tpu.pipeline_mode<synchronous>, transform_indices = @transform_22, window_bounds = array<i64: 15, 1>}, {transform_indices = @transform_23, window_bounds = array<i64: 1, 8, 2>}, {transform_indices = @transform_24, window_bounds = array<i64: 1, 16, 128>}]} {
    %c2_i32 = arith.constant 2 : i32
    %0 = arith.muli %arg0, %c2_i32 : i32
    %1 = tpu.iota {dimensions = array<i32: 1>} : vector<1x2xi32>
    %c0_i32 = arith.constant 0 : i32
    %2 = vector.broadcast %c0_i32 : i32 to vector<1x2xi32>
    %c0_i32_0 = arith.constant 0 : i32
    %3 = vector.broadcast %c0_i32_0 : i32 to vector<1x2xi32>
    %4 = arith.cmpi eq, %1, %3 : vector<1x2xi32>
    %c0_i32_1 = arith.constant 0 : i32
    %5 = arith.addi %0, %c0_i32_1 : i32
    %6 = arith.index_cast %5 : i32 to index
    %7 = memref.load %arg1[%6] : memref<2xi32, #tpu.memory_space<smem>>
    %8 = vector.broadcast %7 : i32 to vector<1x2xi32>
    %9 = arith.select %4, %8, %2 : vector<1x2xi1>, vector<1x2xi32>
    %c1_i32 = arith.constant 1 : i32
    %10 = vector.broadcast %c1_i32 : i32 to vector<1x2xi32>
    %11 = arith.cmpi eq, %1, %10 : vector<1x2xi32>
    %c1_i32_2 = arith.constant 1 : i32
    %12 = arith.addi %0, %c1_i32_2 : i32
    %13 = arith.index_cast %12 : i32 to index
    %14 = memref.load %arg1[%13] : memref<2xi32, #tpu.memory_space<smem>>
    %15 = vector.broadcast %14 : i32 to vector<1x2xi32>
    %16 = arith.select %11, %15, %9 : vector<1x2xi1>, vector<1x2xi32>
    %c1_i32_3 = arith.constant 1 : i32
    %17 = vector.broadcast %c1_i32_3 : i32 to vector<1x2xi32>
    %18 = arith.subi %16, %17 : vector<1x2xi32>
    %19 = tpu.iota {dimensions = array<i32: 1>} : vector<1x16xi32>
    %20 = tpu.iota {dimensions = array<i32: 0>} : vector<16x1xi32>
    %c0_i32_4 = arith.constant 0 : i32
    %21 = vector.broadcast %c0_i32_4 : i32 to vector<1x16xi32>
    %c0_i32_5 = arith.constant 0 : i32
    %22 = vector.broadcast %c0_i32_5 : i32 to vector<16x1xi32>
    %c2_i32_6 = arith.constant 2 : i32
    %23 = vector.broadcast %c2_i32_6 : i32 to vector<1x16xi32>
    %24 = arith.cmpi sge, %19, %23 : vector<1x16xi32>
    %c1_i32_7 = arith.constant 1 : i32
    %25 = vector.broadcast %c1_i32_7 : i32 to vector<1x16xi32>
    %26 = arith.select %24, %25, %21 : vector<1x16xi1>, vector<1x16xi32>
    %c2_i32_8 = arith.constant 2 : i32
    %27 = vector.broadcast %c2_i32_8 : i32 to vector<16x1xi32>
    %28 = arith.cmpi sge, %20, %27 : vector<16x1xi32>
    %c1_i32_9 = arith.constant 1 : i32
    %29 = vector.broadcast %c1_i32_9 : i32 to vector<16x1xi32>
    %30 = arith.select %28, %29, %22 : vector<16x1xi1>, vector<16x1xi32>
    %c4_i32 = arith.constant 4 : i32
    %31 = vector.broadcast %c4_i32 : i32 to vector<1x16xi32>
    %32 = arith.cmpi sge, %19, %31 : vector<1x16xi32>
    %c2_i32_10 = arith.constant 2 : i32
    %33 = vector.broadcast %c2_i32_10 : i32 to vector<1x16xi32>
    %34 = arith.select %32, %33, %26 : vector<1x16xi1>, vector<1x16xi32>
    %c4_i32_11 = arith.constant 4 : i32
    %35 = vector.broadcast %c4_i32_11 : i32 to vector<16x1xi32>
    %36 = arith.cmpi sge, %20, %35 : vector<16x1xi32>
    %c2_i32_12 = arith.constant 2 : i32
    %37 = vector.broadcast %c2_i32_12 : i32 to vector<16x1xi32>
    %38 = arith.select %36, %37, %30 : vector<16x1xi1>, vector<16x1xi32>
    %c6_i32 = arith.constant 6 : i32
    %39 = vector.broadcast %c6_i32 : i32 to vector<1x16xi32>
    %40 = arith.cmpi sge, %19, %39 : vector<1x16xi32>
    %c3_i32 = arith.constant 3 : i32
    %41 = vector.broadcast %c3_i32 : i32 to vector<1x16xi32>
    %42 = arith.select %40, %41, %34 : vector<1x16xi1>, vector<1x16xi32>
    %c6_i32_13 = arith.constant 6 : i32
    %43 = vector.broadcast %c6_i32_13 : i32 to vector<16x1xi32>
    %44 = arith.cmpi sge, %20, %43 : vector<16x1xi32>
    %c3_i32_14 = arith.constant 3 : i32
    %45 = vector.broadcast %c3_i32_14 : i32 to vector<16x1xi32>
    %46 = arith.select %44, %45, %38 : vector<16x1xi1>, vector<16x1xi32>
    %c8_i32 = arith.constant 8 : i32
    %47 = vector.broadcast %c8_i32 : i32 to vector<1x16xi32>
    %48 = arith.cmpi sge, %19, %47 : vector<1x16xi32>
    %c4_i32_15 = arith.constant 4 : i32
    %49 = vector.broadcast %c4_i32_15 : i32 to vector<1x16xi32>
    %50 = arith.select %48, %49, %42 : vector<1x16xi1>, vector<1x16xi32>
    %c8_i32_16 = arith.constant 8 : i32
    %51 = vector.broadcast %c8_i32_16 : i32 to vector<16x1xi32>
    %52 = arith.cmpi sge, %20, %51 : vector<16x1xi32>
    %c4_i32_17 = arith.constant 4 : i32
    %53 = vector.broadcast %c4_i32_17 : i32 to vector<16x1xi32>
    %54 = arith.select %52, %53, %46 : vector<16x1xi1>, vector<16x1xi32>
    %c10_i32 = arith.constant 10 : i32
    %55 = vector.broadcast %c10_i32 : i32 to vector<1x16xi32>
    %56 = arith.cmpi sge, %19, %55 : vector<1x16xi32>
    %c5_i32 = arith.constant 5 : i32
    %57 = vector.broadcast %c5_i32 : i32 to vector<1x16xi32>
    %58 = arith.select %56, %57, %50 : vector<1x16xi1>, vector<1x16xi32>
    %c10_i32_18 = arith.constant 10 : i32
    %59 = vector.broadcast %c10_i32_18 : i32 to vector<16x1xi32>
    %60 = arith.cmpi sge, %20, %59 : vector<16x1xi32>
    %c5_i32_19 = arith.constant 5 : i32
    %61 = vector.broadcast %c5_i32_19 : i32 to vector<16x1xi32>
    %62 = arith.select %60, %61, %54 : vector<16x1xi1>, vector<16x1xi32>
    %c12_i32 = arith.constant 12 : i32
    %63 = vector.broadcast %c12_i32 : i32 to vector<1x16xi32>
    %64 = arith.cmpi sge, %19, %63 : vector<1x16xi32>
    %c6_i32_20 = arith.constant 6 : i32
    %65 = vector.broadcast %c6_i32_20 : i32 to vector<1x16xi32>
    %66 = arith.select %64, %65, %58 : vector<1x16xi1>, vector<1x16xi32>
    %c12_i32_21 = arith.constant 12 : i32
    %67 = vector.broadcast %c12_i32_21 : i32 to vector<16x1xi32>
    %68 = arith.cmpi sge, %20, %67 : vector<16x1xi32>
    %c6_i32_22 = arith.constant 6 : i32
    %69 = vector.broadcast %c6_i32_22 : i32 to vector<16x1xi32>
    %70 = arith.select %68, %69, %62 : vector<16x1xi1>, vector<16x1xi32>
    %c14_i32 = arith.constant 14 : i32
    %71 = vector.broadcast %c14_i32 : i32 to vector<1x16xi32>
    %72 = arith.cmpi sge, %19, %71 : vector<1x16xi32>
    %c7_i32 = arith.constant 7 : i32
    %73 = vector.broadcast %c7_i32 : i32 to vector<1x16xi32>
    %74 = arith.select %72, %73, %66 : vector<1x16xi1>, vector<1x16xi32>
    %c14_i32_23 = arith.constant 14 : i32
    %75 = vector.broadcast %c14_i32_23 : i32 to vector<16x1xi32>
    %76 = arith.cmpi sge, %20, %75 : vector<16x1xi32>
    %c7_i32_24 = arith.constant 7 : i32
    %77 = vector.broadcast %c7_i32_24 : i32 to vector<16x1xi32>
    %78 = arith.select %76, %77, %70 : vector<16x1xi1>, vector<16x1xi32>
    %c2_i32_25 = arith.constant 2 : i32
    %79 = vector.broadcast %c2_i32_25 : i32 to vector<1x16xi32>
    %80 = arith.muli %74, %79 : vector<1x16xi32>
    %81 = arith.subi %19, %80 : vector<1x16xi32>
    %c2_i32_26 = arith.constant 2 : i32
    %82 = vector.broadcast %c2_i32_26 : i32 to vector<16x1xi32>
    %83 = arith.muli %78, %82 : vector<16x1xi32>
    %84 = arith.subi %20, %83 : vector<16x1xi32>
    %c0_i32_27 = arith.constant 0 : i32
    %85 = vector.broadcast %c0_i32_27 : i32 to vector<1x16xi32>
    %c0_i32_28 = arith.constant 0 : i32
    %86 = vector.broadcast %c0_i32_28 : i32 to vector<1x16xi32>
    %87 = arith.cmpi eq, %81, %86 : vector<1x16xi32>
    %c0_i32_29 = arith.constant 0 : i32
    %88 = arith.addi %0, %c0_i32_29 : i32
    %89 = arith.index_cast %88 : i32 to index
    %90 = memref.load %arg1[%89] : memref<2xi32, #tpu.memory_space<smem>>
    %91 = vector.broadcast %90 : i32 to vector<1x16xi32>
    %92 = arith.select %87, %91, %85 : vector<1x16xi1>, vector<1x16xi32>
    %c1_i32_30 = arith.constant 1 : i32
    %93 = vector.broadcast %c1_i32_30 : i32 to vector<1x16xi32>
    %94 = arith.cmpi eq, %81, %93 : vector<1x16xi32>
    %c1_i32_31 = arith.constant 1 : i32
    %95 = arith.addi %0, %c1_i32_31 : i32
    %96 = arith.index_cast %95 : i32 to index
    %97 = memref.load %arg1[%96] : memref<2xi32, #tpu.memory_space<smem>>
    %98 = vector.broadcast %97 : i32 to vector<1x16xi32>
    %99 = arith.select %94, %98, %92 : vector<1x16xi1>, vector<1x16xi32>
    %100 = vector.broadcast %84 : vector<16x1xi32> to vector<16x16xi32>
    %101 = vector.broadcast %81 : vector<1x16xi32> to vector<16x16xi32>
    %102 = arith.cmpi eq, %100, %101 : vector<16x16xi32>
    %103 = arith.cmpi slt, %74, %99 : vector<1x16xi32>
    %104 = vector.broadcast %103 : vector<1x16xi1> to vector<16x16xi1>
    %105 = arith.andi %102, %104 : vector<16x16xi1>
    %cst = arith.constant 0.000000e+00 : f32
    %cst_32 = arith.constant -1.000000e+09 : f32
    %106 = vector.broadcast %cst : f32 to vector<16x16xf32>
    %107 = vector.broadcast %cst_32 : f32 to vector<16x16xf32>
    %108 = arith.select %105, %106, %107 : vector<16x16xi1>, vector<16x16xf32>
    %c0 = arith.constant 0 : index
    %c0_33 = arith.constant 0 : index
    %c0_34 = arith.constant 0 : index
    %109 = vector.load %arg2[%c0, %c0_33, %c0_34] : memref<1x16x32xf32, #tpu.memory_space<vmem>>, vector<1x16x32xf32>
    %110 = vector.shape_cast %109 : vector<1x16x32xf32> to vector<16x32xf32>
    %c0_35 = arith.constant 0 : index
    %c0_36 = arith.constant 0 : index
    %111 = vector.load %arg3[%c0_35, %c0_36] : memref<1x32xf32, #tpu.memory_space<vmem>>, vector<1x32xf32>
    %c0_37 = arith.constant 0 : index
    %c0_38 = arith.constant 0 : index
    %112 = vector.load %arg4[%c0_37, %c0_38] : memref<1x32xf32, #tpu.memory_space<vmem>>, vector<1x32xf32>
    %cst_39 = arith.constant dense<0.000000e+00> : vector<16xf32>
    %113 = vector.multi_reduction <add>, %110, %cst_39 [1] : vector<16x32xf32> to vector<16xf32>
    %114 = vector.shape_cast %113 : vector<16xf32> to vector<16x1xf32>
    %115 = arith.mulf %110, %110 : vector<16x32xf32>
    %cst_40 = arith.constant dense<0.000000e+00> : vector<16xf32>
    %116 = vector.multi_reduction <add>, %115, %cst_40 [1] : vector<16x32xf32> to vector<16xf32>
    %117 = vector.shape_cast %116 : vector<16xf32> to vector<16x1xf32>
    %cst_41 = arith.constant 3.125000e-02 : f32
    %118 = vector.broadcast %cst_41 : f32 to vector<16x1xf32>
    %119 = arith.mulf %114, %118 : vector<16x1xf32>
    %cst_42 = arith.constant 3.125000e-02 : f32
    %120 = vector.broadcast %cst_42 : f32 to vector<16x1xf32>
    %121 = arith.mulf %117, %120 : vector<16x1xf32>
    %122 = arith.mulf %119, %119 : vector<16x1xf32>
    %123 = arith.subf %121, %122 : vector<16x1xf32>
    %cst_43 = arith.constant 0.000000e+00 : f32
    %124 = vector.broadcast %cst_43 : f32 to vector<16x1xf32>
    %125 = arith.maximumf %123, %124 : vector<16x1xf32>
    %126 = vector.broadcast %119 : vector<16x1xf32> to vector<16x32xf32>
    %127 = arith.subf %110, %126 : vector<16x32xf32>
    %cst_44 = arith.constant 9.99999996E-13 : f32
    %128 = vector.broadcast %cst_44 : f32 to vector<16x1xf32>
    %129 = arith.addf %125, %128 : vector<16x1xf32>
    %130 = math.rsqrt %129 : vector<16x1xf32>
    %131 = vector.broadcast %130 : vector<16x1xf32> to vector<16x32xf32>
    %132 = arith.mulf %127, %131 : vector<16x32xf32>
    %133 = vector.broadcast %111 : vector<1x32xf32> to vector<16x32xf32>
    %134 = arith.mulf %132, %133 : vector<16x32xf32>
    %135 = vector.broadcast %112 : vector<1x32xf32> to vector<16x32xf32>
    %136 = arith.addf %134, %135 : vector<16x32xf32>
    %137 = arith.truncf %136 : vector<16x32xf32> to vector<16x32xbf16>
    %cst_45 = arith.constant 0.000000e+00 : f32
    %138 = vector.broadcast %cst_45 : f32 to vector<16x32xf32>
    %c0_46 = arith.constant 0 : index
    %c0_47 = arith.constant 0 : index
    %c0_48 = arith.constant 0 : index
    %c0_49 = arith.constant 0 : index
    %139 = vector.load %arg5[%c0_46, %c0_47, %c0_48, %c0_49] : memref<2x2x32x16xbf16, #tpu.memory_space<vmem>>, vector<1x1x32x16xbf16>
    %140 = vector.shape_cast %139 : vector<1x1x32x16xbf16> to vector<32x16xbf16>
    %cst_50 = arith.constant dense<0.000000e+00> : vector<16x16xf32>
    %141 = tpu.matmul %137, %140, %cst_50 {dimension_numbers = #tpu.dot_dimension_numbers<[1], [0], [0], [1], [0, 0, 1, 1], [], []>} : vector<16x32xbf16>, vector<32x16xbf16>, vector<16x16xf32> -> vector<16x16xf32>
    %c0_51 = arith.constant 0 : index
    %c0_52 = arith.constant 0 : index
    %c0_53 = arith.constant 0 : index
    %c0_54 = arith.constant 0 : index
    %142 = vector.load %arg6[%c0_51, %c0_52, %c0_53, %c0_54] : memref<2x2x32x16xbf16, #tpu.memory_space<vmem>>, vector<1x1x32x16xbf16>
    %143 = vector.shape_cast %142 : vector<1x1x32x16xbf16> to vector<32x16xbf16>
    %cst_55 = arith.constant dense<0.000000e+00> : vector<16x16xf32>
    %144 = tpu.matmul %137, %143, %cst_55 {dimension_numbers = #tpu.dot_dimension_numbers<[1], [0], [0], [1], [0, 0, 1, 1], [], []>} : vector<16x32xbf16>, vector<32x16xbf16>, vector<16x16xf32> -> vector<16x16xf32>
    %c0_56 = arith.constant 0 : index
    %c0_57 = arith.constant 0 : index
    %c0_58 = arith.constant 0 : index
    %c0_59 = arith.constant 0 : index
    %145 = vector.load %arg7[%c0_56, %c0_57, %c0_58, %c0_59] : memref<2x2x32x16xbf16, #tpu.memory_space<vmem>>, vector<1x1x32x16xbf16>
    %146 = vector.shape_cast %145 : vector<1x1x32x16xbf16> to vector<32x16xbf16>
    %cst_60 = arith.constant dense<0.000000e+00> : vector<16x16xf32>
    %147 = tpu.matmul %137, %146, %cst_60 {dimension_numbers = #tpu.dot_dimension_numbers<[1], [0], [0], [1], [0, 0, 1, 1], [], []>} : vector<16x32xbf16>, vector<32x16xbf16>, vector<16x16xf32> -> vector<16x16xf32>
    %cst_61 = arith.constant 2.500000e-01 : f32
    %148 = vector.broadcast %cst_61 : f32 to vector<16x16xf32>
    %149 = arith.mulf %141, %148 : vector<16x16xf32>
    %150 = arith.truncf %149 : vector<16x16xf32> to vector<16x16xbf16>
    %151 = arith.truncf %144 : vector<16x16xf32> to vector<16x16xbf16>
    %cst_62 = arith.constant dense<0.000000e+00> : vector<16x16xf32>
    %152 = tpu.matmul %150, %151, %cst_62 {dimension_numbers = #tpu.dot_dimension_numbers<[1], [1], [0], [0], [0, 0, 1, 0], [], []>} : vector<16x16xbf16>, vector<16x16xbf16>, vector<16x16xf32> -> vector<16x16xf32>
    %153 = arith.addf %152, %108 : vector<16x16xf32>
    %cst_63 = arith.constant dense<0xFF800000> : vector<16xf32>
    %154 = vector.multi_reduction <maximumf>, %153, %cst_63 [1] : vector<16x16xf32> to vector<16xf32>
    %155 = vector.shape_cast %154 : vector<16xf32> to vector<16x1xf32>
    %156 = vector.broadcast %155 : vector<16x1xf32> to vector<16x16xf32>
    %157 = arith.subf %153, %156 : vector<16x16xf32>
    %158 = math.exp %157 : vector<16x16xf32>
    %cst_64 = arith.constant dense<0.000000e+00> : vector<16xf32>
    %159 = vector.multi_reduction <add>, %158, %cst_64 [1] : vector<16x16xf32> to vector<16xf32>
    %160 = vector.shape_cast %159 : vector<16xf32> to vector<16x1xf32>
    %161 = tpu.reciprocal %160 {approx = true} : vector<16x1xf32> -> vector<16x1xf32>
    %162 = vector.broadcast %161 : vector<16x1xf32> to vector<16x16xf32>
    %163 = arith.mulf %158, %162 : vector<16x16xf32>
    %164 = arith.truncf %163 : vector<16x16xf32> to vector<16x16xbf16>
    %165 = arith.truncf %147 : vector<16x16xf32> to vector<16x16xbf16>
    %cst_65 = arith.constant dense<0.000000e+00> : vector<16x16xf32>
    %166 = tpu.matmul %164, %165, %cst_65 {dimension_numbers = #tpu.dot_dimension_numbers<[1], [0], [0], [1], [0, 0, 1, 1], [], []>} : vector<16x16xbf16>, vector<16x16xbf16>, vector<16x16xf32> -> vector<16x16xf32>
    %167 = arith.truncf %166 : vector<16x16xf32> to vector<16x16xbf16>
    %c0_66 = arith.constant 0 : index
    %c0_67 = arith.constant 0 : index
    %c0_68 = arith.constant 0 : index
    %c0_69 = arith.constant 0 : index
    %168 = vector.load %arg8[%c0_66, %c0_67, %c0_68, %c0_69] : memref<2x2x16x32xbf16, #tpu.memory_space<vmem>>, vector<1x1x16x32xbf16>
    %169 = vector.shape_cast %168 : vector<1x1x16x32xbf16> to vector<16x32xbf16>
    %cst_70 = arith.constant dense<0.000000e+00> : vector<16x32xf32>
    %170 = tpu.matmul %167, %169, %cst_70 {dimension_numbers = #tpu.dot_dimension_numbers<[1], [0], [0], [1], [0, 0, 1, 1], [], []>} : vector<16x16xbf16>, vector<16x32xbf16>, vector<16x32xf32> -> vector<16x32xf32>
    %171 = arith.addf %138, %170 : vector<16x32xf32>
    %c0_71 = arith.constant 0 : index
    %c1 = arith.constant 1 : index
    %c0_72 = arith.constant 0 : index
    %c0_73 = arith.constant 0 : index
    %172 = vector.load %arg5[%c0_71, %c1, %c0_72, %c0_73] : memref<2x2x32x16xbf16, #tpu.memory_space<vmem>>, vector<1x1x32x16xbf16>
    %173 = vector.shape_cast %172 : vector<1x1x32x16xbf16> to vector<32x16xbf16>
    %cst_74 = arith.constant dense<0.000000e+00> : vector<16x16xf32>
    %174 = tpu.matmul %137, %173, %cst_74 {dimension_numbers = #tpu.dot_dimension_numbers<[1], [0], [0], [1], [0, 0, 1, 1], [], []>} : vector<16x32xbf16>, vector<32x16xbf16>, vector<16x16xf32> -> vector<16x16xf32>
    %c0_75 = arith.constant 0 : index
    %c1_76 = arith.constant 1 : index
    %c0_77 = arith.constant 0 : index
    %c0_78 = arith.constant 0 : index
    %175 = vector.load %arg6[%c0_75, %c1_76, %c0_77, %c0_78] : memref<2x2x32x16xbf16, #tpu.memory_space<vmem>>, vector<1x1x32x16xbf16>
    %176 = vector.shape_cast %175 : vector<1x1x32x16xbf16> to vector<32x16xbf16>
    %cst_79 = arith.constant dense<0.000000e+00> : vector<16x16xf32>
    %177 = tpu.matmul %137, %176, %cst_79 {dimension_numbers = #tpu.dot_dimension_numbers<[1], [0], [0], [1], [0, 0, 1, 1], [], []>} : vector<16x32xbf16>, vector<32x16xbf16>, vector<16x16xf32> -> vector<16x16xf32>
    %c0_80 = arith.constant 0 : index
    %c1_81 = arith.constant 1 : index
    %c0_82 = arith.constant 0 : index
    %c0_83 = arith.constant 0 : index
    %178 = vector.load %arg7[%c0_80, %c1_81, %c0_82, %c0_83] : memref<2x2x32x16xbf16, #tpu.memory_space<vmem>>, vector<1x1x32x16xbf16>
    %179 = vector.shape_cast %178 : vector<1x1x32x16xbf16> to vector<32x16xbf16>
    %cst_84 = arith.constant dense<0.000000e+00> : vector<16x16xf32>
    %180 = tpu.matmul %137, %179, %cst_84 {dimension_numbers = #tpu.dot_dimension_numbers<[1], [0], [0], [1], [0, 0, 1, 1], [], []>} : vector<16x32xbf16>, vector<32x16xbf16>, vector<16x16xf32> -> vector<16x16xf32>
    %cst_85 = arith.constant 2.500000e-01 : f32
    %181 = vector.broadcast %cst_85 : f32 to vector<16x16xf32>
    %182 = arith.mulf %174, %181 : vector<16x16xf32>
    %183 = arith.truncf %182 : vector<16x16xf32> to vector<16x16xbf16>
    %184 = arith.truncf %177 : vector<16x16xf32> to vector<16x16xbf16>
    %cst_86 = arith.constant dense<0.000000e+00> : vector<16x16xf32>
    %185 = tpu.matmul %183, %184, %cst_86 {dimension_numbers = #tpu.dot_dimension_numbers<[1], [1], [0], [0], [0, 0, 1, 0], [], []>} : vector<16x16xbf16>, vector<16x16xbf16>, vector<16x16xf32> -> vector<16x16xf32>
    %186 = arith.addf %185, %108 : vector<16x16xf32>
    %cst_87 = arith.constant dense<0xFF800000> : vector<16xf32>
    %187 = vector.multi_reduction <maximumf>, %186, %cst_87 [1] : vector<16x16xf32> to vector<16xf32>
    %188 = vector.shape_cast %187 : vector<16xf32> to vector<16x1xf32>
    %189 = vector.broadcast %188 : vector<16x1xf32> to vector<16x16xf32>
    %190 = arith.subf %186, %189 : vector<16x16xf32>
    %191 = math.exp %190 : vector<16x16xf32>
    %cst_88 = arith.constant dense<0.000000e+00> : vector<16xf32>
    %192 = vector.multi_reduction <add>, %191, %cst_88 [1] : vector<16x16xf32> to vector<16xf32>
    %193 = vector.shape_cast %192 : vector<16xf32> to vector<16x1xf32>
    %194 = tpu.reciprocal %193 {approx = true} : vector<16x1xf32> -> vector<16x1xf32>
    %195 = vector.broadcast %194 : vector<16x1xf32> to vector<16x16xf32>
    %196 = arith.mulf %191, %195 : vector<16x16xf32>
    %197 = arith.truncf %196 : vector<16x16xf32> to vector<16x16xbf16>
    %198 = arith.truncf %180 : vector<16x16xf32> to vector<16x16xbf16>
    %cst_89 = arith.constant dense<0.000000e+00> : vector<16x16xf32>
    %199 = tpu.matmul %197, %198, %cst_89 {dimension_numbers = #tpu.dot_dimension_numbers<[1], [0], [0], [1], [0, 0, 1, 1], [], []>} : vector<16x16xbf16>, vector<16x16xbf16>, vector<16x16xf32> -> vector<16x16xf32>
    %200 = arith.truncf %199 : vector<16x16xf32> to vector<16x16xbf16>
    %c0_90 = arith.constant 0 : index
    %c1_91 = arith.constant 1 : index
    %c0_92 = arith.constant 0 : index
    %c0_93 = arith.constant 0 : index
    %201 = vector.load %arg8[%c0_90, %c1_91, %c0_92, %c0_93] : memref<2x2x16x32xbf16, #tpu.memory_space<vmem>>, vector<1x1x16x32xbf16>
    %202 = vector.shape_cast %201 : vector<1x1x16x32xbf16> to vector<16x32xbf16>
    %cst_94 = arith.constant dense<0.000000e+00> : vector<16x32xf32>
    %203 = tpu.matmul %200, %202, %cst_94 {dimension_numbers = #tpu.dot_dimension_numbers<[1], [0], [0], [1], [0, 0, 1, 1], [], []>} : vector<16x16xbf16>, vector<16x32xbf16>, vector<16x32xf32> -> vector<16x32xf32>
    %204 = arith.addf %171, %203 : vector<16x32xf32>
    %c0_95 = arith.constant 0 : index
    %c0_96 = arith.constant 0 : index
    %c0_97 = arith.constant 0 : index
    %205 = vector.load %arg9[%c0_95, %c0_96, %c0_97] : memref<2x1x32xf32, #tpu.memory_space<vmem>>, vector<1x1x32xf32>
    %206 = vector.shape_cast %205 : vector<1x1x32xf32> to vector<1x32xf32>
    %207 = vector.broadcast %206 : vector<1x32xf32> to vector<16x32xf32>
    %208 = arith.addf %204, %207 : vector<16x32xf32>
    %209 = arith.addf %136, %208 : vector<16x32xf32>
    %c0_98 = arith.constant 0 : index
    %c0_99 = arith.constant 0 : index
    %c0_100 = arith.constant 0 : index
    %210 = vector.load %arg10[%c0_98, %c0_99, %c0_100] : memref<2x1x32xf32, #tpu.memory_space<vmem>>, vector<1x1x32xf32>
    %211 = vector.shape_cast %210 : vector<1x1x32xf32> to vector<1x32xf32>
    %c0_101 = arith.constant 0 : index
    %c0_102 = arith.constant 0 : index
    %c0_103 = arith.constant 0 : index
    %212 = vector.load %arg11[%c0_101, %c0_102, %c0_103] : memref<2x1x32xf32, #tpu.memory_space<vmem>>, vector<1x1x32xf32>
    %213 = vector.shape_cast %212 : vector<1x1x32xf32> to vector<1x32xf32>
    %cst_104 = arith.constant dense<0.000000e+00> : vector<16xf32>
    %214 = vector.multi_reduction <add>, %209, %cst_104 [1] : vector<16x32xf32> to vector<16xf32>
    %215 = vector.shape_cast %214 : vector<16xf32> to vector<16x1xf32>
    %216 = arith.mulf %209, %209 : vector<16x32xf32>
    %cst_105 = arith.constant dense<0.000000e+00> : vector<16xf32>
    %217 = vector.multi_reduction <add>, %216, %cst_105 [1] : vector<16x32xf32> to vector<16xf32>
    %218 = vector.shape_cast %217 : vector<16xf32> to vector<16x1xf32>
    %cst_106 = arith.constant 3.125000e-02 : f32
    %219 = vector.broadcast %cst_106 : f32 to vector<16x1xf32>
    %220 = arith.mulf %215, %219 : vector<16x1xf32>
    %cst_107 = arith.constant 3.125000e-02 : f32
    %221 = vector.broadcast %cst_107 : f32 to vector<16x1xf32>
    %222 = arith.mulf %218, %221 : vector<16x1xf32>
    %223 = arith.mulf %220, %220 : vector<16x1xf32>
    %224 = arith.subf %222, %223 : vector<16x1xf32>
    %cst_108 = arith.constant 0.000000e+00 : f32
    %225 = vector.broadcast %cst_108 : f32 to vector<16x1xf32>
    %226 = arith.maximumf %224, %225 : vector<16x1xf32>
    %227 = vector.broadcast %220 : vector<16x1xf32> to vector<16x32xf32>
    %228 = arith.subf %209, %227 : vector<16x32xf32>
    %cst_109 = arith.constant 9.99999996E-13 : f32
    %229 = vector.broadcast %cst_109 : f32 to vector<16x1xf32>
    %230 = arith.addf %226, %229 : vector<16x1xf32>
    %231 = math.rsqrt %230 : vector<16x1xf32>
    %232 = vector.broadcast %231 : vector<16x1xf32> to vector<16x32xf32>
    %233 = arith.mulf %228, %232 : vector<16x32xf32>
    %234 = vector.broadcast %211 : vector<1x32xf32> to vector<16x32xf32>
    %235 = arith.mulf %233, %234 : vector<16x32xf32>
    %236 = vector.broadcast %213 : vector<1x32xf32> to vector<16x32xf32>
    %237 = arith.addf %235, %236 : vector<16x32xf32>
    %238 = arith.truncf %237 : vector<16x32xf32> to vector<16x32xbf16>
    %c0_110 = arith.constant 0 : index
    %c0_111 = arith.constant 0 : index
    %c0_112 = arith.constant 0 : index
    %239 = vector.load %arg12[%c0_110, %c0_111, %c0_112] : memref<2x32x64xbf16, #tpu.memory_space<vmem>>, vector<1x32x64xbf16>
    %240 = vector.shape_cast %239 : vector<1x32x64xbf16> to vector<32x64xbf16>
    %cst_113 = arith.constant dense<0.000000e+00> : vector<16x64xf32>
    %241 = tpu.matmul %238, %240, %cst_113 {dimension_numbers = #tpu.dot_dimension_numbers<[1], [0], [0], [1], [0, 0, 1, 1], [], []>} : vector<16x32xbf16>, vector<32x64xbf16>, vector<16x64xf32> -> vector<16x64xf32>
    %c0_114 = arith.constant 0 : index
    %c0_115 = arith.constant 0 : index
    %c0_116 = arith.constant 0 : index
    %242 = vector.load %arg13[%c0_114, %c0_115, %c0_116] : memref<2x1x64xf32, #tpu.memory_space<vmem>>, vector<1x1x64xf32>
    %243 = vector.shape_cast %242 : vector<1x1x64xf32> to vector<1x64xf32>
    %244 = vector.broadcast %243 : vector<1x64xf32> to vector<16x64xf32>
    %245 = arith.addf %241, %244 : vector<16x64xf32>
    %246 = arith.mulf %245, %245 : vector<16x64xf32>
    %247 = arith.mulf %245, %246 : vector<16x64xf32>
    %cst_117 = arith.constant 4.471500e-02 : f32
    %248 = vector.broadcast %cst_117 : f32 to vector<16x64xf32>
    %249 = arith.mulf %248, %247 : vector<16x64xf32>
    %250 = arith.addf %245, %249 : vector<16x64xf32>
    %cst_118 = arith.constant 0.797884583 : f32
    %251 = vector.broadcast %cst_118 : f32 to vector<16x64xf32>
    %252 = arith.mulf %251, %250 : vector<16x64xf32>
    %253 = math.tanh %252 : vector<16x64xf32>
    %cst_119 = arith.constant 1.000000e+00 : f32
    %254 = vector.broadcast %cst_119 : f32 to vector<16x64xf32>
    %255 = arith.addf %254, %253 : vector<16x64xf32>
    %cst_120 = arith.constant 5.000000e-01 : f32
    %256 = vector.broadcast %cst_120 : f32 to vector<16x64xf32>
    %257 = arith.mulf %256, %255 : vector<16x64xf32>
    %258 = arith.mulf %245, %257 : vector<16x64xf32>
    %259 = arith.truncf %258 : vector<16x64xf32> to vector<16x64xbf16>
    %c0_121 = arith.constant 0 : index
    %c0_122 = arith.constant 0 : index
    %c0_123 = arith.constant 0 : index
    %260 = vector.load %arg14[%c0_121, %c0_122, %c0_123] : memref<2x64x32xbf16, #tpu.memory_space<vmem>>, vector<1x64x32xbf16>
    %261 = vector.shape_cast %260 : vector<1x64x32xbf16> to vector<64x32xbf16>
    %cst_124 = arith.constant dense<0.000000e+00> : vector<16x32xf32>
    %262 = tpu.matmul %259, %261, %cst_124 {dimension_numbers = #tpu.dot_dimension_numbers<[1], [0], [0], [1], [0, 0, 1, 1], [], []>} : vector<16x64xbf16>, vector<64x32xbf16>, vector<16x32xf32> -> vector<16x32xf32>
    %c0_125 = arith.constant 0 : index
    %c0_126 = arith.constant 0 : index
    %c0_127 = arith.constant 0 : index
    %263 = vector.load %arg15[%c0_125, %c0_126, %c0_127] : memref<2x1x32xf32, #tpu.memory_space<vmem>>, vector<1x1x32xf32>
    %264 = vector.shape_cast %263 : vector<1x1x32xf32> to vector<1x32xf32>
    %265 = vector.broadcast %264 : vector<1x32xf32> to vector<16x32xf32>
    %266 = arith.addf %262, %265 : vector<16x32xf32>
    %267 = arith.addf %237, %266 : vector<16x32xf32>
    %c0_128 = arith.constant 0 : index
    %c0_129 = arith.constant 0 : index
    %c0_130 = arith.constant 0 : index
    %268 = vector.load %arg16[%c0_128, %c0_129, %c0_130] : memref<2x1x32xf32, #tpu.memory_space<vmem>>, vector<1x1x32xf32>
    %269 = vector.shape_cast %268 : vector<1x1x32xf32> to vector<1x32xf32>
    %c0_131 = arith.constant 0 : index
    %c0_132 = arith.constant 0 : index
    %c0_133 = arith.constant 0 : index
    %270 = vector.load %arg17[%c0_131, %c0_132, %c0_133] : memref<2x1x32xf32, #tpu.memory_space<vmem>>, vector<1x1x32xf32>
    %271 = vector.shape_cast %270 : vector<1x1x32xf32> to vector<1x32xf32>
    %cst_134 = arith.constant dense<0.000000e+00> : vector<16xf32>
    %272 = vector.multi_reduction <add>, %267, %cst_134 [1] : vector<16x32xf32> to vector<16xf32>
    %273 = vector.shape_cast %272 : vector<16xf32> to vector<16x1xf32>
    %274 = arith.mulf %267, %267 : vector<16x32xf32>
    %cst_135 = arith.constant dense<0.000000e+00> : vector<16xf32>
    %275 = vector.multi_reduction <add>, %274, %cst_135 [1] : vector<16x32xf32> to vector<16xf32>
    %276 = vector.shape_cast %275 : vector<16xf32> to vector<16x1xf32>
    %cst_136 = arith.constant 3.125000e-02 : f32
    %277 = vector.broadcast %cst_136 : f32 to vector<16x1xf32>
    %278 = arith.mulf %273, %277 : vector<16x1xf32>
    %cst_137 = arith.constant 3.125000e-02 : f32
    %279 = vector.broadcast %cst_137 : f32 to vector<16x1xf32>
    %280 = arith.mulf %276, %279 : vector<16x1xf32>
    %281 = arith.mulf %278, %278 : vector<16x1xf32>
    %282 = arith.subf %280, %281 : vector<16x1xf32>
    %cst_138 = arith.constant 0.000000e+00 : f32
    %283 = vector.broadcast %cst_138 : f32 to vector<16x1xf32>
    %284 = arith.maximumf %282, %283 : vector<16x1xf32>
    %285 = vector.broadcast %278 : vector<16x1xf32> to vector<16x32xf32>
    %286 = arith.subf %267, %285 : vector<16x32xf32>
    %cst_139 = arith.constant 9.99999996E-13 : f32
    %287 = vector.broadcast %cst_139 : f32 to vector<16x1xf32>
    %288 = arith.addf %284, %287 : vector<16x1xf32>
    %289 = math.rsqrt %288 : vector<16x1xf32>
    %290 = vector.broadcast %289 : vector<16x1xf32> to vector<16x32xf32>
    %291 = arith.mulf %286, %290 : vector<16x32xf32>
    %292 = vector.broadcast %269 : vector<1x32xf32> to vector<16x32xf32>
    %293 = arith.mulf %291, %292 : vector<16x32xf32>
    %294 = vector.broadcast %271 : vector<1x32xf32> to vector<16x32xf32>
    %295 = arith.addf %293, %294 : vector<16x32xf32>
    %296 = arith.truncf %295 : vector<16x32xf32> to vector<16x32xbf16>
    %cst_140 = arith.constant 0.000000e+00 : f32
    %297 = vector.broadcast %cst_140 : f32 to vector<16x32xf32>
    %c1_141 = arith.constant 1 : index
    %c0_142 = arith.constant 0 : index
    %c0_143 = arith.constant 0 : index
    %c0_144 = arith.constant 0 : index
    %298 = vector.load %arg5[%c1_141, %c0_142, %c0_143, %c0_144] : memref<2x2x32x16xbf16, #tpu.memory_space<vmem>>, vector<1x1x32x16xbf16>
    %299 = vector.shape_cast %298 : vector<1x1x32x16xbf16> to vector<32x16xbf16>
    %cst_145 = arith.constant dense<0.000000e+00> : vector<16x16xf32>
    %300 = tpu.matmul %296, %299, %cst_145 {dimension_numbers = #tpu.dot_dimension_numbers<[1], [0], [0], [1], [0, 0, 1, 1], [], []>} : vector<16x32xbf16>, vector<32x16xbf16>, vector<16x16xf32> -> vector<16x16xf32>
    %c1_146 = arith.constant 1 : index
    %c0_147 = arith.constant 0 : index
    %c0_148 = arith.constant 0 : index
    %c0_149 = arith.constant 0 : index
    %301 = vector.load %arg6[%c1_146, %c0_147, %c0_148, %c0_149] : memref<2x2x32x16xbf16, #tpu.memory_space<vmem>>, vector<1x1x32x16xbf16>
    %302 = vector.shape_cast %301 : vector<1x1x32x16xbf16> to vector<32x16xbf16>
    %cst_150 = arith.constant dense<0.000000e+00> : vector<16x16xf32>
    %303 = tpu.matmul %296, %302, %cst_150 {dimension_numbers = #tpu.dot_dimension_numbers<[1], [0], [0], [1], [0, 0, 1, 1], [], []>} : vector<16x32xbf16>, vector<32x16xbf16>, vector<16x16xf32> -> vector<16x16xf32>
    %c1_151 = arith.constant 1 : index
    %c0_152 = arith.constant 0 : index
    %c0_153 = arith.constant 0 : index
    %c0_154 = arith.constant 0 : index
    %304 = vector.load %arg7[%c1_151, %c0_152, %c0_153, %c0_154] : memref<2x2x32x16xbf16, #tpu.memory_space<vmem>>, vector<1x1x32x16xbf16>
    %305 = vector.shape_cast %304 : vector<1x1x32x16xbf16> to vector<32x16xbf16>
    %cst_155 = arith.constant dense<0.000000e+00> : vector<16x16xf32>
    %306 = tpu.matmul %296, %305, %cst_155 {dimension_numbers = #tpu.dot_dimension_numbers<[1], [0], [0], [1], [0, 0, 1, 1], [], []>} : vector<16x32xbf16>, vector<32x16xbf16>, vector<16x16xf32> -> vector<16x16xf32>
    %cst_156 = arith.constant 2.500000e-01 : f32
    %307 = vector.broadcast %cst_156 : f32 to vector<16x16xf32>
    %308 = arith.mulf %300, %307 : vector<16x16xf32>
    %309 = arith.truncf %308 : vector<16x16xf32> to vector<16x16xbf16>
    %310 = arith.truncf %303 : vector<16x16xf32> to vector<16x16xbf16>
    %cst_157 = arith.constant dense<0.000000e+00> : vector<16x16xf32>
    %311 = tpu.matmul %309, %310, %cst_157 {dimension_numbers = #tpu.dot_dimension_numbers<[1], [1], [0], [0], [0, 0, 1, 0], [], []>} : vector<16x16xbf16>, vector<16x16xbf16>, vector<16x16xf32> -> vector<16x16xf32>
    %312 = arith.addf %311, %108 : vector<16x16xf32>
    %cst_158 = arith.constant dense<0xFF800000> : vector<16xf32>
    %313 = vector.multi_reduction <maximumf>, %312, %cst_158 [1] : vector<16x16xf32> to vector<16xf32>
    %314 = vector.shape_cast %313 : vector<16xf32> to vector<16x1xf32>
    %315 = vector.broadcast %314 : vector<16x1xf32> to vector<16x16xf32>
    %316 = arith.subf %312, %315 : vector<16x16xf32>
    %317 = math.exp %316 : vector<16x16xf32>
    %cst_159 = arith.constant dense<0.000000e+00> : vector<16xf32>
    %318 = vector.multi_reduction <add>, %317, %cst_159 [1] : vector<16x16xf32> to vector<16xf32>
    %319 = vector.shape_cast %318 : vector<16xf32> to vector<16x1xf32>
    %320 = tpu.reciprocal %319 {approx = true} : vector<16x1xf32> -> vector<16x1xf32>
    %321 = vector.broadcast %320 : vector<16x1xf32> to vector<16x16xf32>
    %322 = arith.mulf %317, %321 : vector<16x16xf32>
    %323 = arith.truncf %322 : vector<16x16xf32> to vector<16x16xbf16>
    %324 = arith.truncf %306 : vector<16x16xf32> to vector<16x16xbf16>
    %cst_160 = arith.constant dense<0.000000e+00> : vector<16x16xf32>
    %325 = tpu.matmul %323, %324, %cst_160 {dimension_numbers = #tpu.dot_dimension_numbers<[1], [0], [0], [1], [0, 0, 1, 1], [], []>} : vector<16x16xbf16>, vector<16x16xbf16>, vector<16x16xf32> -> vector<16x16xf32>
    %326 = arith.truncf %325 : vector<16x16xf32> to vector<16x16xbf16>
    %c1_161 = arith.constant 1 : index
    %c0_162 = arith.constant 0 : index
    %c0_163 = arith.constant 0 : index
    %c0_164 = arith.constant 0 : index
    %327 = vector.load %arg8[%c1_161, %c0_162, %c0_163, %c0_164] : memref<2x2x16x32xbf16, #tpu.memory_space<vmem>>, vector<1x1x16x32xbf16>
    %328 = vector.shape_cast %327 : vector<1x1x16x32xbf16> to vector<16x32xbf16>
    %cst_165 = arith.constant dense<0.000000e+00> : vector<16x32xf32>
    %329 = tpu.matmul %326, %328, %cst_165 {dimension_numbers = #tpu.dot_dimension_numbers<[1], [0], [0], [1], [0, 0, 1, 1], [], []>} : vector<16x16xbf16>, vector<16x32xbf16>, vector<16x32xf32> -> vector<16x32xf32>
    %330 = arith.addf %297, %329 : vector<16x32xf32>
    %c1_166 = arith.constant 1 : index
    %c1_167 = arith.constant 1 : index
    %c0_168 = arith.constant 0 : index
    %c0_169 = arith.constant 0 : index
    %331 = vector.load %arg5[%c1_166, %c1_167, %c0_168, %c0_169] : memref<2x2x32x16xbf16, #tpu.memory_space<vmem>>, vector<1x1x32x16xbf16>
    %332 = vector.shape_cast %331 : vector<1x1x32x16xbf16> to vector<32x16xbf16>
    %cst_170 = arith.constant dense<0.000000e+00> : vector<16x16xf32>
    %333 = tpu.matmul %296, %332, %cst_170 {dimension_numbers = #tpu.dot_dimension_numbers<[1], [0], [0], [1], [0, 0, 1, 1], [], []>} : vector<16x32xbf16>, vector<32x16xbf16>, vector<16x16xf32> -> vector<16x16xf32>
    %c1_171 = arith.constant 1 : index
    %c1_172 = arith.constant 1 : index
    %c0_173 = arith.constant 0 : index
    %c0_174 = arith.constant 0 : index
    %334 = vector.load %arg6[%c1_171, %c1_172, %c0_173, %c0_174] : memref<2x2x32x16xbf16, #tpu.memory_space<vmem>>, vector<1x1x32x16xbf16>
    %335 = vector.shape_cast %334 : vector<1x1x32x16xbf16> to vector<32x16xbf16>
    %cst_175 = arith.constant dense<0.000000e+00> : vector<16x16xf32>
    %336 = tpu.matmul %296, %335, %cst_175 {dimension_numbers = #tpu.dot_dimension_numbers<[1], [0], [0], [1], [0, 0, 1, 1], [], []>} : vector<16x32xbf16>, vector<32x16xbf16>, vector<16x16xf32> -> vector<16x16xf32>
    %c1_176 = arith.constant 1 : index
    %c1_177 = arith.constant 1 : index
    %c0_178 = arith.constant 0 : index
    %c0_179 = arith.constant 0 : index
    %337 = vector.load %arg7[%c1_176, %c1_177, %c0_178, %c0_179] : memref<2x2x32x16xbf16, #tpu.memory_space<vmem>>, vector<1x1x32x16xbf16>
    %338 = vector.shape_cast %337 : vector<1x1x32x16xbf16> to vector<32x16xbf16>
    %cst_180 = arith.constant dense<0.000000e+00> : vector<16x16xf32>
    %339 = tpu.matmul %296, %338, %cst_180 {dimension_numbers = #tpu.dot_dimension_numbers<[1], [0], [0], [1], [0, 0, 1, 1], [], []>} : vector<16x32xbf16>, vector<32x16xbf16>, vector<16x16xf32> -> vector<16x16xf32>
    %cst_181 = arith.constant 2.500000e-01 : f32
    %340 = vector.broadcast %cst_181 : f32 to vector<16x16xf32>
    %341 = arith.mulf %333, %340 : vector<16x16xf32>
    %342 = arith.truncf %341 : vector<16x16xf32> to vector<16x16xbf16>
    %343 = arith.truncf %336 : vector<16x16xf32> to vector<16x16xbf16>
    %cst_182 = arith.constant dense<0.000000e+00> : vector<16x16xf32>
    %344 = tpu.matmul %342, %343, %cst_182 {dimension_numbers = #tpu.dot_dimension_numbers<[1], [1], [0], [0], [0, 0, 1, 0], [], []>} : vector<16x16xbf16>, vector<16x16xbf16>, vector<16x16xf32> -> vector<16x16xf32>
    %345 = arith.addf %344, %108 : vector<16x16xf32>
    %cst_183 = arith.constant dense<0xFF800000> : vector<16xf32>
    %346 = vector.multi_reduction <maximumf>, %345, %cst_183 [1] : vector<16x16xf32> to vector<16xf32>
    %347 = vector.shape_cast %346 : vector<16xf32> to vector<16x1xf32>
    %348 = vector.broadcast %347 : vector<16x1xf32> to vector<16x16xf32>
    %349 = arith.subf %345, %348 : vector<16x16xf32>
    %350 = math.exp %349 : vector<16x16xf32>
    %cst_184 = arith.constant dense<0.000000e+00> : vector<16xf32>
    %351 = vector.multi_reduction <add>, %350, %cst_184 [1] : vector<16x16xf32> to vector<16xf32>
    %352 = vector.shape_cast %351 : vector<16xf32> to vector<16x1xf32>
    %353 = tpu.reciprocal %352 {approx = true} : vector<16x1xf32> -> vector<16x1xf32>
    %354 = vector.broadcast %353 : vector<16x1xf32> to vector<16x16xf32>
    %355 = arith.mulf %350, %354 : vector<16x16xf32>
    %356 = arith.truncf %355 : vector<16x16xf32> to vector<16x16xbf16>
    %357 = arith.truncf %339 : vector<16x16xf32> to vector<16x16xbf16>
    %cst_185 = arith.constant dense<0.000000e+00> : vector<16x16xf32>
    %358 = tpu.matmul %356, %357, %cst_185 {dimension_numbers = #tpu.dot_dimension_numbers<[1], [0], [0], [1], [0, 0, 1, 1], [], []>} : vector<16x16xbf16>, vector<16x16xbf16>, vector<16x16xf32> -> vector<16x16xf32>
    %359 = arith.truncf %358 : vector<16x16xf32> to vector<16x16xbf16>
    %c1_186 = arith.constant 1 : index
    %c1_187 = arith.constant 1 : index
    %c0_188 = arith.constant 0 : index
    %c0_189 = arith.constant 0 : index
    %360 = vector.load %arg8[%c1_186, %c1_187, %c0_188, %c0_189] : memref<2x2x16x32xbf16, #tpu.memory_space<vmem>>, vector<1x1x16x32xbf16>
    %361 = vector.shape_cast %360 : vector<1x1x16x32xbf16> to vector<16x32xbf16>
    %cst_190 = arith.constant dense<0.000000e+00> : vector<16x32xf32>
    %362 = tpu.matmul %359, %361, %cst_190 {dimension_numbers = #tpu.dot_dimension_numbers<[1], [0], [0], [1], [0, 0, 1, 1], [], []>} : vector<16x16xbf16>, vector<16x32xbf16>, vector<16x32xf32> -> vector<16x32xf32>
    %363 = arith.addf %330, %362 : vector<16x32xf32>
    %c1_191 = arith.constant 1 : index
    %c0_192 = arith.constant 0 : index
    %c0_193 = arith.constant 0 : index
    %364 = vector.load %arg9[%c1_191, %c0_192, %c0_193] : memref<2x1x32xf32, #tpu.memory_space<vmem>>, vector<1x1x32xf32>
    %365 = vector.shape_cast %364 : vector<1x1x32xf32> to vector<1x32xf32>
    %366 = vector.broadcast %365 : vector<1x32xf32> to vector<16x32xf32>
    %367 = arith.addf %363, %366 : vector<16x32xf32>
    %368 = arith.addf %295, %367 : vector<16x32xf32>
    %c1_194 = arith.constant 1 : index
    %c0_195 = arith.constant 0 : index
    %c0_196 = arith.constant 0 : index
    %369 = vector.load %arg10[%c1_194, %c0_195, %c0_196] : memref<2x1x32xf32, #tpu.memory_space<vmem>>, vector<1x1x32xf32>
    %370 = vector.shape_cast %369 : vector<1x1x32xf32> to vector<1x32xf32>
    %c1_197 = arith.constant 1 : index
    %c0_198 = arith.constant 0 : index
    %c0_199 = arith.constant 0 : index
    %371 = vector.load %arg11[%c1_197, %c0_198, %c0_199] : memref<2x1x32xf32, #tpu.memory_space<vmem>>, vector<1x1x32xf32>
    %372 = vector.shape_cast %371 : vector<1x1x32xf32> to vector<1x32xf32>
    %cst_200 = arith.constant dense<0.000000e+00> : vector<16xf32>
    %373 = vector.multi_reduction <add>, %368, %cst_200 [1] : vector<16x32xf32> to vector<16xf32>
    %374 = vector.shape_cast %373 : vector<16xf32> to vector<16x1xf32>
    %375 = arith.mulf %368, %368 : vector<16x32xf32>
    %cst_201 = arith.constant dense<0.000000e+00> : vector<16xf32>
    %376 = vector.multi_reduction <add>, %375, %cst_201 [1] : vector<16x32xf32> to vector<16xf32>
    %377 = vector.shape_cast %376 : vector<16xf32> to vector<16x1xf32>
    %cst_202 = arith.constant 3.125000e-02 : f32
    %378 = vector.broadcast %cst_202 : f32 to vector<16x1xf32>
    %379 = arith.mulf %374, %378 : vector<16x1xf32>
    %cst_203 = arith.constant 3.125000e-02 : f32
    %380 = vector.broadcast %cst_203 : f32 to vector<16x1xf32>
    %381 = arith.mulf %377, %380 : vector<16x1xf32>
    %382 = arith.mulf %379, %379 : vector<16x1xf32>
    %383 = arith.subf %381, %382 : vector<16x1xf32>
    %cst_204 = arith.constant 0.000000e+00 : f32
    %384 = vector.broadcast %cst_204 : f32 to vector<16x1xf32>
    %385 = arith.maximumf %383, %384 : vector<16x1xf32>
    %386 = vector.broadcast %379 : vector<16x1xf32> to vector<16x32xf32>
    %387 = arith.subf %368, %386 : vector<16x32xf32>
    %cst_205 = arith.constant 9.99999996E-13 : f32
    %388 = vector.broadcast %cst_205 : f32 to vector<16x1xf32>
    %389 = arith.addf %385, %388 : vector<16x1xf32>
    %390 = math.rsqrt %389 : vector<16x1xf32>
    %391 = vector.broadcast %390 : vector<16x1xf32> to vector<16x32xf32>
    %392 = arith.mulf %387, %391 : vector<16x32xf32>
    %393 = vector.broadcast %370 : vector<1x32xf32> to vector<16x32xf32>
    %394 = arith.mulf %392, %393 : vector<16x32xf32>
    %395 = vector.broadcast %372 : vector<1x32xf32> to vector<16x32xf32>
    %396 = arith.addf %394, %395 : vector<16x32xf32>
    %397 = arith.truncf %396 : vector<16x32xf32> to vector<16x32xbf16>
    %c1_206 = arith.constant 1 : index
    %c0_207 = arith.constant 0 : index
    %c0_208 = arith.constant 0 : index
    %398 = vector.load %arg12[%c1_206, %c0_207, %c0_208] : memref<2x32x64xbf16, #tpu.memory_space<vmem>>, vector<1x32x64xbf16>
    %399 = vector.shape_cast %398 : vector<1x32x64xbf16> to vector<32x64xbf16>
    %cst_209 = arith.constant dense<0.000000e+00> : vector<16x64xf32>
    %400 = tpu.matmul %397, %399, %cst_209 {dimension_numbers = #tpu.dot_dimension_numbers<[1], [0], [0], [1], [0, 0, 1, 1], [], []>} : vector<16x32xbf16>, vector<32x64xbf16>, vector<16x64xf32> -> vector<16x64xf32>
    %c1_210 = arith.constant 1 : index
    %c0_211 = arith.constant 0 : index
    %c0_212 = arith.constant 0 : index
    %401 = vector.load %arg13[%c1_210, %c0_211, %c0_212] : memref<2x1x64xf32, #tpu.memory_space<vmem>>, vector<1x1x64xf32>
    %402 = vector.shape_cast %401 : vector<1x1x64xf32> to vector<1x64xf32>
    %403 = vector.broadcast %402 : vector<1x64xf32> to vector<16x64xf32>
    %404 = arith.addf %400, %403 : vector<16x64xf32>
    %405 = arith.mulf %404, %404 : vector<16x64xf32>
    %406 = arith.mulf %404, %405 : vector<16x64xf32>
    %cst_213 = arith.constant 4.471500e-02 : f32
    %407 = vector.broadcast %cst_213 : f32 to vector<16x64xf32>
    %408 = arith.mulf %407, %406 : vector<16x64xf32>
    %409 = arith.addf %404, %408 : vector<16x64xf32>
    %cst_214 = arith.constant 0.797884583 : f32
    %410 = vector.broadcast %cst_214 : f32 to vector<16x64xf32>
    %411 = arith.mulf %410, %409 : vector<16x64xf32>
    %412 = math.tanh %411 : vector<16x64xf32>
    %cst_215 = arith.constant 1.000000e+00 : f32
    %413 = vector.broadcast %cst_215 : f32 to vector<16x64xf32>
    %414 = arith.addf %413, %412 : vector<16x64xf32>
    %cst_216 = arith.constant 5.000000e-01 : f32
    %415 = vector.broadcast %cst_216 : f32 to vector<16x64xf32>
    %416 = arith.mulf %415, %414 : vector<16x64xf32>
    %417 = arith.mulf %404, %416 : vector<16x64xf32>
    %418 = arith.truncf %417 : vector<16x64xf32> to vector<16x64xbf16>
    %c1_217 = arith.constant 1 : index
    %c0_218 = arith.constant 0 : index
    %c0_219 = arith.constant 0 : index
    %419 = vector.load %arg14[%c1_217, %c0_218, %c0_219] : memref<2x64x32xbf16, #tpu.memory_space<vmem>>, vector<1x64x32xbf16>
    %420 = vector.shape_cast %419 : vector<1x64x32xbf16> to vector<64x32xbf16>
    %cst_220 = arith.constant dense<0.000000e+00> : vector<16x32xf32>
    %421 = tpu.matmul %418, %420, %cst_220 {dimension_numbers = #tpu.dot_dimension_numbers<[1], [0], [0], [1], [0, 0, 1, 1], [], []>} : vector<16x64xbf16>, vector<64x32xbf16>, vector<16x32xf32> -> vector<16x32xf32>
    %c1_221 = arith.constant 1 : index
    %c0_222 = arith.constant 0 : index
    %c0_223 = arith.constant 0 : index
    %422 = vector.load %arg15[%c1_221, %c0_222, %c0_223] : memref<2x1x32xf32, #tpu.memory_space<vmem>>, vector<1x1x32xf32>
    %423 = vector.shape_cast %422 : vector<1x1x32xf32> to vector<1x32xf32>
    %424 = vector.broadcast %423 : vector<1x32xf32> to vector<16x32xf32>
    %425 = arith.addf %421, %424 : vector<16x32xf32>
    %426 = arith.addf %396, %425 : vector<16x32xf32>
    %c1_224 = arith.constant 1 : index
    %c0_225 = arith.constant 0 : index
    %c0_226 = arith.constant 0 : index
    %427 = vector.load %arg16[%c1_224, %c0_225, %c0_226] : memref<2x1x32xf32, #tpu.memory_space<vmem>>, vector<1x1x32xf32>
    %428 = vector.shape_cast %427 : vector<1x1x32xf32> to vector<1x32xf32>
    %c1_227 = arith.constant 1 : index
    %c0_228 = arith.constant 0 : index
    %c0_229 = arith.constant 0 : index
    %429 = vector.load %arg17[%c1_227, %c0_228, %c0_229] : memref<2x1x32xf32, #tpu.memory_space<vmem>>, vector<1x1x32xf32>
    %430 = vector.shape_cast %429 : vector<1x1x32xf32> to vector<1x32xf32>
    %cst_230 = arith.constant dense<0.000000e+00> : vector<16xf32>
    %431 = vector.multi_reduction <add>, %426, %cst_230 [1] : vector<16x32xf32> to vector<16xf32>
    %432 = vector.shape_cast %431 : vector<16xf32> to vector<16x1xf32>
    %433 = arith.mulf %426, %426 : vector<16x32xf32>
    %cst_231 = arith.constant dense<0.000000e+00> : vector<16xf32>
    %434 = vector.multi_reduction <add>, %433, %cst_231 [1] : vector<16x32xf32> to vector<16xf32>
    %435 = vector.shape_cast %434 : vector<16xf32> to vector<16x1xf32>
    %cst_232 = arith.constant 3.125000e-02 : f32
    %436 = vector.broadcast %cst_232 : f32 to vector<16x1xf32>
    %437 = arith.mulf %432, %436 : vector<16x1xf32>
    %cst_233 = arith.constant 3.125000e-02 : f32
    %438 = vector.broadcast %cst_233 : f32 to vector<16x1xf32>
    %439 = arith.mulf %435, %438 : vector<16x1xf32>
    %440 = arith.mulf %437, %437 : vector<16x1xf32>
    %441 = arith.subf %439, %440 : vector<16x1xf32>
    %cst_234 = arith.constant 0.000000e+00 : f32
    %442 = vector.broadcast %cst_234 : f32 to vector<16x1xf32>
    %443 = arith.maximumf %441, %442 : vector<16x1xf32>
    %444 = vector.broadcast %437 : vector<16x1xf32> to vector<16x32xf32>
    %445 = arith.subf %426, %444 : vector<16x32xf32>
    %cst_235 = arith.constant 9.99999996E-13 : f32
    %446 = vector.broadcast %cst_235 : f32 to vector<16x1xf32>
    %447 = arith.addf %443, %446 : vector<16x1xf32>
    %448 = math.rsqrt %447 : vector<16x1xf32>
    %449 = vector.broadcast %448 : vector<16x1xf32> to vector<16x32xf32>
    %450 = arith.mulf %445, %449 : vector<16x32xf32>
    %451 = vector.broadcast %428 : vector<1x32xf32> to vector<16x32xf32>
    %452 = arith.mulf %450, %451 : vector<16x32xf32>
    %453 = vector.broadcast %430 : vector<1x32xf32> to vector<16x32xf32>
    %454 = arith.addf %452, %453 : vector<16x32xf32>
    %455 = arith.truncf %454 : vector<16x32xf32> to vector<16x32xbf16>
    %c0_236 = arith.constant 0 : index
    %c0_237 = arith.constant 0 : index
    %456 = vector.load %arg18[%c0_236, %c0_237] : memref<32x128xbf16, #tpu.memory_space<vmem>>, vector<32x128xbf16>
    %cst_238 = arith.constant dense<0.000000e+00> : vector<16x128xf32>
    %457 = tpu.matmul %455, %456, %cst_238 {dimension_numbers = #tpu.dot_dimension_numbers<[1], [0], [0], [1], [0, 0, 1, 1], [], []>} : vector<16x32xbf16>, vector<32x128xbf16>, vector<16x128xf32> -> vector<16x128xf32>
    %c0_239 = arith.constant 0 : index
    %c0_240 = arith.constant 0 : index
    %458 = vector.load %arg19[%c0_239, %c0_240] : memref<1x128xf32, #tpu.memory_space<vmem>>, vector<1x128xf32>
    %459 = vector.broadcast %458 : vector<1x128xf32> to vector<16x128xf32>
    %460 = arith.addf %457, %459 : vector<16x128xf32>
    %c0_241 = arith.constant 0 : index
    %c0_242 = arith.constant 0 : index
    %c0_243 = arith.constant 0 : index
    %461 = vector.load %arg26[%c0_241, %c0_242, %c0_243] : memref<1x16x128xf32, #tpu.memory_space<vmem>>, vector<1x16x128xf32>
    %462 = vector.shape_cast %461 : vector<1x16x128xf32> to vector<16x128xf32>
    %463 = vector.shape_cast %460 : vector<16x128xf32> to vector<1x16x128xf32>
    tpu.vector_store %arg26[%c0_241, %c0_242, %c0_243], %463 {strides = array<i32>} : memref<1x16x128xf32, #tpu.memory_space<vmem>>, vector<1x16x128xf32>,
    %c0_244 = arith.constant 0 : index
    %c0_245 = arith.constant 0 : index
    %464 = vector.load %arg20[%c0_244, %c0_245] : memref<15x32xbf16, #tpu.memory_space<vmem>>, vector<15x32xbf16>
    %cst_246 = arith.constant dense<0.000000e+00> : vector<15x16xf32>
    %465 = tpu.matmul %464, %455, %cst_246 {dimension_numbers = #tpu.dot_dimension_numbers<[1], [1], [0], [0], [0, 0, 1, 0], [], []>} : vector<15x32xbf16>, vector<16x32xbf16>, vector<15x16xf32> -> vector<15x16xf32>
    %c0_247 = arith.constant 0 : index
    %c0_248 = arith.constant 0 : index
    %466 = vector.load %arg21[%c0_247, %c0_248] : memref<15x1xf32, #tpu.memory_space<vmem>>, vector<15x1xf32>
    %467 = vector.broadcast %466 : vector<15x1xf32> to vector<15x16xf32>
    %468 = arith.addf %465, %467 : vector<15x16xf32>
    %c0_249 = arith.constant 0 : index
    %c0_250 = arith.constant 0 : index
    %469 = vector.load %arg23[%c0_249, %c0_250] : memref<15x1xf32, #tpu.memory_space<vmem>>, vector<15x1xf32>
    %470 = vector.extract_strided_slice %468 {offsets = [0, 0], sizes = [15, 2], strides = [1, 1]} : vector<15x16xf32> to vector<15x2xf32>
    %471 = vector.broadcast %469 : vector<15x1xf32> to vector<15x2xf32>
    %472 = arith.addf %471, %470 : vector<15x2xf32>
    %cst_251 = arith.constant 0xFF800000 : f32
    %473 = vector.broadcast %cst_251 : f32 to vector<15x2xf32>
    %c0_i32_252 = arith.constant 0 : i32
    %474 = vector.broadcast %c0_i32_252 : i32 to vector<15x2xi32>
    %475 = vector.extract_strided_slice %472 {offsets = [0, 0], sizes = [1, 2], strides = [1, 1]} : vector<15x2xf32> to vector<1x2xf32>
    %c0_253 = arith.constant 0 : index
    %c0_254 = arith.constant 0 : index
    %c0_255 = arith.constant 0 : index
    %476 = vector.load %arg22[%c0_253, %c0_254, %c0_255] : memref<15x15x1xf32, #tpu.memory_space<vmem>>, vector<1x15x1xf32>
    %477 = vector.shape_cast %476 : vector<1x15x1xf32> to vector<15x1xf32>
    %478 = vector.broadcast %475 : vector<1x2xf32> to vector<15x2xf32>
    %479 = vector.broadcast %477 : vector<15x1xf32> to vector<15x2xf32>
    %480 = arith.addf %478, %479 : vector<15x2xf32>
    %481 = arith.cmpf ogt, %480, %473 : vector<15x2xf32>
    %482 = arith.select %481, %480, %473 : vector<15x2xi1>, vector<15x2xf32>
    %c0_i32_256 = arith.constant 0 : i32
    %483 = vector.broadcast %c0_i32_256 : i32 to vector<15x2xi32>
    %484 = arith.select %481, %483, %474 : vector<15x2xi1>, vector<15x2xi32>
    %485 = vector.extract_strided_slice %472 {offsets = [1, 0], sizes = [1, 2], strides = [1, 1]} : vector<15x2xf32> to vector<1x2xf32>
    %c1_257 = arith.constant 1 : index
    %c0_258 = arith.constant 0 : index
    %c0_259 = arith.constant 0 : index
    %486 = vector.load %arg22[%c1_257, %c0_258, %c0_259] : memref<15x15x1xf32, #tpu.memory_space<vmem>>, vector<1x15x1xf32>
    %487 = vector.shape_cast %486 : vector<1x15x1xf32> to vector<15x1xf32>
    %488 = vector.broadcast %485 : vector<1x2xf32> to vector<15x2xf32>
    %489 = vector.broadcast %487 : vector<15x1xf32> to vector<15x2xf32>
    %490 = arith.addf %488, %489 : vector<15x2xf32>
    %491 = arith.cmpf ogt, %490, %482 : vector<15x2xf32>
    %492 = arith.select %491, %490, %482 : vector<15x2xi1>, vector<15x2xf32>
    %c1_i32_260 = arith.constant 1 : i32
    %493 = vector.broadcast %c1_i32_260 : i32 to vector<15x2xi32>
    %494 = arith.select %491, %493, %484 : vector<15x2xi1>, vector<15x2xi32>
    %495 = vector.extract_strided_slice %472 {offsets = [2, 0], sizes = [1, 2], strides = [1, 1]} : vector<15x2xf32> to vector<1x2xf32>
    %c2 = arith.constant 2 : index
    %c0_261 = arith.constant 0 : index
    %c0_262 = arith.constant 0 : index
    %496 = vector.load %arg22[%c2, %c0_261, %c0_262] : memref<15x15x1xf32, #tpu.memory_space<vmem>>, vector<1x15x1xf32>
    %497 = vector.shape_cast %496 : vector<1x15x1xf32> to vector<15x1xf32>
    %498 = vector.broadcast %495 : vector<1x2xf32> to vector<15x2xf32>
    %499 = vector.broadcast %497 : vector<15x1xf32> to vector<15x2xf32>
    %500 = arith.addf %498, %499 : vector<15x2xf32>
    %501 = arith.cmpf ogt, %500, %492 : vector<15x2xf32>
    %502 = arith.select %501, %500, %492 : vector<15x2xi1>, vector<15x2xf32>
    %c2_i32_263 = arith.constant 2 : i32
    %503 = vector.broadcast %c2_i32_263 : i32 to vector<15x2xi32>
    %504 = arith.select %501, %503, %494 : vector<15x2xi1>, vector<15x2xi32>
    %505 = vector.extract_strided_slice %472 {offsets = [3, 0], sizes = [1, 2], strides = [1, 1]} : vector<15x2xf32> to vector<1x2xf32>
    %c3 = arith.constant 3 : index
    %c0_264 = arith.constant 0 : index
    %c0_265 = arith.constant 0 : index
    %506 = vector.load %arg22[%c3, %c0_264, %c0_265] : memref<15x15x1xf32, #tpu.memory_space<vmem>>, vector<1x15x1xf32>
    %507 = vector.shape_cast %506 : vector<1x15x1xf32> to vector<15x1xf32>
    %508 = vector.broadcast %505 : vector<1x2xf32> to vector<15x2xf32>
    %509 = vector.broadcast %507 : vector<15x1xf32> to vector<15x2xf32>
    %510 = arith.addf %508, %509 : vector<15x2xf32>
    %511 = arith.cmpf ogt, %510, %502 : vector<15x2xf32>
    %512 = arith.select %511, %510, %502 : vector<15x2xi1>, vector<15x2xf32>
    %c3_i32_266 = arith.constant 3 : i32
    %513 = vector.broadcast %c3_i32_266 : i32 to vector<15x2xi32>
    %514 = arith.select %511, %513, %504 : vector<15x2xi1>, vector<15x2xi32>
    %515 = vector.extract_strided_slice %472 {offsets = [4, 0], sizes = [1, 2], strides = [1, 1]} : vector<15x2xf32> to vector<1x2xf32>
    %c4 = arith.constant 4 : index
    %c0_267 = arith.constant 0 : index
    %c0_268 = arith.constant 0 : index
    %516 = vector.load %arg22[%c4, %c0_267, %c0_268] : memref<15x15x1xf32, #tpu.memory_space<vmem>>, vector<1x15x1xf32>
    %517 = vector.shape_cast %516 : vector<1x15x1xf32> to vector<15x1xf32>
    %518 = vector.broadcast %515 : vector<1x2xf32> to vector<15x2xf32>
    %519 = vector.broadcast %517 : vector<15x1xf32> to vector<15x2xf32>
    %520 = arith.addf %518, %519 : vector<15x2xf32>
    %521 = arith.cmpf ogt, %520, %512 : vector<15x2xf32>
    %522 = arith.select %521, %520, %512 : vector<15x2xi1>, vector<15x2xf32>
    %c4_i32_269 = arith.constant 4 : i32
    %523 = vector.broadcast %c4_i32_269 : i32 to vector<15x2xi32>
    %524 = arith.select %521, %523, %514 : vector<15x2xi1>, vector<15x2xi32>
    %525 = vector.extract_strided_slice %472 {offsets = [5, 0], sizes = [1, 2], strides = [1, 1]} : vector<15x2xf32> to vector<1x2xf32>
    %c5 = arith.constant 5 : index
    %c0_270 = arith.constant 0 : index
    %c0_271 = arith.constant 0 : index
    %526 = vector.load %arg22[%c5, %c0_270, %c0_271] : memref<15x15x1xf32, #tpu.memory_space<vmem>>, vector<1x15x1xf32>
    %527 = vector.shape_cast %526 : vector<1x15x1xf32> to vector<15x1xf32>
    %528 = vector.broadcast %525 : vector<1x2xf32> to vector<15x2xf32>
    %529 = vector.broadcast %527 : vector<15x1xf32> to vector<15x2xf32>
    %530 = arith.addf %528, %529 : vector<15x2xf32>
    %531 = arith.cmpf ogt, %530, %522 : vector<15x2xf32>
    %532 = arith.select %531, %530, %522 : vector<15x2xi1>, vector<15x2xf32>
    %c5_i32_272 = arith.constant 5 : i32
    %533 = vector.broadcast %c5_i32_272 : i32 to vector<15x2xi32>
    %534 = arith.select %531, %533, %524 : vector<15x2xi1>, vector<15x2xi32>
    %535 = vector.extract_strided_slice %472 {offsets = [6, 0], sizes = [1, 2], strides = [1, 1]} : vector<15x2xf32> to vector<1x2xf32>
    %c6 = arith.constant 6 : index
    %c0_273 = arith.constant 0 : index
    %c0_274 = arith.constant 0 : index
    %536 = vector.load %arg22[%c6, %c0_273, %c0_274] : memref<15x15x1xf32, #tpu.memory_space<vmem>>, vector<1x15x1xf32>
    %537 = vector.shape_cast %536 : vector<1x15x1xf32> to vector<15x1xf32>
    %538 = vector.broadcast %535 : vector<1x2xf32> to vector<15x2xf32>
    %539 = vector.broadcast %537 : vector<15x1xf32> to vector<15x2xf32>
    %540 = arith.addf %538, %539 : vector<15x2xf32>
    %541 = arith.cmpf ogt, %540, %532 : vector<15x2xf32>
    %542 = arith.select %541, %540, %532 : vector<15x2xi1>, vector<15x2xf32>
    %c6_i32_275 = arith.constant 6 : i32
    %543 = vector.broadcast %c6_i32_275 : i32 to vector<15x2xi32>
    %544 = arith.select %541, %543, %534 : vector<15x2xi1>, vector<15x2xi32>
    %545 = vector.extract_strided_slice %472 {offsets = [7, 0], sizes = [1, 2], strides = [1, 1]} : vector<15x2xf32> to vector<1x2xf32>
    %c7 = arith.constant 7 : index
    %c0_276 = arith.constant 0 : index
    %c0_277 = arith.constant 0 : index
    %546 = vector.load %arg22[%c7, %c0_276, %c0_277] : memref<15x15x1xf32, #tpu.memory_space<vmem>>, vector<1x15x1xf32>
    %547 = vector.shape_cast %546 : vector<1x15x1xf32> to vector<15x1xf32>
    %548 = vector.broadcast %545 : vector<1x2xf32> to vector<15x2xf32>
    %549 = vector.broadcast %547 : vector<15x1xf32> to vector<15x2xf32>
    %550 = arith.addf %548, %549 : vector<15x2xf32>
    %551 = arith.cmpf ogt, %550, %542 : vector<15x2xf32>
    %552 = arith.select %551, %550, %542 : vector<15x2xi1>, vector<15x2xf32>
    %c7_i32_278 = arith.constant 7 : i32
    %553 = vector.broadcast %c7_i32_278 : i32 to vector<15x2xi32>
    %554 = arith.select %551, %553, %544 : vector<15x2xi1>, vector<15x2xi32>
    %555 = vector.extract_strided_slice %472 {offsets = [8, 0], sizes = [1, 2], strides = [1, 1]} : vector<15x2xf32> to vector<1x2xf32>
    %c8 = arith.constant 8 : index
    %c0_279 = arith.constant 0 : index
    %c0_280 = arith.constant 0 : index
    %556 = vector.load %arg22[%c8, %c0_279, %c0_280] : memref<15x15x1xf32, #tpu.memory_space<vmem>>, vector<1x15x1xf32>
    %557 = vector.shape_cast %556 : vector<1x15x1xf32> to vector<15x1xf32>
    %558 = vector.broadcast %555 : vector<1x2xf32> to vector<15x2xf32>
    %559 = vector.broadcast %557 : vector<15x1xf32> to vector<15x2xf32>
    %560 = arith.addf %558, %559 : vector<15x2xf32>
    %561 = arith.cmpf ogt, %560, %552 : vector<15x2xf32>
    %562 = arith.select %561, %560, %552 : vector<15x2xi1>, vector<15x2xf32>
    %c8_i32_281 = arith.constant 8 : i32
    %563 = vector.broadcast %c8_i32_281 : i32 to vector<15x2xi32>
    %564 = arith.select %561, %563, %554 : vector<15x2xi1>, vector<15x2xi32>
    %565 = vector.extract_strided_slice %472 {offsets = [9, 0], sizes = [1, 2], strides = [1, 1]} : vector<15x2xf32> to vector<1x2xf32>
    %c9 = arith.constant 9 : index
    %c0_282 = arith.constant 0 : index
    %c0_283 = arith.constant 0 : index
    %566 = vector.load %arg22[%c9, %c0_282, %c0_283] : memref<15x15x1xf32, #tpu.memory_space<vmem>>, vector<1x15x1xf32>
    %567 = vector.shape_cast %566 : vector<1x15x1xf32> to vector<15x1xf32>
    %568 = vector.broadcast %565 : vector<1x2xf32> to vector<15x2xf32>
    %569 = vector.broadcast %567 : vector<15x1xf32> to vector<15x2xf32>
    %570 = arith.addf %568, %569 : vector<15x2xf32>
    %571 = arith.cmpf ogt, %570, %562 : vector<15x2xf32>
    %572 = arith.select %571, %570, %562 : vector<15x2xi1>, vector<15x2xf32>
    %c9_i32 = arith.constant 9 : i32
    %573 = vector.broadcast %c9_i32 : i32 to vector<15x2xi32>
    %574 = arith.select %571, %573, %564 : vector<15x2xi1>, vector<15x2xi32>
    %575 = vector.extract_strided_slice %472 {offsets = [10, 0], sizes = [1, 2], strides = [1, 1]} : vector<15x2xf32> to vector<1x2xf32>
    %c10 = arith.constant 10 : index
    %c0_284 = arith.constant 0 : index
    %c0_285 = arith.constant 0 : index
    %576 = vector.load %arg22[%c10, %c0_284, %c0_285] : memref<15x15x1xf32, #tpu.memory_space<vmem>>, vector<1x15x1xf32>
    %577 = vector.shape_cast %576 : vector<1x15x1xf32> to vector<15x1xf32>
    %578 = vector.broadcast %575 : vector<1x2xf32> to vector<15x2xf32>
    %579 = vector.broadcast %577 : vector<15x1xf32> to vector<15x2xf32>
    %580 = arith.addf %578, %579 : vector<15x2xf32>
    %581 = arith.cmpf ogt, %580, %572 : vector<15x2xf32>
    %582 = arith.select %581, %580, %572 : vector<15x2xi1>, vector<15x2xf32>
    %c10_i32_286 = arith.constant 10 : i32
    %583 = vector.broadcast %c10_i32_286 : i32 to vector<15x2xi32>
    %584 = arith.select %581, %583, %574 : vector<15x2xi1>, vector<15x2xi32>
    %585 = vector.extract_strided_slice %472 {offsets = [11, 0], sizes = [1, 2], strides = [1, 1]} : vector<15x2xf32> to vector<1x2xf32>
    %c11 = arith.constant 11 : index
    %c0_287 = arith.constant 0 : index
    %c0_288 = arith.constant 0 : index
    %586 = vector.load %arg22[%c11, %c0_287, %c0_288] : memref<15x15x1xf32, #tpu.memory_space<vmem>>, vector<1x15x1xf32>
    %587 = vector.shape_cast %586 : vector<1x15x1xf32> to vector<15x1xf32>
    %588 = vector.broadcast %585 : vector<1x2xf32> to vector<15x2xf32>
    %589 = vector.broadcast %587 : vector<15x1xf32> to vector<15x2xf32>
    %590 = arith.addf %588, %589 : vector<15x2xf32>
    %591 = arith.cmpf ogt, %590, %582 : vector<15x2xf32>
    %592 = arith.select %591, %590, %582 : vector<15x2xi1>, vector<15x2xf32>
    %c11_i32 = arith.constant 11 : i32
    %593 = vector.broadcast %c11_i32 : i32 to vector<15x2xi32>
    %594 = arith.select %591, %593, %584 : vector<15x2xi1>, vector<15x2xi32>
    %595 = vector.extract_strided_slice %472 {offsets = [12, 0], sizes = [1, 2], strides = [1, 1]} : vector<15x2xf32> to vector<1x2xf32>
    %c12 = arith.constant 12 : index
    %c0_289 = arith.constant 0 : index
    %c0_290 = arith.constant 0 : index
    %596 = vector.load %arg22[%c12, %c0_289, %c0_290] : memref<15x15x1xf32, #tpu.memory_space<vmem>>, vector<1x15x1xf32>
    %597 = vector.shape_cast %596 : vector<1x15x1xf32> to vector<15x1xf32>
    %598 = vector.broadcast %595 : vector<1x2xf32> to vector<15x2xf32>
    %599 = vector.broadcast %597 : vector<15x1xf32> to vector<15x2xf32>
    %600 = arith.addf %598, %599 : vector<15x2xf32>
    %601 = arith.cmpf ogt, %600, %592 : vector<15x2xf32>
    %602 = arith.select %601, %600, %592 : vector<15x2xi1>, vector<15x2xf32>
    %c12_i32_291 = arith.constant 12 : i32
    %603 = vector.broadcast %c12_i32_291 : i32 to vector<15x2xi32>
    %604 = arith.select %601, %603, %594 : vector<15x2xi1>, vector<15x2xi32>
    %605 = vector.extract_strided_slice %472 {offsets = [13, 0], sizes = [1, 2], strides = [1, 1]} : vector<15x2xf32> to vector<1x2xf32>
    %c13 = arith.constant 13 : index
    %c0_292 = arith.constant 0 : index
    %c0_293 = arith.constant 0 : index
    %606 = vector.load %arg22[%c13, %c0_292, %c0_293] : memref<15x15x1xf32, #tpu.memory_space<vmem>>, vector<1x15x1xf32>
    %607 = vector.shape_cast %606 : vector<1x15x1xf32> to vector<15x1xf32>
    %608 = vector.broadcast %605 : vector<1x2xf32> to vector<15x2xf32>
    %609 = vector.broadcast %607 : vector<15x1xf32> to vector<15x2xf32>
    %610 = arith.addf %608, %609 : vector<15x2xf32>
    %611 = arith.cmpf ogt, %610, %602 : vector<15x2xf32>
    %612 = arith.select %611, %610, %602 : vector<15x2xi1>, vector<15x2xf32>
    %c13_i32 = arith.constant 13 : i32
    %613 = vector.broadcast %c13_i32 : i32 to vector<15x2xi32>
    %614 = arith.select %611, %613, %604 : vector<15x2xi1>, vector<15x2xi32>
    %615 = vector.extract_strided_slice %472 {offsets = [14, 0], sizes = [1, 2], strides = [1, 1]} : vector<15x2xf32> to vector<1x2xf32>
    %c14 = arith.constant 14 : index
    %c0_294 = arith.constant 0 : index
    %c0_295 = arith.constant 0 : index
    %616 = vector.load %arg22[%c14, %c0_294, %c0_295] : memref<15x15x1xf32, #tpu.memory_space<vmem>>, vector<1x15x1xf32>
    %617 = vector.shape_cast %616 : vector<1x15x1xf32> to vector<15x1xf32>
    %618 = vector.broadcast %615 : vector<1x2xf32> to vector<15x2xf32>
    %619 = vector.broadcast %617 : vector<15x1xf32> to vector<15x2xf32>
    %620 = arith.addf %618, %619 : vector<15x2xf32>
    %621 = arith.cmpf ogt, %620, %612 : vector<15x2xf32>
    %622 = arith.select %621, %620, %612 : vector<15x2xi1>, vector<15x2xf32>
    %c14_i32_296 = arith.constant 14 : i32
    %623 = vector.broadcast %c14_i32_296 : i32 to vector<15x2xi32>
    %624 = arith.select %621, %623, %614 : vector<15x2xi1>, vector<15x2xi32>
    %625 = vector.extract_strided_slice %468 {offsets = [0, 2], sizes = [15, 2], strides = [1, 1]} : vector<15x16xf32> to vector<15x2xf32>
    %626 = arith.addf %622, %625 : vector<15x2xf32>
    %c1_i32_297 = arith.constant 1 : i32
    %627 = vector.broadcast %c1_i32_297 : i32 to vector<1x2xi32>
    %628 = arith.cmpi eq, %18, %627 : vector<1x2xi32>
    %629 = vector.shape_cast %628 : vector<1x2xi1> to vector<1x2xi1>
    %630 = vector.broadcast %629 : vector<1x2xi1> to vector<15x2xi1>
    %631 = arith.select %630, %626, %472 : vector<15x2xi1>, vector<15x2xf32>
    %cst_298 = arith.constant 0xFF800000 : f32
    %632 = vector.broadcast %cst_298 : f32 to vector<15x2xf32>
    %c0_i32_299 = arith.constant 0 : i32
    %633 = vector.broadcast %c0_i32_299 : i32 to vector<15x2xi32>
    %634 = vector.extract_strided_slice %626 {offsets = [0, 0], sizes = [1, 2], strides = [1, 1]} : vector<15x2xf32> to vector<1x2xf32>
    %c0_300 = arith.constant 0 : index
    %c0_301 = arith.constant 0 : index
    %c0_302 = arith.constant 0 : index
    %635 = vector.load %arg22[%c0_300, %c0_301, %c0_302] : memref<15x15x1xf32, #tpu.memory_space<vmem>>, vector<1x15x1xf32>
    %636 = vector.shape_cast %635 : vector<1x15x1xf32> to vector<15x1xf32>
    %637 = vector.broadcast %634 : vector<1x2xf32> to vector<15x2xf32>
    %638 = vector.broadcast %636 : vector<15x1xf32> to vector<15x2xf32>
    %639 = arith.addf %637, %638 : vector<15x2xf32>
    %640 = arith.cmpf ogt, %639, %632 : vector<15x2xf32>
    %641 = arith.select %640, %639, %632 : vector<15x2xi1>, vector<15x2xf32>
    %c0_i32_303 = arith.constant 0 : i32
    %642 = vector.broadcast %c0_i32_303 : i32 to vector<15x2xi32>
    %643 = arith.select %640, %642, %633 : vector<15x2xi1>, vector<15x2xi32>
    %644 = vector.extract_strided_slice %626 {offsets = [1, 0], sizes = [1, 2], strides = [1, 1]} : vector<15x2xf32> to vector<1x2xf32>
    %c1_304 = arith.constant 1 : index
    %c0_305 = arith.constant 0 : index
    %c0_306 = arith.constant 0 : index
    %645 = vector.load %arg22[%c1_304, %c0_305, %c0_306] : memref<15x15x1xf32, #tpu.memory_space<vmem>>, vector<1x15x1xf32>
    %646 = vector.shape_cast %645 : vector<1x15x1xf32> to vector<15x1xf32>
    %647 = vector.broadcast %644 : vector<1x2xf32> to vector<15x2xf32>
    %648 = vector.broadcast %646 : vector<15x1xf32> to vector<15x2xf32>
    %649 = arith.addf %647, %648 : vector<15x2xf32>
    %650 = arith.cmpf ogt, %649, %641 : vector<15x2xf32>
    %651 = arith.select %650, %649, %641 : vector<15x2xi1>, vector<15x2xf32>
    %c1_i32_307 = arith.constant 1 : i32
    %652 = vector.broadcast %c1_i32_307 : i32 to vector<15x2xi32>
    %653 = arith.select %650, %652, %643 : vector<15x2xi1>, vector<15x2xi32>
    %654 = vector.extract_strided_slice %626 {offsets = [2, 0], sizes = [1, 2], strides = [1, 1]} : vector<15x2xf32> to vector<1x2xf32>
    %c2_308 = arith.constant 2 : index
    %c0_309 = arith.constant 0 : index
    %c0_310 = arith.constant 0 : index
    %655 = vector.load %arg22[%c2_308, %c0_309, %c0_310] : memref<15x15x1xf32, #tpu.memory_space<vmem>>, vector<1x15x1xf32>
    %656 = vector.shape_cast %655 : vector<1x15x1xf32> to vector<15x1xf32>
    %657 = vector.broadcast %654 : vector<1x2xf32> to vector<15x2xf32>
    %658 = vector.broadcast %656 : vector<15x1xf32> to vector<15x2xf32>
    %659 = arith.addf %657, %658 : vector<15x2xf32>
    %660 = arith.cmpf ogt, %659, %651 : vector<15x2xf32>
    %661 = arith.select %660, %659, %651 : vector<15x2xi1>, vector<15x2xf32>
    %c2_i32_311 = arith.constant 2 : i32
    %662 = vector.broadcast %c2_i32_311 : i32 to vector<15x2xi32>
    %663 = arith.select %660, %662, %653 : vector<15x2xi1>, vector<15x2xi32>
    %664 = vector.extract_strided_slice %626 {offsets = [3, 0], sizes = [1, 2], strides = [1, 1]} : vector<15x2xf32> to vector<1x2xf32>
    %c3_312 = arith.constant 3 : index
    %c0_313 = arith.constant 0 : index
    %c0_314 = arith.constant 0 : index
    %665 = vector.load %arg22[%c3_312, %c0_313, %c0_314] : memref<15x15x1xf32, #tpu.memory_space<vmem>>, vector<1x15x1xf32>
    %666 = vector.shape_cast %665 : vector<1x15x1xf32> to vector<15x1xf32>
    %667 = vector.broadcast %664 : vector<1x2xf32> to vector<15x2xf32>
    %668 = vector.broadcast %666 : vector<15x1xf32> to vector<15x2xf32>
    %669 = arith.addf %667, %668 : vector<15x2xf32>
    %670 = arith.cmpf ogt, %669, %661 : vector<15x2xf32>
    %671 = arith.select %670, %669, %661 : vector<15x2xi1>, vector<15x2xf32>
    %c3_i32_315 = arith.constant 3 : i32
    %672 = vector.broadcast %c3_i32_315 : i32 to vector<15x2xi32>
    %673 = arith.select %670, %672, %663 : vector<15x2xi1>, vector<15x2xi32>
    %674 = vector.extract_strided_slice %626 {offsets = [4, 0], sizes = [1, 2], strides = [1, 1]} : vector<15x2xf32> to vector<1x2xf32>
    %c4_316 = arith.constant 4 : index
    %c0_317 = arith.constant 0 : index
    %c0_318 = arith.constant 0 : index
    %675 = vector.load %arg22[%c4_316, %c0_317, %c0_318] : memref<15x15x1xf32, #tpu.memory_space<vmem>>, vector<1x15x1xf32>
    %676 = vector.shape_cast %675 : vector<1x15x1xf32> to vector<15x1xf32>
    %677 = vector.broadcast %674 : vector<1x2xf32> to vector<15x2xf32>
    %678 = vector.broadcast %676 : vector<15x1xf32> to vector<15x2xf32>
    %679 = arith.addf %677, %678 : vector<15x2xf32>
    %680 = arith.cmpf ogt, %679, %671 : vector<15x2xf32>
    %681 = arith.select %680, %679, %671 : vector<15x2xi1>, vector<15x2xf32>
    %c4_i32_319 = arith.constant 4 : i32
    %682 = vector.broadcast %c4_i32_319 : i32 to vector<15x2xi32>
    %683 = arith.select %680, %682, %673 : vector<15x2xi1>, vector<15x2xi32>
    %684 = vector.extract_strided_slice %626 {offsets = [5, 0], sizes = [1, 2], strides = [1, 1]} : vector<15x2xf32> to vector<1x2xf32>
    %c5_320 = arith.constant 5 : index
    %c0_321 = arith.constant 0 : index
    %c0_322 = arith.constant 0 : index
    %685 = vector.load %arg22[%c5_320, %c0_321, %c0_322] : memref<15x15x1xf32, #tpu.memory_space<vmem>>, vector<1x15x1xf32>
    %686 = vector.shape_cast %685 : vector<1x15x1xf32> to vector<15x1xf32>
    %687 = vector.broadcast %684 : vector<1x2xf32> to vector<15x2xf32>
    %688 = vector.broadcast %686 : vector<15x1xf32> to vector<15x2xf32>
    %689 = arith.addf %687, %688 : vector<15x2xf32>
    %690 = arith.cmpf ogt, %689, %681 : vector<15x2xf32>
    %691 = arith.select %690, %689, %681 : vector<15x2xi1>, vector<15x2xf32>
    %c5_i32_323 = arith.constant 5 : i32
    %692 = vector.broadcast %c5_i32_323 : i32 to vector<15x2xi32>
    %693 = arith.select %690, %692, %683 : vector<15x2xi1>, vector<15x2xi32>
    %694 = vector.extract_strided_slice %626 {offsets = [6, 0], sizes = [1, 2], strides = [1, 1]} : vector<15x2xf32> to vector<1x2xf32>
    %c6_324 = arith.constant 6 : index
    %c0_325 = arith.constant 0 : index
    %c0_326 = arith.constant 0 : index
    %695 = vector.load %arg22[%c6_324, %c0_325, %c0_326] : memref<15x15x1xf32, #tpu.memory_space<vmem>>, vector<1x15x1xf32>
    %696 = vector.shape_cast %695 : vector<1x15x1xf32> to vector<15x1xf32>
    %697 = vector.broadcast %694 : vector<1x2xf32> to vector<15x2xf32>
    %698 = vector.broadcast %696 : vector<15x1xf32> to vector<15x2xf32>
    %699 = arith.addf %697, %698 : vector<15x2xf32>
    %700 = arith.cmpf ogt, %699, %691 : vector<15x2xf32>
    %701 = arith.select %700, %699, %691 : vector<15x2xi1>, vector<15x2xf32>
    %c6_i32_327 = arith.constant 6 : i32
    %702 = vector.broadcast %c6_i32_327 : i32 to vector<15x2xi32>
    %703 = arith.select %700, %702, %693 : vector<15x2xi1>, vector<15x2xi32>
    %704 = vector.extract_strided_slice %626 {offsets = [7, 0], sizes = [1, 2], strides = [1, 1]} : vector<15x2xf32> to vector<1x2xf32>
    %c7_328 = arith.constant 7 : index
    %c0_329 = arith.constant 0 : index
    %c0_330 = arith.constant 0 : index
    %705 = vector.load %arg22[%c7_328, %c0_329, %c0_330] : memref<15x15x1xf32, #tpu.memory_space<vmem>>, vector<1x15x1xf32>
    %706 = vector.shape_cast %705 : vector<1x15x1xf32> to vector<15x1xf32>
    %707 = vector.broadcast %704 : vector<1x2xf32> to vector<15x2xf32>
    %708 = vector.broadcast %706 : vector<15x1xf32> to vector<15x2xf32>
    %709 = arith.addf %707, %708 : vector<15x2xf32>
    %710 = arith.cmpf ogt, %709, %701 : vector<15x2xf32>
    %711 = arith.select %710, %709, %701 : vector<15x2xi1>, vector<15x2xf32>
    %c7_i32_331 = arith.constant 7 : i32
    %712 = vector.broadcast %c7_i32_331 : i32 to vector<15x2xi32>
    %713 = arith.select %710, %712, %703 : vector<15x2xi1>, vector<15x2xi32>
    %714 = vector.extract_strided_slice %626 {offsets = [8, 0], sizes = [1, 2], strides = [1, 1]} : vector<15x2xf32> to vector<1x2xf32>
    %c8_332 = arith.constant 8 : index
    %c0_333 = arith.constant 0 : index
    %c0_334 = arith.constant 0 : index
    %715 = vector.load %arg22[%c8_332, %c0_333, %c0_334] : memref<15x15x1xf32, #tpu.memory_space<vmem>>, vector<1x15x1xf32>
    %716 = vector.shape_cast %715 : vector<1x15x1xf32> to vector<15x1xf32>
    %717 = vector.broadcast %714 : vector<1x2xf32> to vector<15x2xf32>
    %718 = vector.broadcast %716 : vector<15x1xf32> to vector<15x2xf32>
    %719 = arith.addf %717, %718 : vector<15x2xf32>
    %720 = arith.cmpf ogt, %719, %711 : vector<15x2xf32>
    %721 = arith.select %720, %719, %711 : vector<15x2xi1>, vector<15x2xf32>
    %c8_i32_335 = arith.constant 8 : i32
    %722 = vector.broadcast %c8_i32_335 : i32 to vector<15x2xi32>
    %723 = arith.select %720, %722, %713 : vector<15x2xi1>, vector<15x2xi32>
    %724 = vector.extract_strided_slice %626 {offsets = [9, 0], sizes = [1, 2], strides = [1, 1]} : vector<15x2xf32> to vector<1x2xf32>
    %c9_336 = arith.constant 9 : index
    %c0_337 = arith.constant 0 : index
    %c0_338 = arith.constant 0 : index
    %725 = vector.load %arg22[%c9_336, %c0_337, %c0_338] : memref<15x15x1xf32, #tpu.memory_space<vmem>>, vector<1x15x1xf32>
    %726 = vector.shape_cast %725 : vector<1x15x1xf32> to vector<15x1xf32>
    %727 = vector.broadcast %724 : vector<1x2xf32> to vector<15x2xf32>
    %728 = vector.broadcast %726 : vector<15x1xf32> to vector<15x2xf32>
    %729 = arith.addf %727, %728 : vector<15x2xf32>
    %730 = arith.cmpf ogt, %729, %721 : vector<15x2xf32>
    %731 = arith.select %730, %729, %721 : vector<15x2xi1>, vector<15x2xf32>
    %c9_i32_339 = arith.constant 9 : i32
    %732 = vector.broadcast %c9_i32_339 : i32 to vector<15x2xi32>
    %733 = arith.select %730, %732, %723 : vector<15x2xi1>, vector<15x2xi32>
    %734 = vector.extract_strided_slice %626 {offsets = [10, 0], sizes = [1, 2], strides = [1, 1]} : vector<15x2xf32> to vector<1x2xf32>
    %c10_340 = arith.constant 10 : index
    %c0_341 = arith.constant 0 : index
    %c0_342 = arith.constant 0 : index
    %735 = vector.load %arg22[%c10_340, %c0_341, %c0_342] : memref<15x15x1xf32, #tpu.memory_space<vmem>>, vector<1x15x1xf32>
    %736 = vector.shape_cast %735 : vector<1x15x1xf32> to vector<15x1xf32>
    %737 = vector.broadcast %734 : vector<1x2xf32> to vector<15x2xf32>
    %738 = vector.broadcast %736 : vector<15x1xf32> to vector<15x2xf32>
    %739 = arith.addf %737, %738 : vector<15x2xf32>
    %740 = arith.cmpf ogt, %739, %731 : vector<15x2xf32>
    %741 = arith.select %740, %739, %731 : vector<15x2xi1>, vector<15x2xf32>
    %c10_i32_343 = arith.constant 10 : i32
    %742 = vector.broadcast %c10_i32_343 : i32 to vector<15x2xi32>
    %743 = arith.select %740, %742, %733 : vector<15x2xi1>, vector<15x2xi32>
    %744 = vector.extract_strided_slice %626 {offsets = [11, 0], sizes = [1, 2], strides = [1, 1]} : vector<15x2xf32> to vector<1x2xf32>
    %c11_344 = arith.constant 11 : index
    %c0_345 = arith.constant 0 : index
    %c0_346 = arith.constant 0 : index
    %745 = vector.load %arg22[%c11_344, %c0_345, %c0_346] : memref<15x15x1xf32, #tpu.memory_space<vmem>>, vector<1x15x1xf32>
    %746 = vector.shape_cast %745 : vector<1x15x1xf32> to vector<15x1xf32>
    %747 = vector.broadcast %744 : vector<1x2xf32> to vector<15x2xf32>
    %748 = vector.broadcast %746 : vector<15x1xf32> to vector<15x2xf32>
    %749 = arith.addf %747, %748 : vector<15x2xf32>
    %750 = arith.cmpf ogt, %749, %741 : vector<15x2xf32>
    %751 = arith.select %750, %749, %741 : vector<15x2xi1>, vector<15x2xf32>
    %c11_i32_347 = arith.constant 11 : i32
    %752 = vector.broadcast %c11_i32_347 : i32 to vector<15x2xi32>
    %753 = arith.select %750, %752, %743 : vector<15x2xi1>, vector<15x2xi32>
    %754 = vector.extract_strided_slice %626 {offsets = [12, 0], sizes = [1, 2], strides = [1, 1]} : vector<15x2xf32> to vector<1x2xf32>
    %c12_348 = arith.constant 12 : index
    %c0_349 = arith.constant 0 : index
    %c0_350 = arith.constant 0 : index
    %755 = vector.load %arg22[%c12_348, %c0_349, %c0_350] : memref<15x15x1xf32, #tpu.memory_space<vmem>>, vector<1x15x1xf32>
    %756 = vector.shape_cast %755 : vector<1x15x1xf32> to vector<15x1xf32>
    %757 = vector.broadcast %754 : vector<1x2xf32> to vector<15x2xf32>
    %758 = vector.broadcast %756 : vector<15x1xf32> to vector<15x2xf32>
    %759 = arith.addf %757, %758 : vector<15x2xf32>
    %760 = arith.cmpf ogt, %759, %751 : vector<15x2xf32>
    %761 = arith.select %760, %759, %751 : vector<15x2xi1>, vector<15x2xf32>
    %c12_i32_351 = arith.constant 12 : i32
    %762 = vector.broadcast %c12_i32_351 : i32 to vector<15x2xi32>
    %763 = arith.select %760, %762, %753 : vector<15x2xi1>, vector<15x2xi32>
    %764 = vector.extract_strided_slice %626 {offsets = [13, 0], sizes = [1, 2], strides = [1, 1]} : vector<15x2xf32> to vector<1x2xf32>
    %c13_352 = arith.constant 13 : index
    %c0_353 = arith.constant 0 : index
    %c0_354 = arith.constant 0 : index
    %765 = vector.load %arg22[%c13_352, %c0_353, %c0_354] : memref<15x15x1xf32, #tpu.memory_space<vmem>>, vector<1x15x1xf32>
    %766 = vector.shape_cast %765 : vector<1x15x1xf32> to vector<15x1xf32>
    %767 = vector.broadcast %764 : vector<1x2xf32> to vector<15x2xf32>
    %768 = vector.broadcast %766 : vector<15x1xf32> to vector<15x2xf32>
    %769 = arith.addf %767, %768 : vector<15x2xf32>
    %770 = arith.cmpf ogt, %769, %761 : vector<15x2xf32>
    %771 = arith.select %770, %769, %761 : vector<15x2xi1>, vector<15x2xf32>
    %c13_i32_355 = arith.constant 13 : i32
    %772 = vector.broadcast %c13_i32_355 : i32 to vector<15x2xi32>
    %773 = arith.select %770, %772, %763 : vector<15x2xi1>, vector<15x2xi32>
    %774 = vector.extract_strided_slice %626 {offsets = [14, 0], sizes = [1, 2], strides = [1, 1]} : vector<15x2xf32> to vector<1x2xf32>
    %c14_356 = arith.constant 14 : index
    %c0_357 = arith.constant 0 : index
    %c0_358 = arith.constant 0 : index
    %775 = vector.load %arg22[%c14_356, %c0_357, %c0_358] : memref<15x15x1xf32, #tpu.memory_space<vmem>>, vector<1x15x1xf32>
    %776 = vector.shape_cast %775 : vector<1x15x1xf32> to vector<15x1xf32>
    %777 = vector.broadcast %774 : vector<1x2xf32> to vector<15x2xf32>
    %778 = vector.broadcast %776 : vector<15x1xf32> to vector<15x2xf32>
    %779 = arith.addf %777, %778 : vector<15x2xf32>
    %780 = arith.cmpf ogt, %779, %771 : vector<15x2xf32>
    %781 = arith.select %780, %779, %771 : vector<15x2xi1>, vector<15x2xf32>
    %c14_i32_359 = arith.constant 14 : i32
    %782 = vector.broadcast %c14_i32_359 : i32 to vector<15x2xi32>
    %783 = arith.select %780, %782, %773 : vector<15x2xi1>, vector<15x2xi32>
    %784 = vector.extract_strided_slice %468 {offsets = [0, 4], sizes = [15, 2], strides = [1, 1]} : vector<15x16xf32> to vector<15x2xf32>
    %785 = arith.addf %781, %784 : vector<15x2xf32>
    %c2_i32_360 = arith.constant 2 : i32
    %786 = vector.broadcast %c2_i32_360 : i32 to vector<1x2xi32>
    %787 = arith.cmpi eq, %18, %786 : vector<1x2xi32>
    %788 = vector.shape_cast %787 : vector<1x2xi1> to vector<1x2xi1>
    %789 = vector.broadcast %788 : vector<1x2xi1> to vector<15x2xi1>
    %790 = arith.select %789, %785, %631 : vector<15x2xi1>, vector<15x2xf32>
    %cst_361 = arith.constant 0xFF800000 : f32
    %791 = vector.broadcast %cst_361 : f32 to vector<15x2xf32>
    %c0_i32_362 = arith.constant 0 : i32
    %792 = vector.broadcast %c0_i32_362 : i32 to vector<15x2xi32>
    %793 = vector.extract_strided_slice %785 {offsets = [0, 0], sizes = [1, 2], strides = [1, 1]} : vector<15x2xf32> to vector<1x2xf32>
    %c0_363 = arith.constant 0 : index
    %c0_364 = arith.constant 0 : index
    %c0_365 = arith.constant 0 : index
    %794 = vector.load %arg22[%c0_363, %c0_364, %c0_365] : memref<15x15x1xf32, #tpu.memory_space<vmem>>, vector<1x15x1xf32>
    %795 = vector.shape_cast %794 : vector<1x15x1xf32> to vector<15x1xf32>
    %796 = vector.broadcast %793 : vector<1x2xf32> to vector<15x2xf32>
    %797 = vector.broadcast %795 : vector<15x1xf32> to vector<15x2xf32>
    %798 = arith.addf %796, %797 : vector<15x2xf32>
    %799 = arith.cmpf ogt, %798, %791 : vector<15x2xf32>
    %800 = arith.select %799, %798, %791 : vector<15x2xi1>, vector<15x2xf32>
    %c0_i32_366 = arith.constant 0 : i32
    %801 = vector.broadcast %c0_i32_366 : i32 to vector<15x2xi32>
    %802 = arith.select %799, %801, %792 : vector<15x2xi1>, vector<15x2xi32>
    %803 = vector.extract_strided_slice %785 {offsets = [1, 0], sizes = [1, 2], strides = [1, 1]} : vector<15x2xf32> to vector<1x2xf32>
    %c1_367 = arith.constant 1 : index
    %c0_368 = arith.constant 0 : index
    %c0_369 = arith.constant 0 : index
    %804 = vector.load %arg22[%c1_367, %c0_368, %c0_369] : memref<15x15x1xf32, #tpu.memory_space<vmem>>, vector<1x15x1xf32>
    %805 = vector.shape_cast %804 : vector<1x15x1xf32> to vector<15x1xf32>
    %806 = vector.broadcast %803 : vector<1x2xf32> to vector<15x2xf32>
    %807 = vector.broadcast %805 : vector<15x1xf32> to vector<15x2xf32>
    %808 = arith.addf %806, %807 : vector<15x2xf32>
    %809 = arith.cmpf ogt, %808, %800 : vector<15x2xf32>
    %810 = arith.select %809, %808, %800 : vector<15x2xi1>, vector<15x2xf32>
    %c1_i32_370 = arith.constant 1 : i32
    %811 = vector.broadcast %c1_i32_370 : i32 to vector<15x2xi32>
    %812 = arith.select %809, %811, %802 : vector<15x2xi1>, vector<15x2xi32>
    %813 = vector.extract_strided_slice %785 {offsets = [2, 0], sizes = [1, 2], strides = [1, 1]} : vector<15x2xf32> to vector<1x2xf32>
    %c2_371 = arith.constant 2 : index
    %c0_372 = arith.constant 0 : index
    %c0_373 = arith.constant 0 : index
    %814 = vector.load %arg22[%c2_371, %c0_372, %c0_373] : memref<15x15x1xf32, #tpu.memory_space<vmem>>, vector<1x15x1xf32>
    %815 = vector.shape_cast %814 : vector<1x15x1xf32> to vector<15x1xf32>
    %816 = vector.broadcast %813 : vector<1x2xf32> to vector<15x2xf32>
    %817 = vector.broadcast %815 : vector<15x1xf32> to vector<15x2xf32>
    %818 = arith.addf %816, %817 : vector<15x2xf32>
    %819 = arith.cmpf ogt, %818, %810 : vector<15x2xf32>
    %820 = arith.select %819, %818, %810 : vector<15x2xi1>, vector<15x2xf32>
    %c2_i32_374 = arith.constant 2 : i32
    %821 = vector.broadcast %c2_i32_374 : i32 to vector<15x2xi32>
    %822 = arith.select %819, %821, %812 : vector<15x2xi1>, vector<15x2xi32>
    %823 = vector.extract_strided_slice %785 {offsets = [3, 0], sizes = [1, 2], strides = [1, 1]} : vector<15x2xf32> to vector<1x2xf32>
    %c3_375 = arith.constant 3 : index
    %c0_376 = arith.constant 0 : index
    %c0_377 = arith.constant 0 : index
    %824 = vector.load %arg22[%c3_375, %c0_376, %c0_377] : memref<15x15x1xf32, #tpu.memory_space<vmem>>, vector<1x15x1xf32>
    %825 = vector.shape_cast %824 : vector<1x15x1xf32> to vector<15x1xf32>
    %826 = vector.broadcast %823 : vector<1x2xf32> to vector<15x2xf32>
    %827 = vector.broadcast %825 : vector<15x1xf32> to vector<15x2xf32>
    %828 = arith.addf %826, %827 : vector<15x2xf32>
    %829 = arith.cmpf ogt, %828, %820 : vector<15x2xf32>
    %830 = arith.select %829, %828, %820 : vector<15x2xi1>, vector<15x2xf32>
    %c3_i32_378 = arith.constant 3 : i32
    %831 = vector.broadcast %c3_i32_378 : i32 to vector<15x2xi32>
    %832 = arith.select %829, %831, %822 : vector<15x2xi1>, vector<15x2xi32>
    %833 = vector.extract_strided_slice %785 {offsets = [4, 0], sizes = [1, 2], strides = [1, 1]} : vector<15x2xf32> to vector<1x2xf32>
    %c4_379 = arith.constant 4 : index
    %c0_380 = arith.constant 0 : index
    %c0_381 = arith.constant 0 : index
    %834 = vector.load %arg22[%c4_379, %c0_380, %c0_381] : memref<15x15x1xf32, #tpu.memory_space<vmem>>, vector<1x15x1xf32>
    %835 = vector.shape_cast %834 : vector<1x15x1xf32> to vector<15x1xf32>
    %836 = vector.broadcast %833 : vector<1x2xf32> to vector<15x2xf32>
    %837 = vector.broadcast %835 : vector<15x1xf32> to vector<15x2xf32>
    %838 = arith.addf %836, %837 : vector<15x2xf32>
    %839 = arith.cmpf ogt, %838, %830 : vector<15x2xf32>
    %840 = arith.select %839, %838, %830 : vector<15x2xi1>, vector<15x2xf32>
    %c4_i32_382 = arith.constant 4 : i32
    %841 = vector.broadcast %c4_i32_382 : i32 to vector<15x2xi32>
    %842 = arith.select %839, %841, %832 : vector<15x2xi1>, vector<15x2xi32>
    %843 = vector.extract_strided_slice %785 {offsets = [5, 0], sizes = [1, 2], strides = [1, 1]} : vector<15x2xf32> to vector<1x2xf32>
    %c5_383 = arith.constant 5 : index
    %c0_384 = arith.constant 0 : index
    %c0_385 = arith.constant 0 : index
    %844 = vector.load %arg22[%c5_383, %c0_384, %c0_385] : memref<15x15x1xf32, #tpu.memory_space<vmem>>, vector<1x15x1xf32>
    %845 = vector.shape_cast %844 : vector<1x15x1xf32> to vector<15x1xf32>
    %846 = vector.broadcast %843 : vector<1x2xf32> to vector<15x2xf32>
    %847 = vector.broadcast %845 : vector<15x1xf32> to vector<15x2xf32>
    %848 = arith.addf %846, %847 : vector<15x2xf32>
    %849 = arith.cmpf ogt, %848, %840 : vector<15x2xf32>
    %850 = arith.select %849, %848, %840 : vector<15x2xi1>, vector<15x2xf32>
    %c5_i32_386 = arith.constant 5 : i32
    %851 = vector.broadcast %c5_i32_386 : i32 to vector<15x2xi32>
    %852 = arith.select %849, %851, %842 : vector<15x2xi1>, vector<15x2xi32>
    %853 = vector.extract_strided_slice %785 {offsets = [6, 0], sizes = [1, 2], strides = [1, 1]} : vector<15x2xf32> to vector<1x2xf32>
    %c6_387 = arith.constant 6 : index
    %c0_388 = arith.constant 0 : index
    %c0_389 = arith.constant 0 : index
    %854 = vector.load %arg22[%c6_387, %c0_388, %c0_389] : memref<15x15x1xf32, #tpu.memory_space<vmem>>, vector<1x15x1xf32>
    %855 = vector.shape_cast %854 : vector<1x15x1xf32> to vector<15x1xf32>
    %856 = vector.broadcast %853 : vector<1x2xf32> to vector<15x2xf32>
    %857 = vector.broadcast %855 : vector<15x1xf32> to vector<15x2xf32>
    %858 = arith.addf %856, %857 : vector<15x2xf32>
    %859 = arith.cmpf ogt, %858, %850 : vector<15x2xf32>
    %860 = arith.select %859, %858, %850 : vector<15x2xi1>, vector<15x2xf32>
    %c6_i32_390 = arith.constant 6 : i32
    %861 = vector.broadcast %c6_i32_390 : i32 to vector<15x2xi32>
    %862 = arith.select %859, %861, %852 : vector<15x2xi1>, vector<15x2xi32>
    %863 = vector.extract_strided_slice %785 {offsets = [7, 0], sizes = [1, 2], strides = [1, 1]} : vector<15x2xf32> to vector<1x2xf32>
    %c7_391 = arith.constant 7 : index
    %c0_392 = arith.constant 0 : index
    %c0_393 = arith.constant 0 : index
    %864 = vector.load %arg22[%c7_391, %c0_392, %c0_393] : memref<15x15x1xf32, #tpu.memory_space<vmem>>, vector<1x15x1xf32>
    %865 = vector.shape_cast %864 : vector<1x15x1xf32> to vector<15x1xf32>
    %866 = vector.broadcast %863 : vector<1x2xf32> to vector<15x2xf32>
    %867 = vector.broadcast %865 : vector<15x1xf32> to vector<15x2xf32>
    %868 = arith.addf %866, %867 : vector<15x2xf32>
    %869 = arith.cmpf ogt, %868, %860 : vector<15x2xf32>
    %870 = arith.select %869, %868, %860 : vector<15x2xi1>, vector<15x2xf32>
    %c7_i32_394 = arith.constant 7 : i32
    %871 = vector.broadcast %c7_i32_394 : i32 to vector<15x2xi32>
    %872 = arith.select %869, %871, %862 : vector<15x2xi1>, vector<15x2xi32>
    %873 = vector.extract_strided_slice %785 {offsets = [8, 0], sizes = [1, 2], strides = [1, 1]} : vector<15x2xf32> to vector<1x2xf32>
    %c8_395 = arith.constant 8 : index
    %c0_396 = arith.constant 0 : index
    %c0_397 = arith.constant 0 : index
    %874 = vector.load %arg22[%c8_395, %c0_396, %c0_397] : memref<15x15x1xf32, #tpu.memory_space<vmem>>, vector<1x15x1xf32>
    %875 = vector.shape_cast %874 : vector<1x15x1xf32> to vector<15x1xf32>
    %876 = vector.broadcast %873 : vector<1x2xf32> to vector<15x2xf32>
    %877 = vector.broadcast %875 : vector<15x1xf32> to vector<15x2xf32>
    %878 = arith.addf %876, %877 : vector<15x2xf32>
    %879 = arith.cmpf ogt, %878, %870 : vector<15x2xf32>
    %880 = arith.select %879, %878, %870 : vector<15x2xi1>, vector<15x2xf32>
    %c8_i32_398 = arith.constant 8 : i32
    %881 = vector.broadcast %c8_i32_398 : i32 to vector<15x2xi32>
    %882 = arith.select %879, %881, %872 : vector<15x2xi1>, vector<15x2xi32>
    %883 = vector.extract_strided_slice %785 {offsets = [9, 0], sizes = [1, 2], strides = [1, 1]} : vector<15x2xf32> to vector<1x2xf32>
    %c9_399 = arith.constant 9 : index
    %c0_400 = arith.constant 0 : index
    %c0_401 = arith.constant 0 : index
    %884 = vector.load %arg22[%c9_399, %c0_400, %c0_401] : memref<15x15x1xf32, #tpu.memory_space<vmem>>, vector<1x15x1xf32>
    %885 = vector.shape_cast %884 : vector<1x15x1xf32> to vector<15x1xf32>
    %886 = vector.broadcast %883 : vector<1x2xf32> to vector<15x2xf32>
    %887 = vector.broadcast %885 : vector<15x1xf32> to vector<15x2xf32>
    %888 = arith.addf %886, %887 : vector<15x2xf32>
    %889 = arith.cmpf ogt, %888, %880 : vector<15x2xf32>
    %890 = arith.select %889, %888, %880 : vector<15x2xi1>, vector<15x2xf32>
    %c9_i32_402 = arith.constant 9 : i32
    %891 = vector.broadcast %c9_i32_402 : i32 to vector<15x2xi32>
    %892 = arith.select %889, %891, %882 : vector<15x2xi1>, vector<15x2xi32>
    %893 = vector.extract_strided_slice %785 {offsets = [10, 0], sizes = [1, 2], strides = [1, 1]} : vector<15x2xf32> to vector<1x2xf32>
    %c10_403 = arith.constant 10 : index
    %c0_404 = arith.constant 0 : index
    %c0_405 = arith.constant 0 : index
    %894 = vector.load %arg22[%c10_403, %c0_404, %c0_405] : memref<15x15x1xf32, #tpu.memory_space<vmem>>, vector<1x15x1xf32>
    %895 = vector.shape_cast %894 : vector<1x15x1xf32> to vector<15x1xf32>
    %896 = vector.broadcast %893 : vector<1x2xf32> to vector<15x2xf32>
    %897 = vector.broadcast %895 : vector<15x1xf32> to vector<15x2xf32>
    %898 = arith.addf %896, %897 : vector<15x2xf32>
    %899 = arith.cmpf ogt, %898, %890 : vector<15x2xf32>
    %900 = arith.select %899, %898, %890 : vector<15x2xi1>, vector<15x2xf32>
    %c10_i32_406 = arith.constant 10 : i32
    %901 = vector.broadcast %c10_i32_406 : i32 to vector<15x2xi32>
    %902 = arith.select %899, %901, %892 : vector<15x2xi1>, vector<15x2xi32>
    %903 = vector.extract_strided_slice %785 {offsets = [11, 0], sizes = [1, 2], strides = [1, 1]} : vector<15x2xf32> to vector<1x2xf32>
    %c11_407 = arith.constant 11 : index
    %c0_408 = arith.constant 0 : index
    %c0_409 = arith.constant 0 : index
    %904 = vector.load %arg22[%c11_407, %c0_408, %c0_409] : memref<15x15x1xf32, #tpu.memory_space<vmem>>, vector<1x15x1xf32>
    %905 = vector.shape_cast %904 : vector<1x15x1xf32> to vector<15x1xf32>
    %906 = vector.broadcast %903 : vector<1x2xf32> to vector<15x2xf32>
    %907 = vector.broadcast %905 : vector<15x1xf32> to vector<15x2xf32>
    %908 = arith.addf %906, %907 : vector<15x2xf32>
    %909 = arith.cmpf ogt, %908, %900 : vector<15x2xf32>
    %910 = arith.select %909, %908, %900 : vector<15x2xi1>, vector<15x2xf32>
    %c11_i32_410 = arith.constant 11 : i32
    %911 = vector.broadcast %c11_i32_410 : i32 to vector<15x2xi32>
    %912 = arith.select %909, %911, %902 : vector<15x2xi1>, vector<15x2xi32>
    %913 = vector.extract_strided_slice %785 {offsets = [12, 0], sizes = [1, 2], strides = [1, 1]} : vector<15x2xf32> to vector<1x2xf32>
    %c12_411 = arith.constant 12 : index
    %c0_412 = arith.constant 0 : index
    %c0_413 = arith.constant 0 : index
    %914 = vector.load %arg22[%c12_411, %c0_412, %c0_413] : memref<15x15x1xf32, #tpu.memory_space<vmem>>, vector<1x15x1xf32>
    %915 = vector.shape_cast %914 : vector<1x15x1xf32> to vector<15x1xf32>
    %916 = vector.broadcast %913 : vector<1x2xf32> to vector<15x2xf32>
    %917 = vector.broadcast %915 : vector<15x1xf32> to vector<15x2xf32>
    %918 = arith.addf %916, %917 : vector<15x2xf32>
    %919 = arith.cmpf ogt, %918, %910 : vector<15x2xf32>
    %920 = arith.select %919, %918, %910 : vector<15x2xi1>, vector<15x2xf32>
    %c12_i32_414 = arith.constant 12 : i32
    %921 = vector.broadcast %c12_i32_414 : i32 to vector<15x2xi32>
    %922 = arith.select %919, %921, %912 : vector<15x2xi1>, vector<15x2xi32>
    %923 = vector.extract_strided_slice %785 {offsets = [13, 0], sizes = [1, 2], strides = [1, 1]} : vector<15x2xf32> to vector<1x2xf32>
    %c13_415 = arith.constant 13 : index
    %c0_416 = arith.constant 0 : index
    %c0_417 = arith.constant 0 : index
    %924 = vector.load %arg22[%c13_415, %c0_416, %c0_417] : memref<15x15x1xf32, #tpu.memory_space<vmem>>, vector<1x15x1xf32>
    %925 = vector.shape_cast %924 : vector<1x15x1xf32> to vector<15x1xf32>
    %926 = vector.broadcast %923 : vector<1x2xf32> to vector<15x2xf32>
    %927 = vector.broadcast %925 : vector<15x1xf32> to vector<15x2xf32>
    %928 = arith.addf %926, %927 : vector<15x2xf32>
    %929 = arith.cmpf ogt, %928, %920 : vector<15x2xf32>
    %930 = arith.select %929, %928, %920 : vector<15x2xi1>, vector<15x2xf32>
    %c13_i32_418 = arith.constant 13 : i32
    %931 = vector.broadcast %c13_i32_418 : i32 to vector<15x2xi32>
    %932 = arith.select %929, %931, %922 : vector<15x2xi1>, vector<15x2xi32>
    %933 = vector.extract_strided_slice %785 {offsets = [14, 0], sizes = [1, 2], strides = [1, 1]} : vector<15x2xf32> to vector<1x2xf32>
    %c14_419 = arith.constant 14 : index
    %c0_420 = arith.constant 0 : index
    %c0_421 = arith.constant 0 : index
    %934 = vector.load %arg22[%c14_419, %c0_420, %c0_421] : memref<15x15x1xf32, #tpu.memory_space<vmem>>, vector<1x15x1xf32>
    %935 = vector.shape_cast %934 : vector<1x15x1xf32> to vector<15x1xf32>
    %936 = vector.broadcast %933 : vector<1x2xf32> to vector<15x2xf32>
    %937 = vector.broadcast %935 : vector<15x1xf32> to vector<15x2xf32>
    %938 = arith.addf %936, %937 : vector<15x2xf32>
    %939 = arith.cmpf ogt, %938, %930 : vector<15x2xf32>
    %940 = arith.select %939, %938, %930 : vector<15x2xi1>, vector<15x2xf32>
    %c14_i32_422 = arith.constant 14 : i32
    %941 = vector.broadcast %c14_i32_422 : i32 to vector<15x2xi32>
    %942 = arith.select %939, %941, %932 : vector<15x2xi1>, vector<15x2xi32>
    %943 = vector.extract_strided_slice %468 {offsets = [0, 6], sizes = [15, 2], strides = [1, 1]} : vector<15x16xf32> to vector<15x2xf32>
    %944 = arith.addf %940, %943 : vector<15x2xf32>
    %c3_i32_423 = arith.constant 3 : i32
    %945 = vector.broadcast %c3_i32_423 : i32 to vector<1x2xi32>
    %946 = arith.cmpi eq, %18, %945 : vector<1x2xi32>
    %947 = vector.shape_cast %946 : vector<1x2xi1> to vector<1x2xi1>
    %948 = vector.broadcast %947 : vector<1x2xi1> to vector<15x2xi1>
    %949 = arith.select %948, %944, %790 : vector<15x2xi1>, vector<15x2xf32>
    %cst_424 = arith.constant 0xFF800000 : f32
    %950 = vector.broadcast %cst_424 : f32 to vector<15x2xf32>
    %c0_i32_425 = arith.constant 0 : i32
    %951 = vector.broadcast %c0_i32_425 : i32 to vector<15x2xi32>
    %952 = vector.extract_strided_slice %944 {offsets = [0, 0], sizes = [1, 2], strides = [1, 1]} : vector<15x2xf32> to vector<1x2xf32>
    %c0_426 = arith.constant 0 : index
    %c0_427 = arith.constant 0 : index
    %c0_428 = arith.constant 0 : index
    %953 = vector.load %arg22[%c0_426, %c0_427, %c0_428] : memref<15x15x1xf32, #tpu.memory_space<vmem>>, vector<1x15x1xf32>
    %954 = vector.shape_cast %953 : vector<1x15x1xf32> to vector<15x1xf32>
    %955 = vector.broadcast %952 : vector<1x2xf32> to vector<15x2xf32>
    %956 = vector.broadcast %954 : vector<15x1xf32> to vector<15x2xf32>
    %957 = arith.addf %955, %956 : vector<15x2xf32>
    %958 = arith.cmpf ogt, %957, %950 : vector<15x2xf32>
    %959 = arith.select %958, %957, %950 : vector<15x2xi1>, vector<15x2xf32>
    %c0_i32_429 = arith.constant 0 : i32
    %960 = vector.broadcast %c0_i32_429 : i32 to vector<15x2xi32>
    %961 = arith.select %958, %960, %951 : vector<15x2xi1>, vector<15x2xi32>
    %962 = vector.extract_strided_slice %944 {offsets = [1, 0], sizes = [1, 2], strides = [1, 1]} : vector<15x2xf32> to vector<1x2xf32>
    %c1_430 = arith.constant 1 : index
    %c0_431 = arith.constant 0 : index
    %c0_432 = arith.constant 0 : index
    %963 = vector.load %arg22[%c1_430, %c0_431, %c0_432] : memref<15x15x1xf32, #tpu.memory_space<vmem>>, vector<1x15x1xf32>
    %964 = vector.shape_cast %963 : vector<1x15x1xf32> to vector<15x1xf32>
    %965 = vector.broadcast %962 : vector<1x2xf32> to vector<15x2xf32>
    %966 = vector.broadcast %964 : vector<15x1xf32> to vector<15x2xf32>
    %967 = arith.addf %965, %966 : vector<15x2xf32>
    %968 = arith.cmpf ogt, %967, %959 : vector<15x2xf32>
    %969 = arith.select %968, %967, %959 : vector<15x2xi1>, vector<15x2xf32>
    %c1_i32_433 = arith.constant 1 : i32
    %970 = vector.broadcast %c1_i32_433 : i32 to vector<15x2xi32>
    %971 = arith.select %968, %970, %961 : vector<15x2xi1>, vector<15x2xi32>
    %972 = vector.extract_strided_slice %944 {offsets = [2, 0], sizes = [1, 2], strides = [1, 1]} : vector<15x2xf32> to vector<1x2xf32>
    %c2_434 = arith.constant 2 : index
    %c0_435 = arith.constant 0 : index
    %c0_436 = arith.constant 0 : index
    %973 = vector.load %arg22[%c2_434, %c0_435, %c0_436] : memref<15x15x1xf32, #tpu.memory_space<vmem>>, vector<1x15x1xf32>
    %974 = vector.shape_cast %973 : vector<1x15x1xf32> to vector<15x1xf32>
    %975 = vector.broadcast %972 : vector<1x2xf32> to vector<15x2xf32>
    %976 = vector.broadcast %974 : vector<15x1xf32> to vector<15x2xf32>
    %977 = arith.addf %975, %976 : vector<15x2xf32>
    %978 = arith.cmpf ogt, %977, %969 : vector<15x2xf32>
    %979 = arith.select %978, %977, %969 : vector<15x2xi1>, vector<15x2xf32>
    %c2_i32_437 = arith.constant 2 : i32
    %980 = vector.broadcast %c2_i32_437 : i32 to vector<15x2xi32>
    %981 = arith.select %978, %980, %971 : vector<15x2xi1>, vector<15x2xi32>
    %982 = vector.extract_strided_slice %944 {offsets = [3, 0], sizes = [1, 2], strides = [1, 1]} : vector<15x2xf32> to vector<1x2xf32>
    %c3_438 = arith.constant 3 : index
    %c0_439 = arith.constant 0 : index
    %c0_440 = arith.constant 0 : index
    %983 = vector.load %arg22[%c3_438, %c0_439, %c0_440] : memref<15x15x1xf32, #tpu.memory_space<vmem>>, vector<1x15x1xf32>
    %984 = vector.shape_cast %983 : vector<1x15x1xf32> to vector<15x1xf32>
    %985 = vector.broadcast %982 : vector<1x2xf32> to vector<15x2xf32>
    %986 = vector.broadcast %984 : vector<15x1xf32> to vector<15x2xf32>
    %987 = arith.addf %985, %986 : vector<15x2xf32>
    %988 = arith.cmpf ogt, %987, %979 : vector<15x2xf32>
    %989 = arith.select %988, %987, %979 : vector<15x2xi1>, vector<15x2xf32>
    %c3_i32_441 = arith.constant 3 : i32
    %990 = vector.broadcast %c3_i32_441 : i32 to vector<15x2xi32>
    %991 = arith.select %988, %990, %981 : vector<15x2xi1>, vector<15x2xi32>
    %992 = vector.extract_strided_slice %944 {offsets = [4, 0], sizes = [1, 2], strides = [1, 1]} : vector<15x2xf32> to vector<1x2xf32>
    %c4_442 = arith.constant 4 : index
    %c0_443 = arith.constant 0 : index
    %c0_444 = arith.constant 0 : index
    %993 = vector.load %arg22[%c4_442, %c0_443, %c0_444] : memref<15x15x1xf32, #tpu.memory_space<vmem>>, vector<1x15x1xf32>
    %994 = vector.shape_cast %993 : vector<1x15x1xf32> to vector<15x1xf32>
    %995 = vector.broadcast %992 : vector<1x2xf32> to vector<15x2xf32>
    %996 = vector.broadcast %994 : vector<15x1xf32> to vector<15x2xf32>
    %997 = arith.addf %995, %996 : vector<15x2xf32>
    %998 = arith.cmpf ogt, %997, %989 : vector<15x2xf32>
    %999 = arith.select %998, %997, %989 : vector<15x2xi1>, vector<15x2xf32>
    %c4_i32_445 = arith.constant 4 : i32
    %1000 = vector.broadcast %c4_i32_445 : i32 to vector<15x2xi32>
    %1001 = arith.select %998, %1000, %991 : vector<15x2xi1>, vector<15x2xi32>
    %1002 = vector.extract_strided_slice %944 {offsets = [5, 0], sizes = [1, 2], strides = [1, 1]} : vector<15x2xf32> to vector<1x2xf32>
    %c5_446 = arith.constant 5 : index
    %c0_447 = arith.constant 0 : index
    %c0_448 = arith.constant 0 : index
    %1003 = vector.load %arg22[%c5_446, %c0_447, %c0_448] : memref<15x15x1xf32, #tpu.memory_space<vmem>>, vector<1x15x1xf32>
    %1004 = vector.shape_cast %1003 : vector<1x15x1xf32> to vector<15x1xf32>
    %1005 = vector.broadcast %1002 : vector<1x2xf32> to vector<15x2xf32>
    %1006 = vector.broadcast %1004 : vector<15x1xf32> to vector<15x2xf32>
    %1007 = arith.addf %1005, %1006 : vector<15x2xf32>
    %1008 = arith.cmpf ogt, %1007, %999 : vector<15x2xf32>
    %1009 = arith.select %1008, %1007, %999 : vector<15x2xi1>, vector<15x2xf32>
    %c5_i32_449 = arith.constant 5 : i32
    %1010 = vector.broadcast %c5_i32_449 : i32 to vector<15x2xi32>
    %1011 = arith.select %1008, %1010, %1001 : vector<15x2xi1>, vector<15x2xi32>
    %1012 = vector.extract_strided_slice %944 {offsets = [6, 0], sizes = [1, 2], strides = [1, 1]} : vector<15x2xf32> to vector<1x2xf32>
    %c6_450 = arith.constant 6 : index
    %c0_451 = arith.constant 0 : index
    %c0_452 = arith.constant 0 : index
    %1013 = vector.load %arg22[%c6_450, %c0_451, %c0_452] : memref<15x15x1xf32, #tpu.memory_space<vmem>>, vector<1x15x1xf32>
    %1014 = vector.shape_cast %1013 : vector<1x15x1xf32> to vector<15x1xf32>
    %1015 = vector.broadcast %1012 : vector<1x2xf32> to vector<15x2xf32>
    %1016 = vector.broadcast %1014 : vector<15x1xf32> to vector<15x2xf32>
    %1017 = arith.addf %1015, %1016 : vector<15x2xf32>
    %1018 = arith.cmpf ogt, %1017, %1009 : vector<15x2xf32>
    %1019 = arith.select %1018, %1017, %1009 : vector<15x2xi1>, vector<15x2xf32>
    %c6_i32_453 = arith.constant 6 : i32
    %1020 = vector.broadcast %c6_i32_453 : i32 to vector<15x2xi32>
    %1021 = arith.select %1018, %1020, %1011 : vector<15x2xi1>, vector<15x2xi32>
    %1022 = vector.extract_strided_slice %944 {offsets = [7, 0], sizes = [1, 2], strides = [1, 1]} : vector<15x2xf32> to vector<1x2xf32>
    %c7_454 = arith.constant 7 : index
    %c0_455 = arith.constant 0 : index
    %c0_456 = arith.constant 0 : index
    %1023 = vector.load %arg22[%c7_454, %c0_455, %c0_456] : memref<15x15x1xf32, #tpu.memory_space<vmem>>, vector<1x15x1xf32>
    %1024 = vector.shape_cast %1023 : vector<1x15x1xf32> to vector<15x1xf32>
    %1025 = vector.broadcast %1022 : vector<1x2xf32> to vector<15x2xf32>
    %1026 = vector.broadcast %1024 : vector<15x1xf32> to vector<15x2xf32>
    %1027 = arith.addf %1025, %1026 : vector<15x2xf32>
    %1028 = arith.cmpf ogt, %1027, %1019 : vector<15x2xf32>
    %1029 = arith.select %1028, %1027, %1019 : vector<15x2xi1>, vector<15x2xf32>
    %c7_i32_457 = arith.constant 7 : i32
    %1030 = vector.broadcast %c7_i32_457 : i32 to vector<15x2xi32>
    %1031 = arith.select %1028, %1030, %1021 : vector<15x2xi1>, vector<15x2xi32>
    %1032 = vector.extract_strided_slice %944 {offsets = [8, 0], sizes = [1, 2], strides = [1, 1]} : vector<15x2xf32> to vector<1x2xf32>
    %c8_458 = arith.constant 8 : index
    %c0_459 = arith.constant 0 : index
    %c0_460 = arith.constant 0 : index
    %1033 = vector.load %arg22[%c8_458, %c0_459, %c0_460] : memref<15x15x1xf32, #tpu.memory_space<vmem>>, vector<1x15x1xf32>
    %1034 = vector.shape_cast %1033 : vector<1x15x1xf32> to vector<15x1xf32>
    %1035 = vector.broadcast %1032 : vector<1x2xf32> to vector<15x2xf32>
    %1036 = vector.broadcast %1034 : vector<15x1xf32> to vector<15x2xf32>
    %1037 = arith.addf %1035, %1036 : vector<15x2xf32>
    %1038 = arith.cmpf ogt, %1037, %1029 : vector<15x2xf32>
    %1039 = arith.select %1038, %1037, %1029 : vector<15x2xi1>, vector<15x2xf32>
    %c8_i32_461 = arith.constant 8 : i32
    %1040 = vector.broadcast %c8_i32_461 : i32 to vector<15x2xi32>
    %1041 = arith.select %1038, %1040, %1031 : vector<15x2xi1>, vector<15x2xi32>
    %1042 = vector.extract_strided_slice %944 {offsets = [9, 0], sizes = [1, 2], strides = [1, 1]} : vector<15x2xf32> to vector<1x2xf32>
    %c9_462 = arith.constant 9 : index
    %c0_463 = arith.constant 0 : index
    %c0_464 = arith.constant 0 : index
    %1043 = vector.load %arg22[%c9_462, %c0_463, %c0_464] : memref<15x15x1xf32, #tpu.memory_space<vmem>>, vector<1x15x1xf32>
    %1044 = vector.shape_cast %1043 : vector<1x15x1xf32> to vector<15x1xf32>
    %1045 = vector.broadcast %1042 : vector<1x2xf32> to vector<15x2xf32>
    %1046 = vector.broadcast %1044 : vector<15x1xf32> to vector<15x2xf32>
    %1047 = arith.addf %1045, %1046 : vector<15x2xf32>
    %1048 = arith.cmpf ogt, %1047, %1039 : vector<15x2xf32>
    %1049 = arith.select %1048, %1047, %1039 : vector<15x2xi1>, vector<15x2xf32>
    %c9_i32_465 = arith.constant 9 : i32
    %1050 = vector.broadcast %c9_i32_465 : i32 to vector<15x2xi32>
    %1051 = arith.select %1048, %1050, %1041 : vector<15x2xi1>, vector<15x2xi32>
    %1052 = vector.extract_strided_slice %944 {offsets = [10, 0], sizes = [1, 2], strides = [1, 1]} : vector<15x2xf32> to vector<1x2xf32>
    %c10_466 = arith.constant 10 : index
    %c0_467 = arith.constant 0 : index
    %c0_468 = arith.constant 0 : index
    %1053 = vector.load %arg22[%c10_466, %c0_467, %c0_468] : memref<15x15x1xf32, #tpu.memory_space<vmem>>, vector<1x15x1xf32>
    %1054 = vector.shape_cast %1053 : vector<1x15x1xf32> to vector<15x1xf32>
    %1055 = vector.broadcast %1052 : vector<1x2xf32> to vector<15x2xf32>
    %1056 = vector.broadcast %1054 : vector<15x1xf32> to vector<15x2xf32>
    %1057 = arith.addf %1055, %1056 : vector<15x2xf32>
    %1058 = arith.cmpf ogt, %1057, %1049 : vector<15x2xf32>
    %1059 = arith.select %1058, %1057, %1049 : vector<15x2xi1>, vector<15x2xf32>
    %c10_i32_469 = arith.constant 10 : i32
    %1060 = vector.broadcast %c10_i32_469 : i32 to vector<15x2xi32>
    %1061 = arith.select %1058, %1060, %1051 : vector<15x2xi1>, vector<15x2xi32>
    %1062 = vector.extract_strided_slice %944 {offsets = [11, 0], sizes = [1, 2], strides = [1, 1]} : vector<15x2xf32> to vector<1x2xf32>
    %c11_470 = arith.constant 11 : index
    %c0_471 = arith.constant 0 : index
    %c0_472 = arith.constant 0 : index
    %1063 = vector.load %arg22[%c11_470, %c0_471, %c0_472] : memref<15x15x1xf32, #tpu.memory_space<vmem>>, vector<1x15x1xf32>
    %1064 = vector.shape_cast %1063 : vector<1x15x1xf32> to vector<15x1xf32>
    %1065 = vector.broadcast %1062 : vector<1x2xf32> to vector<15x2xf32>
    %1066 = vector.broadcast %1064 : vector<15x1xf32> to vector<15x2xf32>
    %1067 = arith.addf %1065, %1066 : vector<15x2xf32>
    %1068 = arith.cmpf ogt, %1067, %1059 : vector<15x2xf32>
    %1069 = arith.select %1068, %1067, %1059 : vector<15x2xi1>, vector<15x2xf32>
    %c11_i32_473 = arith.constant 11 : i32
    %1070 = vector.broadcast %c11_i32_473 : i32 to vector<15x2xi32>
    %1071 = arith.select %1068, %1070, %1061 : vector<15x2xi1>, vector<15x2xi32>
    %1072 = vector.extract_strided_slice %944 {offsets = [12, 0], sizes = [1, 2], strides = [1, 1]} : vector<15x2xf32> to vector<1x2xf32>
    %c12_474 = arith.constant 12 : index
    %c0_475 = arith.constant 0 : index
    %c0_476 = arith.constant 0 : index
    %1073 = vector.load %arg22[%c12_474, %c0_475, %c0_476] : memref<15x15x1xf32, #tpu.memory_space<vmem>>, vector<1x15x1xf32>
    %1074 = vector.shape_cast %1073 : vector<1x15x1xf32> to vector<15x1xf32>
    %1075 = vector.broadcast %1072 : vector<1x2xf32> to vector<15x2xf32>
    %1076 = vector.broadcast %1074 : vector<15x1xf32> to vector<15x2xf32>
    %1077 = arith.addf %1075, %1076 : vector<15x2xf32>
    %1078 = arith.cmpf ogt, %1077, %1069 : vector<15x2xf32>
    %1079 = arith.select %1078, %1077, %1069 : vector<15x2xi1>, vector<15x2xf32>
    %c12_i32_477 = arith.constant 12 : i32
    %1080 = vector.broadcast %c12_i32_477 : i32 to vector<15x2xi32>
    %1081 = arith.select %1078, %1080, %1071 : vector<15x2xi1>, vector<15x2xi32>
    %1082 = vector.extract_strided_slice %944 {offsets = [13, 0], sizes = [1, 2], strides = [1, 1]} : vector<15x2xf32> to vector<1x2xf32>
    %c13_478 = arith.constant 13 : index
    %c0_479 = arith.constant 0 : index
    %c0_480 = arith.constant 0 : index
    %1083 = vector.load %arg22[%c13_478, %c0_479, %c0_480] : memref<15x15x1xf32, #tpu.memory_space<vmem>>, vector<1x15x1xf32>
    %1084 = vector.shape_cast %1083 : vector<1x15x1xf32> to vector<15x1xf32>
    %1085 = vector.broadcast %1082 : vector<1x2xf32> to vector<15x2xf32>
    %1086 = vector.broadcast %1084 : vector<15x1xf32> to vector<15x2xf32>
    %1087 = arith.addf %1085, %1086 : vector<15x2xf32>
    %1088 = arith.cmpf ogt, %1087, %1079 : vector<15x2xf32>
    %1089 = arith.select %1088, %1087, %1079 : vector<15x2xi1>, vector<15x2xf32>
    %c13_i32_481 = arith.constant 13 : i32
    %1090 = vector.broadcast %c13_i32_481 : i32 to vector<15x2xi32>
    %1091 = arith.select %1088, %1090, %1081 : vector<15x2xi1>, vector<15x2xi32>
    %1092 = vector.extract_strided_slice %944 {offsets = [14, 0], sizes = [1, 2], strides = [1, 1]} : vector<15x2xf32> to vector<1x2xf32>
    %c14_482 = arith.constant 14 : index
    %c0_483 = arith.constant 0 : index
    %c0_484 = arith.constant 0 : index
    %1093 = vector.load %arg22[%c14_482, %c0_483, %c0_484] : memref<15x15x1xf32, #tpu.memory_space<vmem>>, vector<1x15x1xf32>
    %1094 = vector.shape_cast %1093 : vector<1x15x1xf32> to vector<15x1xf32>
    %1095 = vector.broadcast %1092 : vector<1x2xf32> to vector<15x2xf32>
    %1096 = vector.broadcast %1094 : vector<15x1xf32> to vector<15x2xf32>
    %1097 = arith.addf %1095, %1096 : vector<15x2xf32>
    %1098 = arith.cmpf ogt, %1097, %1089 : vector<15x2xf32>
    %1099 = arith.select %1098, %1097, %1089 : vector<15x2xi1>, vector<15x2xf32>
    %c14_i32_485 = arith.constant 14 : i32
    %1100 = vector.broadcast %c14_i32_485 : i32 to vector<15x2xi32>
    %1101 = arith.select %1098, %1100, %1091 : vector<15x2xi1>, vector<15x2xi32>
    %1102 = vector.extract_strided_slice %468 {offsets = [0, 8], sizes = [15, 2], strides = [1, 1]} : vector<15x16xf32> to vector<15x2xf32>
    %1103 = arith.addf %1099, %1102 : vector<15x2xf32>
    %c4_i32_486 = arith.constant 4 : i32
    %1104 = vector.broadcast %c4_i32_486 : i32 to vector<1x2xi32>
    %1105 = arith.cmpi eq, %18, %1104 : vector<1x2xi32>
    %1106 = vector.shape_cast %1105 : vector<1x2xi1> to vector<1x2xi1>
    %1107 = vector.broadcast %1106 : vector<1x2xi1> to vector<15x2xi1>
    %1108 = arith.select %1107, %1103, %949 : vector<15x2xi1>, vector<15x2xf32>
    %cst_487 = arith.constant 0xFF800000 : f32
    %1109 = vector.broadcast %cst_487 : f32 to vector<15x2xf32>
    %c0_i32_488 = arith.constant 0 : i32
    %1110 = vector.broadcast %c0_i32_488 : i32 to vector<15x2xi32>
    %1111 = vector.extract_strided_slice %1103 {offsets = [0, 0], sizes = [1, 2], strides = [1, 1]} : vector<15x2xf32> to vector<1x2xf32>
    %c0_489 = arith.constant 0 : index
    %c0_490 = arith.constant 0 : index
    %c0_491 = arith.constant 0 : index
    %1112 = vector.load %arg22[%c0_489, %c0_490, %c0_491] : memref<15x15x1xf32, #tpu.memory_space<vmem>>, vector<1x15x1xf32>
    %1113 = vector.shape_cast %1112 : vector<1x15x1xf32> to vector<15x1xf32>
    %1114 = vector.broadcast %1111 : vector<1x2xf32> to vector<15x2xf32>
    %1115 = vector.broadcast %1113 : vector<15x1xf32> to vector<15x2xf32>
    %1116 = arith.addf %1114, %1115 : vector<15x2xf32>
    %1117 = arith.cmpf ogt, %1116, %1109 : vector<15x2xf32>
    %1118 = arith.select %1117, %1116, %1109 : vector<15x2xi1>, vector<15x2xf32>
    %c0_i32_492 = arith.constant 0 : i32
    %1119 = vector.broadcast %c0_i32_492 : i32 to vector<15x2xi32>
    %1120 = arith.select %1117, %1119, %1110 : vector<15x2xi1>, vector<15x2xi32>
    %1121 = vector.extract_strided_slice %1103 {offsets = [1, 0], sizes = [1, 2], strides = [1, 1]} : vector<15x2xf32> to vector<1x2xf32>
    %c1_493 = arith.constant 1 : index
    %c0_494 = arith.constant 0 : index
    %c0_495 = arith.constant 0 : index
    %1122 = vector.load %arg22[%c1_493, %c0_494, %c0_495] : memref<15x15x1xf32, #tpu.memory_space<vmem>>, vector<1x15x1xf32>
    %1123 = vector.shape_cast %1122 : vector<1x15x1xf32> to vector<15x1xf32>
    %1124 = vector.broadcast %1121 : vector<1x2xf32> to vector<15x2xf32>
    %1125 = vector.broadcast %1123 : vector<15x1xf32> to vector<15x2xf32>
    %1126 = arith.addf %1124, %1125 : vector<15x2xf32>
    %1127 = arith.cmpf ogt, %1126, %1118 : vector<15x2xf32>
    %1128 = arith.select %1127, %1126, %1118 : vector<15x2xi1>, vector<15x2xf32>
    %c1_i32_496 = arith.constant 1 : i32
    %1129 = vector.broadcast %c1_i32_496 : i32 to vector<15x2xi32>
    %1130 = arith.select %1127, %1129, %1120 : vector<15x2xi1>, vector<15x2xi32>
    %1131 = vector.extract_strided_slice %1103 {offsets = [2, 0], sizes = [1, 2], strides = [1, 1]} : vector<15x2xf32> to vector<1x2xf32>
    %c2_497 = arith.constant 2 : index
    %c0_498 = arith.constant 0 : index
    %c0_499 = arith.constant 0 : index
    %1132 = vector.load %arg22[%c2_497, %c0_498, %c0_499] : memref<15x15x1xf32, #tpu.memory_space<vmem>>, vector<1x15x1xf32>
    %1133 = vector.shape_cast %1132 : vector<1x15x1xf32> to vector<15x1xf32>
    %1134 = vector.broadcast %1131 : vector<1x2xf32> to vector<15x2xf32>
    %1135 = vector.broadcast %1133 : vector<15x1xf32> to vector<15x2xf32>
    %1136 = arith.addf %1134, %1135 : vector<15x2xf32>
    %1137 = arith.cmpf ogt, %1136, %1128 : vector<15x2xf32>
    %1138 = arith.select %1137, %1136, %1128 : vector<15x2xi1>, vector<15x2xf32>
    %c2_i32_500 = arith.constant 2 : i32
    %1139 = vector.broadcast %c2_i32_500 : i32 to vector<15x2xi32>
    %1140 = arith.select %1137, %1139, %1130 : vector<15x2xi1>, vector<15x2xi32>
    %1141 = vector.extract_strided_slice %1103 {offsets = [3, 0], sizes = [1, 2], strides = [1, 1]} : vector<15x2xf32> to vector<1x2xf32>
    %c3_501 = arith.constant 3 : index
    %c0_502 = arith.constant 0 : index
    %c0_503 = arith.constant 0 : index
    %1142 = vector.load %arg22[%c3_501, %c0_502, %c0_503] : memref<15x15x1xf32, #tpu.memory_space<vmem>>, vector<1x15x1xf32>
    %1143 = vector.shape_cast %1142 : vector<1x15x1xf32> to vector<15x1xf32>
    %1144 = vector.broadcast %1141 : vector<1x2xf32> to vector<15x2xf32>
    %1145 = vector.broadcast %1143 : vector<15x1xf32> to vector<15x2xf32>
    %1146 = arith.addf %1144, %1145 : vector<15x2xf32>
    %1147 = arith.cmpf ogt, %1146, %1138 : vector<15x2xf32>
    %1148 = arith.select %1147, %1146, %1138 : vector<15x2xi1>, vector<15x2xf32>
    %c3_i32_504 = arith.constant 3 : i32
    %1149 = vector.broadcast %c3_i32_504 : i32 to vector<15x2xi32>
    %1150 = arith.select %1147, %1149, %1140 : vector<15x2xi1>, vector<15x2xi32>
    %1151 = vector.extract_strided_slice %1103 {offsets = [4, 0], sizes = [1, 2], strides = [1, 1]} : vector<15x2xf32> to vector<1x2xf32>
    %c4_505 = arith.constant 4 : index
    %c0_506 = arith.constant 0 : index
    %c0_507 = arith.constant 0 : index
    %1152 = vector.load %arg22[%c4_505, %c0_506, %c0_507] : memref<15x15x1xf32, #tpu.memory_space<vmem>>, vector<1x15x1xf32>
    %1153 = vector.shape_cast %1152 : vector<1x15x1xf32> to vector<15x1xf32>
    %1154 = vector.broadcast %1151 : vector<1x2xf32> to vector<15x2xf32>
    %1155 = vector.broadcast %1153 : vector<15x1xf32> to vector<15x2xf32>
    %1156 = arith.addf %1154, %1155 : vector<15x2xf32>
    %1157 = arith.cmpf ogt, %1156, %1148 : vector<15x2xf32>
    %1158 = arith.select %1157, %1156, %1148 : vector<15x2xi1>, vector<15x2xf32>
    %c4_i32_508 = arith.constant 4 : i32
    %1159 = vector.broadcast %c4_i32_508 : i32 to vector<15x2xi32>
    %1160 = arith.select %1157, %1159, %1150 : vector<15x2xi1>, vector<15x2xi32>
    %1161 = vector.extract_strided_slice %1103 {offsets = [5, 0], sizes = [1, 2], strides = [1, 1]} : vector<15x2xf32> to vector<1x2xf32>
    %c5_509 = arith.constant 5 : index
    %c0_510 = arith.constant 0 : index
    %c0_511 = arith.constant 0 : index
    %1162 = vector.load %arg22[%c5_509, %c0_510, %c0_511] : memref<15x15x1xf32, #tpu.memory_space<vmem>>, vector<1x15x1xf32>
    %1163 = vector.shape_cast %1162 : vector<1x15x1xf32> to vector<15x1xf32>
    %1164 = vector.broadcast %1161 : vector<1x2xf32> to vector<15x2xf32>
    %1165 = vector.broadcast %1163 : vector<15x1xf32> to vector<15x2xf32>
    %1166 = arith.addf %1164, %1165 : vector<15x2xf32>
    %1167 = arith.cmpf ogt, %1166, %1158 : vector<15x2xf32>
    %1168 = arith.select %1167, %1166, %1158 : vector<15x2xi1>, vector<15x2xf32>
    %c5_i32_512 = arith.constant 5 : i32
    %1169 = vector.broadcast %c5_i32_512 : i32 to vector<15x2xi32>
    %1170 = arith.select %1167, %1169, %1160 : vector<15x2xi1>, vector<15x2xi32>
    %1171 = vector.extract_strided_slice %1103 {offsets = [6, 0], sizes = [1, 2], strides = [1, 1]} : vector<15x2xf32> to vector<1x2xf32>
    %c6_513 = arith.constant 6 : index
    %c0_514 = arith.constant 0 : index
    %c0_515 = arith.constant 0 : index
    %1172 = vector.load %arg22[%c6_513, %c0_514, %c0_515] : memref<15x15x1xf32, #tpu.memory_space<vmem>>, vector<1x15x1xf32>
    %1173 = vector.shape_cast %1172 : vector<1x15x1xf32> to vector<15x1xf32>
    %1174 = vector.broadcast %1171 : vector<1x2xf32> to vector<15x2xf32>
    %1175 = vector.broadcast %1173 : vector<15x1xf32> to vector<15x2xf32>
    %1176 = arith.addf %1174, %1175 : vector<15x2xf32>
    %1177 = arith.cmpf ogt, %1176, %1168 : vector<15x2xf32>
    %1178 = arith.select %1177, %1176, %1168 : vector<15x2xi1>, vector<15x2xf32>
    %c6_i32_516 = arith.constant 6 : i32
    %1179 = vector.broadcast %c6_i32_516 : i32 to vector<15x2xi32>
    %1180 = arith.select %1177, %1179, %1170 : vector<15x2xi1>, vector<15x2xi32>
    %1181 = vector.extract_strided_slice %1103 {offsets = [7, 0], sizes = [1, 2], strides = [1, 1]} : vector<15x2xf32> to vector<1x2xf32>
    %c7_517 = arith.constant 7 : index
    %c0_518 = arith.constant 0 : index
    %c0_519 = arith.constant 0 : index
    %1182 = vector.load %arg22[%c7_517, %c0_518, %c0_519] : memref<15x15x1xf32, #tpu.memory_space<vmem>>, vector<1x15x1xf32>
    %1183 = vector.shape_cast %1182 : vector<1x15x1xf32> to vector<15x1xf32>
    %1184 = vector.broadcast %1181 : vector<1x2xf32> to vector<15x2xf32>
    %1185 = vector.broadcast %1183 : vector<15x1xf32> to vector<15x2xf32>
    %1186 = arith.addf %1184, %1185 : vector<15x2xf32>
    %1187 = arith.cmpf ogt, %1186, %1178 : vector<15x2xf32>
    %1188 = arith.select %1187, %1186, %1178 : vector<15x2xi1>, vector<15x2xf32>
    %c7_i32_520 = arith.constant 7 : i32
    %1189 = vector.broadcast %c7_i32_520 : i32 to vector<15x2xi32>
    %1190 = arith.select %1187, %1189, %1180 : vector<15x2xi1>, vector<15x2xi32>
    %1191 = vector.extract_strided_slice %1103 {offsets = [8, 0], sizes = [1, 2], strides = [1, 1]} : vector<15x2xf32> to vector<1x2xf32>
    %c8_521 = arith.constant 8 : index
    %c0_522 = arith.constant 0 : index
    %c0_523 = arith.constant 0 : index
    %1192 = vector.load %arg22[%c8_521, %c0_522, %c0_523] : memref<15x15x1xf32, #tpu.memory_space<vmem>>, vector<1x15x1xf32>
    %1193 = vector.shape_cast %1192 : vector<1x15x1xf32> to vector<15x1xf32>
    %1194 = vector.broadcast %1191 : vector<1x2xf32> to vector<15x2xf32>
    %1195 = vector.broadcast %1193 : vector<15x1xf32> to vector<15x2xf32>
    %1196 = arith.addf %1194, %1195 : vector<15x2xf32>
    %1197 = arith.cmpf ogt, %1196, %1188 : vector<15x2xf32>
    %1198 = arith.select %1197, %1196, %1188 : vector<15x2xi1>, vector<15x2xf32>
    %c8_i32_524 = arith.constant 8 : i32
    %1199 = vector.broadcast %c8_i32_524 : i32 to vector<15x2xi32>
    %1200 = arith.select %1197, %1199, %1190 : vector<15x2xi1>, vector<15x2xi32>
    %1201 = vector.extract_strided_slice %1103 {offsets = [9, 0], sizes = [1, 2], strides = [1, 1]} : vector<15x2xf32> to vector<1x2xf32>
    %c9_525 = arith.constant 9 : index
    %c0_526 = arith.constant 0 : index
    %c0_527 = arith.constant 0 : index
    %1202 = vector.load %arg22[%c9_525, %c0_526, %c0_527] : memref<15x15x1xf32, #tpu.memory_space<vmem>>, vector<1x15x1xf32>
    %1203 = vector.shape_cast %1202 : vector<1x15x1xf32> to vector<15x1xf32>
    %1204 = vector.broadcast %1201 : vector<1x2xf32> to vector<15x2xf32>
    %1205 = vector.broadcast %1203 : vector<15x1xf32> to vector<15x2xf32>
    %1206 = arith.addf %1204, %1205 : vector<15x2xf32>
    %1207 = arith.cmpf ogt, %1206, %1198 : vector<15x2xf32>
    %1208 = arith.select %1207, %1206, %1198 : vector<15x2xi1>, vector<15x2xf32>
    %c9_i32_528 = arith.constant 9 : i32
    %1209 = vector.broadcast %c9_i32_528 : i32 to vector<15x2xi32>
    %1210 = arith.select %1207, %1209, %1200 : vector<15x2xi1>, vector<15x2xi32>
    %1211 = vector.extract_strided_slice %1103 {offsets = [10, 0], sizes = [1, 2], strides = [1, 1]} : vector<15x2xf32> to vector<1x2xf32>
    %c10_529 = arith.constant 10 : index
    %c0_530 = arith.constant 0 : index
    %c0_531 = arith.constant 0 : index
    %1212 = vector.load %arg22[%c10_529, %c0_530, %c0_531] : memref<15x15x1xf32, #tpu.memory_space<vmem>>, vector<1x15x1xf32>
    %1213 = vector.shape_cast %1212 : vector<1x15x1xf32> to vector<15x1xf32>
    %1214 = vector.broadcast %1211 : vector<1x2xf32> to vector<15x2xf32>
    %1215 = vector.broadcast %1213 : vector<15x1xf32> to vector<15x2xf32>
    %1216 = arith.addf %1214, %1215 : vector<15x2xf32>
    %1217 = arith.cmpf ogt, %1216, %1208 : vector<15x2xf32>
    %1218 = arith.select %1217, %1216, %1208 : vector<15x2xi1>, vector<15x2xf32>
    %c10_i32_532 = arith.constant 10 : i32
    %1219 = vector.broadcast %c10_i32_532 : i32 to vector<15x2xi32>
    %1220 = arith.select %1217, %1219, %1210 : vector<15x2xi1>, vector<15x2xi32>
    %1221 = vector.extract_strided_slice %1103 {offsets = [11, 0], sizes = [1, 2], strides = [1, 1]} : vector<15x2xf32> to vector<1x2xf32>
    %c11_533 = arith.constant 11 : index
    %c0_534 = arith.constant 0 : index
    %c0_535 = arith.constant 0 : index
    %1222 = vector.load %arg22[%c11_533, %c0_534, %c0_535] : memref<15x15x1xf32, #tpu.memory_space<vmem>>, vector<1x15x1xf32>
    %1223 = vector.shape_cast %1222 : vector<1x15x1xf32> to vector<15x1xf32>
    %1224 = vector.broadcast %1221 : vector<1x2xf32> to vector<15x2xf32>
    %1225 = vector.broadcast %1223 : vector<15x1xf32> to vector<15x2xf32>
    %1226 = arith.addf %1224, %1225 : vector<15x2xf32>
    %1227 = arith.cmpf ogt, %1226, %1218 : vector<15x2xf32>
    %1228 = arith.select %1227, %1226, %1218 : vector<15x2xi1>, vector<15x2xf32>
    %c11_i32_536 = arith.constant 11 : i32
    %1229 = vector.broadcast %c11_i32_536 : i32 to vector<15x2xi32>
    %1230 = arith.select %1227, %1229, %1220 : vector<15x2xi1>, vector<15x2xi32>
    %1231 = vector.extract_strided_slice %1103 {offsets = [12, 0], sizes = [1, 2], strides = [1, 1]} : vector<15x2xf32> to vector<1x2xf32>
    %c12_537 = arith.constant 12 : index
    %c0_538 = arith.constant 0 : index
    %c0_539 = arith.constant 0 : index
    %1232 = vector.load %arg22[%c12_537, %c0_538, %c0_539] : memref<15x15x1xf32, #tpu.memory_space<vmem>>, vector<1x15x1xf32>
    %1233 = vector.shape_cast %1232 : vector<1x15x1xf32> to vector<15x1xf32>
    %1234 = vector.broadcast %1231 : vector<1x2xf32> to vector<15x2xf32>
    %1235 = vector.broadcast %1233 : vector<15x1xf32> to vector<15x2xf32>
    %1236 = arith.addf %1234, %1235 : vector<15x2xf32>
    %1237 = arith.cmpf ogt, %1236, %1228 : vector<15x2xf32>
    %1238 = arith.select %1237, %1236, %1228 : vector<15x2xi1>, vector<15x2xf32>
    %c12_i32_540 = arith.constant 12 : i32
    %1239 = vector.broadcast %c12_i32_540 : i32 to vector<15x2xi32>
    %1240 = arith.select %1237, %1239, %1230 : vector<15x2xi1>, vector<15x2xi32>
    %1241 = vector.extract_strided_slice %1103 {offsets = [13, 0], sizes = [1, 2], strides = [1, 1]} : vector<15x2xf32> to vector<1x2xf32>
    %c13_541 = arith.constant 13 : index
    %c0_542 = arith.constant 0 : index
    %c0_543 = arith.constant 0 : index
    %1242 = vector.load %arg22[%c13_541, %c0_542, %c0_543] : memref<15x15x1xf32, #tpu.memory_space<vmem>>, vector<1x15x1xf32>
    %1243 = vector.shape_cast %1242 : vector<1x15x1xf32> to vector<15x1xf32>
    %1244 = vector.broadcast %1241 : vector<1x2xf32> to vector<15x2xf32>
    %1245 = vector.broadcast %1243 : vector<15x1xf32> to vector<15x2xf32>
    %1246 = arith.addf %1244, %1245 : vector<15x2xf32>
    %1247 = arith.cmpf ogt, %1246, %1238 : vector<15x2xf32>
    %1248 = arith.select %1247, %1246, %1238 : vector<15x2xi1>, vector<15x2xf32>
    %c13_i32_544 = arith.constant 13 : i32
    %1249 = vector.broadcast %c13_i32_544 : i32 to vector<15x2xi32>
    %1250 = arith.select %1247, %1249, %1240 : vector<15x2xi1>, vector<15x2xi32>
    %1251 = vector.extract_strided_slice %1103 {offsets = [14, 0], sizes = [1, 2], strides = [1, 1]} : vector<15x2xf32> to vector<1x2xf32>
    %c14_545 = arith.constant 14 : index
    %c0_546 = arith.constant 0 : index
    %c0_547 = arith.constant 0 : index
    %1252 = vector.load %arg22[%c14_545, %c0_546, %c0_547] : memref<15x15x1xf32, #tpu.memory_space<vmem>>, vector<1x15x1xf32>
    %1253 = vector.shape_cast %1252 : vector<1x15x1xf32> to vector<15x1xf32>
    %1254 = vector.broadcast %1251 : vector<1x2xf32> to vector<15x2xf32>
    %1255 = vector.broadcast %1253 : vector<15x1xf32> to vector<15x2xf32>
    %1256 = arith.addf %1254, %1255 : vector<15x2xf32>
    %1257 = arith.cmpf ogt, %1256, %1248 : vector<15x2xf32>
    %1258 = arith.select %1257, %1256, %1248 : vector<15x2xi1>, vector<15x2xf32>
    %c14_i32_548 = arith.constant 14 : i32
    %1259 = vector.broadcast %c14_i32_548 : i32 to vector<15x2xi32>
    %1260 = arith.select %1257, %1259, %1250 : vector<15x2xi1>, vector<15x2xi32>
    %1261 = vector.extract_strided_slice %468 {offsets = [0, 10], sizes = [15, 2], strides = [1, 1]} : vector<15x16xf32> to vector<15x2xf32>
    %1262 = arith.addf %1258, %1261 : vector<15x2xf32>
    %c5_i32_549 = arith.constant 5 : i32
    %1263 = vector.broadcast %c5_i32_549 : i32 to vector<1x2xi32>
    %1264 = arith.cmpi eq, %18, %1263 : vector<1x2xi32>
    %1265 = vector.shape_cast %1264 : vector<1x2xi1> to vector<1x2xi1>
    %1266 = vector.broadcast %1265 : vector<1x2xi1> to vector<15x2xi1>
    %1267 = arith.select %1266, %1262, %1108 : vector<15x2xi1>, vector<15x2xf32>
    %cst_550 = arith.constant 0xFF800000 : f32
    %1268 = vector.broadcast %cst_550 : f32 to vector<15x2xf32>
    %c0_i32_551 = arith.constant 0 : i32
    %1269 = vector.broadcast %c0_i32_551 : i32 to vector<15x2xi32>
    %1270 = vector.extract_strided_slice %1262 {offsets = [0, 0], sizes = [1, 2], strides = [1, 1]} : vector<15x2xf32> to vector<1x2xf32>
    %c0_552 = arith.constant 0 : index
    %c0_553 = arith.constant 0 : index
    %c0_554 = arith.constant 0 : index
    %1271 = vector.load %arg22[%c0_552, %c0_553, %c0_554] : memref<15x15x1xf32, #tpu.memory_space<vmem>>, vector<1x15x1xf32>
    %1272 = vector.shape_cast %1271 : vector<1x15x1xf32> to vector<15x1xf32>
    %1273 = vector.broadcast %1270 : vector<1x2xf32> to vector<15x2xf32>
    %1274 = vector.broadcast %1272 : vector<15x1xf32> to vector<15x2xf32>
    %1275 = arith.addf %1273, %1274 : vector<15x2xf32>
    %1276 = arith.cmpf ogt, %1275, %1268 : vector<15x2xf32>
    %1277 = arith.select %1276, %1275, %1268 : vector<15x2xi1>, vector<15x2xf32>
    %c0_i32_555 = arith.constant 0 : i32
    %1278 = vector.broadcast %c0_i32_555 : i32 to vector<15x2xi32>
    %1279 = arith.select %1276, %1278, %1269 : vector<15x2xi1>, vector<15x2xi32>
    %1280 = vector.extract_strided_slice %1262 {offsets = [1, 0], sizes = [1, 2], strides = [1, 1]} : vector<15x2xf32> to vector<1x2xf32>
    %c1_556 = arith.constant 1 : index
    %c0_557 = arith.constant 0 : index
    %c0_558 = arith.constant 0 : index
    %1281 = vector.load %arg22[%c1_556, %c0_557, %c0_558] : memref<15x15x1xf32, #tpu.memory_space<vmem>>, vector<1x15x1xf32>
    %1282 = vector.shape_cast %1281 : vector<1x15x1xf32> to vector<15x1xf32>
    %1283 = vector.broadcast %1280 : vector<1x2xf32> to vector<15x2xf32>
    %1284 = vector.broadcast %1282 : vector<15x1xf32> to vector<15x2xf32>
    %1285 = arith.addf %1283, %1284 : vector<15x2xf32>
    %1286 = arith.cmpf ogt, %1285, %1277 : vector<15x2xf32>
    %1287 = arith.select %1286, %1285, %1277 : vector<15x2xi1>, vector<15x2xf32>
    %c1_i32_559 = arith.constant 1 : i32
    %1288 = vector.broadcast %c1_i32_559 : i32 to vector<15x2xi32>
    %1289 = arith.select %1286, %1288, %1279 : vector<15x2xi1>, vector<15x2xi32>
    %1290 = vector.extract_strided_slice %1262 {offsets = [2, 0], sizes = [1, 2], strides = [1, 1]} : vector<15x2xf32> to vector<1x2xf32>
    %c2_560 = arith.constant 2 : index
    %c0_561 = arith.constant 0 : index
    %c0_562 = arith.constant 0 : index
    %1291 = vector.load %arg22[%c2_560, %c0_561, %c0_562] : memref<15x15x1xf32, #tpu.memory_space<vmem>>, vector<1x15x1xf32>
    %1292 = vector.shape_cast %1291 : vector<1x15x1xf32> to vector<15x1xf32>
    %1293 = vector.broadcast %1290 : vector<1x2xf32> to vector<15x2xf32>
    %1294 = vector.broadcast %1292 : vector<15x1xf32> to vector<15x2xf32>
    %1295 = arith.addf %1293, %1294 : vector<15x2xf32>
    %1296 = arith.cmpf ogt, %1295, %1287 : vector<15x2xf32>
    %1297 = arith.select %1296, %1295, %1287 : vector<15x2xi1>, vector<15x2xf32>
    %c2_i32_563 = arith.constant 2 : i32
    %1298 = vector.broadcast %c2_i32_563 : i32 to vector<15x2xi32>
    %1299 = arith.select %1296, %1298, %1289 : vector<15x2xi1>, vector<15x2xi32>
    %1300 = vector.extract_strided_slice %1262 {offsets = [3, 0], sizes = [1, 2], strides = [1, 1]} : vector<15x2xf32> to vector<1x2xf32>
    %c3_564 = arith.constant 3 : index
    %c0_565 = arith.constant 0 : index
    %c0_566 = arith.constant 0 : index
    %1301 = vector.load %arg22[%c3_564, %c0_565, %c0_566] : memref<15x15x1xf32, #tpu.memory_space<vmem>>, vector<1x15x1xf32>
    %1302 = vector.shape_cast %1301 : vector<1x15x1xf32> to vector<15x1xf32>
    %1303 = vector.broadcast %1300 : vector<1x2xf32> to vector<15x2xf32>
    %1304 = vector.broadcast %1302 : vector<15x1xf32> to vector<15x2xf32>
    %1305 = arith.addf %1303, %1304 : vector<15x2xf32>
    %1306 = arith.cmpf ogt, %1305, %1297 : vector<15x2xf32>
    %1307 = arith.select %1306, %1305, %1297 : vector<15x2xi1>, vector<15x2xf32>
    %c3_i32_567 = arith.constant 3 : i32
    %1308 = vector.broadcast %c3_i32_567 : i32 to vector<15x2xi32>
    %1309 = arith.select %1306, %1308, %1299 : vector<15x2xi1>, vector<15x2xi32>
    %1310 = vector.extract_strided_slice %1262 {offsets = [4, 0], sizes = [1, 2], strides = [1, 1]} : vector<15x2xf32> to vector<1x2xf32>
    %c4_568 = arith.constant 4 : index
    %c0_569 = arith.constant 0 : index
    %c0_570 = arith.constant 0 : index
    %1311 = vector.load %arg22[%c4_568, %c0_569, %c0_570] : memref<15x15x1xf32, #tpu.memory_space<vmem>>, vector<1x15x1xf32>
    %1312 = vector.shape_cast %1311 : vector<1x15x1xf32> to vector<15x1xf32>
    %1313 = vector.broadcast %1310 : vector<1x2xf32> to vector<15x2xf32>
    %1314 = vector.broadcast %1312 : vector<15x1xf32> to vector<15x2xf32>
    %1315 = arith.addf %1313, %1314 : vector<15x2xf32>
    %1316 = arith.cmpf ogt, %1315, %1307 : vector<15x2xf32>
    %1317 = arith.select %1316, %1315, %1307 : vector<15x2xi1>, vector<15x2xf32>
    %c4_i32_571 = arith.constant 4 : i32
    %1318 = vector.broadcast %c4_i32_571 : i32 to vector<15x2xi32>
    %1319 = arith.select %1316, %1318, %1309 : vector<15x2xi1>, vector<15x2xi32>
    %1320 = vector.extract_strided_slice %1262 {offsets = [5, 0], sizes = [1, 2], strides = [1, 1]} : vector<15x2xf32> to vector<1x2xf32>
    %c5_572 = arith.constant 5 : index
    %c0_573 = arith.constant 0 : index
    %c0_574 = arith.constant 0 : index
    %1321 = vector.load %arg22[%c5_572, %c0_573, %c0_574] : memref<15x15x1xf32, #tpu.memory_space<vmem>>, vector<1x15x1xf32>
    %1322 = vector.shape_cast %1321 : vector<1x15x1xf32> to vector<15x1xf32>
    %1323 = vector.broadcast %1320 : vector<1x2xf32> to vector<15x2xf32>
    %1324 = vector.broadcast %1322 : vector<15x1xf32> to vector<15x2xf32>
    %1325 = arith.addf %1323, %1324 : vector<15x2xf32>
    %1326 = arith.cmpf ogt, %1325, %1317 : vector<15x2xf32>
    %1327 = arith.select %1326, %1325, %1317 : vector<15x2xi1>, vector<15x2xf32>
    %c5_i32_575 = arith.constant 5 : i32
    %1328 = vector.broadcast %c5_i32_575 : i32 to vector<15x2xi32>
    %1329 = arith.select %1326, %1328, %1319 : vector<15x2xi1>, vector<15x2xi32>
    %1330 = vector.extract_strided_slice %1262 {offsets = [6, 0], sizes = [1, 2], strides = [1, 1]} : vector<15x2xf32> to vector<1x2xf32>
    %c6_576 = arith.constant 6 : index
    %c0_577 = arith.constant 0 : index
    %c0_578 = arith.constant 0 : index
    %1331 = vector.load %arg22[%c6_576, %c0_577, %c0_578] : memref<15x15x1xf32, #tpu.memory_space<vmem>>, vector<1x15x1xf32>
    %1332 = vector.shape_cast %1331 : vector<1x15x1xf32> to vector<15x1xf32>
    %1333 = vector.broadcast %1330 : vector<1x2xf32> to vector<15x2xf32>
    %1334 = vector.broadcast %1332 : vector<15x1xf32> to vector<15x2xf32>
    %1335 = arith.addf %1333, %1334 : vector<15x2xf32>
    %1336 = arith.cmpf ogt, %1335, %1327 : vector<15x2xf32>
    %1337 = arith.select %1336, %1335, %1327 : vector<15x2xi1>, vector<15x2xf32>
    %c6_i32_579 = arith.constant 6 : i32
    %1338 = vector.broadcast %c6_i32_579 : i32 to vector<15x2xi32>
    %1339 = arith.select %1336, %1338, %1329 : vector<15x2xi1>, vector<15x2xi32>
    %1340 = vector.extract_strided_slice %1262 {offsets = [7, 0], sizes = [1, 2], strides = [1, 1]} : vector<15x2xf32> to vector<1x2xf32>
    %c7_580 = arith.constant 7 : index
    %c0_581 = arith.constant 0 : index
    %c0_582 = arith.constant 0 : index
    %1341 = vector.load %arg22[%c7_580, %c0_581, %c0_582] : memref<15x15x1xf32, #tpu.memory_space<vmem>>, vector<1x15x1xf32>
    %1342 = vector.shape_cast %1341 : vector<1x15x1xf32> to vector<15x1xf32>
    %1343 = vector.broadcast %1340 : vector<1x2xf32> to vector<15x2xf32>
    %1344 = vector.broadcast %1342 : vector<15x1xf32> to vector<15x2xf32>
    %1345 = arith.addf %1343, %1344 : vector<15x2xf32>
    %1346 = arith.cmpf ogt, %1345, %1337 : vector<15x2xf32>
    %1347 = arith.select %1346, %1345, %1337 : vector<15x2xi1>, vector<15x2xf32>
    %c7_i32_583 = arith.constant 7 : i32
    %1348 = vector.broadcast %c7_i32_583 : i32 to vector<15x2xi32>
    %1349 = arith.select %1346, %1348, %1339 : vector<15x2xi1>, vector<15x2xi32>
    %1350 = vector.extract_strided_slice %1262 {offsets = [8, 0], sizes = [1, 2], strides = [1, 1]} : vector<15x2xf32> to vector<1x2xf32>
    %c8_584 = arith.constant 8 : index
    %c0_585 = arith.constant 0 : index
    %c0_586 = arith.constant 0 : index
    %1351 = vector.load %arg22[%c8_584, %c0_585, %c0_586] : memref<15x15x1xf32, #tpu.memory_space<vmem>>, vector<1x15x1xf32>
    %1352 = vector.shape_cast %1351 : vector<1x15x1xf32> to vector<15x1xf32>
    %1353 = vector.broadcast %1350 : vector<1x2xf32> to vector<15x2xf32>
    %1354 = vector.broadcast %1352 : vector<15x1xf32> to vector<15x2xf32>
    %1355 = arith.addf %1353, %1354 : vector<15x2xf32>
    %1356 = arith.cmpf ogt, %1355, %1347 : vector<15x2xf32>
    %1357 = arith.select %1356, %1355, %1347 : vector<15x2xi1>, vector<15x2xf32>
    %c8_i32_587 = arith.constant 8 : i32
    %1358 = vector.broadcast %c8_i32_587 : i32 to vector<15x2xi32>
    %1359 = arith.select %1356, %1358, %1349 : vector<15x2xi1>, vector<15x2xi32>
    %1360 = vector.extract_strided_slice %1262 {offsets = [9, 0], sizes = [1, 2], strides = [1, 1]} : vector<15x2xf32> to vector<1x2xf32>
    %c9_588 = arith.constant 9 : index
    %c0_589 = arith.constant 0 : index
    %c0_590 = arith.constant 0 : index
    %1361 = vector.load %arg22[%c9_588, %c0_589, %c0_590] : memref<15x15x1xf32, #tpu.memory_space<vmem>>, vector<1x15x1xf32>
    %1362 = vector.shape_cast %1361 : vector<1x15x1xf32> to vector<15x1xf32>
    %1363 = vector.broadcast %1360 : vector<1x2xf32> to vector<15x2xf32>
    %1364 = vector.broadcast %1362 : vector<15x1xf32> to vector<15x2xf32>
    %1365 = arith.addf %1363, %1364 : vector<15x2xf32>
    %1366 = arith.cmpf ogt, %1365, %1357 : vector<15x2xf32>
    %1367 = arith.select %1366, %1365, %1357 : vector<15x2xi1>, vector<15x2xf32>
    %c9_i32_591 = arith.constant 9 : i32
    %1368 = vector.broadcast %c9_i32_591 : i32 to vector<15x2xi32>
    %1369 = arith.select %1366, %1368, %1359 : vector<15x2xi1>, vector<15x2xi32>
    %1370 = vector.extract_strided_slice %1262 {offsets = [10, 0], sizes = [1, 2], strides = [1, 1]} : vector<15x2xf32> to vector<1x2xf32>
    %c10_592 = arith.constant 10 : index
    %c0_593 = arith.constant 0 : index
    %c0_594 = arith.constant 0 : index
    %1371 = vector.load %arg22[%c10_592, %c0_593, %c0_594] : memref<15x15x1xf32, #tpu.memory_space<vmem>>, vector<1x15x1xf32>
    %1372 = vector.shape_cast %1371 : vector<1x15x1xf32> to vector<15x1xf32>
    %1373 = vector.broadcast %1370 : vector<1x2xf32> to vector<15x2xf32>
    %1374 = vector.broadcast %1372 : vector<15x1xf32> to vector<15x2xf32>
    %1375 = arith.addf %1373, %1374 : vector<15x2xf32>
    %1376 = arith.cmpf ogt, %1375, %1367 : vector<15x2xf32>
    %1377 = arith.select %1376, %1375, %1367 : vector<15x2xi1>, vector<15x2xf32>
    %c10_i32_595 = arith.constant 10 : i32
    %1378 = vector.broadcast %c10_i32_595 : i32 to vector<15x2xi32>
    %1379 = arith.select %1376, %1378, %1369 : vector<15x2xi1>, vector<15x2xi32>
    %1380 = vector.extract_strided_slice %1262 {offsets = [11, 0], sizes = [1, 2], strides = [1, 1]} : vector<15x2xf32> to vector<1x2xf32>
    %c11_596 = arith.constant 11 : index
    %c0_597 = arith.constant 0 : index
    %c0_598 = arith.constant 0 : index
    %1381 = vector.load %arg22[%c11_596, %c0_597, %c0_598] : memref<15x15x1xf32, #tpu.memory_space<vmem>>, vector<1x15x1xf32>
    %1382 = vector.shape_cast %1381 : vector<1x15x1xf32> to vector<15x1xf32>
    %1383 = vector.broadcast %1380 : vector<1x2xf32> to vector<15x2xf32>
    %1384 = vector.broadcast %1382 : vector<15x1xf32> to vector<15x2xf32>
    %1385 = arith.addf %1383, %1384 : vector<15x2xf32>
    %1386 = arith.cmpf ogt, %1385, %1377 : vector<15x2xf32>
    %1387 = arith.select %1386, %1385, %1377 : vector<15x2xi1>, vector<15x2xf32>
    %c11_i32_599 = arith.constant 11 : i32
    %1388 = vector.broadcast %c11_i32_599 : i32 to vector<15x2xi32>
    %1389 = arith.select %1386, %1388, %1379 : vector<15x2xi1>, vector<15x2xi32>
    %1390 = vector.extract_strided_slice %1262 {offsets = [12, 0], sizes = [1, 2], strides = [1, 1]} : vector<15x2xf32> to vector<1x2xf32>
    %c12_600 = arith.constant 12 : index
    %c0_601 = arith.constant 0 : index
    %c0_602 = arith.constant 0 : index
    %1391 = vector.load %arg22[%c12_600, %c0_601, %c0_602] : memref<15x15x1xf32, #tpu.memory_space<vmem>>, vector<1x15x1xf32>
    %1392 = vector.shape_cast %1391 : vector<1x15x1xf32> to vector<15x1xf32>
    %1393 = vector.broadcast %1390 : vector<1x2xf32> to vector<15x2xf32>
    %1394 = vector.broadcast %1392 : vector<15x1xf32> to vector<15x2xf32>
    %1395 = arith.addf %1393, %1394 : vector<15x2xf32>
    %1396 = arith.cmpf ogt, %1395, %1387 : vector<15x2xf32>
    %1397 = arith.select %1396, %1395, %1387 : vector<15x2xi1>, vector<15x2xf32>
    %c12_i32_603 = arith.constant 12 : i32
    %1398 = vector.broadcast %c12_i32_603 : i32 to vector<15x2xi32>
    %1399 = arith.select %1396, %1398, %1389 : vector<15x2xi1>, vector<15x2xi32>
    %1400 = vector.extract_strided_slice %1262 {offsets = [13, 0], sizes = [1, 2], strides = [1, 1]} : vector<15x2xf32> to vector<1x2xf32>
    %c13_604 = arith.constant 13 : index
    %c0_605 = arith.constant 0 : index
    %c0_606 = arith.constant 0 : index
    %1401 = vector.load %arg22[%c13_604, %c0_605, %c0_606] : memref<15x15x1xf32, #tpu.memory_space<vmem>>, vector<1x15x1xf32>
    %1402 = vector.shape_cast %1401 : vector<1x15x1xf32> to vector<15x1xf32>
    %1403 = vector.broadcast %1400 : vector<1x2xf32> to vector<15x2xf32>
    %1404 = vector.broadcast %1402 : vector<15x1xf32> to vector<15x2xf32>
    %1405 = arith.addf %1403, %1404 : vector<15x2xf32>
    %1406 = arith.cmpf ogt, %1405, %1397 : vector<15x2xf32>
    %1407 = arith.select %1406, %1405, %1397 : vector<15x2xi1>, vector<15x2xf32>
    %c13_i32_607 = arith.constant 13 : i32
    %1408 = vector.broadcast %c13_i32_607 : i32 to vector<15x2xi32>
    %1409 = arith.select %1406, %1408, %1399 : vector<15x2xi1>, vector<15x2xi32>
    %1410 = vector.extract_strided_slice %1262 {offsets = [14, 0], sizes = [1, 2], strides = [1, 1]} : vector<15x2xf32> to vector<1x2xf32>
    %c14_608 = arith.constant 14 : index
    %c0_609 = arith.constant 0 : index
    %c0_610 = arith.constant 0 : index
    %1411 = vector.load %arg22[%c14_608, %c0_609, %c0_610] : memref<15x15x1xf32, #tpu.memory_space<vmem>>, vector<1x15x1xf32>
    %1412 = vector.shape_cast %1411 : vector<1x15x1xf32> to vector<15x1xf32>
    %1413 = vector.broadcast %1410 : vector<1x2xf32> to vector<15x2xf32>
    %1414 = vector.broadcast %1412 : vector<15x1xf32> to vector<15x2xf32>
    %1415 = arith.addf %1413, %1414 : vector<15x2xf32>
    %1416 = arith.cmpf ogt, %1415, %1407 : vector<15x2xf32>
    %1417 = arith.select %1416, %1415, %1407 : vector<15x2xi1>, vector<15x2xf32>
    %c14_i32_611 = arith.constant 14 : i32
    %1418 = vector.broadcast %c14_i32_611 : i32 to vector<15x2xi32>
    %1419 = arith.select %1416, %1418, %1409 : vector<15x2xi1>, vector<15x2xi32>
    %1420 = vector.extract_strided_slice %468 {offsets = [0, 12], sizes = [15, 2], strides = [1, 1]} : vector<15x16xf32> to vector<15x2xf32>
    %1421 = arith.addf %1417, %1420 : vector<15x2xf32>
    %c6_i32_612 = arith.constant 6 : i32
    %1422 = vector.broadcast %c6_i32_612 : i32 to vector<1x2xi32>
    %1423 = arith.cmpi eq, %18, %1422 : vector<1x2xi32>
    %1424 = vector.shape_cast %1423 : vector<1x2xi1> to vector<1x2xi1>
    %1425 = vector.broadcast %1424 : vector<1x2xi1> to vector<15x2xi1>
    %1426 = arith.select %1425, %1421, %1267 : vector<15x2xi1>, vector<15x2xf32>
    %cst_613 = arith.constant 0xFF800000 : f32
    %1427 = vector.broadcast %cst_613 : f32 to vector<15x2xf32>
    %c0_i32_614 = arith.constant 0 : i32
    %1428 = vector.broadcast %c0_i32_614 : i32 to vector<15x2xi32>
    %1429 = vector.extract_strided_slice %1421 {offsets = [0, 0], sizes = [1, 2], strides = [1, 1]} : vector<15x2xf32> to vector<1x2xf32>
    %c0_615 = arith.constant 0 : index
    %c0_616 = arith.constant 0 : index
    %c0_617 = arith.constant 0 : index
    %1430 = vector.load %arg22[%c0_615, %c0_616, %c0_617] : memref<15x15x1xf32, #tpu.memory_space<vmem>>, vector<1x15x1xf32>
    %1431 = vector.shape_cast %1430 : vector<1x15x1xf32> to vector<15x1xf32>
    %1432 = vector.broadcast %1429 : vector<1x2xf32> to vector<15x2xf32>
    %1433 = vector.broadcast %1431 : vector<15x1xf32> to vector<15x2xf32>
    %1434 = arith.addf %1432, %1433 : vector<15x2xf32>
    %1435 = arith.cmpf ogt, %1434, %1427 : vector<15x2xf32>
    %1436 = arith.select %1435, %1434, %1427 : vector<15x2xi1>, vector<15x2xf32>
    %c0_i32_618 = arith.constant 0 : i32
    %1437 = vector.broadcast %c0_i32_618 : i32 to vector<15x2xi32>
    %1438 = arith.select %1435, %1437, %1428 : vector<15x2xi1>, vector<15x2xi32>
    %1439 = vector.extract_strided_slice %1421 {offsets = [1, 0], sizes = [1, 2], strides = [1, 1]} : vector<15x2xf32> to vector<1x2xf32>
    %c1_619 = arith.constant 1 : index
    %c0_620 = arith.constant 0 : index
    %c0_621 = arith.constant 0 : index
    %1440 = vector.load %arg22[%c1_619, %c0_620, %c0_621] : memref<15x15x1xf32, #tpu.memory_space<vmem>>, vector<1x15x1xf32>
    %1441 = vector.shape_cast %1440 : vector<1x15x1xf32> to vector<15x1xf32>
    %1442 = vector.broadcast %1439 : vector<1x2xf32> to vector<15x2xf32>
    %1443 = vector.broadcast %1441 : vector<15x1xf32> to vector<15x2xf32>
    %1444 = arith.addf %1442, %1443 : vector<15x2xf32>
    %1445 = arith.cmpf ogt, %1444, %1436 : vector<15x2xf32>
    %1446 = arith.select %1445, %1444, %1436 : vector<15x2xi1>, vector<15x2xf32>
    %c1_i32_622 = arith.constant 1 : i32
    %1447 = vector.broadcast %c1_i32_622 : i32 to vector<15x2xi32>
    %1448 = arith.select %1445, %1447, %1438 : vector<15x2xi1>, vector<15x2xi32>
    %1449 = vector.extract_strided_slice %1421 {offsets = [2, 0], sizes = [1, 2], strides = [1, 1]} : vector<15x2xf32> to vector<1x2xf32>
    %c2_623 = arith.constant 2 : index
    %c0_624 = arith.constant 0 : index
    %c0_625 = arith.constant 0 : index
    %1450 = vector.load %arg22[%c2_623, %c0_624, %c0_625] : memref<15x15x1xf32, #tpu.memory_space<vmem>>, vector<1x15x1xf32>
    %1451 = vector.shape_cast %1450 : vector<1x15x1xf32> to vector<15x1xf32>
    %1452 = vector.broadcast %1449 : vector<1x2xf32> to vector<15x2xf32>
    %1453 = vector.broadcast %1451 : vector<15x1xf32> to vector<15x2xf32>
    %1454 = arith.addf %1452, %1453 : vector<15x2xf32>
    %1455 = arith.cmpf ogt, %1454, %1446 : vector<15x2xf32>
    %1456 = arith.select %1455, %1454, %1446 : vector<15x2xi1>, vector<15x2xf32>
    %c2_i32_626 = arith.constant 2 : i32
    %1457 = vector.broadcast %c2_i32_626 : i32 to vector<15x2xi32>
    %1458 = arith.select %1455, %1457, %1448 : vector<15x2xi1>, vector<15x2xi32>
    %1459 = vector.extract_strided_slice %1421 {offsets = [3, 0], sizes = [1, 2], strides = [1, 1]} : vector<15x2xf32> to vector<1x2xf32>
    %c3_627 = arith.constant 3 : index
    %c0_628 = arith.constant 0 : index
    %c0_629 = arith.constant 0 : index
    %1460 = vector.load %arg22[%c3_627, %c0_628, %c0_629] : memref<15x15x1xf32, #tpu.memory_space<vmem>>, vector<1x15x1xf32>
    %1461 = vector.shape_cast %1460 : vector<1x15x1xf32> to vector<15x1xf32>
    %1462 = vector.broadcast %1459 : vector<1x2xf32> to vector<15x2xf32>
    %1463 = vector.broadcast %1461 : vector<15x1xf32> to vector<15x2xf32>
    %1464 = arith.addf %1462, %1463 : vector<15x2xf32>
    %1465 = arith.cmpf ogt, %1464, %1456 : vector<15x2xf32>
    %1466 = arith.select %1465, %1464, %1456 : vector<15x2xi1>, vector<15x2xf32>
    %c3_i32_630 = arith.constant 3 : i32
    %1467 = vector.broadcast %c3_i32_630 : i32 to vector<15x2xi32>
    %1468 = arith.select %1465, %1467, %1458 : vector<15x2xi1>, vector<15x2xi32>
    %1469 = vector.extract_strided_slice %1421 {offsets = [4, 0], sizes = [1, 2], strides = [1, 1]} : vector<15x2xf32> to vector<1x2xf32>
    %c4_631 = arith.constant 4 : index
    %c0_632 = arith.constant 0 : index
    %c0_633 = arith.constant 0 : index
    %1470 = vector.load %arg22[%c4_631, %c0_632, %c0_633] : memref<15x15x1xf32, #tpu.memory_space<vmem>>, vector<1x15x1xf32>
    %1471 = vector.shape_cast %1470 : vector<1x15x1xf32> to vector<15x1xf32>
    %1472 = vector.broadcast %1469 : vector<1x2xf32> to vector<15x2xf32>
    %1473 = vector.broadcast %1471 : vector<15x1xf32> to vector<15x2xf32>
    %1474 = arith.addf %1472, %1473 : vector<15x2xf32>
    %1475 = arith.cmpf ogt, %1474, %1466 : vector<15x2xf32>
    %1476 = arith.select %1475, %1474, %1466 : vector<15x2xi1>, vector<15x2xf32>
    %c4_i32_634 = arith.constant 4 : i32
    %1477 = vector.broadcast %c4_i32_634 : i32 to vector<15x2xi32>
    %1478 = arith.select %1475, %1477, %1468 : vector<15x2xi1>, vector<15x2xi32>
    %1479 = vector.extract_strided_slice %1421 {offsets = [5, 0], sizes = [1, 2], strides = [1, 1]} : vector<15x2xf32> to vector<1x2xf32>
    %c5_635 = arith.constant 5 : index
    %c0_636 = arith.constant 0 : index
    %c0_637 = arith.constant 0 : index
    %1480 = vector.load %arg22[%c5_635, %c0_636, %c0_637] : memref<15x15x1xf32, #tpu.memory_space<vmem>>, vector<1x15x1xf32>
    %1481 = vector.shape_cast %1480 : vector<1x15x1xf32> to vector<15x1xf32>
    %1482 = vector.broadcast %1479 : vector<1x2xf32> to vector<15x2xf32>
    %1483 = vector.broadcast %1481 : vector<15x1xf32> to vector<15x2xf32>
    %1484 = arith.addf %1482, %1483 : vector<15x2xf32>
    %1485 = arith.cmpf ogt, %1484, %1476 : vector<15x2xf32>
    %1486 = arith.select %1485, %1484, %1476 : vector<15x2xi1>, vector<15x2xf32>
    %c5_i32_638 = arith.constant 5 : i32
    %1487 = vector.broadcast %c5_i32_638 : i32 to vector<15x2xi32>
    %1488 = arith.select %1485, %1487, %1478 : vector<15x2xi1>, vector<15x2xi32>
    %1489 = vector.extract_strided_slice %1421 {offsets = [6, 0], sizes = [1, 2], strides = [1, 1]} : vector<15x2xf32> to vector<1x2xf32>
    %c6_639 = arith.constant 6 : index
    %c0_640 = arith.constant 0 : index
    %c0_641 = arith.constant 0 : index
    %1490 = vector.load %arg22[%c6_639, %c0_640, %c0_641] : memref<15x15x1xf32, #tpu.memory_space<vmem>>, vector<1x15x1xf32>
    %1491 = vector.shape_cast %1490 : vector<1x15x1xf32> to vector<15x1xf32>
    %1492 = vector.broadcast %1489 : vector<1x2xf32> to vector<15x2xf32>
    %1493 = vector.broadcast %1491 : vector<15x1xf32> to vector<15x2xf32>
    %1494 = arith.addf %1492, %1493 : vector<15x2xf32>
    %1495 = arith.cmpf ogt, %1494, %1486 : vector<15x2xf32>
    %1496 = arith.select %1495, %1494, %1486 : vector<15x2xi1>, vector<15x2xf32>
    %c6_i32_642 = arith.constant 6 : i32
    %1497 = vector.broadcast %c6_i32_642 : i32 to vector<15x2xi32>
    %1498 = arith.select %1495, %1497, %1488 : vector<15x2xi1>, vector<15x2xi32>
    %1499 = vector.extract_strided_slice %1421 {offsets = [7, 0], sizes = [1, 2], strides = [1, 1]} : vector<15x2xf32> to vector<1x2xf32>
    %c7_643 = arith.constant 7 : index
    %c0_644 = arith.constant 0 : index
    %c0_645 = arith.constant 0 : index
    %1500 = vector.load %arg22[%c7_643, %c0_644, %c0_645] : memref<15x15x1xf32, #tpu.memory_space<vmem>>, vector<1x15x1xf32>
    %1501 = vector.shape_cast %1500 : vector<1x15x1xf32> to vector<15x1xf32>
    %1502 = vector.broadcast %1499 : vector<1x2xf32> to vector<15x2xf32>
    %1503 = vector.broadcast %1501 : vector<15x1xf32> to vector<15x2xf32>
    %1504 = arith.addf %1502, %1503 : vector<15x2xf32>
    %1505 = arith.cmpf ogt, %1504, %1496 : vector<15x2xf32>
    %1506 = arith.select %1505, %1504, %1496 : vector<15x2xi1>, vector<15x2xf32>
    %c7_i32_646 = arith.constant 7 : i32
    %1507 = vector.broadcast %c7_i32_646 : i32 to vector<15x2xi32>
    %1508 = arith.select %1505, %1507, %1498 : vector<15x2xi1>, vector<15x2xi32>
    %1509 = vector.extract_strided_slice %1421 {offsets = [8, 0], sizes = [1, 2], strides = [1, 1]} : vector<15x2xf32> to vector<1x2xf32>
    %c8_647 = arith.constant 8 : index
    %c0_648 = arith.constant 0 : index
    %c0_649 = arith.constant 0 : index
    %1510 = vector.load %arg22[%c8_647, %c0_648, %c0_649] : memref<15x15x1xf32, #tpu.memory_space<vmem>>, vector<1x15x1xf32>
    %1511 = vector.shape_cast %1510 : vector<1x15x1xf32> to vector<15x1xf32>
    %1512 = vector.broadcast %1509 : vector<1x2xf32> to vector<15x2xf32>
    %1513 = vector.broadcast %1511 : vector<15x1xf32> to vector<15x2xf32>
    %1514 = arith.addf %1512, %1513 : vector<15x2xf32>
    %1515 = arith.cmpf ogt, %1514, %1506 : vector<15x2xf32>
    %1516 = arith.select %1515, %1514, %1506 : vector<15x2xi1>, vector<15x2xf32>
    %c8_i32_650 = arith.constant 8 : i32
    %1517 = vector.broadcast %c8_i32_650 : i32 to vector<15x2xi32>
    %1518 = arith.select %1515, %1517, %1508 : vector<15x2xi1>, vector<15x2xi32>
    %1519 = vector.extract_strided_slice %1421 {offsets = [9, 0], sizes = [1, 2], strides = [1, 1]} : vector<15x2xf32> to vector<1x2xf32>
    %c9_651 = arith.constant 9 : index
    %c0_652 = arith.constant 0 : index
    %c0_653 = arith.constant 0 : index
    %1520 = vector.load %arg22[%c9_651, %c0_652, %c0_653] : memref<15x15x1xf32, #tpu.memory_space<vmem>>, vector<1x15x1xf32>
    %1521 = vector.shape_cast %1520 : vector<1x15x1xf32> to vector<15x1xf32>
    %1522 = vector.broadcast %1519 : vector<1x2xf32> to vector<15x2xf32>
    %1523 = vector.broadcast %1521 : vector<15x1xf32> to vector<15x2xf32>
    %1524 = arith.addf %1522, %1523 : vector<15x2xf32>
    %1525 = arith.cmpf ogt, %1524, %1516 : vector<15x2xf32>
    %1526 = arith.select %1525, %1524, %1516 : vector<15x2xi1>, vector<15x2xf32>
    %c9_i32_654 = arith.constant 9 : i32
    %1527 = vector.broadcast %c9_i32_654 : i32 to vector<15x2xi32>
    %1528 = arith.select %1525, %1527, %1518 : vector<15x2xi1>, vector<15x2xi32>
    %1529 = vector.extract_strided_slice %1421 {offsets = [10, 0], sizes = [1, 2], strides = [1, 1]} : vector<15x2xf32> to vector<1x2xf32>
    %c10_655 = arith.constant 10 : index
    %c0_656 = arith.constant 0 : index
    %c0_657 = arith.constant 0 : index
    %1530 = vector.load %arg22[%c10_655, %c0_656, %c0_657] : memref<15x15x1xf32, #tpu.memory_space<vmem>>, vector<1x15x1xf32>
    %1531 = vector.shape_cast %1530 : vector<1x15x1xf32> to vector<15x1xf32>
    %1532 = vector.broadcast %1529 : vector<1x2xf32> to vector<15x2xf32>
    %1533 = vector.broadcast %1531 : vector<15x1xf32> to vector<15x2xf32>
    %1534 = arith.addf %1532, %1533 : vector<15x2xf32>
    %1535 = arith.cmpf ogt, %1534, %1526 : vector<15x2xf32>
    %1536 = arith.select %1535, %1534, %1526 : vector<15x2xi1>, vector<15x2xf32>
    %c10_i32_658 = arith.constant 10 : i32
    %1537 = vector.broadcast %c10_i32_658 : i32 to vector<15x2xi32>
    %1538 = arith.select %1535, %1537, %1528 : vector<15x2xi1>, vector<15x2xi32>
    %1539 = vector.extract_strided_slice %1421 {offsets = [11, 0], sizes = [1, 2], strides = [1, 1]} : vector<15x2xf32> to vector<1x2xf32>
    %c11_659 = arith.constant 11 : index
    %c0_660 = arith.constant 0 : index
    %c0_661 = arith.constant 0 : index
    %1540 = vector.load %arg22[%c11_659, %c0_660, %c0_661] : memref<15x15x1xf32, #tpu.memory_space<vmem>>, vector<1x15x1xf32>
    %1541 = vector.shape_cast %1540 : vector<1x15x1xf32> to vector<15x1xf32>
    %1542 = vector.broadcast %1539 : vector<1x2xf32> to vector<15x2xf32>
    %1543 = vector.broadcast %1541 : vector<15x1xf32> to vector<15x2xf32>
    %1544 = arith.addf %1542, %1543 : vector<15x2xf32>
    %1545 = arith.cmpf ogt, %1544, %1536 : vector<15x2xf32>
    %1546 = arith.select %1545, %1544, %1536 : vector<15x2xi1>, vector<15x2xf32>
    %c11_i32_662 = arith.constant 11 : i32
    %1547 = vector.broadcast %c11_i32_662 : i32 to vector<15x2xi32>
    %1548 = arith.select %1545, %1547, %1538 : vector<15x2xi1>, vector<15x2xi32>
    %1549 = vector.extract_strided_slice %1421 {offsets = [12, 0], sizes = [1, 2], strides = [1, 1]} : vector<15x2xf32> to vector<1x2xf32>
    %c12_663 = arith.constant 12 : index
    %c0_664 = arith.constant 0 : index
    %c0_665 = arith.constant 0 : index
    %1550 = vector.load %arg22[%c12_663, %c0_664, %c0_665] : memref<15x15x1xf32, #tpu.memory_space<vmem>>, vector<1x15x1xf32>
    %1551 = vector.shape_cast %1550 : vector<1x15x1xf32> to vector<15x1xf32>
    %1552 = vector.broadcast %1549 : vector<1x2xf32> to vector<15x2xf32>
    %1553 = vector.broadcast %1551 : vector<15x1xf32> to vector<15x2xf32>
    %1554 = arith.addf %1552, %1553 : vector<15x2xf32>
    %1555 = arith.cmpf ogt, %1554, %1546 : vector<15x2xf32>
    %1556 = arith.select %1555, %1554, %1546 : vector<15x2xi1>, vector<15x2xf32>
    %c12_i32_666 = arith.constant 12 : i32
    %1557 = vector.broadcast %c12_i32_666 : i32 to vector<15x2xi32>
    %1558 = arith.select %1555, %1557, %1548 : vector<15x2xi1>, vector<15x2xi32>
    %1559 = vector.extract_strided_slice %1421 {offsets = [13, 0], sizes = [1, 2], strides = [1, 1]} : vector<15x2xf32> to vector<1x2xf32>
    %c13_667 = arith.constant 13 : index
    %c0_668 = arith.constant 0 : index
    %c0_669 = arith.constant 0 : index
    %1560 = vector.load %arg22[%c13_667, %c0_668, %c0_669] : memref<15x15x1xf32, #tpu.memory_space<vmem>>, vector<1x15x1xf32>
    %1561 = vector.shape_cast %1560 : vector<1x15x1xf32> to vector<15x1xf32>
    %1562 = vector.broadcast %1559 : vector<1x2xf32> to vector<15x2xf32>
    %1563 = vector.broadcast %1561 : vector<15x1xf32> to vector<15x2xf32>
    %1564 = arith.addf %1562, %1563 : vector<15x2xf32>
    %1565 = arith.cmpf ogt, %1564, %1556 : vector<15x2xf32>
    %1566 = arith.select %1565, %1564, %1556 : vector<15x2xi1>, vector<15x2xf32>
    %c13_i32_670 = arith.constant 13 : i32
    %1567 = vector.broadcast %c13_i32_670 : i32 to vector<15x2xi32>
    %1568 = arith.select %1565, %1567, %1558 : vector<15x2xi1>, vector<15x2xi32>
    %1569 = vector.extract_strided_slice %1421 {offsets = [14, 0], sizes = [1, 2], strides = [1, 1]} : vector<15x2xf32> to vector<1x2xf32>
    %c14_671 = arith.constant 14 : index
    %c0_672 = arith.constant 0 : index
    %c0_673 = arith.constant 0 : index
    %1570 = vector.load %arg22[%c14_671, %c0_672, %c0_673] : memref<15x15x1xf32, #tpu.memory_space<vmem>>, vector<1x15x1xf32>
    %1571 = vector.shape_cast %1570 : vector<1x15x1xf32> to vector<15x1xf32>
    %1572 = vector.broadcast %1569 : vector<1x2xf32> to vector<15x2xf32>
    %1573 = vector.broadcast %1571 : vector<15x1xf32> to vector<15x2xf32>
    %1574 = arith.addf %1572, %1573 : vector<15x2xf32>
    %1575 = arith.cmpf ogt, %1574, %1566 : vector<15x2xf32>
    %1576 = arith.select %1575, %1574, %1566 : vector<15x2xi1>, vector<15x2xf32>
    %c14_i32_674 = arith.constant 14 : i32
    %1577 = vector.broadcast %c14_i32_674 : i32 to vector<15x2xi32>
    %1578 = arith.select %1575, %1577, %1568 : vector<15x2xi1>, vector<15x2xi32>
    %1579 = vector.extract_strided_slice %468 {offsets = [0, 14], sizes = [15, 2], strides = [1, 1]} : vector<15x16xf32> to vector<15x2xf32>
    %1580 = arith.addf %1576, %1579 : vector<15x2xf32>
    %c7_i32_675 = arith.constant 7 : i32
    %1581 = vector.broadcast %c7_i32_675 : i32 to vector<1x2xi32>
    %1582 = arith.cmpi eq, %18, %1581 : vector<1x2xi32>
    %1583 = vector.shape_cast %1582 : vector<1x2xi1> to vector<1x2xi1>
    %1584 = vector.broadcast %1583 : vector<1x2xi1> to vector<15x2xi1>
    %1585 = arith.select %1584, %1580, %1426 : vector<15x2xi1>, vector<15x2xf32>
    %c0_676 = arith.constant 0 : index
    %c0_677 = arith.constant 0 : index
    %1586 = vector.load %arg24[%c0_676, %c0_677] : memref<15x1xf32, #tpu.memory_space<vmem>>, vector<15x1xf32>
    %1587 = vector.broadcast %1586 : vector<15x1xf32> to vector<15x2xf32>
    %1588 = arith.addf %1585, %1587 : vector<15x2xf32>
    %cst_678 = arith.constant dense<0xFF800000> : vector<2xf32>
    %1589 = vector.multi_reduction <maximumf>, %1588, %cst_678 [0] : vector<15x2xf32> to vector<2xf32>
    %1590 = vector.shape_cast %1589 : vector<2xf32> to vector<1x2xf32>
    %1591 = tpu.iota {dimensions = array<i32: 0>} : vector<15x2xi32>
    %1592 = vector.broadcast %1590 : vector<1x2xf32> to vector<15x2xf32>
    %1593 = arith.cmpf oeq, %1588, %1592 : vector<15x2xf32>
    %c15_i32 = arith.constant 15 : i32
    %1594 = vector.broadcast %c15_i32 : i32 to vector<15x2xi32>
    %1595 = arith.select %1593, %1591, %1594 : vector<15x2xi1>, vector<15x2xi32>
    %cst_679 = arith.constant dense<2147483647> : vector<2xi32>
    %1596 = vector.multi_reduction <minsi>, %1595, %cst_679 [0] : vector<15x2xi32> to vector<2xi32>
    %1597 = vector.shape_cast %1596 : vector<2xi32> to vector<1x2xi32>
    %1598 = tpu.iota {dimensions = array<i32: 0>} : vector<8x2xi32>
    %1599 = vector.broadcast %18 : vector<1x2xi32> to vector<8x2xi32>
    %1600 = arith.cmpi eq, %1598, %1599 : vector<8x2xi32>
    %c0_i32_680 = arith.constant 0 : i32
    %1601 = vector.shape_cast %1597 : vector<1x2xi32> to vector<1x2xi32>
    %1602 = vector.broadcast %1601 : vector<1x2xi32> to vector<8x2xi32>
    %1603 = vector.broadcast %c0_i32_680 : i32 to vector<8x2xi32>
    %1604 = arith.select %1600, %1602, %1603 : vector<8x2xi1>, vector<8x2xi32>
    %1605 = vector.broadcast %1597 : vector<1x2xi32> to vector<15x2xi32>
    %1606 = arith.cmpi eq, %1591, %1605 : vector<15x2xi32>
    %c0_i32_681 = arith.constant 0 : i32
    %1607 = vector.broadcast %c0_i32_681 : i32 to vector<15x2xi32>
    %1608 = arith.select %1606, %1578, %1607 : vector<15x2xi1>, vector<15x2xi32>
    %cst_682 = arith.constant dense<0> : vector<2xi32>
    %1609 = vector.multi_reduction <add>, %1608, %cst_682 [0] : vector<15x2xi32> to vector<2xi32>
    %1610 = vector.shape_cast %1609 : vector<2xi32> to vector<1x2xi32>
    %c6_i32_683 = arith.constant 6 : i32
    %1611 = vector.broadcast %c6_i32_683 : i32 to vector<1x2xi32>
    %1612 = arith.cmpi sgt, %18, %1611 : vector<1x2xi32>
    %1613 = arith.select %1612, %1610, %1597 : vector<1x2xi1>, vector<1x2xi32>
    %c6_i32_684 = arith.constant 6 : i32
    %1614 = vector.broadcast %c6_i32_684 : i32 to vector<8x2xi32>
    %1615 = arith.cmpi eq, %1598, %1614 : vector<8x2xi32>
    %1616 = vector.broadcast %1612 : vector<1x2xi1> to vector<8x2xi1>
    %1617 = arith.andi %1615, %1616 : vector<8x2xi1>
    %1618 = vector.shape_cast %1613 : vector<1x2xi32> to vector<1x2xi32>
    %1619 = vector.broadcast %1618 : vector<1x2xi32> to vector<8x2xi32>
    %1620 = arith.select %1617, %1619, %1604 : vector<8x2xi1>, vector<8x2xi32>
    %1621 = vector.broadcast %1613 : vector<1x2xi32> to vector<15x2xi32>
    %1622 = arith.cmpi eq, %1591, %1621 : vector<15x2xi32>
    %c0_i32_685 = arith.constant 0 : i32
    %1623 = vector.broadcast %c0_i32_685 : i32 to vector<15x2xi32>
    %1624 = arith.select %1622, %1419, %1623 : vector<15x2xi1>, vector<15x2xi32>
    %cst_686 = arith.constant dense<0> : vector<2xi32>
    %1625 = vector.multi_reduction <add>, %1624, %cst_686 [0] : vector<15x2xi32> to vector<2xi32>
    %1626 = vector.shape_cast %1625 : vector<2xi32> to vector<1x2xi32>
    %c5_i32_687 = arith.constant 5 : i32
    %1627 = vector.broadcast %c5_i32_687 : i32 to vector<1x2xi32>
    %1628 = arith.cmpi sgt, %18, %1627 : vector<1x2xi32>
    %1629 = arith.select %1628, %1626, %1613 : vector<1x2xi1>, vector<1x2xi32>
    %c5_i32_688 = arith.constant 5 : i32
    %1630 = vector.broadcast %c5_i32_688 : i32 to vector<8x2xi32>
    %1631 = arith.cmpi eq, %1598, %1630 : vector<8x2xi32>
    %1632 = vector.broadcast %1628 : vector<1x2xi1> to vector<8x2xi1>
    %1633 = arith.andi %1631, %1632 : vector<8x2xi1>
    %1634 = vector.shape_cast %1629 : vector<1x2xi32> to vector<1x2xi32>
    %1635 = vector.broadcast %1634 : vector<1x2xi32> to vector<8x2xi32>
    %1636 = arith.select %1633, %1635, %1620 : vector<8x2xi1>, vector<8x2xi32>
    %1637 = vector.broadcast %1629 : vector<1x2xi32> to vector<15x2xi32>
    %1638 = arith.cmpi eq, %1591, %1637 : vector<15x2xi32>
    %c0_i32_689 = arith.constant 0 : i32
    %1639 = vector.broadcast %c0_i32_689 : i32 to vector<15x2xi32>
    %1640 = arith.select %1638, %1260, %1639 : vector<15x2xi1>, vector<15x2xi32>
    %cst_690 = arith.constant dense<0> : vector<2xi32>
    %1641 = vector.multi_reduction <add>, %1640, %cst_690 [0] : vector<15x2xi32> to vector<2xi32>
    %1642 = vector.shape_cast %1641 : vector<2xi32> to vector<1x2xi32>
    %c4_i32_691 = arith.constant 4 : i32
    %1643 = vector.broadcast %c4_i32_691 : i32 to vector<1x2xi32>
    %1644 = arith.cmpi sgt, %18, %1643 : vector<1x2xi32>
    %1645 = arith.select %1644, %1642, %1629 : vector<1x2xi1>, vector<1x2xi32>
    %c4_i32_692 = arith.constant 4 : i32
    %1646 = vector.broadcast %c4_i32_692 : i32 to vector<8x2xi32>
    %1647 = arith.cmpi eq, %1598, %1646 : vector<8x2xi32>
    %1648 = vector.broadcast %1644 : vector<1x2xi1> to vector<8x2xi1>
    %1649 = arith.andi %1647, %1648 : vector<8x2xi1>
    %1650 = vector.shape_cast %1645 : vector<1x2xi32> to vector<1x2xi32>
    %1651 = vector.broadcast %1650 : vector<1x2xi32> to vector<8x2xi32>
    %1652 = arith.select %1649, %1651, %1636 : vector<8x2xi1>, vector<8x2xi32>
    %1653 = vector.broadcast %1645 : vector<1x2xi32> to vector<15x2xi32>
    %1654 = arith.cmpi eq, %1591, %1653 : vector<15x2xi32>
    %c0_i32_693 = arith.constant 0 : i32
    %1655 = vector.broadcast %c0_i32_693 : i32 to vector<15x2xi32>
    %1656 = arith.select %1654, %1101, %1655 : vector<15x2xi1>, vector<15x2xi32>
    %cst_694 = arith.constant dense<0> : vector<2xi32>
    %1657 = vector.multi_reduction <add>, %1656, %cst_694 [0] : vector<15x2xi32> to vector<2xi32>
    %1658 = vector.shape_cast %1657 : vector<2xi32> to vector<1x2xi32>
    %c3_i32_695 = arith.constant 3 : i32
    %1659 = vector.broadcast %c3_i32_695 : i32 to vector<1x2xi32>
    %1660 = arith.cmpi sgt, %18, %1659 : vector<1x2xi32>
    %1661 = arith.select %1660, %1658, %1645 : vector<1x2xi1>, vector<1x2xi32>
    %c3_i32_696 = arith.constant 3 : i32
    %1662 = vector.broadcast %c3_i32_696 : i32 to vector<8x2xi32>
    %1663 = arith.cmpi eq, %1598, %1662 : vector<8x2xi32>
    %1664 = vector.broadcast %1660 : vector<1x2xi1> to vector<8x2xi1>
    %1665 = arith.andi %1663, %1664 : vector<8x2xi1>
    %1666 = vector.shape_cast %1661 : vector<1x2xi32> to vector<1x2xi32>
    %1667 = vector.broadcast %1666 : vector<1x2xi32> to vector<8x2xi32>
    %1668 = arith.select %1665, %1667, %1652 : vector<8x2xi1>, vector<8x2xi32>
    %1669 = vector.broadcast %1661 : vector<1x2xi32> to vector<15x2xi32>
    %1670 = arith.cmpi eq, %1591, %1669 : vector<15x2xi32>
    %c0_i32_697 = arith.constant 0 : i32
    %1671 = vector.broadcast %c0_i32_697 : i32 to vector<15x2xi32>
    %1672 = arith.select %1670, %942, %1671 : vector<15x2xi1>, vector<15x2xi32>
    %cst_698 = arith.constant dense<0> : vector<2xi32>
    %1673 = vector.multi_reduction <add>, %1672, %cst_698 [0] : vector<15x2xi32> to vector<2xi32>
    %1674 = vector.shape_cast %1673 : vector<2xi32> to vector<1x2xi32>
    %c2_i32_699 = arith.constant 2 : i32
    %1675 = vector.broadcast %c2_i32_699 : i32 to vector<1x2xi32>
    %1676 = arith.cmpi sgt, %18, %1675 : vector<1x2xi32>
    %1677 = arith.select %1676, %1674, %1661 : vector<1x2xi1>, vector<1x2xi32>
    %c2_i32_700 = arith.constant 2 : i32
    %1678 = vector.broadcast %c2_i32_700 : i32 to vector<8x2xi32>
    %1679 = arith.cmpi eq, %1598, %1678 : vector<8x2xi32>
    %1680 = vector.broadcast %1676 : vector<1x2xi1> to vector<8x2xi1>
    %1681 = arith.andi %1679, %1680 : vector<8x2xi1>
    %1682 = vector.shape_cast %1677 : vector<1x2xi32> to vector<1x2xi32>
    %1683 = vector.broadcast %1682 : vector<1x2xi32> to vector<8x2xi32>
    %1684 = arith.select %1681, %1683, %1668 : vector<8x2xi1>, vector<8x2xi32>
    %1685 = vector.broadcast %1677 : vector<1x2xi32> to vector<15x2xi32>
    %1686 = arith.cmpi eq, %1591, %1685 : vector<15x2xi32>
    %c0_i32_701 = arith.constant 0 : i32
    %1687 = vector.broadcast %c0_i32_701 : i32 to vector<15x2xi32>
    %1688 = arith.select %1686, %783, %1687 : vector<15x2xi1>, vector<15x2xi32>
    %cst_702 = arith.constant dense<0> : vector<2xi32>
    %1689 = vector.multi_reduction <add>, %1688, %cst_702 [0] : vector<15x2xi32> to vector<2xi32>
    %1690 = vector.shape_cast %1689 : vector<2xi32> to vector<1x2xi32>
    %c1_i32_703 = arith.constant 1 : i32
    %1691 = vector.broadcast %c1_i32_703 : i32 to vector<1x2xi32>
    %1692 = arith.cmpi sgt, %18, %1691 : vector<1x2xi32>
    %1693 = arith.select %1692, %1690, %1677 : vector<1x2xi1>, vector<1x2xi32>
    %c1_i32_704 = arith.constant 1 : i32
    %1694 = vector.broadcast %c1_i32_704 : i32 to vector<8x2xi32>
    %1695 = arith.cmpi eq, %1598, %1694 : vector<8x2xi32>
    %1696 = vector.broadcast %1692 : vector<1x2xi1> to vector<8x2xi1>
    %1697 = arith.andi %1695, %1696 : vector<8x2xi1>
    %1698 = vector.shape_cast %1693 : vector<1x2xi32> to vector<1x2xi32>
    %1699 = vector.broadcast %1698 : vector<1x2xi32> to vector<8x2xi32>
    %1700 = arith.select %1697, %1699, %1684 : vector<8x2xi1>, vector<8x2xi32>
    %1701 = vector.broadcast %1693 : vector<1x2xi32> to vector<15x2xi32>
    %1702 = arith.cmpi eq, %1591, %1701 : vector<15x2xi32>
    %c0_i32_705 = arith.constant 0 : i32
    %1703 = vector.broadcast %c0_i32_705 : i32 to vector<15x2xi32>
    %1704 = arith.select %1702, %624, %1703 : vector<15x2xi1>, vector<15x2xi32>
    %cst_706 = arith.constant dense<0> : vector<2xi32>
    %1705 = vector.multi_reduction <add>, %1704, %cst_706 [0] : vector<15x2xi32> to vector<2xi32>
    %1706 = vector.shape_cast %1705 : vector<2xi32> to vector<1x2xi32>
    %c0_i32_707 = arith.constant 0 : i32
    %1707 = vector.broadcast %c0_i32_707 : i32 to vector<1x2xi32>
    %1708 = arith.cmpi sgt, %18, %1707 : vector<1x2xi32>
    %1709 = arith.select %1708, %1706, %1693 : vector<1x2xi1>, vector<1x2xi32>
    %c0_i32_708 = arith.constant 0 : i32
    %1710 = vector.broadcast %c0_i32_708 : i32 to vector<8x2xi32>
    %1711 = arith.cmpi eq, %1598, %1710 : vector<8x2xi32>
    %1712 = vector.broadcast %1708 : vector<1x2xi1> to vector<8x2xi1>
    %1713 = arith.andi %1711, %1712 : vector<8x2xi1>
    %1714 = vector.shape_cast %1709 : vector<1x2xi32> to vector<1x2xi32>
    %1715 = vector.broadcast %1714 : vector<1x2xi32> to vector<8x2xi32>
    %1716 = arith.select %1713, %1715, %1700 : vector<8x2xi1>, vector<8x2xi32>
    %c0_709 = arith.constant 0 : index
    %c0_710 = arith.constant 0 : index
    %c0_711 = arith.constant 0 : index
    %1717 = vector.load %arg25[%c0_709, %c0_710, %c0_711] : memref<1x8x2xi32, #tpu.memory_space<vmem>>, vector<1x8x2xi32>
    %1718 = vector.shape_cast %1717 : vector<1x8x2xi32> to vector<8x2xi32>
    %1719 = vector.shape_cast %1716 : vector<8x2xi32> to vector<1x8x2xi32>
    tpu.vector_store %arg25[%c0_709, %c0_710, %c0_711], %1719 {strides = array<i32>} : memref<1x8x2xi32, #tpu.memory_space<vmem>>, vector<1x8x2xi32>,
    return
  }
  func.func @transform_0(%arg0: i32, %arg1: memref<2xi32, #tpu.memory_space<smem>>) -> (i32, i32, i32) {
    %c0_i32 = arith.constant 0 : i32
    %c0_i32_0 = arith.constant 0 : i32
    %c0_i32_1 = arith.constant 0 : i32
    return %arg0, %c0_i32, %c0_i32_0 : i32, i32, i32
  }
  func.func @transform_1(%arg0: i32, %arg1: memref<2xi32, #tpu.memory_space<smem>>) -> (i32, i32) {
    %c0_i32 = arith.constant 0 : i32
    %c0_i32_0 = arith.constant 0 : i32
    %c0_i32_1 = arith.constant 0 : i32
    return %c0_i32, %c0_i32_0 : i32, i32
  }
  func.func @transform_2(%arg0: i32, %arg1: memref<2xi32, #tpu.memory_space<smem>>) -> (i32, i32) {
    %c0_i32 = arith.constant 0 : i32
    %c0_i32_0 = arith.constant 0 : i32
    %c0_i32_1 = arith.constant 0 : i32
    return %c0_i32, %c0_i32_0 : i32, i32
  }
  func.func @transform_3(%arg0: i32, %arg1: memref<2xi32, #tpu.memory_space<smem>>) -> (i32, i32, i32, i32) {
    %c0_i32 = arith.constant 0 : i32
    %c0_i32_0 = arith.constant 0 : i32
    %c0_i32_1 = arith.constant 0 : i32
    %c0_i32_2 = arith.constant 0 : i32
    %c0_i32_3 = arith.constant 0 : i32
    return %c0_i32, %c0_i32_0, %c0_i32_1, %c0_i32_2 : i32, i32, i32, i32
  }
  func.func @transform_4(%arg0: i32, %arg1: memref<2xi32, #tpu.memory_space<smem>>) -> (i32, i32, i32, i32) {
    %c0_i32 = arith.constant 0 : i32
    %c0_i32_0 = arith.constant 0 : i32
    %c0_i32_1 = arith.constant 0 : i32
    %c0_i32_2 = arith.constant 0 : i32
    %c0_i32_3 = arith.constant 0 : i32
    return %c0_i32, %c0_i32_0, %c0_i32_1, %c0_i32_2 : i32, i32, i32, i32
  }
  func.func @transform_5(%arg0: i32, %arg1: memref<2xi32, #tpu.memory_space<smem>>) -> (i32, i32, i32, i32) {
    %c0_i32 = arith.constant 0 : i32
    %c0_i32_0 = arith.constant 0 : i32
    %c0_i32_1 = arith.constant 0 : i32
    %c0_i32_2 = arith.constant 0 : i32
    %c0_i32_3 = arith.constant 0 : i32
    return %c0_i32, %c0_i32_0, %c0_i32_1, %c0_i32_2 : i32, i32, i32, i32
  }
  func.func @transform_6(%arg0: i32, %arg1: memref<2xi32, #tpu.memory_space<smem>>) -> (i32, i32, i32, i32) {
    %c0_i32 = arith.constant 0 : i32
    %c0_i32_0 = arith.constant 0 : i32
    %c0_i32_1 = arith.constant 0 : i32
    %c0_i32_2 = arith.constant 0 : i32
    %c0_i32_3 = arith.constant 0 : i32
    return %c0_i32, %c0_i32_0, %c0_i32_1, %c0_i32_2 : i32, i32, i32, i32
  }
  func.func @transform_7(%arg0: i32, %arg1: memref<2xi32, #tpu.memory_space<smem>>) -> (i32, i32, i32) {
    %c0_i32 = arith.constant 0 : i32
    %c0_i32_0 = arith.constant 0 : i32
    %c0_i32_1 = arith.constant 0 : i32
    %c0_i32_2 = arith.constant 0 : i32
    return %c0_i32, %c0_i32_0, %c0_i32_1 : i32, i32, i32
  }
  func.func @transform_8(%arg0: i32, %arg1: memref<2xi32, #tpu.memory_space<smem>>) -> (i32, i32, i32) {
    %c0_i32 = arith.constant 0 : i32
    %c0_i32_0 = arith.constant 0 : i32
    %c0_i32_1 = arith.constant 0 : i32
    %c0_i32_2 = arith.constant 0 : i32
    return %c0_i32, %c0_i32_0, %c0_i32_1 : i32, i32, i32
  }
  func.func @transform_9(%arg0: i32, %arg1: memref<2xi32, #tpu.memory_space<smem>>) -> (i32, i32, i32) {
    %c0_i32 = arith.constant 0 : i32
    %c0_i32_0 = arith.constant 0 : i32
    %c0_i32_1 = arith.constant 0 : i32
    %c0_i32_2 = arith.constant 0 : i32
    return %c0_i32, %c0_i32_0, %c0_i32_1 : i32, i32, i32
  }
  func.func @transform_10(%arg0: i32, %arg1: memref<2xi32, #tpu.memory_space<smem>>) -> (i32, i32, i32) {
    %c0_i32 = arith.constant 0 : i32
    %c0_i32_0 = arith.constant 0 : i32
    %c0_i32_1 = arith.constant 0 : i32
    %c0_i32_2 = arith.constant 0 : i32
    return %c0_i32, %c0_i32_0, %c0_i32_1 : i32, i32, i32
  }
  func.func @transform_11(%arg0: i32, %arg1: memref<2xi32, #tpu.memory_space<smem>>) -> (i32, i32, i32) {
    %c0_i32 = arith.constant 0 : i32
    %c0_i32_0 = arith.constant 0 : i32
    %c0_i32_1 = arith.constant 0 : i32
    %c0_i32_2 = arith.constant 0 : i32
    return %c0_i32, %c0_i32_0, %c0_i32_1 : i32, i32, i32
  }
  func.func @transform_12(%arg0: i32, %arg1: memref<2xi32, #tpu.memory_space<smem>>) -> (i32, i32, i32) {
    %c0_i32 = arith.constant 0 : i32
    %c0_i32_0 = arith.constant 0 : i32
    %c0_i32_1 = arith.constant 0 : i32
    %c0_i32_2 = arith.constant 0 : i32
    return %c0_i32, %c0_i32_0, %c0_i32_1 : i32, i32, i32
  }
  func.func @transform_13(%arg0: i32, %arg1: memref<2xi32, #tpu.memory_space<smem>>) -> (i32, i32, i32) {
    %c0_i32 = arith.constant 0 : i32
    %c0_i32_0 = arith.constant 0 : i32
    %c0_i32_1 = arith.constant 0 : i32
    %c0_i32_2 = arith.constant 0 : i32
    return %c0_i32, %c0_i32_0, %c0_i32_1 : i32, i32, i32
  }
  func.func @transform_14(%arg0: i32, %arg1: memref<2xi32, #tpu.memory_space<smem>>) -> (i32, i32, i32) {
    %c0_i32 = arith.constant 0 : i32
    %c0_i32_0 = arith.constant 0 : i32
    %c0_i32_1 = arith.constant 0 : i32
    %c0_i32_2 = arith.constant 0 : i32
    return %c0_i32, %c0_i32_0, %c0_i32_1 : i32, i32, i32
  }
  func.func @transform_15(%arg0: i32, %arg1: memref<2xi32, #tpu.memory_space<smem>>) -> (i32, i32, i32) {
    %c0_i32 = arith.constant 0 : i32
    %c0_i32_0 = arith.constant 0 : i32
    %c0_i32_1 = arith.constant 0 : i32
    %c0_i32_2 = arith.constant 0 : i32
    return %c0_i32, %c0_i32_0, %c0_i32_1 : i32, i32, i32
  }
  func.func @transform_16(%arg0: i32, %arg1: memref<2xi32, #tpu.memory_space<smem>>) -> (i32, i32) {
    %c0_i32 = arith.constant 0 : i32
    %c0_i32_0 = arith.constant 0 : i32
    %c0_i32_1 = arith.constant 0 : i32
    return %c0_i32, %c0_i32_0 : i32, i32
  }
  func.func @transform_17(%arg0: i32, %arg1: memref<2xi32, #tpu.memory_space<smem>>) -> (i32, i32) {
    %c0_i32 = arith.constant 0 : i32
    %c0_i32_0 = arith.constant 0 : i32
    %c0_i32_1 = arith.constant 0 : i32
    return %c0_i32, %c0_i32_0 : i32, i32
  }
  func.func @transform_18(%arg0: i32, %arg1: memref<2xi32, #tpu.memory_space<smem>>) -> (i32, i32) {
    %c0_i32 = arith.constant 0 : i32
    %c0_i32_0 = arith.constant 0 : i32
    %c0_i32_1 = arith.constant 0 : i32
    return %c0_i32, %c0_i32_0 : i32, i32
  }
  func.func @transform_19(%arg0: i32, %arg1: memref<2xi32, #tpu.memory_space<smem>>) -> (i32, i32) {
    %c0_i32 = arith.constant 0 : i32
    %c0_i32_0 = arith.constant 0 : i32
    %c0_i32_1 = arith.constant 0 : i32
    return %c0_i32, %c0_i32_0 : i32, i32
  }
  func.func @transform_20(%arg0: i32, %arg1: memref<2xi32, #tpu.memory_space<smem>>) -> (i32, i32, i32) {
    %c0_i32 = arith.constant 0 : i32
    %c0_i32_0 = arith.constant 0 : i32
    %c0_i32_1 = arith.constant 0 : i32
    %c0_i32_2 = arith.constant 0 : i32
    return %c0_i32, %c0_i32_0, %c0_i32_1 : i32, i32, i32
  }
  func.func @transform_21(%arg0: i32, %arg1: memref<2xi32, #tpu.memory_space<smem>>) -> (i32, i32) {
    %c0_i32 = arith.constant 0 : i32
    %c0_i32_0 = arith.constant 0 : i32
    %c0_i32_1 = arith.constant 0 : i32
    return %c0_i32, %c0_i32_0 : i32, i32
  }
  func.func @transform_22(%arg0: i32, %arg1: memref<2xi32, #tpu.memory_space<smem>>) -> (i32, i32) {
    %c0_i32 = arith.constant 0 : i32
    %c0_i32_0 = arith.constant 0 : i32
    %c0_i32_1 = arith.constant 0 : i32
    return %c0_i32, %c0_i32_0 : i32, i32
  }
  func.func @transform_23(%arg0: i32, %arg1: memref<2xi32, #tpu.memory_space<smem>>) -> (i32, i32, i32) {
    %c0_i32 = arith.constant 0 : i32
    %c0_i32_0 = arith.constant 0 : i32
    %c0_i32_1 = arith.constant 0 : i32
    return %arg0, %c0_i32, %c0_i32_0 : i32, i32, i32
  }
  func.func @transform_24(%arg0: i32, %arg1: memref<2xi32, #tpu.memory_space<smem>>) -> (i32, i32, i32) {
    %c0_i32 = arith.constant 0 : i32
    %c0_i32_0 = arith.constant 0 : i32
    %c0_i32_1 = arith.constant 0 : i32
    return %arg0, %c0_i32, %c0_i32_0 : i32, i32, i32
  }
}

</mosaic_0001>

<bundles_post_ra>
// kernel: ner_forward.1
= control target key start
LH: loop header
LB: loop body
LE: loop exit
PB: predicated region body
PF: predicated region fallthrough
CT: control target
= control target key end

     0   :  { %s6627_s0 = inlined_call_operand.vmem [shape: s32[2], index: 0, kind: input, shape index: {}]   ;;  %s6628_s1 = inlined_call_operand.vmem [shape: f32[1,16,32], index: 1, kind: input, shape index: {}]   ;;  %s6629_s2 = inlined_call_operand.vmem [shape: f32[1,32], index: 2, kind: input, shape index: {}]   ;;  %s6630_s3 = inlined_call_operand.vmem [shape: f32[1,32], index: 3, kind: input, shape index: {}]   ;;  %s6631_s4 = inlined_call_operand.vmem [shape: bf16[2,2,32,16], index: 4, kind: input, shape index: {}]   ;;  %s6632_s5 = inlined_call_operand.vmem [shape: bf16[2,2,32,16], index: 5, kind: input, shape index: {}]   ;;  %s6633_s6 = inlined_call_operand.vmem [shape: bf16[2,2,32,16], index: 6, kind: input, shape index: {}]   ;;  %s6634_s7 = inlined_call_operand.vmem [shape: bf16[2,2,16,32], index: 7, kind: input, shape index: {}]   ;;  %s6635_s8 = inlined_call_operand.vmem [shape: f32[2,1,32], index: 8, kind: input, shape index: {}]   ;;  %s6636_s9 = inlined_call_operand.vmem [shape: f32[2,1,32], index: 9, kind: input, shape index: {}]   ;;  %s6637_s10 = inlined_call_operand.vmem [shape: f32[2,1,32], index: 10, kind: input, shape index: {}]   ;;  %s6638_s11 = inlined_call_operand.vmem [shape: bf16[2,32,64], index: 11, kind: input, shape index: {}]   ;;  %s6639_s12 = inlined_call_operand.vmem [shape: f32[2,1,64], index: 12, kind: input, shape index: {}]   ;;  %s6640_s13 = inlined_call_operand.vmem [shape: bf16[2,64,32], index: 13, kind: input, shape index: {}]   ;;  %s6641_s14 = inlined_call_operand.vmem [shape: f32[2,1,32], index: 14, kind: input, shape index: {}]   ;;  %s6642_s15 = inlined_call_operand.vmem [shape: f32[2,1,32], index: 15, kind: input, shape index: {}]   ;;  %s6643_s16 = inlined_call_operand.vmem [shape: f32[2,1,32], index: 16, kind: input, shape index: {}]   ;;  %s6644_s17 = inlined_call_operand.vmem [shape: bf16[32,128], index: 17, kind: input, shape index: {}]   ;;  %s6645_s18 = inlined_call_operand.vmem [shape: f32[1,128], index: 18, kind: input, shape index: {}]   ;;  %s6646_s19 = inlined_call_operand.vmem [shape: bf16[15,32], index: 19, kind: input, shape index: {}]   ;;  %s6647_s20 = inlined_call_operand.vmem [shape: f32[15,1], index: 20, kind: input, shape index: {}]   ;;  %s6648_s21 = inlined_call_operand.vmem [shape: f32[15,15,1], index: 21, kind: input, shape index: {}]   ;;  %s6649_s22 = inlined_call_operand.vmem [shape: f32[15,1], index: 22, kind: input, shape index: {}]   ;;  %s6650_s23 = inlined_call_operand.vmem [shape: f32[15,1], index: 23, kind: input, shape index: {}]   ;;  %s6651_s24 = inlined_call_operand.vmem [shape: s32[1,8,2], index: 24, kind: output, shape index: {0}]   ;;  %s6652_s25 = inlined_call_operand.vmem [shape: f32[1,16,128], index: 25, kind: output, shape index: {1}]  }
   0x1   :  { %6752 = sst [smem:[#allocation41_spill]] %s6627_s0 }
   0x2   :  { %6753 = sst [smem:[#allocation42_spill]] %s6628_s1 }
   0x3   :  { %6754 = sst [smem:[#allocation43_spill]] %s6629_s2 }
   0x4   :  { %6755 = sst [smem:[#allocation44_spill]] %s6630_s3 }
   0x5   :  { %6756 = sst [smem:[#allocation45_spill]] %s6631_s4 }
   0x6   :  { %6757 = sst [smem:[#allocation46_spill]] %s6632_s5 }
   0x7   :  { %6758 = sst [smem:[#allocation47_spill]] %s6633_s6 }
   0x8   :  { %6759 = sst [smem:[#allocation48_spill]] %s6634_s7 }
   0x9   :  { %6760 = sst [smem:[#allocation49_spill]] %s6635_s8 }
   0xa   :  { %6761 = sst [smem:[#allocation50_spill]] %s6636_s9 }
   0xb   :  { %6762 = sst [smem:[#allocation51_spill]] %s6645_s18 }
   0xc   :  { %s6763_s6 = sld [smem:[#allocation41_spill]] }
  0x12   :  { %s31_s18 = sshll.u32 %s6763_s6, 4  ;;  %s32_s18 = int_to_ptr.vmem [resolvable:$true] %s31_s18 }
  0x13   :  { %s4658_s30 = scalar_lea.vmem %s32_s18, 16  ;;  %p4663_p1 = scmp.lt.s32.totalorder %s32_s18, %s32_s18 }
  0x14   :  { %p4659_p0 = scmp.ne.s32.totalorder %s32_s18, %s4658_s30  ;;  %p4664_p2 = scmp.lt.s32.totalorder %s4658_s30, %s4658_s30 }
  0x16   :  { %p4665_p3 = por %p4664_p2, %p4663_p1 }
  0x18   :  { %p4666_p4 = pnand %p4665_p3, %p4659_p0 }
  0x1a   :  { %4669 = shalt.err (!%p4666_p4)  }
  0x1b   :  { %s4672_s7 = smov [#allocation3]  }
  0x1c   :  { %34 = dma.vmem_to_smem %s32_s18, 16, %s4672_s7, [#allocation2] }
  0x1d   :  { %4670 = dma.done.wait [#allocation2], 16 }
  0x1e   :  { %4671 = vsyncadd [#allocation2], 4294967280 }
  0x1f   :  { %36 = sfence }
  0x20   :  { %s6764_s1 = sld [smem:[#allocation42_spill]]  ;;  %vm165_vm0 = vcmask 261120   ;;  %v4673_v10 = vmov 0.0   ;;  %vm4674_vm1 = vmmov 0   ;;  %v85_v44 = vlaneseq }
  0x21   :  { %s6765_s28 = sld [smem:[#allocation45_spill]]  ;;  %4318 = vmatprep.subr.bf16.mxu0 %v4673_v10  ;;  %4326 = vmatprep.subr.bf16.mxu1 %v4673_v10  ;;  %v6660_v45 = vmov 0   ;;  %vm393_vm4 = vcmask 130048  }
  0x22   :  { %s6766_s0 = sld [smem:[#allocation46_spill]]  ;;  %4322 = vmatprep.mubr.msk.bf16.mxu0 %vm4674_vm1, %v4673_v10  ;;  %4330 = vmatprep.mubr.msk.bf16.mxu1 %vm4674_vm1, %v4673_v10  ;;  %v4891_v46 = vand.u32 127, %v85_v44 }
  0x23   :  { %s6767_s26 = sld [smem:[#allocation43_spill]]  ;;  %4554 = vset.pattern.permute.xlu1 %v6660_v45  ;;  %4553 = vset.pattern.permute.xlu0 %v6660_v45 }
  0x24   :  { %s6768_s27 = sld [smem:[#allocation44_spill]]  ;;  %vm87_vm2 = vcmp.eq.s32.totalorder %v4891_v46, 0  ;;  %vm91_vm3 = vcmp.eq.s32.totalorder %v4891_v46, 1  ;;  %vm100_vm5 = vcmp.ge.s32.totalorder %v4891_v46, 2  ;;  %vm106_vm6 = vcmp.ge.s32.totalorder %v4891_v46, 4 }
  0x25   :  { %s6769_s9 = sld [smem:[#allocation47_spill]]  ;;  %vm112_vm7 = vcmp.ge.s32.totalorder %v4891_v46, 6  ;;  %vm118_vm8 = vcmp.ge.s32.totalorder %v4891_v46, 8  ;;  %vm124_vm9 = vcmp.ge.s32.totalorder %v4891_v46, 10  ;;  %vm130_vm10 = vcmp.ge.s32.totalorder %v4891_v46, 12 }
  0x26   :  { %v161_v0 = vld [vmem:[%s6764_s1] sm:$0xff]  ;;  %v162_v1 = vld [vmem:[%s6764_s1 + $0x8] sm:$0xff]  ;;  %s4884_s2 = sld [smem:[#allocation3]]  ;;  %vm136_vm11 = vcmp.ge.s32.totalorder %v4891_v46, 14  ;;  %s4684_s1 = smov 114  }
  0x27   :  { %v166_v2 = vsel %vm165_vm0, %v161_v0, 0.0  ;;  %v172_v3 = vmul.f32 %v161_v0, %v161_v0  ;;  %v169_v4 = vsel %vm165_vm0, %v162_v1, 0.0  ;;  %v173_v5 = vmul.f32 %v162_v1, %v162_v1  ;;  %v4555_v8 = vld [vmem:[%s6765_s28 + $0x8] sm:$0xff]   ;;  %v4557_v11 = vld [vmem:[%s6765_s28] sm:$0xff]   ;;  %s4886_s6 = sld [smem:[#allocation3 + $0x1]] }
  0x28   :  { %167 = vadd.xlane.f32.xlu0 %v166_v2  ;;  %v4556_v9 = vld [vmem:[%s6766_s0 + $0x8] sm:$0xff]   ;;  %4319 = vmatpush3.bf16.msra.mxu0 %v4555_v8  ;;  %v4558_v12 = vld [vmem:[%s6766_s0] sm:$0xff]   ;;  %v4561_v2 = vld [vmem:[%s6765_s28 + $0x18] sm:$0xff]   ;;  %s6772_s7 = sld [smem:[#allocation48_spill]] }
  0x29   :  { %v174_v6 = vsel %vm165_vm0, %v172_v3, 0.0  ;;  %v177_v7 = vsel %vm165_vm0, %v173_v5, 0.0  ;;  %4327 = vmatpush3.bf16.msra.mxu1 %v4556_v9  ;;  %4320 = vmatprep.subr.bf16.mxu0 %v4673_v10  ;;  %v4058_v32 = vld [vmem:[%s6767_s26] ss:$0 sm:$0xff]  ;;  %v101_v9 = vsel %vm100_vm5, 1, %v6660_v45  ;;  %s6774_s30 = sld [smem:[#allocation50_spill]] }
  0x2a   :  { %175 = vadd.xlane.f32.xlu1 %v174_v6  ;;  %4328 = vmatprep.subr.bf16.mxu1 %v4673_v10  ;;  %v4059_v37 = vld [vmem:[%s6768_s27] ss:$0 sm:$0xff]  ;;  %v4562_v6 = vld [vmem:[%s6765_s28 + $0x10] sm:$0xff]   ;;  %s6773_s27 = sld [smem:[#allocation49_spill]] }
  0x2b   :  { %v4559_v41 = vld [vmem:[%s6769_s9 + $0x8] sm:$0xff]   ;;  %v4560_v43 = vld [vmem:[%s6769_s9] sm:$0xff]   ;;  %v4564_v8 = vld [vmem:[%s6769_s9 + $0x10] sm:$0xff]  }
  0x2c   :  { %170 = vadd.xlane.f32.xlu0 %v169_v4  ;;  %4321 = vmatpush3.bf16.msra.mxu0 %v4557_v11  ;;  %v89_v47 = vstv %s4884_s2  ;;  %v107_v11 = vsel %vm106_vm6, 2, %v101_v9 }
  0x2d   :  { %4329 = vmatpush3.bf16.msra.mxu1 %v4558_v12  ;;  %4334 = vmatprep.subr.bf16.mxu0 %v4673_v10  ;;  %v90_v48 = vsel %vm87_vm2, %v89_v47, 0  ;;  %v94_v49 = vstv %s4886_s6  ;;  %v113_v12 = vsel %vm112_vm7, 3, %v107_v11  ;;  %s4681_s6 = smov 120  }
  0x2e   :  { %178 = vadd.xlane.f32.xlu1 %v177_v7  ;;  %4342 = vmatprep.subr.bf16.mxu1 %v4673_v10  ;;  %v4901_v50 = vsel %vm91_vm3, %v94_v49, %v90_v48  ;;  %v4563_v7 = vld [vmem:[%s6769_s9 + $0x18] sm:$0xff]  }
  0xb1   :  { %v168_v13 = vpop.xlane.xlu0 %167 }
  0xb2   :  { %v180_v14 = vmul.f32 0.03125, %v168_v13  ;;  %v119_v13 = vsel %vm118_vm8, 4, %v113_v12 }
  0xb3   :  { %v176_v15 = vpop.xlane.xlu1 %175 }
  0xb4   :  { %v184_v16 = vmul.f32 %v180_v14, %v180_v14  ;;  %v182_v17 = vmul.f32 0.03125, %v176_v15  ;;  %v190_v29 = vsub.f32 %v161_v0, %v180_v14  ;;  %v125_v14 = vsel %vm124_vm9, 5, %v119_v13 }
  0xb5   :  { %v171_v18 = vpop.xlane.xlu0 %170  ;;  %v4941_v15 = vshrl.u32 %v85_v44, 7 }
  0xb6   :  { %v186_v19 = vsub.f32 %v182_v17, %v184_v16  ;;  %v181_v20 = vmul.f32 0.03125, %v171_v18  ;;  %v131_v16 = vsel %vm130_vm10, 6, %v125_v14 }
  0xb7   :  { %v179_v21 = vpop.xlane.xlu1 %178  ;;  %6770 = vst [vmem:[#allocation5_spill] sm:$0xff] %v4941_v15  ;;  %vm102_vm12 = vcmp.ge.s32.totalorder %v4941_v15, 2  ;;  %v137_v17 = vsel %vm136_vm11, 7, %v131_v16  ;;  %v4946_v18 = vadd.s32 8, %v4941_v15  ;;  %vm108_vm13 = vcmp.ge.s32.totalorder %v4941_v15, 4  ;;  %v4565_v16 = vld [vmem:[%s6766_s0 + $0x18] sm:$0xff]  }
  0xb8   :  { %v188_v22 = vmax.f32 %v186_v19, 0.0  ;;  %v185_v23 = vmul.f32 %v181_v20, %v181_v20  ;;  %v183_v24 = vmul.f32 0.03125, %v179_v21  ;;  %v191_v33 = vsub.f32 %v162_v1, %v181_v20 }
  0xb9   :  { %6771 = vst [vmem:[#allocation6_spill] sm:$0xff] %v4946_v18  ;;  %v104_v19 = vsel %vm102_vm12, 1, %v6660_v45  ;;  %v142_v20 = vmul.u32 2, %v137_v17  ;;  %vm127_vm14 = vcmp.ge.s32.totalorder %v4946_v18, 10  ;;  %vm114_vm15 = vcmp.ge.s32.totalorder %v4941_v15, 6 }
  0xba   :  { %v192_v25 = vadd.f32 1e-12, %v188_v22  ;;  %v187_v26 = vsub.f32 %v183_v24, %v185_v23  ;;  %v110_v21 = vsel %vm108_vm13, 2, %v104_v19  ;;  %v4676_v23 = vmov 4   ;;  %v4566_v19 = vld [vmem:[%s6766_s0 + $0x10] sm:$0xff]  }
  0xbb   :  { %v143_v22 = vsub.s32 %v4891_v46, %v142_v20  ;;  %v129_v24 = vsel %vm127_vm14, 5, %v4676_v23  ;;  %vm133_vm2 = vcmp.ge.s32.totalorder %v4946_v18, 12  ;;  %vm139_vm3 = vcmp.ge.s32.totalorder %v4946_v18, 14 }
  0xbc   :  { %4598 = vrsqrt.f32 %v192_v25  ;;  %v189_v27 = vmax.f32 %v187_v26, 0.0  ;;  %v116_v25 = vsel %vm114_vm15, 3, %v110_v21  ;;  %v135_v26 = vsel %vm133_vm2, 6, %v129_v24 }
  0xbd   :  { %vm148_vm5 = vcmp.eq.s32.totalorder %v143_v22, 0  ;;  %vm150_vm6 = vcmp.eq.s32.totalorder %v143_v22, 1  ;;  %vm1096_vm12 = vcmask 523264  }
  0xbe   :  { %v193_v28 = vadd.f32 1e-12, %v189_v27  ;;  %v144_v27 = vmul.u32 2, %v116_v25 }
  0xc0   :  { %4600 = vrsqrt.f32 %v193_v28  ;;  %v141_v28 = vsel %vm139_vm3, 7, %v135_v26 }
  0xc9   :  { %v4599_v30 = vpop.eup %4598 }
  0xca   :  { %v196_v31 = vmul.f32 %v4599_v30, %v190_v29  ;;  %v149_v29 = vsel %vm148_vm5, %v89_v47, 0  ;;  %v146_v30 = vsub.s32 %v4941_v15, %v144_v27 }
  0xcc   :  { %v204_v35 = vmul.f32 %v4058_v32, %v196_v31  ;;  %v145_v31 = vmul.u32 2, %v141_v28  ;;  %vm152_vm7 = vcmp.eq.s32.totalorder %v146_v30, %v143_v22 }
  0xcd   :  { %v4601_v34 = vpop.eup %4600 }
  0xce   :  { %v197_v36 = vmul.f32 %v4601_v34, %v191_v33  ;;  %v4856_v39 = vadd.f32 %v4059_v37, %v204_v35  ;;  %v147_v33 = vsub.s32 %v4946_v18, %v145_v31  ;;  %v4677_v34 = vmov -1e+09  }
  0xd0   :  { %v205_v38 = vmul.f32 %v4058_v32, %v197_v36  ;;  %v151_v32 = vsel %vm150_vm6, %v94_v49, %v149_v29  ;;  %vm153_vm10 = vcmp.eq.s32.totalorder %v147_v33, %v143_v22 }
  0xd1   :  { %vm154_vm8 = vcmp.lt.s32.totalorder %v137_v17, %v151_v32 }
  0xd2   :  { %v4858_v40 = vadd.f32 %v4059_v37, %v205_v38  ;;  %vm157_vm9 = vmand %vm152_vm7, %vm154_vm8 }
  0xd3   :  { %v4961_v35 = vsel %vm157_vm9, 0.0, %v4677_v34  ;;  %vm158_vm11 = vmand %vm153_vm10, %vm154_vm8 }
  0xd4   :  { %v4865_v42 = vpack.c.bf16 %v4858_v40, %v4856_v39 }
  0xd6   :  { %4323 = vmatmul.mubr.msk.bf16.vlgmr.msra.gmra.mxu0 %vm165_vm0, %v4865_v42  ;;  %4331 = vmatmul.mubr.msk.bf16.vlgmr.msra.gmra.mxu1 %vm165_vm0, %v4865_v42 }
  0xd7   :  { %4335 = vmatpush3.bf16.msra.mxu0 %v4559_v41  ;;  %4338 = vmatprep.mubr.msk.bf16.mxu0 %vm4674_vm1, %v4673_v10  ;;  %v4964_v41 = vsel %vm158_vm11, 0.0, %v4677_v34 }
  0xd8   :  { %4336 = vmatprep.subr.bf16.mxu0 %v4673_v10  ;;  %4344 = vmatprep.mubr.msk.bf16.mxu1 %vm4674_vm1, %v4673_v10 }
  0xdb   :  { %4337 = vmatpush3.bf16.msra.mxu0 %v4560_v43 }
  0xdc   :  { %4348 = vmatprep.subr.bf16.mxu0 %v4673_v10 }
  0xde   :  { %4339 = vmatmul.mubr.msk.bf16.vlgmr.msra.gmra.mxu0 %vm165_vm0, %v4865_v42 }
  0xdf   :  { %4350 = vmatprep.mubr.msk.bf16.mxu0 %vm4674_vm1, %v4673_v10 }
 0x196   :  { %v268_v51 = vpop.f32.mrf.mxu0  ;;  %v325_v52 = vpop.f32.mrf.mxu1 }
 0x197   :  { %v389_v0 = vmul.f32 0.25, %v268_v51 }
 0x198   :  { %v4324_v53 = vpop.f32.mrf.mxu0  ;;  %v4332_v54 = vpop.f32.mrf.mxu1 }
 0x19a   :  { %v271_v55 = vpop.f32.mrf.mxu0  ;;  %v328_v56 = vpop.f32.mrf.mxu1 }
 0x19b   :  { %v392_v57 = vpack.c.bf16 %v328_v56, %v325_v52  ;;  %v390_v62 = vmul.f32 0.25, %v271_v55 }
 0x19c   :  { %v4325_v58 = vpop.f32.mrf.mxu0  ;;  %v4333_v59 = vpop.f32.mrf.mxu1 }
 0x19d   :  { %v398_v60 = vsel %vm393_vm4, %v392_v57, 0  ;;  %v391_v3 = vpack.c.bf16 %v390_v62, %v389_v0 }
 0x19e   :  { %v382_v61 = vpop.f32.mrf.mxu0  ;;  %4343 = vmatpush3.bf16.xpose.msra.mxu1 %v398_v60 }
 0x19f   :  { %4354 = vmatprep.subr.bf16.mxu1 %v4673_v10 }
 0x1a0   :  { %v4340_v63 = vpop.f32.mrf.mxu0 }
 0x1a2   :  { %v385_v1 = vpop.f32.mrf.mxu0 }
 0x1a3   :  { %v464_v4 = vpack.c.bf16 %v385_v1, %v382_v61 }
 0x1a4   :  { %v4341_v5 = vpop.f32.mrf.mxu0 }
 0x1a5   :  { %4345 = vmatmul.mubr.msk.bf16.vlgmr.msra.gmra.mxu1 %vm393_vm4, %v391_v3  ;;  %4349 = vmatpush3.bf16.msra.mxu0 %v464_v4 }
 0x1a6   :  { %4355 = vmatpush3.bf16.msra.mxu1 %v4561_v2  ;;  %4358 = vmatprep.mubr.msk.bf16.mxu1 %vm4674_vm1, %v4673_v10 }
 0x1a7   :  { %4356 = vmatprep.subr.bf16.mxu1 %v4673_v10  ;;  %4362 = vmatprep.subr.bf16.mxu0 %v4673_v10 }
 0x1aa   :  { %4357 = vmatpush3.bf16.msra.mxu1 %v4562_v6 }
 0x1ab   :  { %4370 = vmatprep.subr.bf16.mxu1 %v4673_v10 }
 0x1ad   :  { %4359 = vmatmul.mubr.msk.bf16.vlgmr.msra.gmra.mxu1 %vm165_vm0, %v4865_v42 }
 0x1ae   :  { %4371 = vmatpush3.bf16.msra.mxu1 %v4563_v7  ;;  %4374 = vmatprep.mubr.msk.bf16.mxu1 %vm4674_vm1, %v4673_v10 }
 0x1af   :  { %4372 = vmatprep.subr.bf16.mxu1 %v4673_v10 }
 0x1b2   :  { %4373 = vmatpush3.bf16.msra.mxu1 %v4564_v8 }
 0x1b3   :  { %4384 = vmatprep.subr.bf16.mxu1 %v4673_v10 }
 0x1b5   :  { %4375 = vmatmul.mubr.msk.bf16.vlgmr.msra.gmra.mxu1 %vm165_vm0, %v4865_v42 }
 0x1b6   :  { %4386 = vmatprep.mubr.msk.bf16.mxu1 %vm4674_vm1, %v4673_v10 }
 0x265   :  { %v434_v36 = vpop.f32.mrf.mxu1 }
 0x266   :  { %v435_v37 = vadd.f32 %v434_v36, %v4961_v35 }
 0x267   :  { %v4346_v38 = vpop.f32.mrf.mxu1 }
 0x268   :  { %v441_v43 = vsel %vm393_vm4, %v435_v37, -inf }
 0x269   :  { %v437_v44 = vpop.f32.mrf.mxu1  ;;  %442 = vmax.xlane.f32.xlu0 %v441_v43 }
 0x26a   :  { %v438_v46 = vadd.f32 %v437_v44, %v4964_v41 }
 0x26b   :  { %v4347_v47 = vpop.f32.mrf.mxu1 }
 0x26c   :  { %v444_v48 = vsel %vm393_vm4, %v438_v46, -inf }
 0x26d   :  { %v563_v49 = vpop.f32.mrf.mxu1  ;;  %445 = vmax.xlane.f32.xlu1 %v444_v48 }
 0x26e   :  { %v686_v53 = vmul.f32 0.25, %v563_v49 }
 0x26f   :  { %v4360_v51 = vpop.f32.mrf.mxu1 }
 0x271   :  { %v566_v52 = vpop.f32.mrf.mxu1 }
 0x272   :  { %v687_v54 = vmul.f32 0.25, %v566_v52 }
 0x273   :  { %v4361_v55 = vpop.f32.mrf.mxu1 }
 0x274   :  { %v688_v56 = vpack.c.bf16 %v687_v54, %v686_v53 }
 0x275   :  { %v679_v57 = vpop.f32.mrf.mxu1 }
 0x277   :  { %v4376_v58 = vpop.f32.mrf.mxu1 }
 0x279   :  { %v682_v59 = vpop.f32.mrf.mxu1 }
 0x27a   :  { %v760_v60 = vpack.c.bf16 %v682_v59, %v679_v57 }
 0x27b   :  { %v4377_v61 = vpop.f32.mrf.mxu1 }
 0x27c   :  { %4385 = vmatpush3.bf16.msra.mxu1 %v760_v60  ;;  %v4567_v61 = vld [vmem:[%s6772_s7] sm:$0xff]  }
 0x27d   :  { %4396 = vmatprep.subr.bf16.mxu1 %v4673_v10 }
 0x2f2   :  { %v443_v62 = vpop.xlane.xlu0 %442 }
 0x2f3   :  { %v447_v63 = vsub.f32 %v435_v37, %v443_v62 }
 0x2f5   :  { %v449_v0 = vmul.f32 1.442695, %v447_v63  ;;  %v4568_v63 = vld [vmem:[%s6772_s7 + $0x8] sm:$0xff]  }
 0x2f6   :  { %v446_v1 = vpop.xlane.xlu1 %445 }
 0x2f7   :  { %4602 = vpow2.f32 %v449_v0  ;;  %v448_v2 = vsub.f32 %v438_v46, %v446_v1 }
 0x2f9   :  { %v451_v3 = vmul.f32 1.442695, %v448_v2 }
 0x2fb   :  { %4604 = vpow2.f32 %v451_v3 }
 0x304   :  { %v4603_v4 = vpop.eup %4602 }
 0x305   :  { %v453_v5 = vsel %vm393_vm4, %v4603_v4, 0.0 }
 0x306   :  { %454 = vadd.xlane.f32.xlu0 %v453_v5 }
 0x308   :  { %v4605_v6 = vpop.eup %4604 }
 0x309   :  { %v456_v7 = vsel %vm393_vm4, %v4605_v6, 0.0 }
 0x30a   :  { %457 = vadd.xlane.f32.xlu1 %v456_v7 }
 0x38f   :  { %v455_v8 = vpop.xlane.xlu0 %454 }
 0x390   :  { %4606 = vrcp.f32 %v455_v8 }
 0x393   :  { %v458_v9 = vpop.xlane.xlu1 %457 }
 0x394   :  { %4608 = vrcp.f32 %v458_v9 }
 0x39d   :  { %v4607_v11 = vpop.eup %4606 }
 0x39e   :  { %v461_v13 = vmul.f32 %v4607_v11, %v4603_v4  ;;  %v4100_v11 = vld [vmem:[%s6773_s27] ss:$0 sm:$0xff] }
 0x3a1   :  { %v4609_v12 = vpop.eup %4608 }
 0x3a2   :  { %v462_v14 = vmul.f32 %v4609_v12, %v4605_v6 }
 0x3a4   :  { %v463_v17 = vpack.c.bf16 %v462_v14, %v461_v13 }
 0x3a6   :  { %4351 = vmatmul.mubr.msk.bf16.vlgmr.msra.gmra.mxu0 %vm393_vm4, %v463_v17 }
 0x3a7   :  { %4363 = vmatpush3.bf16.msra.mxu0 %v4565_v16  ;;  %4366 = vmatprep.mubr.msk.bf16.mxu0 %vm4674_vm1, %v4673_v10 }
 0x3a8   :  { %4364 = vmatprep.subr.bf16.mxu0 %v4673_v10 }
 0x3ab   :  { %4365 = vmatpush3.bf16.msra.mxu0 %v4566_v19 }
 0x3ac   :  { %4378 = vmatprep.subr.bf16.mxu0 %v4673_v10 }
 0x3ae   :  { %4367 = vmatmul.mubr.msk.bf16.vlgmr.msra.gmra.mxu0 %vm165_vm0, %v4865_v42 }
 0x3af   :  { %4380 = vmatprep.mubr.msk.bf16.mxu0 %vm4674_vm1, %v4673_v10 }
 0x466   :  { %v502_v20 = vpop.f32.mrf.mxu0 }
 0x468   :  { %v4352_v21 = vpop.f32.mrf.mxu0 }
 0x46a   :  { %v505_v22 = vpop.f32.mrf.mxu0 }
 0x46b   :  { %v509_v23 = vpack.c.bf16 %v505_v22, %v502_v20 }
 0x46c   :  { %v4353_v24 = vpop.f32.mrf.mxu0 }
 0x46e   :  { %v621_v25 = vpop.f32.mrf.mxu0 }
 0x470   :  { %v4368_v26 = vpop.f32.mrf.mxu0 }
 0x472   :  { %v624_v27 = vpop.f32.mrf.mxu0 }
 0x473   :  { %v689_v28 = vpack.c.bf16 %v624_v27, %v621_v25 }
 0x474   :  { %v4369_v29 = vpop.f32.mrf.mxu0 }
 0x475   :  { %v694_v30 = vsel %vm393_vm4, %v689_v28, 0  ;;  %v4570_v29 = vld [vmem:[%s6638_s11] sm:$0xff]  }
 0x476   :  { %4379 = vmatpush3.bf16.xpose.msra.mxu0 %v694_v30 }
 0x477   :  { %4390 = vmatprep.subr.bf16.mxu0 %v4673_v10 }
 0x47d   :  { %4381 = vmatmul.mubr.msk.bf16.vlgmr.msra.gmra.mxu0 %vm393_vm4, %v688_v56 }
 0x47e   :  { %4392 = vmatprep.mubr.msk.bf16.mxu0 %vm4674_vm1, %v4673_v10  ;;  %4391 = vmatpush3.bf16.msra.mxu0 %v4568_v63 }
 0x47f   :  { %4402 = vmatprep.subr.bf16.mxu0 %v4673_v10 }
 0x53d   :  { %v730_v42 = vpop.f32.mrf.mxu0 }
 0x53e   :  { %v731_v31 = vadd.f32 %v730_v42, %v4961_v35 }
 0x53f   :  { %v4382_v32 = vpop.f32.mrf.mxu0 }
 0x540   :  { %v737_v33 = vsel %vm393_vm4, %v731_v31, -inf }
 0x541   :  { %738 = vmax.xlane.f32.xlu0 %v737_v33  ;;  %v733_v34 = vpop.f32.mrf.mxu0 }
 0x542   :  { %v734_v36 = vadd.f32 %v733_v34, %v4964_v41 }
 0x543   :  { %v4383_v37 = vpop.f32.mrf.mxu0 }
 0x544   :  { %v740_v38 = vsel %vm393_vm4, %v734_v36, -inf }
 0x545   :  { %741 = vmax.xlane.f32.xlu1 %v740_v38 }
 0x5ca   :  { %v739_v43 = vpop.xlane.xlu0 %738 }
 0x5cb   :  { %v743_v44 = vsub.f32 %v731_v31, %v739_v43 }
 0x5cd   :  { %v745_v46 = vmul.f32 1.442695, %v743_v44 }
 0x5ce   :  { %v742_v47 = vpop.xlane.xlu1 %741 }
 0x5cf   :  { %4610 = vpow2.f32 %v745_v46  ;;  %v744_v48 = vsub.f32 %v734_v36, %v742_v47 }
 0x5d1   :  { %v747_v49 = vmul.f32 1.442695, %v744_v48 }
 0x5d3   :  { %4612 = vpow2.f32 %v747_v49 }
 0x5dc   :  { %v4611_v51 = vpop.eup %4610 }
 0x5dd   :  { %v749_v52 = vsel %vm393_vm4, %v4611_v51, 0.0 }
 0x5de   :  { %750 = vadd.xlane.f32.xlu0 %v749_v52 }
 0x5e0   :  { %v4613_v53 = vpop.eup %4612 }
 0x5e1   :  { %v752_v54 = vsel %vm393_vm4, %v4613_v53, 0.0 }
 0x5e2   :  { %753 = vadd.xlane.f32.xlu1 %v752_v54  ;;  %v4101_v54 = vld [vmem:[%s6774_s30] ss:$0 sm:$0xff] }
 0x667   :  { %v751_v55 = vpop.xlane.xlu0 %750 }
 0x668   :  { %4614 = vrcp.f32 %v751_v55 }
 0x66b   :  { %v754_v56 = vpop.xlane.xlu1 %753 }
 0x66c   :  { %4616 = vrcp.f32 %v754_v56 }
 0x675   :  { %v4615_v57 = vpop.eup %4614 }
 0x676   :  { %v757_v59 = vmul.f32 %v4615_v57, %v4611_v51 }
 0x679   :  { %v4617_v58 = vpop.eup %4616 }
 0x67a   :  { %v758_v60 = vmul.f32 %v4617_v58, %v4613_v53 }
 0x67c   :  { %v759_v62 = vpack.c.bf16 %v758_v60, %v757_v59  ;;  %v4102_v59 = vld [vmem:[%s6637_s10] ss:$0 sm:$0xff] }
 0x67e   :  { %4387 = vmatmul.mubr.msk.bf16.vlgmr.msra.gmra.mxu1 %vm393_vm4, %v759_v62 }
 0x67f   :  { %4397 = vmatpush3.bf16.msra.mxu1 %v4567_v61  ;;  %4398 = vmatprep.mubr.msk.bf16.mxu1 %vm4674_vm1, %v4673_v10 }
 0x680   :  { %4410 = vmatprep.subr.bf16.mxu1 %v4673_v10 }
 0x686   :  { %4399 = vmatmul.mubr.msk.bf16.vlgmr.msra.gmra.mxu1 %vm393_vm4, %v509_v23 }
 0x687   :  { %4418 = vmatprep.mubr.msk.bf16.mxu1 %vm4674_vm1, %v4673_v10 }
 0x73e   :  { %v798_v0 = vpop.f32.mrf.mxu1 }
 0x740   :  { %v4388_v1 = vpop.f32.mrf.mxu1 }
 0x741   :  { %v4572_v1 = vld [vmem:[%s6640_s13 + $0x10] sm:$0xff]  }
 0x742   :  { %v801_v2 = vpop.f32.mrf.mxu1 }
 0x743   :  { %v805_v3 = vpack.c.bf16 %v801_v2, %v798_v0  ;;  %v4571_v0 = vld [vmem:[%s6640_s13 + $0x18] sm:$0xff]   ;;  %v4573_v2 = vld [vmem:[%s6640_s13 + $0x8] sm:$0xff]  }
 0x744   :  { %v4389_v4 = vpop.f32.mrf.mxu1  ;;  %4411 = vmatpush3.bf16.msra.mxu1 %v4571_v0 }
 0x745   :  { %4393 = vmatmul.mubr.msk.bf16.vlgmr.msra.gmra.mxu0 %vm393_vm4, %v805_v3  ;;  %4412 = vmatprep.subr.bf16.mxu1 %v4673_v10  ;;  %v4574_v3 = vld [vmem:[%s6640_s13] sm:$0xff]  }
 0x746   :  { %v902_v5 = vpop.f32.mrf.mxu1  ;;  %4406 = vmatprep.mubr.msk.bf16.mxu0 %vm4674_vm1, %v4673_v10  ;;  %v4103_v4 = vld [vmem:[%s6639_s12] ss:$0 sm:$0xff] }
 0x748   :  { %v4400_v6 = vpop.f32.mrf.mxu1  ;;  %4413 = vmatpush3.bf16.msra.mxu1 %v4572_v1 }
 0x749   :  { %4414 = vmatprep.subr.bf16.mxu1 %v4673_v10 }
 0x74a   :  { %v905_v7 = vpop.f32.mrf.mxu1 }
 0x74c   :  { %v4401_v8 = vpop.f32.mrf.mxu1  ;;  %4415 = vmatpush3.bf16.msra.mxu1 %v4573_v2 }
 0x74d   :  { %4416 = vmatprep.subr.bf16.mxu1 %v4673_v10 }
 0x750   :  { %4417 = vmatpush3.bf16.msra.mxu1 %v4574_v3 }
 0x751   :  { %4438 = vmatprep.subr.bf16.mxu1 %v4673_v10 }
 0x805   :  { %v852_v9 = vpop.f32.mrf.mxu0 }
 0x806   :  { %v903_v12 = vadd.f32 %v902_v5, %v852_v9 }
 0x807   :  { %v4394_v13 = vpop.f32.mrf.mxu0 }
 0x808   :  { %v916_v14 = vadd.f32 %v4100_v11, %v903_v12 }
 0x809   :  { %v855_v16 = vpop.f32.mrf.mxu0 }
 0x80a   :  { %v918_v17 = vadd.f32 %v916_v14, %v4856_v39  ;;  %v906_v19 = vadd.f32 %v905_v7, %v855_v16  ;;  %v4569_v39 = vld [vmem:[%s6638_s11 + $0x8] sm:$0xff]  }
 0x80b   :  { %v4395_v20 = vpop.f32.mrf.mxu0  ;;  %4403 = vmatpush3.bf16.msra.mxu0 %v4569_v39 }
 0x80c   :  { %v917_v21 = vadd.f32 %v4100_v11, %v906_v19  ;;  %v922_v22 = vsel %vm165_vm0, %v918_v17, 0.0  ;;  %v928_v23 = vmul.f32 %v918_v17, %v918_v17  ;;  %4404 = vmatprep.subr.bf16.mxu0 %v4673_v10 }
 0x80d   :  { %923 = vadd.xlane.f32.xlu0 %v922_v22 }
 0x80e   :  { %v919_v24 = vadd.f32 %v917_v21, %v4858_v40  ;;  %v930_v25 = vsel %vm165_vm0, %v928_v23, 0.0 }
 0x80f   :  { %4405 = vmatpush3.bf16.msra.mxu0 %v4570_v29 }
 0x810   :  { %v925_v26 = vsel %vm165_vm0, %v919_v24, 0.0  ;;  %v929_v27 = vmul.f32 %v919_v24, %v919_v24  ;;  %4422 = vmatprep.subr.bf16.mxu0 %v4673_v10 }
 0x811   :  { %931 = vadd.xlane.f32.xlu0 %v930_v25  ;;  %926 = vadd.xlane.f32.xlu1 %v925_v26 }
 0x812   :  { %v933_v28 = vsel %vm165_vm0, %v929_v27, 0.0 }
 0x815   :  { %934 = vadd.xlane.f32.xlu1 %v933_v28 }
 0x896   :  { %v924_v40 = vpop.xlane.xlu0 %923 }
 0x897   :  { %v936_v30 = vmul.f32 0.03125, %v924_v40 }
 0x899   :  { %v940_v32 = vmul.f32 %v936_v30, %v936_v30  ;;  %v946_v51 = vsub.f32 %v918_v17, %v936_v30 }
 0x89a   :  { %v932_v42 = vpop.xlane.xlu0 %931  ;;  %v927_v31 = vpop.xlane.xlu1 %926 }
 0x89b   :  { %v938_v33 = vmul.f32 0.03125, %v932_v42  ;;  %v937_v34 = vmul.f32 0.03125, %v927_v31  ;;  %v4107_v42 = vld [vmem:[%s6641_s14] ss:$0 sm:$0xff] }
 0x89d   :  { %v942_v36 = vsub.f32 %v938_v33, %v940_v32  ;;  %v941_v43 = vmul.f32 %v937_v34, %v937_v34  ;;  %v947_v55 = vsub.f32 %v919_v24, %v937_v34 }
 0x89e   :  { %v935_v37 = vpop.xlane.xlu1 %934 }
 0x89f   :  { %v944_v38 = vmax.f32 %v942_v36, 0.0  ;;  %v939_v44 = vmul.f32 0.03125, %v935_v37 }
 0x8a1   :  { %v948_v46 = vadd.f32 1e-12, %v944_v38  ;;  %v943_v47 = vsub.f32 %v939_v44, %v941_v43 }
 0x8a3   :  { %4618 = vrsqrt.f32 %v948_v46  ;;  %v945_v48 = vmax.f32 %v943_v47, 0.0 }
 0x8a5   :  { %v949_v49 = vadd.f32 1e-12, %v945_v48 }
 0x8a7   :  { %4620 = vrsqrt.f32 %v949_v49 }
 0x8b0   :  { %v4619_v52 = vpop.eup %4618 }
 0x8b1   :  { %v952_v53 = vmul.f32 %v4619_v52, %v946_v51  ;;  %v4575_v52 = vld [vmem:[%s6765_s28 + $0x28] sm:$0xff]  }
 0x8b3   :  { %v960_v58 = vmul.f32 %v4101_v54, %v952_v53  ;;  %v4576_v53 = vld [vmem:[%s6769_s9 + $0x28] sm:$0xff]  }
 0x8b4   :  { %v4621_v56 = vpop.eup %4620 }
 0x8b5   :  { %v953_v57 = vmul.f32 %v4621_v56, %v947_v55  ;;  %v968_v61 = vadd.f32 %v4102_v59, %v960_v58  ;;  %v4578_v55 = vld [vmem:[%s6769_s9 + $0x20] sm:$0xff]  }
 0x8b7   :  { %v961_v60 = vmul.f32 %v4101_v54, %v953_v57  ;;  %v4577_v54 = vld [vmem:[%s6765_s28 + $0x20] sm:$0xff]  }
 0x8b9   :  { %v969_v62 = vadd.f32 %v4102_v59, %v961_v60 }
 0x8bb   :  { %v970_v63 = vpack.c.bf16 %v969_v62, %v968_v61 }
 0x8bd   :  { %4407 = vmatmul.mubr.msk.bf16.vlgmr.msra.gmra.mxu0 %vm165_vm0, %v970_v63 }
 0x8be   :  { %4426 = vmatprep.mubr.msk.bf16.mxu0 %vm4674_vm1, %v4673_v10  ;;  %4423 = vmatpush3.bf16.msra.mxu0 %v4575_v52 }
 0x8bf   :  { %4424 = vmatprep.subr.bf16.mxu0 %v4673_v10 }
 0x8c2   :  { %4425 = vmatpush3.bf16.msra.mxu0 %v4577_v54 }
 0x8c3   :  { %4430 = vmatprep.subr.bf16.mxu0 %v4673_v10 }
 0x97d   :  { %v1031_v5 = vpop.f32.mrf.mxu0 }
 0x97e   :  { %v1032_v6 = vadd.f32 %v4103_v4, %v1031_v5 }
 0x97f   :  { %v4408_v7 = vpop.f32.mrf.mxu0 }
 0x980   :  { %v1038_v8 = vmul.f32 %v1032_v6, %v1032_v6 }
 0x981   :  { %v1034_v9 = vpop.f32.mrf.mxu0 }
 0x982   :  { %v1040_v11 = vmul.f32 %v1038_v8, %v1032_v6  ;;  %v1035_v12 = vadd.f32 %v4103_v4, %v1034_v9 }
 0x983   :  { %v4409_v13 = vpop.f32.mrf.mxu0 }
 0x984   :  { %v1042_v14 = vmul.f32 0.044715, %v1040_v11  ;;  %v1039_v16 = vmul.f32 %v1035_v12, %v1035_v12 }
 0x986   :  { %v1044_v17 = vadd.f32 %v1042_v14, %v1032_v6  ;;  %v1041_v19 = vmul.f32 %v1039_v16, %v1035_v12 }
 0x988   :  { %v1046_v20 = vmul.f32 0.7978846, %v1044_v17  ;;  %v1043_v21 = vmul.f32 0.044715, %v1041_v19  ;;  %v4114_v19 = vld [vmem:[%s6643_s16] ss:$0 sm:$0xff] }
 0x98a   :  { %4622 = vtanh.f32 %v1046_v20  ;;  %v1045_v22 = vadd.f32 %v1043_v21, %v1035_v12 }
 0x98c   :  { %v1047_v23 = vmul.f32 0.7978846, %v1045_v22 }
 0x98e   :  { %4624 = vtanh.f32 %v1047_v23  ;;  %v4579_v23 = vld [vmem:[%s6766_s0 + $0x28] sm:$0xff]  }
 0x997   :  { %v4623_v24 = vpop.eup %4622 }
 0x998   :  { %v1050_v25 = vadd.f32 1.0, %v4623_v24 }
 0x99a   :  { %v1052_v27 = vmul.f32 0.5, %v1050_v25  ;;  %v4580_v25 = vld [vmem:[%s6766_s0 + $0x20] sm:$0xff]  }
 0x99b   :  { %v4625_v26 = vpop.eup %4624 }
 0x99c   :  { %v1051_v28 = vadd.f32 1.0, %v4625_v26  ;;  %v1054_v29 = vmul.f32 %v1052_v27, %v1032_v6 }
 0x99e   :  { %v1053_v39 = vmul.f32 0.5, %v1051_v28 }
 0x9a0   :  { %v1055_v40 = vmul.f32 %v1053_v39, %v1035_v12  ;;  %v4113_v12 = vld [vmem:[%s6642_s15] ss:$0 sm:$0xff] }
 0x9a2   :  { %v1056_v30 = vpack.c.bf16 %v1055_v40, %v1054_v29 }
 0x9a4   :  { %4419 = vmatmul.mubr.msk.bf16.vlgmr.msra.gmra.mxu1 %vm1096_vm12, %v1056_v30 }
 0x9a5   :  { %4442 = vmatprep.mubr.msk.bf16.mxu1 %vm4674_vm1, %v4673_v10  ;;  %4439 = vmatpush3.bf16.msra.mxu1 %v4576_v53 }
 0x9a6   :  { %4440 = vmatprep.subr.bf16.mxu1 %v4673_v10 }
 0x9a9   :  { %4441 = vmatpush3.bf16.msra.mxu1 %v4578_v55 }
 0x9aa   :  { %4452 = vmatprep.subr.bf16.mxu1 %v4673_v10 }
 0xa64   :  { %v1134_v31 = vpop.f32.mrf.mxu1 }
 0xa65   :  { %v1135_v32 = vadd.f32 %v4107_v42, %v1134_v31 }
 0xa66   :  { %v4420_v33 = vpop.f32.mrf.mxu1 }
 0xa67   :  { %v1141_v34 = vadd.f32 %v1135_v32, %v968_v61 }
 0xa68   :  { %v1137_v36 = vpop.f32.mrf.mxu1 }
 0xa69   :  { %v1138_v37 = vadd.f32 %v4107_v42, %v1137_v36  ;;  %v1145_v38 = vsel %vm165_vm0, %v1141_v34, 0.0  ;;  %v1151_v43 = vmul.f32 %v1141_v34, %v1141_v34 }
 0xa6a   :  { %1146 = vadd.xlane.f32.xlu0 %v1145_v38  ;;  %v4421_v44 = vpop.f32.mrf.mxu1 }
 0xa6b   :  { %v1142_v46 = vadd.f32 %v1138_v37, %v969_v62  ;;  %v1153_v47 = vsel %vm165_vm0, %v1151_v43, 0.0 }
 0xa6d   :  { %v1148_v48 = vsel %vm165_vm0, %v1142_v46, 0.0  ;;  %v1152_v49 = vmul.f32 %v1142_v46, %v1142_v46 }
 0xa6e   :  { %1154 = vadd.xlane.f32.xlu0 %v1153_v47  ;;  %1149 = vadd.xlane.f32.xlu1 %v1148_v48  ;;  %v4582_v48 = vld [vmem:[%s6765_s28 + $0x30] sm:$0xff]  }
 0xa6f   :  { %v1156_v51 = vsel %vm165_vm0, %v1152_v49, 0.0  ;;  %v4583_v49 = vld [vmem:[%s6769_s9 + $0x38] sm:$0xff]  }
 0xa72   :  { %1157 = vadd.xlane.f32.xlu1 %v1156_v51  ;;  %v4584_v51 = vld [vmem:[%s6769_s9 + $0x30] sm:$0xff]  }
 0xaf3   :  { %v1147_v56 = vpop.xlane.xlu0 %1146 }
 0xaf4   :  { %v1159_v57 = vmul.f32 0.03125, %v1147_v56 }
 0xaf6   :  { %v1163_v60 = vmul.f32 %v1159_v57, %v1159_v57  ;;  %v1169_v8 = vsub.f32 %v1141_v34, %v1159_v57 }
 0xaf7   :  { %v1155_v58 = vpop.xlane.xlu0 %1154  ;;  %v1150_v59 = vpop.xlane.xlu1 %1149 }
 0xaf8   :  { %v1161_v61 = vmul.f32 0.03125, %v1155_v58  ;;  %v1160_v62 = vmul.f32 0.03125, %v1150_v59 }
 0xafa   :  { %v1165_v63 = vsub.f32 %v1161_v61, %v1163_v60  ;;  %v1164_v2 = vmul.f32 %v1160_v62, %v1160_v62  ;;  %v1170_v13 = vsub.f32 %v1142_v46, %v1160_v62  ;;  %v4581_v46 = vld [vmem:[%s6765_s28 + $0x38] sm:$0xff]  }
 0xafb   :  { %v1158_v0 = vpop.xlane.xlu1 %1157 }
 0xafc   :  { %v1167_v1 = vmax.f32 %v1165_v63, 0.0  ;;  %v1162_v3 = vmul.f32 0.03125, %v1158_v0 }
 0xafe   :  { %v1171_v4 = vadd.f32 1e-12, %v1167_v1  ;;  %v1166_v5 = vsub.f32 %v1162_v3, %v1164_v2 }
 0xb00   :  { %4626 = vrsqrt.f32 %v1171_v4  ;;  %v1168_v6 = vmax.f32 %v1166_v5, 0.0 }
 0xb02   :  { %v1172_v7 = vadd.f32 1e-12, %v1168_v6 }
 0xb04   :  { %4628 = vrsqrt.f32 %v1172_v7 }
 0xb0d   :  { %v4627_v9 = vpop.eup %4626 }
 0xb0e   :  { %v1175_v11 = vmul.f32 %v4627_v9, %v1169_v8 }
 0xb10   :  { %v1183_v16 = vmul.f32 %v4113_v12, %v1175_v11 }
 0xb11   :  { %v4629_v14 = vpop.eup %4628 }
 0xb12   :  { %v1176_v17 = vmul.f32 %v4629_v14, %v1170_v13  ;;  %v5092_v21 = vadd.f32 %v4114_v19, %v1183_v16 }
 0xb14   :  { %v1184_v20 = vmul.f32 %v4113_v12, %v1176_v17 }
 0xb16   :  { %v5094_v22 = vadd.f32 %v4114_v19, %v1184_v20 }
 0xb18   :  { %v5101_v24 = vpack.c.bf16 %v5094_v22, %v5092_v21 }
 0xb1a   :  { %4427 = vmatmul.mubr.msk.bf16.vlgmr.msra.gmra.mxu0 %vm165_vm0, %v5101_v24  ;;  %4443 = vmatmul.mubr.msk.bf16.vlgmr.msra.gmra.mxu1 %vm165_vm0, %v5101_v24 }
 0xb1b   :  { %4431 = vmatpush3.bf16.msra.mxu0 %v4579_v23  ;;  %4434 = vmatprep.mubr.msk.bf16.mxu0 %vm4674_vm1, %v4673_v10 }
 0xb1c   :  { %4432 = vmatprep.subr.bf16.mxu0 %v4673_v10  ;;  %4454 = vmatprep.mubr.msk.bf16.mxu1 %vm4674_vm1, %v4673_v10 }
 0xb1f   :  { %4433 = vmatpush3.bf16.msra.mxu0 %v4580_v25 }
 0xb20   :  { %4446 = vmatprep.subr.bf16.mxu0 %v4673_v10 }
 0xb22   :  { %4435 = vmatmul.mubr.msk.bf16.vlgmr.msra.gmra.mxu0 %vm165_vm0, %v5101_v24 }
 0xb23   :  { %4448 = vmatprep.mubr.msk.bf16.mxu0 %vm4674_vm1, %v4673_v10 }
 0xbda   :  { %v1248_v26 = vpop.f32.mrf.mxu0  ;;  %v1364_v27 = vpop.f32.mrf.mxu1 }
 0xbdb   :  { %v1371_v44 = vmul.f32 0.25, %v1248_v26 }
 0xbdc   :  { %v4428_v28 = vpop.f32.mrf.mxu0  ;;  %v4444_v39 = vpop.f32.mrf.mxu1 }
 0xbde   :  { %v1251_v29 = vpop.f32.mrf.mxu0  ;;  %v1367_v40 = vpop.f32.mrf.mxu1 }
 0xbdf   :  { %v1445_v30 = vpack.c.bf16 %v1367_v40, %v1364_v27  ;;  %v1372_v43 = vmul.f32 0.25, %v1251_v29  ;;  %v4585_v29 = vld [vmem:[%s6766_s0 + $0x38] sm:$0xff]  }
 0xbe0   :  { %v4429_v42 = vpop.f32.mrf.mxu0  ;;  %v4445_v31 = vpop.f32.mrf.mxu1 }
 0xbe1   :  { %4453 = vmatpush3.bf16.msra.mxu1 %v1445_v30  ;;  %v1373_v47 = vpack.c.bf16 %v1372_v43, %v1371_v44  ;;  %v4586_v30 = vld [vmem:[%s6766_s0 + $0x30] sm:$0xff]   ;;  %s4683_s0 = smov 116  }
 0xbe2   :  { %v1306_v32 = vpop.f32.mrf.mxu0  ;;  %4466 = vmatprep.subr.bf16.mxu1 %v4673_v10 }
 0xbe4   :  { %v4436_v33 = vpop.f32.mrf.mxu0 }
 0xbe6   :  { %v1309_v34 = vpop.f32.mrf.mxu0 }
 0xbe7   :  { %v1374_v36 = vpack.c.bf16 %v1309_v34, %v1306_v32 }
 0xbe8   :  { %v4437_v37 = vpop.f32.mrf.mxu0 }
 0xbe9   :  { %v1379_v38 = vsel %vm393_vm4, %v1374_v36, 0 }
 0xbea   :  { %4447 = vmatpush3.bf16.xpose.msra.mxu0 %v1379_v38 }
 0xbeb   :  { %4458 = vmatprep.subr.bf16.mxu0 %v4673_v10 }
 0xbf1   :  { %4449 = vmatmul.mubr.msk.bf16.vlgmr.msra.gmra.mxu0 %vm393_vm4, %v1373_v47 }
 0xbf2   :  { %4459 = vmatpush3.bf16.msra.mxu0 %v4581_v46  ;;  %4462 = vmatprep.mubr.msk.bf16.mxu0 %vm4674_vm1, %v4673_v10 }
 0xbf3   :  { %4460 = vmatprep.subr.bf16.mxu0 %v4673_v10 }
 0xbf6   :  { %4461 = vmatpush3.bf16.msra.mxu0 %v4582_v48 }
 0xbf7   :  { %4474 = vmatprep.subr.bf16.mxu0 %v4673_v10 }
 0xbf9   :  { %4463 = vmatmul.mubr.msk.bf16.vlgmr.msra.gmra.mxu0 %vm165_vm0, %v5101_v24 }
 0xbfa   :  { %4475 = vmatpush3.bf16.msra.mxu0 %v4583_v49  ;;  %4478 = vmatprep.mubr.msk.bf16.mxu0 %vm4674_vm1, %v4673_v10 }
 0xbfb   :  { %4476 = vmatprep.subr.bf16.mxu0 %v4673_v10 }
 0xbfe   :  { %4477 = vmatpush3.bf16.msra.mxu0 %v4584_v51 }
 0xbff   :  { %4488 = vmatprep.subr.bf16.mxu0 %v4673_v10 }
 0xc01   :  { %4479 = vmatmul.mubr.msk.bf16.vlgmr.msra.gmra.mxu0 %vm165_vm0, %v5101_v24 }
 0xc02   :  { %4490 = vmatprep.mubr.msk.bf16.mxu0 %vm4674_vm1, %v4673_v10 }
 0xcb1   :  { %v1415_v52 = vpop.f32.mrf.mxu0 }
 0xcb2   :  { %v1416_v53 = vadd.f32 %v1415_v52, %v4961_v35 }
 0xcb3   :  { %v4450_v54 = vpop.f32.mrf.mxu0 }
 0xcb4   :  { %v1422_v55 = vsel %vm393_vm4, %v1416_v53, -inf }
 0xcb5   :  { %1423 = vmax.xlane.f32.xlu0 %v1422_v55  ;;  %v1418_v56 = vpop.f32.mrf.mxu0 }
 0xcb6   :  { %v1419_v57 = vadd.f32 %v1418_v56, %v4964_v41 }
 0xcb7   :  { %v4451_v58 = vpop.f32.mrf.mxu0 }
 0xcb8   :  { %v1425_v59 = vsel %vm393_vm4, %v1419_v57, -inf }
 0xcb9   :  { %1426 = vmax.xlane.f32.xlu1 %v1425_v59  ;;  %v1545_v60 = vpop.f32.mrf.mxu0 }
 0xcba   :  { %v1668_v63 = vmul.f32 0.25, %v1545_v60 }
 0xcbb   :  { %v4464_v61 = vpop.f32.mrf.mxu0 }
 0xcbd   :  { %v1548_v62 = vpop.f32.mrf.mxu0 }
 0xcbe   :  { %v1669_v0 = vmul.f32 0.25, %v1548_v62 }
 0xcbf   :  { %v4465_v1 = vpop.f32.mrf.mxu0 }
 0xcc0   :  { %v1670_v2 = vpack.c.bf16 %v1669_v0, %v1668_v63 }
 0xcc1   :  { %v1661_v3 = vpop.f32.mrf.mxu0 }
 0xcc3   :  { %v4480_v4 = vpop.f32.mrf.mxu0 }
 0xcc5   :  { %v1664_v5 = vpop.f32.mrf.mxu0 }
 0xcc6   :  { %v1742_v6 = vpack.c.bf16 %v1664_v5, %v1661_v3  ;;  %v4587_v5 = vld [vmem:[%s6772_s7 + $0x10] sm:$0xff]  }
 0xcc7   :  { %v4481_v7 = vpop.f32.mrf.mxu0 }
 0xcc8   :  { %4489 = vmatpush3.bf16.msra.mxu0 %v1742_v6  ;;  %v4588_v7 = vld [vmem:[%s6772_s7 + $0x18] sm:$0xff]  }
 0xcc9   :  { %4500 = vmatprep.subr.bf16.mxu0 %v4673_v10 }
 0xd3e   :  { %v1424_v8 = vpop.xlane.xlu0 %1423 }
 0xd3f   :  { %v1428_v9 = vsub.f32 %v1416_v53, %v1424_v8 }
 0xd41   :  { %v1430_v11 = vmul.f32 1.442695, %v1428_v9 }
 0xd42   :  { %v1427_v12 = vpop.xlane.xlu1 %1426 }
 0xd43   :  { %4630 = vpow2.f32 %v1430_v11  ;;  %v1429_v13 = vsub.f32 %v1419_v57, %v1427_v12 }
 0xd45   :  { %v1432_v14 = vmul.f32 1.442695, %v1429_v13 }
 0xd47   :  { %4632 = vpow2.f32 %v1432_v14 }
 0xd50   :  { %v4631_v16 = vpop.eup %4630 }
 0xd51   :  { %v1434_v17 = vsel %vm393_vm4, %v4631_v16, 0.0 }
 0xd52   :  { %1435 = vadd.xlane.f32.xlu0 %v1434_v17 }
 0xd54   :  { %v4633_v19 = vpop.eup %4632 }
 0xd55   :  { %v1437_v20 = vsel %vm393_vm4, %v4633_v19, 0.0 }
 0xd56   :  { %1438 = vadd.xlane.f32.xlu1 %v1437_v20 }
 0xddb   :  { %v1436_v23 = vpop.xlane.xlu0 %1435 }
 0xddc   :  { %4634 = vrcp.f32 %v1436_v23  ;;  %v4170_v23 = vld [vmem:[%s6773_s27 + $0x1] ss:$0 sm:$0xff]  ;;  %s6790_s27 = sld [smem:[#allocation51_spill]] }
 0xddf   :  { %v1439_v25 = vpop.xlane.xlu1 %1438 }
 0xde0   :  { %4636 = vrcp.f32 %v1439_v25 }
 0xde9   :  { %v4635_v26 = vpop.eup %4634 }
 0xdea   :  { %v1442_v28 = vmul.f32 %v4635_v26, %v4631_v16 }
 0xded   :  { %v4637_v27 = vpop.eup %4636 }
 0xdee   :  { %v1443_v39 = vmul.f32 %v4637_v27, %v4633_v19 }
 0xdf0   :  { %v1444_v40 = vpack.c.bf16 %v1443_v39, %v1442_v28 }
 0xdf2   :  { %4455 = vmatmul.mubr.msk.bf16.vlgmr.msra.gmra.mxu1 %vm393_vm4, %v1444_v40 }
 0xdf3   :  { %4467 = vmatpush3.bf16.msra.mxu1 %v4585_v29  ;;  %4470 = vmatprep.mubr.msk.bf16.mxu1 %vm4674_vm1, %v4673_v10 }
 0xdf4   :  { %4468 = vmatprep.subr.bf16.mxu1 %v4673_v10 }
 0xdf7   :  { %4469 = vmatpush3.bf16.msra.mxu1 %v4586_v30 }
 0xdf8   :  { %4482 = vmatprep.subr.bf16.mxu1 %v4673_v10 }
 0xdfa   :  { %4471 = vmatmul.mubr.msk.bf16.vlgmr.msra.gmra.mxu1 %vm165_vm0, %v5101_v24 }
 0xdfb   :  { %4484 = vmatprep.mubr.msk.bf16.mxu1 %vm4674_vm1, %v4673_v10 }
 0xeb2   :  { %v1483_v42 = vpop.f32.mrf.mxu1 }
 0xeb4   :  { %v4456_v31 = vpop.f32.mrf.mxu1 }
 0xeb6   :  { %v1486_v32 = vpop.f32.mrf.mxu1 }
 0xeb7   :  { %v1490_v33 = vpack.c.bf16 %v1486_v32, %v1483_v42 }
 0xeb8   :  { %v4457_v34 = vpop.f32.mrf.mxu1 }
 0xeba   :  { %v1603_v36 = vpop.f32.mrf.mxu1 }
 0xebc   :  { %v4472_v37 = vpop.f32.mrf.mxu1 }
 0xebe   :  { %v1606_v38 = vpop.f32.mrf.mxu1 }
 0xebf   :  { %v1671_v43 = vpack.c.bf16 %v1606_v38, %v1603_v36  ;;  %v4590_v38 = vld [vmem:[%s6638_s11 + $0x10] sm:$0xff]  }
 0xec0   :  { %v4473_v44 = vpop.f32.mrf.mxu1 }
 0xec1   :  { %v1676_v46 = vsel %vm393_vm4, %v1671_v43, 0 }
 0xec2   :  { %4483 = vmatpush3.bf16.xpose.msra.mxu1 %v1676_v46 }
 0xec3   :  { %4494 = vmatprep.subr.bf16.mxu1 %v4673_v10 }
 0xec9   :  { %4485 = vmatmul.mubr.msk.bf16.vlgmr.msra.gmra.mxu1 %vm393_vm4, %v1670_v2 }
 0xeca   :  { %4496 = vmatprep.mubr.msk.bf16.mxu1 %vm4674_vm1, %v4673_v10  ;;  %4495 = vmatpush3.bf16.msra.mxu1 %v4588_v7  ;;  %v4592_v7 = vld [vmem:[%s6640_s13 + $0x30] sm:$0xff]  }
 0xecb   :  { %4506 = vmatprep.subr.bf16.mxu1 %v4673_v10 }
 0xf89   :  { %v1712_v24 = vpop.f32.mrf.mxu1 }
 0xf8a   :  { %v1713_v47 = vadd.f32 %v1712_v24, %v4961_v35 }
 0xf8b   :  { %v4486_v48 = vpop.f32.mrf.mxu1 }
 0xf8c   :  { %v1719_v49 = vsel %vm393_vm4, %v1713_v47, -inf }
 0xf8d   :  { %1720 = vmax.xlane.f32.xlu0 %v1719_v49  ;;  %v1715_v51 = vpop.f32.mrf.mxu1 }
 0xf8e   :  { %v1716_v52 = vadd.f32 %v1715_v51, %v4964_v41 }
 0xf8f   :  { %v4487_v53 = vpop.f32.mrf.mxu1 }
 0xf90   :  { %v1722_v54 = vsel %vm393_vm4, %v1716_v52, -inf }
 0xf91   :  { %1723 = vmax.xlane.f32.xlu1 %v1722_v54 }
0x1016   :  { %v1721_v55 = vpop.xlane.xlu0 %1720 }
0x1017   :  { %v1725_v56 = vsub.f32 %v1713_v47, %v1721_v55 }
0x1019   :  { %v1727_v57 = vmul.f32 1.442695, %v1725_v56 }
0x101a   :  { %v1724_v58 = vpop.xlane.xlu1 %1723 }
0x101b   :  { %4638 = vpow2.f32 %v1727_v57  ;;  %v1726_v59 = vsub.f32 %v1716_v52, %v1724_v58 }
0x101d   :  { %v1729_v60 = vmul.f32 1.442695, %v1726_v59 }
0x101f   :  { %4640 = vpow2.f32 %v1729_v60 }
0x1028   :  { %v4639_v35 = vpop.eup %4638 }
0x1029   :  { %v1731_v61 = vsel %vm393_vm4, %v4639_v35, 0.0 }
0x102a   :  { %1732 = vadd.xlane.f32.xlu0 %v1731_v61  ;;  %v4173_v61 = vld [vmem:[%s6774_s30 + $0x1] ss:$0 sm:$0xff]  ;;  %s4682_s30 = smov 118  }
0x102c   :  { %v4641_v62 = vpop.eup %4640 }
0x102d   :  { %v1734_v63 = vsel %vm393_vm4, %v4641_v62, 0.0 }
0x102e   :  { %1735 = vadd.xlane.f32.xlu1 %v1734_v63 }
0x10b3   :  { %v1733_v41 = vpop.xlane.xlu0 %1732 }
0x10b4   :  { %4642 = vrcp.f32 %v1733_v41 }
0x10b7   :  { %v1736_v0 = vpop.xlane.xlu1 %1735 }
0x10b8   :  { %4644 = vrcp.f32 %v1736_v0 }
0x10c1   :  { %v4643_v1 = vpop.eup %4642 }
0x10c2   :  { %v1739_v3 = vmul.f32 %v4643_v1, %v4639_v35  ;;  %v4174_v1 = vld [vmem:[%s6637_s10 + $0x1] ss:$0 sm:$0xff] }
0x10c5   :  { %v4645_v2 = vpop.eup %4644 }
0x10c6   :  { %v1740_v4 = vmul.f32 %v4645_v2, %v4641_v62 }
0x10c8   :  { %v1741_v6 = vpack.c.bf16 %v1740_v4, %v1739_v3 }
0x10ca   :  { %4491 = vmatmul.mubr.msk.bf16.vlgmr.msra.gmra.mxu0 %vm393_vm4, %v1741_v6  ;;  %v4591_v6 = vld [vmem:[%s6640_s13 + $0x38] sm:$0xff]  }
0x10cb   :  { %4501 = vmatpush3.bf16.msra.mxu0 %v4587_v5  ;;  %4502 = vmatprep.mubr.msk.bf16.mxu0 %vm4674_vm1, %v4673_v10 }
0x10cc   :  { %4514 = vmatprep.subr.bf16.mxu0 %v4673_v10 }
0x10d2   :  { %4503 = vmatmul.mubr.msk.bf16.vlgmr.msra.gmra.mxu0 %vm393_vm4, %v1490_v33 }
0x10d3   :  { %4522 = vmatprep.mubr.msk.bf16.mxu0 %vm4674_vm1, %v4673_v10  ;;  %4515 = vmatpush3.bf16.msra.mxu0 %v4591_v6  ;;  %v4215_v6 = vld [vmem:[%s6648_s21 + $0x40] sm:$0xff] }
0x10d4   :  { %4516 = vmatprep.subr.bf16.mxu0 %v4673_v10 }
0x10d7   :  { %4517 = vmatpush3.bf16.msra.mxu0 %v4592_v7  ;;  %v4229_v7 = vld [vmem:[%s6648_s21 + $0xb0] sm:$0xff] }
0x10d8   :  { %4518 = vmatprep.subr.bf16.mxu0 %v4673_v10 }
0x118a   :  { %v1780_v8 = vpop.f32.mrf.mxu0 }
0x118c   :  { %v4492_v9 = vpop.f32.mrf.mxu0 }
0x118d   :  { %v4594_v9 = vld [vmem:[%s6640_s13 + $0x20] sm:$0xff]  }
0x118e   :  { %v1783_v11 = vpop.f32.mrf.mxu0 }
0x118f   :  { %v1787_v12 = vpack.c.bf16 %v1783_v11, %v1780_v8  ;;  %v4593_v8 = vld [vmem:[%s6640_s13 + $0x28] sm:$0xff]   ;;  %v4180_v11 = vld [vmem:[%s6639_s12 + $0x1] ss:$0 sm:$0xff] }
0x1190   :  { %v4493_v13 = vpop.f32.mrf.mxu0  ;;  %4519 = vmatpush3.bf16.msra.mxu0 %v4593_v8  ;;  %v4217_v8 = vld [vmem:[%s6648_s21 + $0x50] sm:$0xff] }
0x1191   :  { %4497 = vmatmul.mubr.msk.bf16.vlgmr.msra.gmra.mxu1 %vm393_vm4, %v1787_v12  ;;  %4520 = vmatprep.subr.bf16.mxu0 %v4673_v10 }
0x1192   :  { %v1884_v14 = vpop.f32.mrf.mxu0  ;;  %4510 = vmatprep.mubr.msk.bf16.mxu1 %vm4674_vm1, %v4673_v10 }
0x1194   :  { %v4504_v16 = vpop.f32.mrf.mxu0  ;;  %4521 = vmatpush3.bf16.msra.mxu0 %v4594_v9  ;;  %v4231_v9 = vld [vmem:[%s6648_s21 + $0xc0] sm:$0xff] }
0x1196   :  { %v1887_v17 = vpop.f32.mrf.mxu0 }
0x1198   :  { %v4505_v19 = vpop.f32.mrf.mxu0 }
0x1251   :  { %v1834_v20 = vpop.f32.mrf.mxu1 }
0x1252   :  { %v1885_v25 = vadd.f32 %v1884_v14, %v1834_v20 }
0x1253   :  { %v4498_v26 = vpop.f32.mrf.mxu1 }
0x1254   :  { %v1899_v27 = vadd.f32 %v4170_v23, %v1885_v25 }
0x1255   :  { %v1837_v28 = vpop.f32.mrf.mxu1 }
0x1256   :  { %v1901_v39 = vadd.f32 %v1899_v27, %v5092_v21  ;;  %v1888_v29 = vadd.f32 %v1887_v17, %v1837_v28  ;;  %v4589_v21 = vld [vmem:[%s6638_s11 + $0x18] sm:$0xff]  }
0x1257   :  { %v4499_v40 = vpop.f32.mrf.mxu1  ;;  %4507 = vmatpush3.bf16.msra.mxu1 %v4589_v21 }
0x1258   :  { %v1900_v30 = vadd.f32 %v4170_v23, %v1888_v29  ;;  %v1907_v42 = vsel %vm165_vm0, %v1901_v39, 0.0  ;;  %v1913_v31 = vmul.f32 %v1901_v39, %v1901_v39  ;;  %4508 = vmatprep.subr.bf16.mxu1 %v4673_v10 }
0x1259   :  { %1908 = vadd.xlane.f32.xlu0 %v1907_v42 }
0x125a   :  { %v1902_v32 = vadd.f32 %v1900_v30, %v5094_v22  ;;  %v1915_v33 = vsel %vm165_vm0, %v1913_v31, 0.0 }
0x125b   :  { %4509 = vmatpush3.bf16.msra.mxu1 %v4590_v38 }
0x125c   :  { %v1910_v34 = vsel %vm165_vm0, %v1902_v32, 0.0  ;;  %v1914_v36 = vmul.f32 %v1902_v32, %v1902_v32  ;;  %4526 = vmatprep.subr.bf16.mxu1 %v4673_v10 }
0x125d   :  { %1916 = vadd.xlane.f32.xlu0 %v1915_v33  ;;  %1911 = vadd.xlane.f32.xlu1 %v1910_v34 }
0x125e   :  { %v1918_v37 = vsel %vm165_vm0, %v1914_v36, 0.0 }
0x1261   :  { %1919 = vadd.xlane.f32.xlu1 %v1918_v37 }
0x12e2   :  { %v1909_v22 = vpop.xlane.xlu0 %1908 }
0x12e3   :  { %v1921_v43 = vmul.f32 0.03125, %v1909_v22  ;;  %v4193_v22 = vld [vmem:[%s6641_s14 + $0x1] ss:$0 sm:$0xff] }
0x12e5   :  { %v1925_v24 = vmul.f32 %v1921_v43, %v1921_v43  ;;  %v1931_v59 = vsub.f32 %v1901_v39, %v1921_v43 }
0x12e6   :  { %v1917_v44 = vpop.xlane.xlu0 %1916  ;;  %v1912_v46 = vpop.xlane.xlu1 %1911 }
0x12e7   :  { %v1923_v47 = vmul.f32 0.03125, %v1917_v44  ;;  %v1922_v48 = vmul.f32 0.03125, %v1912_v46 }
0x12e9   :  { %v1927_v49 = vsub.f32 %v1923_v47, %v1925_v24  ;;  %v1926_v53 = vmul.f32 %v1922_v48, %v1922_v48  ;;  %v1932_v62 = vsub.f32 %v1902_v32, %v1922_v48 }
0x12ea   :  { %v1920_v51 = vpop.xlane.xlu1 %1919 }
0x12eb   :  { %v1929_v52 = vmax.f32 %v1927_v49, 0.0  ;;  %v1924_v54 = vmul.f32 0.03125, %v1920_v51 }
0x12ed   :  { %v1933_v55 = vadd.f32 1e-12, %v1929_v52  ;;  %v1928_v56 = vsub.f32 %v1924_v54, %v1926_v53 }
0x12ef   :  { %4646 = vrsqrt.f32 %v1933_v55  ;;  %v1930_v57 = vmax.f32 %v1928_v56, 0.0 }
0x12f1   :  { %v1934_v58 = vadd.f32 1e-12, %v1930_v57 }
0x12f3   :  { %4648 = vrsqrt.f32 %v1934_v58  ;;  %v4595_v58 = vld [vmem:[%s6644_s17 + $0x8] sm:$0xff]  }
0x12fc   :  { %v4647_v60 = vpop.eup %4646 }
0x12fd   :  { %v1937_v35 = vmul.f32 %v4647_v60, %v1931_v59  ;;  %v4596_v59 = vld [vmem:[%s6644_s17] sm:$0xff]   ;;  %v2256_v60 = vld [vmem:[%s6647_s20 + $0x8] sm:$0x7f]  ;;  %s4680_s17 = smov 122  }
0x12ff   :  { %v1945_v0 = vmul.f32 %v4173_v61, %v1937_v35  ;;  %v2255_v35 = vld [vmem:[%s6647_s20] sm:$0xff] }
0x1300   :  { %v4649_v63 = vpop.eup %4648 }
0x1301   :  { %v1938_v41 = vmul.f32 %v4649_v63, %v1932_v62  ;;  %v1953_v3 = vadd.f32 %v4174_v1, %v1945_v0  ;;  %v2317_v62 = vld [vmem:[%s6649_s22 + $0x8] sm:$0x7f]  ;;  %v2330_v63 = vld [vmem:[%s6648_s21] sm:$0xff]  ;;  %v4209_v0 = vld [vmem:[%s6648_s21 + $0x10] sm:$0xff] }
0x1303   :  { %v1946_v2 = vmul.f32 %v4173_v61, %v1938_v41  ;;  %v2316_v61 = vld [vmem:[%s6649_s22] sm:$0xff]  ;;  %v4221_v41 = vld [vmem:[%s6648_s21 + $0x70] sm:$0xff] }
0x1305   :  { %v1954_v4 = vadd.f32 %v4174_v1, %v1946_v2  ;;  %v4223_v1 = vld [vmem:[%s6648_s21 + $0x80] sm:$0xff] }
0x1306   :  { %v4211_v2 = vld [vmem:[%s6648_s21 + $0x20] sm:$0xff] }
0x1307   :  { %v1955_v5 = vpack.c.bf16 %v1954_v4, %v1953_v3 }
0x1309   :  { %4511 = vmatmul.mubr.msk.bf16.vlgmr.msra.gmra.mxu1 %vm165_vm0, %v1955_v5  ;;  %v4227_v5 = vld [vmem:[%s6648_s21 + $0xa0] sm:$0xff] }
0x130a   :  { %4530 = vmatprep.mubr.msk.bf16.mxu1 %vm4674_vm1, %v4673_v10  ;;  %4527 = vmatpush3.bf16.msra.mxu1 %v4595_v58 }
0x130b   :  { %4528 = vmatprep.subr.bf16.mxu1 %v4673_v10 }
0x130e   :  { %4529 = vmatpush3.bf16.msra.mxu1 %v4596_v59  ;;  %v4202_v59 = vld [vmem:[%s6643_s16 + $0x1] ss:$0 sm:$0xff] }
0x130f   :  { %4534 = vmatprep.subr.bf16.mxu1 %v4673_v10 }
0x13c9   :  { %v2018_v12 = vpop.f32.mrf.mxu1 }
0x13ca   :  { %v2019_v13 = vadd.f32 %v4180_v11, %v2018_v12  ;;  %v4233_v12 = vld [vmem:[%s6648_s21 + $0xd0] sm:$0xff] }
0x13cb   :  { %v4512_v14 = vpop.f32.mrf.mxu1 }
0x13cc   :  { %v2025_v16 = vmul.f32 %v2019_v13, %v2019_v13  ;;  %v4235_v14 = vld [vmem:[%s6648_s21 + $0xe0] sm:$0xff] }
0x13cd   :  { %v2021_v17 = vpop.f32.mrf.mxu1 }
0x13ce   :  { %v2027_v19 = vmul.f32 %v2025_v16, %v2019_v13  ;;  %v2022_v20 = vadd.f32 %v4180_v11, %v2021_v17  ;;  %v4219_v11 = vld [vmem:[%s6648_s21 + $0x60] sm:$0xff]  ;;  %v4210_v16 = vld [vmem:[%s6648_s21 + $0x18] sm:$0x7f]  ;;  %v4224_v17 = vld [vmem:[%s6648_s21 + $0x88] sm:$0x7f] }
0x13cf   :  { %v4513_v23 = vpop.f32.mrf.mxu1 }
0x13d0   :  { %v2029_v25 = vmul.f32 0.044715, %v2027_v19  ;;  %v2026_v26 = vmul.f32 %v2022_v20, %v2022_v20  ;;  %v4212_v19 = vld [vmem:[%s6648_s21 + $0x28] sm:$0x7f]  ;;  %v4214_v23 = vld [vmem:[%s6648_s21 + $0x38] sm:$0x7f] }
0x13d2   :  { %v2031_v27 = vadd.f32 %v2029_v25, %v2019_v13  ;;  %v2028_v28 = vmul.f32 %v2026_v26, %v2022_v20  ;;  %v4230_v25 = vld [vmem:[%s6648_s21 + $0xb8] sm:$0x7f]  ;;  %v4216_v26 = vld [vmem:[%s6648_s21 + $0x48] sm:$0x7f] }
0x13d4   :  { %v2033_v39 = vmul.f32 0.7978846, %v2031_v27  ;;  %v2030_v29 = vmul.f32 0.044715, %v2028_v28  ;;  %v4234_v27 = vld [vmem:[%s6648_s21 + $0xd8] sm:$0x7f] }
0x13d5   :  { %v4218_v28 = vld [vmem:[%s6648_s21 + $0x58] sm:$0x7f] }
0x13d6   :  { %4650 = vtanh.f32 %v2033_v39  ;;  %v2032_v40 = vadd.f32 %v2030_v29, %v2022_v20  ;;  %v4220_v39 = vld [vmem:[%s6648_s21 + $0x68] sm:$0x7f]  ;;  %v4222_v29 = vld [vmem:[%s6648_s21 + $0x78] sm:$0x7f] }
0x13d8   :  { %v2034_v30 = vmul.f32 0.7978846, %v2032_v40  ;;  %v4226_v40 = vld [vmem:[%s6648_s21 + $0x98] sm:$0x7f] }
0x13da   :  { %4652 = vtanh.f32 %v2034_v30 }
0x13e3   :  { %v4651_v42 = vpop.eup %4650 }
0x13e4   :  { %v2037_v31 = vadd.f32 1.0, %v4651_v42 }
0x13e6   :  { %v2039_v33 = vmul.f32 0.5, %v2037_v31 }
0x13e7   :  { %v4653_v32 = vpop.eup %4652 }
0x13e8   :  { %v2038_v34 = vadd.f32 1.0, %v4653_v32  ;;  %v2041_v37 = vmul.f32 %v2039_v33, %v2019_v13  ;;  %v2331_v13 = vld [vmem:[%s6648_s21 + $0x8] sm:$0x7f] }
0x13ea   :  { %v2040_v36 = vmul.f32 0.5, %v2038_v34 }
0x13ec   :  { %v2042_v21 = vmul.f32 %v2040_v36, %v2022_v20  ;;  %v4228_v20 = vld [vmem:[%s6648_s21 + $0xa8] sm:$0x7f] }
0x13ee   :  { %v2043_v38 = vpack.c.bf16 %v2042_v21, %v2041_v37 }
0x13f0   :  { %4523 = vmatmul.mubr.msk.bf16.vlgmr.msra.gmra.mxu0 %vm1096_vm12, %v2043_v38 }
0x14b0   :  { %v2122_v43 = vpop.f32.mrf.mxu0 }
0x14b1   :  { %v2123_v44 = vadd.f32 %v4193_v22, %v2122_v43 }
0x14b2   :  { %v4524_v46 = vpop.f32.mrf.mxu0 }
0x14b3   :  { %v5248_v24 = vadd.f32 %v2123_v44, %v1953_v3  ;;  %v4225_v3 = vld [vmem:[%s6648_s21 + $0x90] sm:$0xff] }
0x14b4   :  { %v2125_v47 = vpop.f32.mrf.mxu0 }
0x14b5   :  { %v2126_v48 = vadd.f32 %v4193_v22, %v2125_v47  ;;  %v2135_v49 = vsel %vm165_vm0, %v5248_v24, 0.0  ;;  %v2141_v51 = vmul.f32 %v5248_v24, %v5248_v24 }
0x14b6   :  { %2136 = vadd.xlane.f32.xlu0 %v2135_v49  ;;  %v4525_v52 = vpop.f32.mrf.mxu0 }
0x14b7   :  { %v5254_v53 = vadd.f32 %v2126_v48, %v1954_v4  ;;  %v2143_v54 = vsel %vm165_vm0, %v2141_v51, 0.0  ;;  %v4213_v4 = vld [vmem:[%s6648_s21 + $0x30] sm:$0xff] }
0x14b9   :  { %v2138_v55 = vsel %vm165_vm0, %v5254_v53, 0.0  ;;  %v2142_v56 = vmul.f32 %v5254_v53, %v5254_v53 }
0x14ba   :  { %2144 = vadd.xlane.f32.xlu0 %v2143_v54  ;;  %2139 = vadd.xlane.f32.xlu1 %v2138_v55  ;;  %v4201_v54 = vld [vmem:[%s6642_s15 + $0x1] ss:$0 sm:$0xff] }
0x14bb   :  { %v2146_v57 = vsel %vm165_vm0, %v2142_v56, 0.0 }
0x14be   :  { %2147 = vadd.xlane.f32.xlu1 %v2146_v57 }
0x14cf   :  { %2264 = vperm.xlu1 %4554, %v2256_v60  }
0x14d0   :  { %2259 = vperm.xlu0 %4553, %v2255_v35  }
0x14d3   :  { %2320 = vperm.xlu1 %4554, %v2316_v61  }
0x14d4   :  { %2325 = vperm.xlu0 %4553, %v2317_v62  }
0x14d7   :  { %2338 = vperm.xlu1 %4554, %v2330_v63  }
0x14d8   :  { %2511 = vperm.xlu0 %4553, %v4221_v41  }
0x14db   :  { %2361 = vperm.xlu1 %4554, %v4209_v0  }
0x14dc   :  { %2536 = vperm.xlu0 %4553, %v4223_v1  }
0x14df   :  { %2386 = vperm.xlu1 %4554, %v4211_v2  }
0x14e0   :  { %2561 = vperm.xlu0 %4553, %v4225_v3  }
0x14e3   :  { %2411 = vperm.xlu1 %4554, %v4213_v4  }
0x14e4   :  { %2586 = vperm.xlu0 %4553, %v4227_v5  }
0x14e7   :  { %2436 = vperm.xlu1 %4554, %v4215_v6  }
0x14e8   :  { %2611 = vperm.xlu0 %4553, %v4229_v7  }
0x14eb   :  { %2461 = vperm.xlu1 %4554, %v4217_v8  }
0x14ec   :  { %2636 = vperm.xlu0 %4553, %v4231_v9  }
0x14ef   :  { %2486 = vperm.xlu1 %4554, %v4219_v11  }
0x14f0   :  { %2661 = vperm.xlu0 %4553, %v4233_v12  }
0x14f3   :  { %2343 = vperm.xlu1 %4554, %v2331_v13  }
0x14f4   :  { %2686 = vperm.xlu0 %4553, %v4235_v14  }
0x14f7   :  { %2366 = vperm.xlu1 %4554, %v4210_v16  }
0x14f8   :  { %2541 = vperm.xlu0 %4553, %v4224_v17  }
0x14fb   :  { %2391 = vperm.xlu1 %4554, %v4212_v19   ;;  %v4203_v19 = vld [vmem:[%s6790_s27] ss:$0 sm:$0xff] }
0x14fc   :  { %2591 = vperm.xlu0 %4553, %v4228_v20  }
0x14ff   :  { %2416 = vperm.xlu1 %4554, %v4214_v23  }
0x1500   :  { %2616 = vperm.xlu0 %4553, %v4230_v25  }
0x1503   :  { %2441 = vperm.xlu1 %4554, %v4216_v26  }
0x1504   :  { %2666 = vperm.xlu0 %4553, %v4234_v27  }
0x1507   :  { %2466 = vperm.xlu1 %4554, %v4218_v28  }
0x150b   :  { %2491 = vperm.xlu1 %4554, %v4220_v39  }
0x150f   :  { %2516 = vperm.xlu1 %4554, %v4222_v29  }
0x1513   :  { %2566 = vperm.xlu1 %4554, %v4226_v40  }
0x153f   :  { %v2137_v30 = vpop.xlane.xlu0 %2136 }
0x1540   :  { %v2149_v42 = vmul.f32 0.03125, %v2137_v30 }
0x1542   :  { %v2153_v33 = vmul.f32 %v2149_v42, %v2149_v42  ;;  %v2159_v49 = vsub.f32 %v5248_v24, %v2149_v42  ;;  %v5430_v42 = vsub.s32 0, %v4941_v15 }
0x1543   :  { %v2145_v31 = vpop.xlane.xlu0 %2144  ;;  %v2140_v32 = vpop.xlane.xlu1 %2139 }
0x1544   :  { %v2151_v34 = vmul.f32 0.03125, %v2145_v31  ;;  %v2150_v36 = vmul.f32 0.03125, %v2140_v32  ;;  %v5435_v32 = vsub.s32 1, %v4941_v15 }
0x1546   :  { %v2155_v37 = vsub.f32 %v2151_v34, %v2153_v33  ;;  %v2154_v22 = vmul.f32 %v2150_v36, %v2150_v36  ;;  %v2160_v55 = vsub.f32 %v5254_v53, %v2150_v36  ;;  %v4597_v53 = vld [vmem:[%s6646_s19] sm:$0xff]   ;;  %v5438_v33 = vsub.s32 2, %v4941_v15 }
0x1547   :  { %v2148_v21 = vpop.xlane.xlu1 %2147  ;;  %v5441_v34 = vsub.s32 3, %v4941_v15 }
0x1548   :  { %v2157_v38 = vmax.f32 %v2155_v37, 0.0  ;;  %v2152_v43 = vmul.f32 0.03125, %v2148_v21  ;;  %v5446_v21 = vsub.s32 4, %v4941_v15 }
0x154a   :  { %v2161_v44 = vadd.f32 1e-12, %v2157_v38  ;;  %v2156_v46 = vsub.f32 %v2152_v43, %v2154_v22  ;;  %v5449_v38 = vsub.s32 5, %v4941_v15  ;;  %v5455_v43 = vsub.s32 6, %v4941_v15 }
0x154b   :  { %v2265_v63 = vpop.permute.xlu1 %2264  ;;  %v2260_v5 = vpop.permute.xlu0 %2259 }
0x154c   :  { %4654 = vrsqrt.f32 %v2161_v44  ;;  %v2158_v47 = vmax.f32 %v2156_v46, 0.0  ;;  %v4232_v46 = vld [vmem:[%s6648_s21 + $0xc8] sm:$0x7f] }
0x154e   :  { %v2162_v48 = vadd.f32 1e-12, %v2158_v47 }
0x154f   :  { %v2321_v41 = vpop.permute.xlu1 %2320  ;;  %v5394_v6 = vpop.permute.xlu0 %2325 }
0x1550   :  { %4656 = vrsqrt.f32 %v2162_v48 }
0x1553   :  { %v5382_v0 = vpop.permute.xlu1 %2338  ;;  %v5398_v8 = vpop.permute.xlu0 %2511 }
0x1554   :  { %6775 = vst [vmem:[#allocation7_spill] sm:$0xff] %v5382_v0  ;;  %6782 = vst [vmem:[#allocation14_spill] sm:$0xff] %v5398_v8 }
0x1557   :  { %v5384_v1 = vpop.permute.xlu1 %2361  ;;  %v5402_v11 = vpop.permute.xlu0 %2536 }
0x1558   :  { %6776 = vst [vmem:[#allocation8_spill] sm:$0xff] %v5384_v1  ;;  %6784 = vst [vmem:[#allocation16_spill] sm:$0xff] %v5402_v11 }
0x1559   :  { %v4655_v51 = vpop.eup %4654 }
0x155a   :  { %v2165_v52 = vmul.f32 %v4655_v51, %v2159_v49 }
0x155b   :  { %v5386_v2 = vpop.permute.xlu1 %2386  ;;  %v5406_v13 = vpop.permute.xlu0 %2561 }
0x155c   :  { %v2173_v58 = vmul.f32 %v4201_v54, %v2165_v52  ;;  %6777 = vst [vmem:[#allocation9_spill] sm:$0xff] %v5386_v2  ;;  %6786 = vst [vmem:[#allocation18_spill] sm:$0xff] %v5406_v13 }
0x155d   :  { %v4657_v56 = vpop.eup %4656 }
0x155e   :  { %v2166_v57 = vmul.f32 %v4657_v56, %v2160_v55  ;;  %v2181_v35 = vadd.f32 %v4202_v59, %v2173_v58  ;;  %v5478_v58 = vsub.s32 7, %v4941_v15 }
0x155f   :  { %v5388_v3 = vpop.permute.xlu1 %2411  ;;  %v5410_v16 = vpop.permute.xlu0 %2586 }
0x1560   :  { %v2174_v60 = vmul.f32 %v4201_v54, %v2166_v57  ;;  %6778 = vst [vmem:[#allocation10_spill] sm:$0xff] %v5388_v3  ;;  %6788 = vst [vmem:[#allocation20_spill] sm:$0xff] %v5410_v16 }
0x1561   :  { %6795 = vst [vmem:[#allocation26_spill] sm:$0xff] %v5478_v58 }
0x1562   :  { %v2182_v61 = vadd.f32 %v4202_v59, %v2174_v60 }
0x1563   :  { %v5390_v4 = vpop.permute.xlu1 %2436  ;;  %v5417_v25 = vpop.permute.xlu0 %2611 }
0x1564   :  { %v2183_v62 = vpack.c.bf16 %v2182_v61, %v2181_v35  ;;  %6779 = vst [vmem:[#allocation11_spill] sm:$0xff] %v5390_v4  ;;  %6791 = vst [vmem:[#allocation22_spill] sm:$0xff] %v5417_v25 }
0x1566   :  { %4531 = vmatmul.mubr.msk.bf16.vlgmr.msra.gmra.mxu1 %vm165_vm0, %v2183_v62  ;;  %v2208_v24 = vsel %vm165_vm0, %v2183_v62, 0 }
0x1567   :  { %4535 = vmatpush3.bf16.xpose.msra.mxu1 %v2208_v24  ;;  %4536 = vmatprep.mubr.msk.bf16.mxu1 %vm4674_vm1, %v4673_v10  ;;  %v5392_v10 = vpop.permute.xlu1 %2461  ;;  %v5427_v40 = vpop.permute.xlu0 %2636 }
0x1568   :  { %6780 = vst [vmem:[#allocation12_spill] sm:$0xff] %v5392_v10  ;;  %6793 = vst [vmem:[#allocation24_spill] sm:$0xff] %v5427_v40 }
0x156b   :  { %v5396_v7 = vpop.permute.xlu1 %2486  ;;  %v5469_v52 = vpop.permute.xlu0 %2661 }
0x156c   :  { %6781 = vst [vmem:[#allocation13_spill] sm:$0xff] %v5396_v7 }
0x156e   :  { %4537 = vmatmul.mubr.msk.bf16.vlgmr.msra.gmra.mxu1 %vm165_vm0, %v4597_v53 }
0x156f   :  { %v5400_v9 = vpop.permute.xlu1 %2343 }
0x1570   :  { %6783 = vst [vmem:[#allocation15_spill] sm:$0xff] %v5400_v9 }
0x1573   :  { %v5404_v12 = vpop.permute.xlu1 %2366 }
0x1574   :  { %6785 = vst [vmem:[#allocation17_spill] sm:$0xff] %v5404_v12 }
0x1577   :  { %v5408_v14 = vpop.permute.xlu1 %2391 }
0x1578   :  { %6787 = vst [vmem:[#allocation19_spill] sm:$0xff] %v5408_v14 }
0x157b   :  { %v5412_v17 = vpop.permute.xlu1 %2416 }
0x157c   :  { %6789 = vst [vmem:[#allocation21_spill] sm:$0xff] %v5412_v17 }
0x157f   :  { %v5422_v27 = vpop.permute.xlu1 %2441 }
0x1580   :  { %6792 = vst [vmem:[#allocation23_spill] sm:$0xff] %v5422_v27 }
0x1583   :  { %v5443_v36 = vpop.permute.xlu1 %2466 }
0x1584   :  { %6794 = vst [vmem:[#allocation25_spill] sm:$0xff] %v5443_v36 }
0x1626   :  { %v2244_v20 = vpop.f32.mrf.mxu1 }
0x1627   :  { %v2245_v23 = vadd.f32 %v4203_v19, %v2244_v20 }
0x1628   :  { %v4532_v26 = vpop.f32.mrf.mxu1 }
0x1629   :  { %2251 = vst [vmem:[%s6652_s25] sm:$0xff] %v2245_v23 }
0x162a   :  { %v2247_v28 = vpop.f32.mrf.mxu1 }
0x162b   :  { %v2248_v39 = vadd.f32 %v4203_v19, %v2247_v28 }
0x162c   :  { %v4533_v29 = vpop.f32.mrf.mxu1 }
0x162d   :  { %2252 = vst [vmem:[%s6652_s25 + $0x8] sm:$0xff] %v2248_v39  ;;  %s4678_s25 = smov 126  }
0x162e   :  { %v2309_v30 = vpop.f32.mrf.mxu1 }
0x162f   :  { %v5432_v31 = vadd.f32 %v2309_v30, %v2260_v5  ;;  %v4236_v5 = vld [vmem:[%s6648_s21 + $0xe8] sm:$0x7f]  ;;  %s4679_s21 = smov 124  }
0x1630   :  { %v4538_v37 = vpop.f32.mrf.mxu1 }
0x1631   :  { %v5452_v22 = vadd.f32 %v2321_v41, %v5432_v31  ;;  %2704 = vrot.lane.b32.xlu1 %v5432_v31, %s4678_s25  ;;  %v5489_v41 = vpop.permute.xlu1 %2491  ;;  %v5501_v37 = vpop.permute.xlu0 %2686 }
0x1632   :  { %v2312_v44 = vpop.f32.mrf.mxu1  ;;  %6796 = vst [vmem:[#allocation27_spill] sm:$0xff] %v5489_v41 }
0x1633   :  { %v2335_v47 = vrot.slane %v5452_v22, %v5430_v42  ;;  %v2358_v48 = vrot.slane %v5452_v22, %v5435_v32  ;;  %v2383_v49 = vrot.slane %v5452_v22, %v5438_v33  ;;  %v2408_v51 = vrot.slane %v5452_v22, %v5441_v34 }
0x1634   :  { %v2433_v54 = vrot.slane %v5452_v22, %v5446_v21  ;;  %v2458_v55 = vrot.slane %v5452_v22, %v5449_v38  ;;  %v5475_v56 = vadd.f32 %v2312_v44, %v2265_v63  ;;  %v4539_v57 = vpop.f32.mrf.mxu1  ;;  %v2483_v61 = vrot.slane %v5452_v22, %v5455_v43 }
0x1635   :  { %v2346_v59 = vadd.f32 %v5382_v0, %v2335_v47  ;;  %v2347_v60 = vadd.f32 %v5400_v9, %v2335_v47  ;;  %v2369_v35 = vadd.f32 %v5384_v1, %v2358_v48  ;;  %2641 = vperm.xlu1 %4554, %v4232_v46   ;;  %v2370_v62 = vadd.f32 %v5404_v12, %v2358_v48 }
0x1636   :  { %v2394_v24 = vadd.f32 %v5386_v2, %v2383_v49  ;;  %v2395_v53 = vadd.f32 %v5408_v14, %v2383_v49  ;;  %v2419_v63 = vadd.f32 %v5388_v3, %v2408_v51  ;;  %2706 = vrot.lane.b32.xlu0 %v5475_v56, %s4678_s25  ;;  %v2420_v19 = vadd.f32 %v5412_v17, %v2408_v51 }
0x1637   :  { %vm2348_vm0 = vcmp.gt.f32.partialorder %v2346_v59, -inf  ;;  %vm2349_vm1 = vcmp.gt.f32.partialorder %v2347_v60, -inf  ;;  %v2444_v20 = vadd.f32 %v5390_v4, %v2433_v54  ;;  %v2445_v28 = vadd.f32 %v5422_v27, %v2433_v54 }
0x1638   :  { %v2350_v23 = vsel %vm2348_vm0, %v2346_v59, -inf  ;;  %v2351_v26 = vsel %vm2349_vm1, %v2347_v60, -inf  ;;  %v2469_v39 = vadd.f32 %v5392_v10, %v2458_v55  ;;  %v2470_v29 = vadd.f32 %v5443_v36, %v2458_v55  ;;  %v5512_v60 = vpop.permute.xlu1 %2516 }
0x1639   :  { %vm2371_vm4 = vcmp.gt.f32.partialorder %v2369_v35, %v2350_v23  ;;  %vm2372_vm13 = vcmp.gt.f32.partialorder %v2370_v62, %v2351_v26  ;;  %v2494_v30 = vadd.f32 %v5396_v7, %v2483_v61  ;;  %2691 = vperm.xlu1 %4554, %v4236_v5   ;;  %v5508_v49 = vadd.f32 %v5394_v6, %v5475_v56 }
0x163a   :  { %v2373_v44 = vsel %vm2371_vm4, %v2369_v35, %v2350_v23  ;;  %v2374_v46 = vsel %vm2372_vm13, %v2370_v62, %v2351_v26  ;;  %v2375_v47 = vsel %vm2371_vm4, 1, %v6660_v45  ;;  %v2376_v48 = vsel %vm2372_vm13, 1, %v6660_v45  ;;  %2897 = vrot.lane.b32.xlu0 %v5475_v56, %s4679_s21  ;;  %6797 = vst [vmem:[#allocation28_spill] sm:$0xff] %v5512_v60 }
0x163b   :  { %vm2396_vm14 = vcmp.gt.f32.partialorder %v2394_v24, %v2373_v44  ;;  %vm2397_vm15 = vcmp.gt.f32.partialorder %v2395_v53, %v2374_v46  ;;  %v2508_v51 = vrot.slane %v5452_v22, %v5478_v58  ;;  %v2495_v35 = vadd.f32 %v5489_v41, %v2483_v61 }
0x163c   :  { %v2398_v54 = vsel %vm2396_vm14, %v2394_v24, %v2373_v44  ;;  %v2399_v55 = vsel %vm2397_vm15, %v2395_v53, %v2374_v46  ;;  %v2400_v57 = vsel %vm2396_vm14, 2, %v2375_v47  ;;  %v2401_v59 = vsel %vm2397_vm15, 2, %v2376_v48  ;;  %v5521_v44 = vpop.permute.xlu0 %2541 }
0x163d   :  { %vm2421_vm2 = vcmp.gt.f32.partialorder %v2419_v63, %v2398_v54  ;;  %vm2422_vm3 = vcmp.gt.f32.partialorder %v2420_v19, %v2399_v55  ;;  %v2519_v62 = vadd.f32 %v5398_v8, %v2508_v51  ;;  %2895 = vrot.lane.b32.xlu1 %v5432_v31, %s4679_s21  ;;  %v2520_v24 = vadd.f32 %v5512_v60, %v2508_v51 }
0x163e   :  { %v2423_v5 = vsel %vm2421_vm2, %v2419_v63, %v2398_v54  ;;  %v2424_v6 = vsel %vm2422_vm3, %v2420_v19, %v2399_v55  ;;  %v2425_v23 = vsel %vm2421_vm2, 3, %v2400_v57  ;;  %v2426_v26 = vsel %vm2422_vm3, 3, %v2401_v59  ;;  %3088 = vrot.lane.b32.xlu0 %v5475_v56, %s4680_s17  ;;  %6798 = vst [vmem:[#allocation29_spill] sm:$0xff] %v5521_v44 }
0x163f   :  { %vm2446_vm5 = vcmp.gt.f32.partialorder %v2444_v20, %v2423_v5  ;;  %vm2447_vm6 = vcmp.gt.f32.partialorder %v2445_v28, %v2424_v6  ;;  %v2533_v53 = vrot.slane %v5508_v49, %v5430_v42  ;;  %v2558_v19 = vrot.slane %v5508_v49, %v5435_v32 }
0x1640   :  { %v2448_v61 = vsel %vm2446_vm5, %v2444_v20, %v2423_v5  ;;  %v2449_v46 = vsel %vm2447_vm6, %v2445_v28, %v2424_v6  ;;  %v2450_v47 = vsel %vm2446_vm5, 4, %v2425_v23  ;;  %v2451_v48 = vsel %vm2447_vm6, 4, %v2426_v26  ;;  %v5531_v26 = vpop.permute.xlu1 %2566 }
0x1641   :  { %vm2471_vm7 = vcmp.gt.f32.partialorder %v2469_v39, %v2448_v61  ;;  %vm2472_vm8 = vcmp.gt.f32.partialorder %v2470_v29, %v2449_v46  ;;  %v2544_v63 = vadd.f32 %v5402_v11, %v2533_v53  ;;  %3086 = vrot.lane.b32.xlu1 %v5432_v31, %s4680_s17  ;;  %v2545_v20 = vadd.f32 %v5521_v44, %v2533_v53 }
0x1642   :  { %v2473_v54 = vsel %vm2471_vm7, %v2469_v39, %v2448_v61  ;;  %v2474_v51 = vsel %vm2472_vm8, %v2470_v29, %v2449_v46  ;;  %v2475_v55 = vsel %vm2471_vm7, 5, %v2450_v47  ;;  %v2476_v57 = vsel %vm2472_vm8, 5, %v2451_v48  ;;  %3279 = vrot.lane.b32.xlu0 %v5475_v56, %s4681_s6  ;;  %6799 = vst [vmem:[#allocation30_spill] sm:$0xff] %v5531_v26  ;;  %v5536_v61 = vpop.permute.xlu0 %2591 }
0x1643   :  { %vm2496_vm9 = vcmp.gt.f32.partialorder %v2494_v30, %v2473_v54  ;;  %vm2497_vm10 = vcmp.gt.f32.partialorder %v2495_v35, %v2474_v51  ;;  %v2583_v28 = vrot.slane %v5508_v49, %v5438_v33  ;;  %v2569_v39 = vadd.f32 %v5406_v13, %v2558_v19  ;;  %6800 = vst [vmem:[#allocation31_spill] sm:$0xff] %v5536_v61 }
0x1644   :  { %v2500_v59 = vsel %vm2496_vm9, 6, %v2475_v55  ;;  %v2501_v5 = vsel %vm2497_vm10, 6, %v2476_v57  ;;  %v2498_v6 = vsel %vm2496_vm9, %v2494_v30, %v2473_v54  ;;  %v2499_v23 = vsel %vm2497_vm10, %v2495_v35, %v2474_v51 }
0x1645   :  { %vm2521_vm11 = vcmp.gt.f32.partialorder %v2519_v62, %v2498_v6  ;;  %vm2522_vm12 = vcmp.gt.f32.partialorder %v2520_v24, %v2499_v23  ;;  %v2594_v29 = vadd.f32 %v5410_v16, %v2583_v28  ;;  %3277 = vrot.lane.b32.xlu1 %v5432_v31, %s4681_s6  ;;  %v2570_v30 = vadd.f32 %v5531_v26, %v2558_v19 }
0x1646   :  { %v2523_v53 = vsel %vm2521_vm11, %v2519_v62, %v2498_v6  ;;  %v2525_v46 = vsel %vm2521_vm11, 7, %v2500_v59  ;;  %v2524_v47 = vsel %vm2522_vm12, %v2520_v24, %v2499_v23  ;;  %v2526_v48 = vsel %vm2522_vm12, 7, %v2501_v5  ;;  %3470 = vrot.lane.b32.xlu0 %v5475_v56, %s4682_s30  ;;  %v5555_v23 = vpop.permute.xlu0 %2616 }
0x1647   :  { %vm2546_vm0 = vcmp.gt.f32.partialorder %v2544_v63, %v2523_v53  ;;  %vm2547_vm1 = vcmp.gt.f32.partialorder %v2545_v20, %v2524_v47  ;;  %v2608_v35 = vrot.slane %v5508_v49, %v5441_v34  ;;  %v2595_v62 = vadd.f32 %v5536_v61, %v2583_v28  ;;  %6801 = vst [vmem:[#allocation32_spill] sm:$0xff] %v5555_v23 }
0x1648   :  { %v2548_v54 = vsel %vm2546_vm0, %v2544_v63, %v2523_v53  ;;  %v2549_v51 = vsel %vm2547_vm1, %v2545_v20, %v2524_v47  ;;  %v2550_v55 = vsel %vm2546_vm0, 8, %v2525_v46  ;;  %v2551_v57 = vsel %vm2547_vm1, 8, %v2526_v48  ;;  %v3864_v63 = vld [vmem:[%s6650_s23 + $0x8] sm:$0x7f] }
0x1649   :  { %vm2571_vm4 = vcmp.gt.f32.partialorder %v2569_v39, %v2548_v54  ;;  %vm2572_vm13 = vcmp.gt.f32.partialorder %v2570_v30, %v2549_v51  ;;  %3468 = vrot.lane.b32.xlu1 %v5432_v31, %s4682_s30  ;;  %v5546_v24 = vrot.slane %v5508_v49, %v5446_v21  ;;  %v2619_v20 = vadd.f32 %v5417_v25, %v2608_v35 }
0x164a   :  { %v2573_v59 = vsel %vm2571_vm4, %v2569_v39, %v2548_v54  ;;  %v2575_v5 = vsel %vm2571_vm4, 9, %v2550_v55  ;;  %v2574_v19 = vsel %vm2572_vm13, %v2570_v30, %v2549_v51  ;;  %v2576_v6 = vsel %vm2572_vm13, 9, %v2551_v57  ;;  %3661 = vrot.lane.b32.xlu0 %v5475_v56, %s4683_s0  ;;  %v3863_v51 = vld [vmem:[%s6650_s23] sm:$0xff] }
0x164b   :  { %vm2596_vm14 = vcmp.gt.f32.partialorder %v2594_v29, %v2573_v59  ;;  %vm2597_vm15 = vcmp.gt.f32.partialorder %v2595_v62, %v2574_v19  ;;  %v2658_v28 = vrot.slane %v5508_v49, %v5449_v38  ;;  %v2644_v47 = vadd.f32 %v5427_v40, %v5546_v24 }
0x164c   :  { %v2600_v39 = vsel %vm2596_vm14, 10, %v2575_v5  ;;  %v2601_v53 = vsel %vm2597_vm15, 10, %v2576_v6  ;;  %v2598_v46 = vsel %vm2596_vm14, %v2594_v29, %v2573_v59  ;;  %v5562_v48 = vrot.slane %v5508_v49, %v5455_v43 }
0x164d   :  { %3659 = vrot.lane.b32.xlu1 %v5432_v31, %s4683_s0  ;;  %vm2621_vm2 = vcmp.gt.f32.partialorder %v2619_v20, %v2598_v46  ;;  %v2599_v30 = vsel %vm2597_vm15, %v2595_v62, %v2574_v19  ;;  %v2620_v54 = vadd.f32 %v5555_v23, %v2608_v35  ;;  %v2669_v57 = vadd.f32 %v5469_v52, %v2658_v28 }
0x164e   :  { %3872 = vperm.xlu0 %4553, %v3864_v63   ;;  %v2623_v55 = vsel %vm2621_vm2, %v2619_v20, %v2598_v46  ;;  %v2625_v29 = vsel %vm2621_vm2, 11, %v2600_v39  ;;  %v2694_v35 = vadd.f32 %v5501_v37, %v5562_v48  ;;  %v5580_v46 = vpop.permute.xlu0 %2666 }
0x164f   :  { %vm2646_vm3 = vcmp.gt.f32.partialorder %v2644_v47, %v2623_v55  ;;  %vm2622_vm5 = vcmp.gt.f32.partialorder %v2620_v54, %v2599_v30 }
0x1650   :  { %v2648_v59 = vsel %vm2646_vm3, %v2644_v47, %v2623_v55  ;;  %v5570_v5 = vsel %vm2622_vm5, 11, %v2601_v53  ;;  %v2650_v6 = vsel %vm2646_vm3, 12, %v2625_v29  ;;  %v2624_v55 = vsel %vm2622_vm5, %v2620_v54, %v2599_v30 }
0x1651   :  { %3867 = vperm.xlu1 %4554, %v3863_v51   ;;  %vm2671_vm6 = vcmp.gt.f32.partialorder %v2669_v57, %v2648_v59  ;;  %v2670_v29 = vadd.f32 %v5580_v46, %v2658_v28 }
0x1652   :  { %3852 = vrot.lane.b32.xlu0 %v5475_v56, %s4684_s1  ;;  %v2673_v62 = vsel %vm2671_vm6, %v2669_v57, %v2648_v59  ;;  %v2675_v19 = vsel %vm2671_vm6, 13, %v2650_v6 }
0x1653   :  { %vm2696_vm7 = vcmp.gt.f32.partialorder %v2694_v35, %v2673_v62 }
0x1654   :  { %v5575_v63 = vsel %vm2696_vm7, 14, %v2675_v19  ;;  %v2698_v20 = vsel %vm2696_vm7, %v2694_v35, %v2673_v62 }
0x1655   :  { %6802 = vst [vmem:[#allocation33_spill] sm:$0xff] %v5575_v63  ;;  %3850 = vrot.lane.b32.xlu1 %v5432_v31, %s4684_s1 }
0x16a3   :  { %v2705_v39 = vpop.permute.xlu1 %2704 }
0x16a4   :  { %v5578_v53 = vadd.f32 %v2705_v39, %v2698_v20 }
0x16a6   :  { %v2720_v47 = vrot.slane %v5578_v53, %v5430_v42  ;;  %v2730_v51 = vrot.slane %v5578_v53, %v5435_v32  ;;  %v2742_v56 = vrot.slane %v5578_v53, %v5438_v33  ;;  %v2754_v31 = vrot.slane %v5578_v53, %v5441_v34 }
0x16a7   :  { %v2766_v6 = vrot.slane %v5578_v53, %v5446_v21  ;;  %v2778_v35 = vrot.slane %v5578_v53, %v5449_v38  ;;  %v2790_v28 = vrot.slane %v5578_v53, %v5455_v43  ;;  %v2802_v30 = vrot.slane %v5578_v53, %v5478_v58 }
0x16a8   :  { %v2721_v57 = vadd.f32 %v2720_v47, %v5382_v0  ;;  %v2722_v59 = vadd.f32 %v2720_v47, %v5400_v9  ;;  %v2731_v62 = vadd.f32 %v2730_v51, %v5384_v1  ;;  %v2732_v19 = vadd.f32 %v2730_v51, %v5404_v12 }
0x16a9   :  { %v2743_v54 = vadd.f32 %v2742_v56, %v5386_v2  ;;  %v2744_v20 = vadd.f32 %v2742_v56, %v5408_v14  ;;  %v2755_v45 = vadd.f32 %v2754_v31, %v5388_v3  ;;  %v2756_v63 = vadd.f32 %v2754_v31, %v5412_v17 }
0x16aa   :  { %vm2723_vm8 = vcmp.gt.f32.partialorder %v2721_v57, -inf  ;;  %vm2724_vm9 = vcmp.gt.f32.partialorder %v2722_v59, -inf  ;;  %v2767_v51 = vadd.f32 %v2766_v6, %v5390_v4  ;;  %v2768_v18 = vadd.f32 %v2766_v6, %v5422_v27 }
0x16ab   :  { %v2725_v39 = vsel %vm2723_vm8, %v2721_v57, -inf  ;;  %v2726_v47 = vsel %vm2724_vm9, %v2722_v59, -inf  ;;  %v6803_v12 = vmov 0   ;;  %v2779_v56 = vadd.f32 %v2778_v35, %v5392_v10 }
0x16ac   :  { %vm2733_vm10 = vcmp.gt.f32.partialorder %v2731_v62, %v2725_v39  ;;  %vm2734_vm11 = vcmp.gt.f32.partialorder %v2732_v19, %v2726_v47  ;;  %v2780_v57 = vadd.f32 %v2778_v35, %v5443_v36  ;;  %v2791_v6 = vadd.f32 %v2790_v28, %v5396_v7 }
0x16ad   :  { %v2735_v15 = vsel %vm2733_vm10, %v2731_v62, %v2725_v39  ;;  %v2736_v58 = vsel %vm2734_vm11, %v2732_v19, %v2726_v47  ;;  %v2737_v1 = vsel %vm2733_vm10, 1, %v6803_v12  ;;  %v2738_v2 = vsel %vm2734_vm11, 1, %v6803_v12 }
0x16ae   :  { %vm2745_vm12 = vcmp.gt.f32.partialorder %v2743_v54, %v2735_v15  ;;  %vm2746_vm0 = vcmp.gt.f32.partialorder %v2744_v20, %v2736_v58  ;;  %v2792_v62 = vadd.f32 %v2790_v28, %v5489_v41 }
0x16af   :  { %v2747_v59 = vsel %vm2745_vm12, %v2743_v54, %v2735_v15  ;;  %v2748_v31 = vsel %vm2746_vm0, %v2744_v20, %v2736_v58  ;;  %v2749_v17 = vsel %vm2745_vm12, 2, %v2737_v1  ;;  %v2750_v3 = vsel %vm2746_vm0, 2, %v2738_v2 }
0x16b0   :  { %v5614_v14 = vpop.permute.xlu1 %2641  ;;  %vm2757_vm1 = vcmp.gt.f32.partialorder %v2755_v45, %v2747_v59  ;;  %vm2758_vm4 = vcmp.gt.f32.partialorder %v2756_v63, %v2748_v31  ;;  %v2803_v15 = vadd.f32 %v2802_v30, %v5398_v8 }
0x16b1   :  { %v2645_v19 = vadd.f32 %v5614_v14, %v5546_v24  ;;  %v2759_v39 = vsel %vm2757_vm1, %v2755_v45, %v2747_v59  ;;  %v2760_v47 = vsel %vm2758_vm4, %v2756_v63, %v2748_v31  ;;  %v2761_v12 = vsel %vm2757_vm1, 3, %v2749_v17 }
0x16b2   :  { %v2762_v10 = vsel %vm2758_vm4, 3, %v2750_v3  ;;  %vm2769_vm13 = vcmp.gt.f32.partialorder %v2767_v51, %v2759_v39  ;;  %vm2770_vm14 = vcmp.gt.f32.partialorder %v2768_v18, %v2760_v47 }
0x16b3   :  { %vm2647_vm15 = vcmp.gt.f32.partialorder %v2645_v19, %v2624_v55  ;;  %v2771_v1 = vsel %vm2769_vm13, %v2767_v51, %v2759_v39  ;;  %v2772_v2 = vsel %vm2770_vm14, %v2768_v18, %v2760_v47  ;;  %v2773_v58 = vsel %vm2769_vm13, 4, %v2761_v12 }
0x16b4   :  { %v2649_v35 = vsel %vm2647_vm15, %v2645_v19, %v2624_v55  ;;  %v2651_v54 = vsel %vm2647_vm15, 12, %v5570_v5  ;;  %v2774_v20 = vsel %vm2770_vm14, 4, %v2762_v10  ;;  %vm2781_vm2 = vcmp.gt.f32.partialorder %v2779_v56, %v2771_v1  ;;  %v5622_v28 = vpop.permute.xlu1 %2691 }
0x16b5   :  { %vm2672_vm3 = vcmp.gt.f32.partialorder %v2670_v29, %v2649_v35  ;;  %vm2782_vm5 = vcmp.gt.f32.partialorder %v2780_v57, %v2772_v2  ;;  %v2783_v45 = vsel %vm2781_vm2, %v2779_v56, %v2771_v1  ;;  %v2785_v17 = vsel %vm2781_vm2, 5, %v2773_v58 }
0x16b6   :  { %v2674_v3 = vsel %vm2672_vm3, %v2670_v29, %v2649_v35  ;;  %v2676_v24 = vsel %vm2672_vm3, 13, %v2651_v54  ;;  %v2784_v63 = vsel %vm2782_vm5, %v2780_v57, %v2772_v2  ;;  %v2786_v59 = vsel %vm2782_vm5, 5, %v2774_v20  ;;  %v2707_v29 = vpop.permute.xlu0 %2706 }
0x16b7   :  { %vm2793_vm6 = vcmp.gt.f32.partialorder %v2791_v6, %v2783_v45  ;;  %vm2794_vm7 = vcmp.gt.f32.partialorder %v2792_v62, %v2784_v63  ;;  %v2804_v18 = vadd.f32 %v2802_v30, %v5512_v60  ;;  %v2695_v12 = vadd.f32 %v5622_v28, %v5562_v48 }
0x16b8   :  { %v2795_v5 = vsel %vm2793_vm6, %v2791_v6, %v2783_v45  ;;  %v2796_v10 = vsel %vm2794_vm7, %v2792_v62, %v2784_v63  ;;  %v2797_v55 = vsel %vm2793_vm6, 6, %v2785_v17  ;;  %v2798_v51 = vsel %vm2794_vm7, 6, %v2786_v59 }
0x16b9   :  { %vm2805_vm8 = vcmp.gt.f32.partialorder %v2803_v15, %v2795_v5  ;;  %vm2806_vm9 = vcmp.gt.f32.partialorder %v2804_v18, %v2796_v10  ;;  %vm2697_vm10 = vcmp.gt.f32.partialorder %v2695_v12, %v2674_v3  ;;  %v5636_v6 = vadd.s32 4294967295, %v4901_v50 }
0x16ba   :  { %v2809_v56 = vsel %vm2805_vm8, 7, %v2797_v55  ;;  %v2810_v31 = vsel %vm2806_vm9, 7, %v2798_v51  ;;  %v2699_v19 = vsel %vm2697_vm10, %v2695_v12, %v2674_v3  ;;  %v5627_v57 = vsel %vm2697_vm10, 14, %v2676_v24 }
0x16bb   :  { %6804 = vst [vmem:[#allocation34_spill] sm:$0xff] %v5627_v57  ;;  %v5629_v39 = vadd.f32 %v2707_v29, %v2699_v19  ;;  %v2807_v62 = vsel %vm2805_vm8, %v2803_v15, %v2795_v5  ;;  %v2808_v47 = vsel %vm2806_vm9, %v2804_v18, %v2796_v10  ;;  %vm2712_vm9 = vcmp.eq.s32.totalorder %v5636_v6, 1 }
0x16bd   :  { %v2814_v30 = vrot.slane %v5629_v39, %v5430_v42  ;;  %v2826_v48 = vrot.slane %v5629_v39, %v5435_v32  ;;  %v2838_v58 = vrot.slane %v5629_v39, %v5438_v33  ;;  %v2850_v35 = vrot.slane %v5629_v39, %v5441_v34 }
0x16be   :  { %v2862_v54 = vrot.slane %v5629_v39, %v5446_v21  ;;  %v2874_v20 = vrot.slane %v5629_v39, %v5449_v38  ;;  %v2886_v50 = vrot.slane %v5629_v39, %v5455_v43 }
0x16bf   :  { %v2815_v1 = vadd.f32 %v2814_v30, %v5402_v11  ;;  %v2816_v2 = vadd.f32 %v2814_v30, %v5521_v44  ;;  %v2827_v15 = vadd.f32 %v2826_v48, %v5406_v13  ;;  %v2828_v45 = vadd.f32 %v2826_v48, %v5531_v26 }
0x16c0   :  { %v2839_v59 = vadd.f32 %v2838_v58, %v5410_v16  ;;  %v2840_v18 = vadd.f32 %v2838_v58, %v5536_v61  ;;  %v2851_v51 = vadd.f32 %v2850_v35, %v5417_v25  ;;  %v2852_v29 = vadd.f32 %v2850_v35, %v5555_v23 }
0x16c1   :  { %vm2817_vm11 = vcmp.gt.f32.partialorder %v2815_v1, %v2807_v62  ;;  %vm2818_vm12 = vcmp.gt.f32.partialorder %v2816_v2, %v2808_v47  ;;  %v2863_v48 = vadd.f32 %v2862_v54, %v5427_v40  ;;  %v2876_v35 = vadd.f32 %v2874_v20, %v5580_v46 }
0x16c2   :  { %v2819_v17 = vsel %vm2817_vm11, %v2815_v1, %v2807_v62  ;;  %v2820_v3 = vsel %vm2818_vm12, %v2816_v2, %v2808_v47  ;;  %v2821_v24 = vsel %vm2817_vm11, 8, %v2809_v56  ;;  %v2822_v63 = vsel %vm2818_vm12, 8, %v2810_v31 }
0x16c3   :  { %vm2829_vm0 = vcmp.gt.f32.partialorder %v2827_v15, %v2819_v17  ;;  %vm2830_vm1 = vcmp.gt.f32.partialorder %v2828_v45, %v2820_v3  ;;  %v2864_v62 = vadd.f32 %v2862_v54, %v5614_v14  ;;  %v2888_v54 = vadd.f32 %v2886_v50, %v5622_v28 }
0x16c4   :  { %v2831_v12 = vsel %vm2829_vm0, %v2827_v15, %v2819_v17  ;;  %v2832_v5 = vsel %vm2830_vm1, %v2828_v45, %v2820_v3  ;;  %v2833_v10 = vsel %vm2829_vm0, 9, %v2821_v24  ;;  %v2834_v55 = vsel %vm2830_vm1, 9, %v2822_v63 }
0x16c5   :  { %vm2841_vm4 = vcmp.gt.f32.partialorder %v2839_v59, %v2831_v12  ;;  %vm2842_vm13 = vcmp.gt.f32.partialorder %v2840_v18, %v2832_v5  ;;  %v2875_v15 = vadd.f32 %v2874_v20, %v5469_v52  ;;  %v2887_v63 = vadd.f32 %v2886_v50, %v5501_v37 }
0x16c6   :  { %v2843_v19 = vsel %vm2841_vm4, %v2839_v59, %v2831_v12  ;;  %v2844_v30 = vsel %vm2842_vm13, %v2840_v18, %v2832_v5  ;;  %v2845_v56 = vsel %vm2841_vm4, 10, %v2833_v10  ;;  %v2846_v31 = vsel %vm2842_vm13, 10, %v2834_v55  ;;  %v2898_v10 = vpop.permute.xlu0 %2897 }
0x16c7   :  { %vm2853_vm14 = vcmp.gt.f32.partialorder %v2851_v51, %v2843_v19  ;;  %vm2854_vm15 = vcmp.gt.f32.partialorder %v2852_v29, %v2844_v30  ;;  %vm2903_vm12 = vcmp.eq.s32.totalorder %v5636_v6, 2 }
0x16c8   :  { %v2855_v47 = vsel %vm2853_vm14, %v2851_v51, %v2843_v19  ;;  %v2856_v1 = vsel %vm2854_vm15, %v2852_v29, %v2844_v30  ;;  %v2857_v2 = vsel %vm2853_vm14, 11, %v2845_v56  ;;  %v2858_v58 = vsel %vm2854_vm15, 11, %v2846_v31  ;;  %v2896_v19 = vpop.permute.xlu1 %2895 }
0x16c9   :  { %vm2865_vm2 = vcmp.gt.f32.partialorder %v2863_v48, %v2855_v47  ;;  %vm2866_vm3 = vcmp.gt.f32.partialorder %v2864_v62, %v2856_v1 }
0x16ca   :  { %v2867_v45 = vsel %vm2865_vm2, %v2863_v48, %v2855_v47  ;;  %v2868_v17 = vsel %vm2866_vm3, %v2864_v62, %v2856_v1  ;;  %v2869_v3 = vsel %vm2865_vm2, 12, %v2857_v2  ;;  %v2870_v24 = vsel %vm2866_vm3, 12, %v2858_v58 }
0x16cb   :  { %vm2877_vm5 = vcmp.gt.f32.partialorder %v2875_v15, %v2867_v45  ;;  %vm2878_vm6 = vcmp.gt.f32.partialorder %v2876_v35, %v2868_v17  ;;  %v5685_v1 = vsel %vm2712_vm9, %v5629_v39, %v5508_v49  ;;  %v5689_v2 = vsel %vm2712_vm9, %v5578_v53, %v5452_v22 }
0x16cc   :  { %v2879_v59 = vsel %vm2877_vm5, %v2875_v15, %v2867_v45  ;;  %v2880_v18 = vsel %vm2878_vm6, %v2876_v35, %v2868_v17  ;;  %v2881_v12 = vsel %vm2877_vm5, 13, %v2869_v3  ;;  %v2882_v5 = vsel %vm2878_vm6, 13, %v2870_v24  ;;  %v6807_v24 = vld [vmem:[#allocation8_spill] sm:$0xff] }
0x16cd   :  { %vm2889_vm7 = vcmp.gt.f32.partialorder %v2887_v63, %v2879_v59  ;;  %vm2890_vm8 = vcmp.gt.f32.partialorder %v2888_v54, %v2880_v18 }
0x16ce   :  { %v2891_v55 = vsel %vm2889_vm7, %v2887_v63, %v2879_v59  ;;  %v2892_v51 = vsel %vm2890_vm8, %v2888_v54, %v2880_v18  ;;  %v5662_v20 = vsel %vm2889_vm7, 14, %v2881_v12  ;;  %v5664_v29 = vsel %vm2890_vm8, 14, %v2882_v5  ;;  %v6808_v59 = vld [vmem:[#allocation17_spill] sm:$0xff] }
0x16cf   :  { %6805 = vst [vmem:[#allocation35_spill] sm:$0xff] %v5662_v20  ;;  %6806 = vst [vmem:[#allocation36_spill] sm:$0xff] %v5664_v29  ;;  %v5666_v30 = vadd.f32 %v2898_v10, %v2892_v51  ;;  %v5668_v56 = vadd.f32 %v2896_v19, %v2891_v55  ;;  %v6809_v51 = vld [vmem:[#allocation9_spill] sm:$0xff]  ;;  %v6811_v29 = vld [vmem:[#allocation10_spill] sm:$0xff] }
0x16d1   :  { %v3017_v50 = vrot.slane %v5666_v30, %v5435_v32  ;;  %v5675_v31 = vrot.slane %v5666_v30, %v5441_v34  ;;  %v3005_v48 = vrot.slane %v5666_v30, %v5430_v42  ;;  %v2911_v62 = vrot.slane %v5668_v56, %v5430_v42 }
0x16d2   :  { %v2921_v47 = vrot.slane %v5668_v56, %v5435_v32  ;;  %v3029_v58 = vrot.slane %v5666_v30, %v5438_v33  ;;  %v5699_v35 = vrot.slane %v5666_v30, %v5455_v43  ;;  %v2933_v45 = vrot.slane %v5668_v56, %v5438_v33 }
0x16d3   :  { %v5695_v15 = vadd.f32 %v5675_v31, %v5417_v25  ;;  %v5704_v49 = vadd.f32 %v3005_v48, %v5402_v11  ;;  %v5707_v22 = vadd.f32 %v3017_v50, %v5406_v13  ;;  %v2912_v53 = vadd.f32 %v2911_v62, %v5382_v0 }
0x16d4   :  { %v2913_v39 = vadd.f32 %v2911_v62, %v5400_v9  ;;  %v5712_v17 = vadd.f32 %v3005_v48, %v5521_v44  ;;  %v5715_v3 = vadd.f32 %v3017_v50, %v5531_v26  ;;  %v2922_v63 = vadd.f32 %v2921_v47, %v6807_v24  ;;  %v6810_v50 = vld [vmem:[#allocation19_spill] sm:$0xff]  ;;  %v6813_v44 = vld [vmem:[#allocation26_spill] sm:$0xff] }
0x16d5   :  { %v2945_v54 = vrot.slane %v5668_v56, %v5441_v34  ;;  %vm2914_vm10 = vcmp.gt.f32.partialorder %v2912_v53, -inf  ;;  %v2923_v18 = vadd.f32 %v2921_v47, %v6808_v59  ;;  %v2957_v12 = vrot.slane %v5668_v56, %v5446_v21 }
0x16d6   :  { %vm2915_vm11 = vcmp.gt.f32.partialorder %v2913_v39, -inf  ;;  %v5725_v5 = vadd.f32 %v3029_v58, %v5410_v16  ;;  %v2916_v10 = vsel %vm2914_vm10, %v2912_v53, -inf  ;;  %v2934_v19 = vadd.f32 %v2933_v45, %v6809_v51  ;;  %v6812_v53 = vld [vmem:[#allocation21_spill] sm:$0xff] }
0x16d7   :  { %v2917_v55 = vsel %vm2915_vm11, %v2913_v39, -inf  ;;  %vm2924_vm0 = vcmp.gt.f32.partialorder %v2922_v63, %v2916_v10  ;;  %v2935_v48 = vadd.f32 %v2933_v45, %v6810_v50  ;;  %v2969_v62 = vrot.slane %v5668_v56, %v5449_v38 }
0x16d8   :  { %vm2925_vm1 = vcmp.gt.f32.partialorder %v2923_v18, %v2917_v55  ;;  %v2926_v47 = vsel %vm2924_vm0, %v2922_v63, %v2916_v10  ;;  %v2946_v20 = vadd.f32 %v2945_v54, %v6811_v29  ;;  %v2981_v25 = vrot.slane %v5668_v56, %v5455_v43  ;;  %v6814_v29 = vld [vmem:[#allocation12_spill] sm:$0xff] }
0x16d9   :  { %v2927_v57 = vsel %vm2925_vm1, %v2923_v18, %v2917_v55  ;;  %vm2936_vm4 = vcmp.gt.f32.partialorder %v2934_v19, %v2926_v47  ;;  %v2947_v39 = vadd.f32 %v2945_v54, %v6812_v53  ;;  %v2958_v16 = vadd.f32 %v2957_v12, %v5390_v4 }
0x16da   :  { %vm2937_vm13 = vcmp.gt.f32.partialorder %v2935_v48, %v2927_v57  ;;  %v2938_v45 = vsel %vm2936_vm4, %v2934_v19, %v2926_v47  ;;  %v2959_v13 = vadd.f32 %v2957_v12, %v5422_v27  ;;  %v2993_v11 = vrot.slane %v5668_v56, %v6813_v44 }
0x16db   :  { %v2939_v26 = vsel %vm2937_vm13, %v2935_v48, %v2927_v57  ;;  %vm2948_vm14 = vcmp.gt.f32.partialorder %v2946_v20, %v2938_v45  ;;  %v2970_v50 = vadd.f32 %v2969_v62, %v6814_v29  ;;  %v3053_v51 = vrot.slane %v5666_v30, %v5446_v21 }
0x16dc   :  { %vm2949_vm15 = vcmp.gt.f32.partialorder %v2947_v39, %v2939_v26  ;;  %v2950_v54 = vsel %vm2948_vm14, %v2946_v20, %v2938_v45  ;;  %v2971_v53 = vadd.f32 %v2969_v62, %v5443_v36  ;;  %v2982_v59 = vadd.f32 %v2981_v25, %v5396_v7 }
0x16dd   :  { %v2951_v4 = vsel %vm2949_vm15, %v2947_v39, %v2939_v26  ;;  %vm2960_vm2 = vcmp.gt.f32.partialorder %v2958_v16, %v2950_v54  ;;  %v2983_v12 = vadd.f32 %v2981_v25, %v5489_v41  ;;  %v5753_v27 = vrot.slane %v5666_v30, %v5449_v38 }
0x16de   :  { %vm2961_vm3 = vcmp.gt.f32.partialorder %v2959_v13, %v2951_v4  ;;  %v2962_v29 = vsel %vm2960_vm2, %v2958_v16, %v2950_v54  ;;  %v2994_v9 = vadd.f32 %v2993_v11, %v5398_v8  ;;  %v3031_v0 = vadd.f32 %v3029_v58, %v5536_v61 }
0x16df   :  { %v2963_v24 = vsel %vm2961_vm3, %v2959_v13, %v2951_v4  ;;  %vm2972_vm5 = vcmp.gt.f32.partialorder %v2970_v50, %v2962_v29  ;;  %v2995_v62 = vadd.f32 %v2993_v11, %v5512_v60  ;;  %v3054_v7 = vadd.f32 %v3053_v51, %v5427_v40 }
0x16e0   :  { %vm2973_vm6 = vcmp.gt.f32.partialorder %v2971_v53, %v2963_v24  ;;  %v2974_v25 = vsel %vm2972_vm5, %v2970_v50, %v2962_v29  ;;  %v3043_v36 = vadd.f32 %v5675_v31, %v5555_v23  ;;  %v5769_v8 = vsel %vm2903_vm12, %v5666_v30, %v5685_v1 }
0x16e1   :  { %v2975_v41 = vsel %vm2973_vm6, %v2971_v53, %v2963_v24  ;;  %6815 = vst [vmem:[#allocation26_spill] sm:$0xff] %v5769_v8  ;;  %vm2984_vm7 = vcmp.gt.f32.partialorder %v2982_v59, %v2974_v25  ;;  %v3055_v58 = vadd.f32 %v3053_v51, %v5614_v14  ;;  %v6816_v11 = vmov 0  }
0x16e2   :  { %vm2985_vm8 = vcmp.gt.f32.partialorder %v2983_v12, %v2975_v41  ;;  %v2928_v40 = vsel %vm2924_vm0, 1, %v6816_v11  ;;  %v2986_v61 = vsel %vm2984_vm7, %v2982_v59, %v2974_v25  ;;  %v2929_v31 = vsel %vm2925_vm1, 1, %v6816_v11 }
0x16e3   :  { %v2987_v60 = vsel %vm2985_vm8, %v2983_v12, %v2975_v41  ;;  %v2940_v23 = vsel %vm2936_vm4, 2, %v2928_v40  ;;  %vm2996_vm9 = vcmp.gt.f32.partialorder %v2994_v9, %v2986_v61  ;;  %v2941_v30 = vsel %vm2937_vm13, 2, %v2929_v31 }
0x16e4   :  { %vm2997_vm10 = vcmp.gt.f32.partialorder %v2995_v62, %v2987_v60  ;;  %v2952_v1 = vsel %vm2948_vm14, 3, %v2940_v23  ;;  %v2998_v51 = vsel %vm2996_vm9, %v2994_v9, %v2986_v61  ;;  %v2953_v10 = vsel %vm2949_vm15, 3, %v2941_v30 }
0x16e5   :  { %v2999_v63 = vsel %vm2997_vm10, %v2995_v62, %v2987_v60  ;;  %v2964_v8 = vsel %vm2960_vm2, 4, %v2952_v1  ;;  %vm3008_vm11 = vcmp.gt.f32.partialorder %v5704_v49, %v2998_v51  ;;  %v2965_v40 = vsel %vm2961_vm3, 4, %v2953_v10 }
0x16e6   :  { %vm3009_vm0 = vcmp.gt.f32.partialorder %v5712_v17, %v2999_v63  ;;  %v2976_v18 = vsel %vm2972_vm5, 5, %v2964_v8  ;;  %v3010_v57 = vsel %vm3008_vm11, %v5704_v49, %v2998_v51  ;;  %v2977_v20 = vsel %vm2973_vm6, 5, %v2965_v40 }
0x16e7   :  { %v3011_v23 = vsel %vm3009_vm0, %v5712_v17, %v2999_v63  ;;  %v2988_v26 = vsel %vm2984_vm7, 6, %v2976_v18  ;;  %vm3020_vm1 = vcmp.gt.f32.partialorder %v5707_v22, %v3010_v57  ;;  %v2989_v16 = vsel %vm2985_vm8, 6, %v2977_v20 }
0x16e8   :  { %vm3021_vm4 = vcmp.gt.f32.partialorder %v5715_v3, %v3011_v23  ;;  %v3000_v4 = vsel %vm2996_vm9, 7, %v2988_v26  ;;  %v3022_v8 = vsel %vm3020_vm1, %v5707_v22, %v3010_v57  ;;  %v3001_v29 = vsel %vm2997_vm10, 7, %v2989_v16  ;;  %v6822_v26 = vld [vmem:[#allocation15_spill] sm:$0xff] }
0x16e9   :  { %v3023_v13 = vsel %vm3021_vm4, %v5715_v3, %v3011_v23  ;;  %v3012_v49 = vsel %vm3008_vm11, 8, %v3000_v4  ;;  %vm3032_vm13 = vcmp.gt.f32.partialorder %v5725_v5, %v3022_v8  ;;  %v3013_v24 = vsel %vm3009_vm0, 8, %v3001_v29  ;;  %v6821_v23 = vld [vmem:[#allocation7_spill] sm:$0xff]  ;;  %v6823_v4 = vld [vmem:[#allocation8_spill] sm:$0xff] }
0x16ea   :  { %vm3033_vm14 = vcmp.gt.f32.partialorder %v3031_v0, %v3023_v13  ;;  %v3024_v59 = vsel %vm3020_vm1, 9, %v3012_v49  ;;  %v3034_v55 = vsel %vm3032_vm13, %v5725_v5, %v3022_v8  ;;  %v3025_v19 = vsel %vm3021_vm4, 9, %v3013_v24  ;;  %v6825_v49 = vld [vmem:[#allocation9_spill] sm:$0xff] }
0x16eb   :  { %v3035_v41 = vsel %vm3033_vm14, %v3031_v0, %v3023_v13  ;;  %v3036_v9 = vsel %vm3032_vm13, 10, %v3024_v59  ;;  %vm3044_vm15 = vcmp.gt.f32.partialorder %v5695_v15, %v3034_v55  ;;  %v3037_v61 = vsel %vm3033_vm14, 10, %v3025_v19  ;;  %v6824_v13 = vld [vmem:[#allocation17_spill] sm:$0xff]  ;;  %v6826_v59 = vld [vmem:[#allocation19_spill] sm:$0xff] }
0x16ec   :  { %vm3045_vm2 = vcmp.gt.f32.partialorder %v3043_v36, %v3035_v41  ;;  %v5811_v60 = vsel %vm2903_vm12, %v5668_v56, %v5689_v2  ;;  %v3046_v22 = vsel %vm3044_vm15, %v5695_v15, %v3034_v55  ;;  %v3048_v3 = vsel %vm3044_vm15, 11, %v3036_v9  ;;  %v6828_v9 = vld [vmem:[#allocation21_spill] sm:$0xff] }
0x16ed   :  { %6817 = vst [vmem:[#allocation37_spill] sm:$0xff] %v5811_v60  ;;  %v3047_v17 = vsel %vm3045_vm2, %v3043_v36, %v3035_v41  ;;  %v3049_v50 = vsel %vm3045_vm2, 11, %v3037_v61  ;;  %vm3056_vm3 = vcmp.gt.f32.partialorder %v3054_v7, %v3046_v22  ;;  %v3066_v0 = vadd.f32 %v5753_v27, %v5469_v52  ;;  %v6827_v41 = vld [vmem:[#allocation10_spill] sm:$0xff] }
0x16ee   :  { %vm3057_vm5 = vcmp.gt.f32.partialorder %v3055_v58, %v3047_v17  ;;  %v3067_v5 = vadd.f32 %v5753_v27, %v5580_v46  ;;  %v3058_v48 = vsel %vm3056_vm3, %v3054_v7, %v3046_v22  ;;  %v3060_v53 = vsel %vm3056_vm3, 12, %v3048_v3  ;;  %v3087_v27 = vpop.permute.xlu1 %3086  ;;  %v6829_v22 = vld [vmem:[#allocation11_spill] sm:$0xff] }
0x16ef   :  { %v3059_v47 = vsel %vm3057_vm5, %v3055_v58, %v3047_v17  ;;  %v3061_v39 = vsel %vm3057_vm5, 12, %v3049_v50  ;;  %v3078_v56 = vadd.f32 %v5699_v35, %v5501_v37  ;;  %v3079_v36 = vadd.f32 %v5699_v35, %v5622_v28  ;;  %v3089_v58 = vpop.permute.xlu0 %3088  ;;  %v6830_v3 = vld [vmem:[#allocation23_spill] sm:$0xff] }
0x16f0   :  { %vm3068_vm12 = vcmp.gt.f32.partialorder %v3066_v0, %v3058_v48  ;;  %vm3069_vm6 = vcmp.gt.f32.partialorder %v3067_v5, %v3059_v47 }
0x16f1   :  { %v3070_v2 = vsel %vm3068_vm12, %v3066_v0, %v3058_v48  ;;  %v3071_v15 = vsel %vm3069_vm6, %v3067_v5, %v3059_v47  ;;  %v3072_v45 = vsel %vm3068_vm12, 13, %v3060_v53  ;;  %v3073_v54 = vsel %vm3069_vm6, 13, %v3061_v39  ;;  %v6831_v48 = vld [vmem:[#allocation12_spill] sm:$0xff]  ;;  %v6832_v53 = vld [vmem:[#allocation25_spill] sm:$0xff] }
0x16f2   :  { %vm3080_vm7 = vcmp.gt.f32.partialorder %v3078_v56, %v3070_v2  ;;  %vm3081_vm8 = vcmp.gt.f32.partialorder %v3079_v36, %v3071_v15 }
0x16f3   :  { %v3082_v12 = vsel %vm3080_vm7, %v3078_v56, %v3070_v2  ;;  %v3083_v7 = vsel %vm3081_vm8, %v3079_v36, %v3071_v15  ;;  %v5822_v62 = vsel %vm3080_vm7, 14, %v3072_v45  ;;  %v5824_v25 = vsel %vm3081_vm8, 14, %v3073_v54  ;;  %v6833_v56 = vld [vmem:[#allocation13_spill] sm:$0xff]  ;;  %v6834_v2 = vld [vmem:[#allocation27_spill] sm:$0xff] }
0x16f4   :  { %6818 = vst [vmem:[#allocation38_spill] sm:$0xff] %v5822_v62  ;;  %6819 = vst [vmem:[#allocation39_spill] sm:$0xff] %v5824_v25  ;;  %v5826_v31 = vadd.f32 %v3087_v27, %v3082_v12  ;;  %v5828_v30 = vadd.f32 %v3089_v58, %v3083_v7  ;;  %v6835_v7 = vld [vmem:[#allocation14_spill] sm:$0xff]  ;;  %vm3094_vm7 = vcmp.eq.s32.totalorder %v5636_v6, 3 }
0x16f5   :  { %v6839_v25 = vld [vmem:[#allocation18_spill] sm:$0xff] }
0x16f6   :  { %6820 = vst [vmem:[#allocation40_spill] sm:$0xff] %v5826_v31  ;;  %v3102_v35 = vrot.slane %v5826_v31, %v5430_v42  ;;  %v3112_v1 = vrot.slane %v5826_v31, %v5435_v32  ;;  %v3124_v51 = vrot.slane %v5826_v31, %v5438_v33  ;;  %v3136_v63 = vrot.slane %v5826_v31, %v5441_v34 }
0x16f7   :  { %v3148_v10 = vrot.slane %v5826_v31, %v5446_v21  ;;  %v3160_v40 = vrot.slane %v5826_v31, %v5449_v38  ;;  %v3172_v18 = vrot.slane %v5826_v31, %v5455_v43  ;;  %v3184_v57 = vrot.slane %v5826_v31, %v6813_v44  ;;  %v6840_v31 = vld [vmem:[#allocation30_spill] sm:$0xff] }
0x16f8   :  { %v3103_v20 = vadd.f32 %v3102_v35, %v6821_v23  ;;  %v3104_v16 = vadd.f32 %v3102_v35, %v6822_v26  ;;  %v3113_v8 = vadd.f32 %v3112_v1, %v6823_v4  ;;  %v3114_v29 = vadd.f32 %v3112_v1, %v6824_v13  ;;  %v6836_v35 = vld [vmem:[#allocation28_spill] sm:$0xff] }
0x16f9   :  { %v3125_v24 = vadd.f32 %v3124_v51, %v6825_v49  ;;  %v3126_v55 = vadd.f32 %v3124_v51, %v6826_v59  ;;  %v3137_v19 = vadd.f32 %v3136_v63, %v6827_v41  ;;  %v3138_v61 = vadd.f32 %v3136_v63, %v6828_v9 }
0x16fa   :  { %vm3105_vm9 = vcmp.gt.f32.partialorder %v3103_v20, -inf  ;;  %vm3106_vm10 = vcmp.gt.f32.partialorder %v3104_v16, -inf  ;;  %v3149_v17 = vadd.f32 %v3148_v10, %v6829_v22  ;;  %v3150_v50 = vadd.f32 %v3148_v10, %v6830_v3 }
0x16fb   :  { %v3107_v0 = vsel %vm3105_vm9, %v3103_v20, -inf  ;;  %v3108_v5 = vsel %vm3106_vm10, %v3104_v16, -inf  ;;  %v3161_v47 = vadd.f32 %v3160_v40, %v6831_v48  ;;  %v3162_v39 = vadd.f32 %v3160_v40, %v6832_v53 }
0x16fc   :  { %vm3115_vm11 = vcmp.gt.f32.partialorder %v3113_v8, %v3107_v0  ;;  %vm3116_vm0 = vcmp.gt.f32.partialorder %v3114_v29, %v3108_v5  ;;  %v3173_v36 = vadd.f32 %v3172_v18, %v6833_v56  ;;  %v3174_v15 = vadd.f32 %v3172_v18, %v6834_v2 }
0x16fd   :  { %v3117_v45 = vsel %vm3115_vm11, %v3113_v8, %v3107_v0  ;;  %v3118_v54 = vsel %vm3116_vm0, %v3114_v29, %v3108_v5  ;;  %v3119_v12 = vsel %vm3115_vm11, 1, %v6816_v11  ;;  %v3120_v27 = vsel %vm3116_vm0, 1, %v6816_v11  ;;  %v6837_v5 = vld [vmem:[#allocation16_spill] sm:$0xff] }
0x16fe   :  { %vm3127_vm1 = vcmp.gt.f32.partialorder %v3125_v24, %v3117_v45  ;;  %vm3128_vm4 = vcmp.gt.f32.partialorder %v3126_v55, %v3118_v54  ;;  %v3185_v58 = vadd.f32 %v3184_v57, %v6835_v7  ;;  %v3186_v1 = vadd.f32 %v3184_v57, %v6836_v35 }
0x16ff   :  { %v3129_v51 = vsel %vm3127_vm1, %v3125_v24, %v3117_v45  ;;  %v3130_v63 = vsel %vm3128_vm4, %v3126_v55, %v3118_v54  ;;  %v3131_v10 = vsel %vm3127_vm1, 2, %v3119_v12  ;;  %v3132_v40 = vsel %vm3128_vm4, 2, %v3120_v27  ;;  %v6838_v24 = vld [vmem:[#allocation29_spill] sm:$0xff] }
0x1700   :  { %vm3139_vm13 = vcmp.gt.f32.partialorder %v3137_v19, %v3129_v51  ;;  %vm3140_vm14 = vcmp.gt.f32.partialorder %v3138_v61, %v3130_v63  ;;  %v3196_v18 = vrot.slane %v5828_v30, %v5430_v42  ;;  %v3208_v20 = vrot.slane %v5828_v30, %v5435_v32 }
0x1701   :  { %v3141_v16 = vsel %vm3139_vm13, %v3137_v19, %v3129_v51  ;;  %v3142_v8 = vsel %vm3140_vm14, %v3138_v61, %v3130_v63  ;;  %v3143_v29 = vsel %vm3139_vm13, 3, %v3131_v10  ;;  %v3144_v0 = vsel %vm3140_vm14, 3, %v3132_v40 }
0x1702   :  { %vm3151_vm15 = vcmp.gt.f32.partialorder %v3149_v17, %v3141_v16  ;;  %vm3152_vm2 = vcmp.gt.f32.partialorder %v3150_v50, %v3142_v8  ;;  %v3197_v57 = vadd.f32 %v3196_v18, %v6837_v5  ;;  %v3198_v55 = vadd.f32 %v3196_v18, %v6838_v24 }
0x1703   :  { %v3153_v45 = vsel %vm3151_vm15, %v3149_v17, %v3141_v16  ;;  %v3154_v54 = vsel %vm3152_vm2, %v3150_v50, %v3142_v8  ;;  %v3155_v12 = vsel %vm3151_vm15, 4, %v3143_v29  ;;  %v3156_v27 = vsel %vm3152_vm2, 4, %v3144_v0 }
0x1704   :  { %vm3163_vm3 = vcmp.gt.f32.partialorder %v3161_v47, %v3153_v45  ;;  %vm3164_vm5 = vcmp.gt.f32.partialorder %v3162_v39, %v3154_v54  ;;  %v3209_v62 = vadd.f32 %v3208_v20, %v6839_v25  ;;  %v3210_v60 = vadd.f32 %v3208_v20, %v6840_v31  ;;  %v6842_v20 = vld [vmem:[#allocation31_spill] sm:$0xff] }
0x1705   :  { %v3165_v19 = vsel %vm3163_vm3, %v3161_v47, %v3153_v45  ;;  %v3166_v61 = vsel %vm3164_vm5, %v3162_v39, %v3154_v54  ;;  %v3167_v51 = vsel %vm3163_vm3, 5, %v3155_v12  ;;  %v3168_v63 = vsel %vm3164_vm5, 5, %v3156_v27  ;;  %v6841_v47 = vld [vmem:[#allocation20_spill] sm:$0xff]  ;;  %v6843_v12 = vld [vmem:[#allocation22_spill] sm:$0xff] }
0x1706   :  { %vm3175_vm12 = vcmp.gt.f32.partialorder %v3173_v36, %v3165_v19  ;;  %vm3176_vm6 = vcmp.gt.f32.partialorder %v3174_v15, %v3166_v61  ;;  %v3220_v10 = vrot.slane %v5828_v30, %v5438_v33  ;;  %v3232_v17 = vrot.slane %v5828_v30, %v5441_v34 }
0x1707   :  { %v3177_v50 = vsel %vm3175_vm12, %v3173_v36, %v3165_v19  ;;  %v3178_v40 = vsel %vm3176_vm6, %v3174_v15, %v3166_v61  ;;  %v3179_v18 = vsel %vm3175_vm12, 6, %v3167_v51  ;;  %v3180_v16 = vsel %vm3176_vm6, 6, %v3168_v63  ;;  %v6844_v36 = vld [vmem:[#allocation32_spill] sm:$0xff] }
0x1708   :  { %vm3187_vm8 = vcmp.gt.f32.partialorder %v3185_v58, %v3177_v50  ;;  %vm3188_vm9 = vcmp.gt.f32.partialorder %v3186_v1, %v3178_v40  ;;  %v3221_v39 = vadd.f32 %v3220_v10, %v6841_v47  ;;  %v3222_v8 = vadd.f32 %v3220_v10, %v6842_v20 }
0x1709   :  { %v3189_v29 = vsel %vm3187_vm8, %v3185_v58, %v3177_v50  ;;  %v3190_v0 = vsel %vm3188_vm9, %v3186_v1, %v3178_v40  ;;  %v3191_v45 = vsel %vm3187_vm8, 7, %v3179_v18  ;;  %v3192_v54 = vsel %vm3188_vm9, 7, %v3180_v16  ;;  %v6845_v18 = vld [vmem:[#allocation24_spill] sm:$0xff] }
0x170a   :  { %vm3199_vm10 = vcmp.gt.f32.partialorder %v3197_v57, %v3189_v29  ;;  %vm3200_vm11 = vcmp.gt.f32.partialorder %v3198_v55, %v3190_v0  ;;  %v3233_v27 = vadd.f32 %v3232_v17, %v6843_v12  ;;  %v3234_v15 = vadd.f32 %v3232_v17, %v6844_v36 }
0x170b   :  { %v3201_v19 = vsel %vm3199_vm10, %v3197_v57, %v3189_v29  ;;  %v3202_v61 = vsel %vm3200_vm11, %v3198_v55, %v3190_v0  ;;  %v3203_v51 = vsel %vm3199_vm10, 8, %v3191_v45  ;;  %v3204_v63 = vsel %vm3200_vm11, 8, %v3192_v54 }
0x170c   :  { %vm3211_vm0 = vcmp.gt.f32.partialorder %v3209_v62, %v3201_v19  ;;  %vm3212_vm1 = vcmp.gt.f32.partialorder %v3210_v60, %v3202_v61  ;;  %v3244_v47 = vrot.slane %v5828_v30, %v5446_v21  ;;  %v3256_v58 = vrot.slane %v5828_v30, %v5449_v38 }
0x170d   :  { %v3213_v1 = vsel %vm3211_vm0, %v3209_v62, %v3201_v19  ;;  %v3214_v10 = vsel %vm3212_vm1, %v3210_v60, %v3202_v61  ;;  %v3215_v50 = vsel %vm3211_vm0, 9, %v3203_v51  ;;  %v3216_v40 = vsel %vm3212_vm1, 9, %v3204_v63 }
0x170e   :  { %vm3223_vm4 = vcmp.gt.f32.partialorder %v3221_v39, %v3213_v1  ;;  %vm3224_vm13 = vcmp.gt.f32.partialorder %v3222_v8, %v3214_v10  ;;  %v3245_v17 = vadd.f32 %v3244_v47, %v6845_v18  ;;  %v3246_v57 = vadd.f32 %v3244_v47, %v5614_v14  ;;  %v6846_v47 = vld [vmem:[#allocation26_spill] sm:$0xff] }
0x170f   :  { %v3225_v55 = vsel %vm3223_vm4, %v3221_v39, %v3213_v1  ;;  %v3226_v16 = vsel %vm3224_vm13, %v3222_v8, %v3214_v10  ;;  %v3227_v29 = vsel %vm3223_vm4, 10, %v3215_v50  ;;  %v3228_v0 = vsel %vm3224_vm13, 10, %v3216_v40 }
0x1710   :  { %vm3235_vm14 = vcmp.gt.f32.partialorder %v3233_v27, %v3225_v55  ;;  %vm3236_vm15 = vcmp.gt.f32.partialorder %v3234_v15, %v3226_v16  ;;  %v3257_v45 = vadd.f32 %v3256_v58, %v5469_v52  ;;  %v3258_v54 = vadd.f32 %v3256_v58, %v5580_v46 }
0x1711   :  { %v3237_v62 = vsel %vm3235_vm14, %v3233_v27, %v3225_v55  ;;  %v3238_v60 = vsel %vm3236_vm15, %v3234_v15, %v3226_v16  ;;  %v3239_v19 = vsel %vm3235_vm14, 11, %v3227_v29  ;;  %v3240_v61 = vsel %vm3236_vm15, 11, %v3228_v0  ;;  %v3280_v0 = vpop.permute.xlu0 %3279 }
0x1712   :  { %vm3247_vm2 = vcmp.gt.f32.partialorder %v3245_v17, %v3237_v62  ;;  %vm3248_vm3 = vcmp.gt.f32.partialorder %v3246_v57, %v3238_v60  ;;  %v3268_v51 = vrot.slane %v5828_v30, %v5455_v43  ;;  %v5895_v39 = vsel %vm3094_vm7, %v5828_v30, %v6846_v47 }
0x1713   :  { %v3249_v8 = vsel %vm3247_vm2, %v3245_v17, %v3237_v62  ;;  %v3250_v63 = vsel %vm3248_vm3, %v3246_v57, %v3238_v60  ;;  %v3251_v1 = vsel %vm3247_vm2, 12, %v3239_v19  ;;  %v3252_v10 = vsel %vm3248_vm3, 12, %v3240_v61  ;;  %v3278_v57 = vpop.permute.xlu1 %3277 }
0x1714   :  { %vm3259_vm5 = vcmp.gt.f32.partialorder %v3257_v45, %v3249_v8  ;;  %vm3260_vm12 = vcmp.gt.f32.partialorder %v3258_v54, %v3250_v63  ;;  %v3269_v27 = vadd.f32 %v3268_v51, %v5501_v37  ;;  %v3270_v15 = vadd.f32 %v3268_v51, %v5622_v28 }
0x1715   :  { %v3261_v58 = vsel %vm3259_vm5, %v3257_v45, %v3249_v8  ;;  %v3262_v50 = vsel %vm3260_vm12, %v3258_v54, %v3250_v63  ;;  %v3263_v40 = vsel %vm3259_vm5, 13, %v3251_v1  ;;  %v3264_v55 = vsel %vm3260_vm12, 13, %v3252_v10 }
0x1716   :  { %vm3271_vm6 = vcmp.gt.f32.partialorder %v3269_v27, %v3261_v58  ;;  %vm3272_vm8 = vcmp.gt.f32.partialorder %v3270_v15, %v3262_v50 }
0x1717   :  { %v3273_v16 = vsel %vm3271_vm6, %v3269_v27, %v3261_v58  ;;  %v3274_v29 = vsel %vm3272_vm8, %v3270_v15, %v3262_v50  ;;  %v5899_v30 = vsel %vm3271_vm6, 14, %v3263_v40  ;;  %v5901_v17 = vsel %vm3272_vm8, 14, %v3264_v55 }
0x1718   :  { %6847 = vst [vmem:[#allocation7_spill] sm:$0xff] %v5899_v30  ;;  %6848 = vst [vmem:[#allocation15_spill] sm:$0xff] %v5901_v17  ;;  %v5903_v62 = vadd.f32 %v3278_v57, %v3273_v16  ;;  %v5905_v60 = vadd.f32 %v3280_v0, %v3274_v29  ;;  %vm3285_vm8 = vcmp.eq.s32.totalorder %v5636_v6, 4 }
0x171a   :  { %v3293_v45 = vrot.slane %v5903_v62, %v5430_v42  ;;  %v3303_v54 = vrot.slane %v5903_v62, %v5435_v32  ;;  %v3315_v19 = vrot.slane %v5903_v62, %v5438_v33  ;;  %v3327_v61 = vrot.slane %v5903_v62, %v5441_v34 }
0x171b   :  { %v3339_v51 = vrot.slane %v5903_v62, %v5446_v21  ;;  %v3351_v47 = vrot.slane %v5903_v62, %v5449_v38  ;;  %v3363_v8 = vrot.slane %v5903_v62, %v5455_v43  ;;  %v3375_v63 = vrot.slane %v5903_v62, %v6813_v44 }
0x171c   :  { %v3294_v1 = vadd.f32 %v3293_v45, %v6821_v23  ;;  %v3295_v10 = vadd.f32 %v3293_v45, %v6822_v26  ;;  %v3304_v27 = vadd.f32 %v3303_v54, %v6823_v4  ;;  %v3305_v15 = vadd.f32 %v3303_v54, %v6824_v13 }
0x171d   :  { %v3316_v58 = vadd.f32 %v3315_v19, %v6825_v49  ;;  %v3317_v50 = vadd.f32 %v3315_v19, %v6826_v59  ;;  %v3328_v40 = vadd.f32 %v3327_v61, %v6827_v41  ;;  %v3329_v55 = vadd.f32 %v3327_v61, %v6828_v9 }
0x171e   :  { %vm3296_vm9 = vcmp.gt.f32.partialorder %v3294_v1, -inf  ;;  %vm3297_vm10 = vcmp.gt.f32.partialorder %v3295_v10, -inf  ;;  %v3340_v16 = vadd.f32 %v3339_v51, %v6829_v22  ;;  %v3341_v29 = vadd.f32 %v3339_v51, %v6830_v3 }
0x171f   :  { %v3298_v57 = vsel %vm3296_vm9, %v3294_v1, -inf  ;;  %v3299_v0 = vsel %vm3297_vm10, %v3295_v10, -inf  ;;  %v3352_v45 = vadd.f32 %v3351_v47, %v6831_v48  ;;  %v3353_v54 = vadd.f32 %v3351_v47, %v6832_v53 }
0x1720   :  { %vm3306_vm11 = vcmp.gt.f32.partialorder %v3304_v27, %v3298_v57  ;;  %vm3307_vm0 = vcmp.gt.f32.partialorder %v3305_v15, %v3299_v0  ;;  %v3364_v19 = vadd.f32 %v3363_v8, %v6833_v56  ;;  %v3365_v17 = vadd.f32 %v3363_v8, %v6834_v2 }
0x1721   :  { %v3308_v30 = vsel %vm3306_vm11, %v3304_v27, %v3298_v57  ;;  %v3309_v61 = vsel %vm3307_vm0, %v3305_v15, %v3299_v0  ;;  %v3310_v9 = vsel %vm3306_vm11, 1, %v6816_v11  ;;  %v3311_v22 = vsel %vm3307_vm0, 1, %v6816_v11 }
0x1722   :  { %vm3318_vm1 = vcmp.gt.f32.partialorder %v3316_v58, %v3308_v30  ;;  %vm3319_vm4 = vcmp.gt.f32.partialorder %v3317_v50, %v3309_v61  ;;  %v3376_v51 = vadd.f32 %v3375_v63, %v6835_v7  ;;  %v3377_v1 = vadd.f32 %v3375_v63, %v6836_v35 }
0x1723   :  { %v3320_v10 = vsel %vm3318_vm1, %v3316_v58, %v3308_v30  ;;  %v3321_v47 = vsel %vm3319_vm4, %v3317_v50, %v3309_v61  ;;  %v3322_v53 = vsel %vm3318_vm1, 2, %v3310_v9  ;;  %v3323_v48 = vsel %vm3319_vm4, 2, %v3311_v22 }
0x1724   :  { %vm3330_vm13 = vcmp.gt.f32.partialorder %v3328_v40, %v3320_v10  ;;  %vm3331_vm14 = vcmp.gt.f32.partialorder %v3329_v55, %v3321_v47  ;;  %v3387_v8 = vrot.slane %v5905_v60, %v5430_v42  ;;  %v3399_v27 = vrot.slane %v5905_v60, %v5435_v32 }
0x1725   :  { %v3332_v15 = vsel %vm3330_vm13, %v3328_v40, %v3320_v10  ;;  %v3333_v57 = vsel %vm3331_vm14, %v3329_v55, %v3321_v47  ;;  %v3334_v0 = vsel %vm3330_vm13, 3, %v3322_v53  ;;  %v3335_v2 = vsel %vm3331_vm14, 3, %v3323_v48 }
0x1726   :  { %vm3342_vm15 = vcmp.gt.f32.partialorder %v3340_v16, %v3332_v15  ;;  %vm3343_vm2 = vcmp.gt.f32.partialorder %v3341_v29, %v3333_v57  ;;  %v3388_v63 = vadd.f32 %v3387_v8, %v6837_v5  ;;  %v3389_v30 = vadd.f32 %v3387_v8, %v6838_v24 }
0x1727   :  { %v3344_v9 = vsel %vm3342_vm15, %v3340_v16, %v3332_v15  ;;  %v3345_v22 = vsel %vm3343_vm2, %v3341_v29, %v3333_v57  ;;  %v3346_v58 = vsel %vm3342_vm15, 4, %v3334_v0  ;;  %v3347_v50 = vsel %vm3343_vm2, 4, %v3335_v2 }
0x1728   :  { %vm3354_vm3 = vcmp.gt.f32.partialorder %v3352_v45, %v3344_v9  ;;  %vm3355_vm5 = vcmp.gt.f32.partialorder %v3353_v54, %v3345_v22  ;;  %v3400_v61 = vadd.f32 %v3399_v27, %v6839_v25  ;;  %v3401_v35 = vadd.f32 %v3399_v27, %v6840_v31 }
0x1729   :  { %v3356_v40 = vsel %vm3354_vm3, %v3352_v45, %v3344_v9  ;;  %v3357_v55 = vsel %vm3355_vm5, %v3353_v54, %v3345_v22  ;;  %v3358_v53 = vsel %vm3354_vm3, 5, %v3346_v58  ;;  %v3359_v48 = vsel %vm3355_vm5, 5, %v3347_v50  ;;  %v6849_v45 = vld [vmem:[#allocation20_spill] sm:$0xff] }
0x172a   :  { %vm3366_vm12 = vcmp.gt.f32.partialorder %v3364_v19, %v3356_v40  ;;  %vm3367_vm6 = vcmp.gt.f32.partialorder %v3365_v17, %v3357_v55  ;;  %v3411_v10 = vrot.slane %v5905_v60, %v5438_v33  ;;  %v3423_v16 = vrot.slane %v5905_v60, %v5441_v34 }
0x172b   :  { %v3368_v29 = vsel %vm3366_vm12, %v3364_v19, %v3356_v40  ;;  %v3369_v2 = vsel %vm3367_vm6, %v3365_v17, %v3357_v55  ;;  %v3370_v47 = vsel %vm3366_vm12, 6, %v3358_v53  ;;  %v3371_v8 = vsel %vm3367_vm6, 6, %v3359_v48 }
0x172c   :  { %vm3378_vm9 = vcmp.gt.f32.partialorder %v3376_v51, %v3368_v29  ;;  %vm3379_vm10 = vcmp.gt.f32.partialorder %v3377_v1, %v3369_v2  ;;  %v3412_v54 = vadd.f32 %v3411_v10, %v6849_v45  ;;  %v3413_v27 = vadd.f32 %v3411_v10, %v6842_v20 }
0x172d   :  { %v3380_v15 = vsel %vm3378_vm9, %v3376_v51, %v3368_v29  ;;  %v3381_v57 = vsel %vm3379_vm10, %v3377_v1, %v3369_v2  ;;  %v3382_v0 = vsel %vm3378_vm9, 7, %v3370_v47  ;;  %v3383_v9 = vsel %vm3379_vm10, 7, %v3371_v8 }
0x172e   :  { %vm3390_vm11 = vcmp.gt.f32.partialorder %v3388_v63, %v3380_v15  ;;  %vm3391_vm0 = vcmp.gt.f32.partialorder %v3389_v30, %v3381_v57  ;;  %v3424_v22 = vadd.f32 %v3423_v16, %v6843_v12  ;;  %v3425_v17 = vadd.f32 %v3423_v16, %v6844_v36 }
0x172f   :  { %v3392_v19 = vsel %vm3390_vm11, %v3388_v63, %v3380_v15  ;;  %v3393_v58 = vsel %vm3391_vm0, %v3389_v30, %v3381_v57  ;;  %v3394_v50 = vsel %vm3390_vm11, 8, %v3382_v0  ;;  %v3395_v40 = vsel %vm3391_vm0, 8, %v3383_v9 }
0x1730   :  { %vm3402_vm1 = vcmp.gt.f32.partialorder %v3400_v61, %v3392_v19  ;;  %vm3403_vm4 = vcmp.gt.f32.partialorder %v3401_v35, %v3393_v58  ;;  %v3435_v55 = vrot.slane %v5905_v60, %v5446_v21  ;;  %v3447_v51 = vrot.slane %v5905_v60, %v5449_v38 }
0x1731   :  { %v3404_v1 = vsel %vm3402_vm1, %v3400_v61, %v3392_v19  ;;  %v3405_v53 = vsel %vm3403_vm4, %v3401_v35, %v3393_v58  ;;  %v3406_v48 = vsel %vm3402_vm1, 9, %v3394_v50  ;;  %v3407_v10 = vsel %vm3403_vm4, 9, %v3395_v40 }
0x1732   :  { %vm3414_vm13 = vcmp.gt.f32.partialorder %v3412_v54, %v3404_v1  ;;  %vm3415_vm14 = vcmp.gt.f32.partialorder %v3413_v27, %v3405_v53  ;;  %v3436_v16 = vadd.f32 %v3435_v55, %v6845_v18  ;;  %v3437_v63 = vadd.f32 %v3435_v55, %v5614_v14 }
0x1733   :  { %v3416_v30 = vsel %vm3414_vm13, %v3412_v54, %v3404_v1  ;;  %v3417_v29 = vsel %vm3415_vm14, %v3413_v27, %v3405_v53  ;;  %v3418_v2 = vsel %vm3414_vm13, 10, %v3406_v48  ;;  %v3419_v47 = vsel %vm3415_vm14, 10, %v3407_v10  ;;  %v6853_v10 = vld [vmem:[#allocation37_spill] sm:$0xff] }
0x1734   :  { %vm3426_vm15 = vcmp.gt.f32.partialorder %v3424_v22, %v3416_v30  ;;  %vm3427_vm2 = vcmp.gt.f32.partialorder %v3425_v17, %v3417_v29  ;;  %v3448_v8 = vadd.f32 %v3447_v51, %v5469_v52  ;;  %v3449_v15 = vadd.f32 %v3447_v51, %v5580_v46 }
0x1735   :  { %v3428_v61 = vsel %vm3426_vm15, %v3424_v22, %v3416_v30  ;;  %v3429_v35 = vsel %vm3427_vm2, %v3425_v17, %v3417_v29  ;;  %v3430_v57 = vsel %vm3426_vm15, 11, %v3418_v2  ;;  %v3431_v0 = vsel %vm3427_vm2, 11, %v3419_v47  ;;  %v3471_v47 = vpop.permute.xlu0 %3470 }
0x1736   :  { %vm3438_vm3 = vcmp.gt.f32.partialorder %v3436_v16, %v3428_v61  ;;  %vm3439_vm5 = vcmp.gt.f32.partialorder %v3437_v63, %v3429_v35  ;;  %v3459_v9 = vrot.slane %v5905_v60, %v5455_v43  ;;  %v5972_v54 = vsel %vm3285_vm8, %v5905_v60, %v5895_v39  ;;  %v3469_v60 = vpop.permute.xlu1 %3468 }
0x1737   :  { %6850 = vst [vmem:[#allocation8_spill] sm:$0xff] %v5972_v54  ;;  %v3440_v27 = vsel %vm3438_vm3, %v3436_v16, %v3428_v61  ;;  %v3441_v19 = vsel %vm3439_vm5, %v3437_v63, %v3429_v35  ;;  %v3442_v58 = vsel %vm3438_vm3, 12, %v3430_v57  ;;  %v3443_v50 = vsel %vm3439_vm5, 12, %v3431_v0  ;;  %v6854_v16 = vld [vmem:[#allocation40_spill] sm:$0xff] }
0x1738   :  { %vm3450_vm12 = vcmp.gt.f32.partialorder %v3448_v8, %v3440_v27  ;;  %vm3451_vm6 = vcmp.gt.f32.partialorder %v3449_v15, %v3441_v19  ;;  %v3460_v22 = vadd.f32 %v3459_v9, %v5501_v37  ;;  %v3461_v17 = vadd.f32 %v3459_v9, %v5622_v28 }
0x1739   :  { %v3452_v40 = vsel %vm3450_vm12, %v3448_v8, %v3440_v27  ;;  %v3453_v55 = vsel %vm3451_vm6, %v3449_v15, %v3441_v19  ;;  %v3454_v51 = vsel %vm3450_vm12, 13, %v3442_v58  ;;  %v3455_v1 = vsel %vm3451_vm6, 13, %v3443_v50 }
0x173a   :  { %vm3462_vm9 = vcmp.gt.f32.partialorder %v3460_v22, %v3452_v40  ;;  %vm3463_vm10 = vcmp.gt.f32.partialorder %v3461_v17, %v3453_v55  ;;  %v3097_v63 = vsel %vm3094_vm7, %v6854_v16, %v6853_v10 }
0x173b   :  { %v3464_v53 = vsel %vm3462_vm9, %v3460_v22, %v3452_v40  ;;  %v5976_v48 = vsel %vm3462_vm9, 14, %v3454_v51  ;;  %v5978_v39 = vsel %vm3463_vm10, 14, %v3455_v1  ;;  %v3465_v30 = vsel %vm3463_vm10, %v3461_v17, %v3453_v55  ;;  %v6855_v51 = vld [vmem:[#allocation21_spill] sm:$0xff] }
0x173c   :  { %6851 = vst [vmem:[#allocation17_spill] sm:$0xff] %v5976_v48  ;;  %6852 = vst [vmem:[#allocation19_spill] sm:$0xff] %v5978_v39  ;;  %v5984_v29 = vadd.f32 %v3469_v60, %v3464_v53  ;;  %v5989_v2 = vsel %vm3285_vm8, %v5903_v62, %v3097_v63  ;;  %v5999_v57 = vadd.f32 %v3471_v47, %v3465_v30  ;;  %v6856_v53 = vld [vmem:[#allocation11_spill] sm:$0xff]  ;;  %v6857_v30 = vld [vmem:[#allocation12_spill] sm:$0xff] }
0x173e   :  { %v3484_v8 = vrot.slane %v5984_v29, %v5430_v42  ;;  %v3494_v15 = vrot.slane %v5984_v29, %v5435_v32  ;;  %v3506_v61 = vrot.slane %v5984_v29, %v5438_v33  ;;  %v3518_v35 = vrot.slane %v5984_v29, %v5441_v34 }
0x173f   :  { %v3530_v0 = vrot.slane %v5984_v29, %v5446_v21  ;;  %v3542_v62 = vrot.slane %v5984_v29, %v5449_v38  ;;  %v3554_v9 = vrot.slane %v5984_v29, %v5455_v43  ;;  %v3566_v50 = vrot.slane %v5984_v29, %v6813_v44 }
0x1740   :  { %v3485_v27 = vadd.f32 %v3484_v8, %v6821_v23  ;;  %v3486_v19 = vadd.f32 %v3484_v8, %v6822_v26  ;;  %v3495_v58 = vadd.f32 %v3494_v15, %v6823_v4  ;;  %v3496_v22 = vadd.f32 %v3494_v15, %v6824_v13  ;;  %v6858_v8 = vld [vmem:[#allocation25_spill] sm:$0xff] }
0x1741   :  { %v3507_v17 = vadd.f32 %v3506_v61, %v6825_v49  ;;  %v3508_v40 = vadd.f32 %v3506_v61, %v6826_v59  ;;  %v3519_v55 = vadd.f32 %v3518_v35, %v6827_v41  ;;  %v3520_v1 = vadd.f32 %v3518_v35, %v6855_v51 }
0x1742   :  { %vm3487_vm7 = vcmp.gt.f32.partialorder %v3485_v27, -inf  ;;  %vm3488_vm8 = vcmp.gt.f32.partialorder %v3486_v19, -inf  ;;  %v3531_v60 = vadd.f32 %v3530_v0, %v6856_v53  ;;  %v3532_v63 = vadd.f32 %v3530_v0, %v6830_v3 }
0x1743   :  { %v3489_v10 = vsel %vm3487_vm7, %v3485_v27, -inf  ;;  %v3490_v16 = vsel %vm3488_vm8, %v3486_v19, -inf  ;;  %v3543_v47 = vadd.f32 %v3542_v62, %v6857_v30  ;;  %v3544_v15 = vadd.f32 %v3542_v62, %v6858_v8  ;;  %v6859_v27 = vld [vmem:[#allocation27_spill] sm:$0xff] }
0x1744   :  { %vm3497_vm11 = vcmp.gt.f32.partialorder %v3495_v58, %v3489_v10  ;;  %vm3498_vm0 = vcmp.gt.f32.partialorder %v3496_v22, %v3490_v16  ;;  %v3555_v61 = vadd.f32 %v3554_v9, %v6833_v56  ;;  %v3556_v19 = vadd.f32 %v3554_v9, %v6859_v27  ;;  %v6860_v9 = vld [vmem:[#allocation28_spill] sm:$0xff] }
0x1745   :  { %v3499_v39 = vsel %vm3497_vm11, %v3495_v58, %v3489_v10  ;;  %v3500_v48 = vsel %vm3498_vm0, %v3496_v22, %v3490_v16  ;;  %v3501_v54 = vsel %vm3497_vm11, 1, %v6816_v11  ;;  %v3502_v35 = vsel %vm3498_vm0, 1, %v6816_v11 }
0x1746   :  { %vm3509_vm1 = vcmp.gt.f32.partialorder %v3507_v17, %v3499_v39  ;;  %vm3510_vm4 = vcmp.gt.f32.partialorder %v3508_v40, %v3500_v48  ;;  %v3567_v0 = vadd.f32 %v3566_v50, %v6835_v7  ;;  %v3578_v62 = vrot.slane %v5999_v57, %v5430_v42 }
0x1747   :  { %v3511_v53 = vsel %vm3509_vm1, %v3507_v17, %v3499_v39  ;;  %v3512_v30 = vsel %vm3510_vm4, %v3508_v40, %v3500_v48  ;;  %v3513_v41 = vsel %vm3509_vm1, 2, %v3501_v54  ;;  %v3514_v49 = vsel %vm3510_vm4, 2, %v3502_v35 }
0x1748   :  { %vm3521_vm13 = vcmp.gt.f32.partialorder %v3519_v55, %v3511_v53  ;;  %vm3522_vm14 = vcmp.gt.f32.partialorder %v3520_v1, %v3512_v30  ;;  %v3590_v58 = vrot.slane %v5999_v57, %v5435_v32  ;;  %v3568_v7 = vadd.f32 %v3566_v50, %v6860_v9 }
0x1749   :  { %v3523_v22 = vsel %vm3521_vm13, %v3519_v55, %v3511_v53  ;;  %v3524_v10 = vsel %vm3522_vm14, %v3520_v1, %v3512_v30  ;;  %v3525_v16 = vsel %vm3521_vm13, 3, %v3513_v41  ;;  %v3526_v11 = vsel %vm3522_vm14, 3, %v3514_v49 }
0x174a   :  { %vm3533_vm15 = vcmp.gt.f32.partialorder %v3531_v60, %v3523_v22  ;;  %vm3534_vm2 = vcmp.gt.f32.partialorder %v3532_v63, %v3524_v10  ;;  %v3579_v48 = vadd.f32 %v3578_v62, %v6837_v5  ;;  %v3580_v35 = vadd.f32 %v3578_v62, %v6838_v24 }
0x174b   :  { %v3535_v54 = vsel %vm3533_vm15, %v3531_v60, %v3523_v22  ;;  %v3536_v39 = vsel %vm3534_vm2, %v3532_v63, %v3524_v10  ;;  %v3537_v17 = vsel %vm3533_vm15, 4, %v3525_v16  ;;  %v3538_v40 = vsel %vm3534_vm2, 4, %v3526_v11 }
0x174c   :  { %vm3545_vm3 = vcmp.gt.f32.partialorder %v3543_v47, %v3535_v54  ;;  %vm3546_vm5 = vcmp.gt.f32.partialorder %v3544_v15, %v3536_v39  ;;  %v3591_v56 = vadd.f32 %v3590_v58, %v6839_v25  ;;  %v3602_v50 = vrot.slane %v5999_v57, %v5438_v33 }
0x174d   :  { %v3547_v55 = vsel %vm3545_vm3, %v3543_v47, %v3535_v54  ;;  %v3548_v1 = vsel %vm3546_vm5, %v3544_v15, %v3536_v39  ;;  %v3549_v41 = vsel %vm3545_vm3, 5, %v3537_v17  ;;  %v3550_v49 = vsel %vm3546_vm5, 5, %v3538_v40 }
0x174e   :  { %vm3557_vm12 = vcmp.gt.f32.partialorder %v3555_v61, %v3547_v55  ;;  %vm3558_vm6 = vcmp.gt.f32.partialorder %v3556_v19, %v3548_v1  ;;  %v3614_v53 = vrot.slane %v5999_v57, %v5441_v34  ;;  %v3592_v62 = vadd.f32 %v3590_v58, %v6840_v31 }
0x174f   :  { %v3559_v60 = vsel %vm3557_vm12, %v3555_v61, %v3547_v55  ;;  %v3560_v11 = vsel %vm3558_vm6, %v3556_v19, %v3548_v1  ;;  %v3561_v63 = vsel %vm3557_vm12, 6, %v3549_v41  ;;  %v3562_v30 = vsel %vm3558_vm6, 6, %v3550_v49 }
0x1750   :  { %vm3569_vm9 = vcmp.gt.f32.partialorder %v3567_v0, %v3559_v60  ;;  %vm3570_vm10 = vcmp.gt.f32.partialorder %v3568_v7, %v3560_v11  ;;  %v3603_v47 = vadd.f32 %v3602_v50, %v6849_v45  ;;  %v3604_v54 = vadd.f32 %v3602_v50, %v6842_v20 }
0x1751   :  { %v3571_v15 = vsel %vm3569_vm9, %v3567_v0, %v3559_v60  ;;  %v3572_v22 = vsel %vm3570_vm10, %v3568_v7, %v3560_v11  ;;  %v3573_v10 = vsel %vm3569_vm9, 7, %v3561_v63  ;;  %v3574_v16 = vsel %vm3570_vm10, 7, %v3562_v30 }
0x1752   :  { %vm3581_vm7 = vcmp.gt.f32.partialorder %v3579_v48, %v3571_v15  ;;  %vm3582_vm8 = vcmp.gt.f32.partialorder %v3580_v35, %v3572_v22  ;;  %v3615_v39 = vadd.f32 %v3614_v53, %v6843_v12  ;;  %vm3476_vm11 = vcmp.eq.s32.totalorder %v5636_v6, 5 }
0x1753   :  { %v3583_v61 = vsel %vm3581_vm7, %v3579_v48, %v3571_v15  ;;  %v3584_v19 = vsel %vm3582_vm8, %v3580_v35, %v3572_v22  ;;  %v3585_v17 = vsel %vm3581_vm7, 8, %v3573_v10  ;;  %v3586_v40 = vsel %vm3582_vm8, 8, %v3574_v16 }
0x1754   :  { %vm3593_vm0 = vcmp.gt.f32.partialorder %v3591_v56, %v3583_v61  ;;  %vm3594_vm1 = vcmp.gt.f32.partialorder %v3592_v62, %v3584_v19  ;;  %v3626_v0 = vrot.slane %v5999_v57, %v5446_v21  ;;  %v3638_v7 = vrot.slane %v5999_v57, %v5449_v38 }
0x1755   :  { %v3595_v58 = vsel %vm3593_vm0, %v3591_v56, %v3583_v61  ;;  %v3596_v55 = vsel %vm3594_vm1, %v3592_v62, %v3584_v19  ;;  %v3597_v1 = vsel %vm3593_vm0, 9, %v3585_v17  ;;  %v3598_v41 = vsel %vm3594_vm1, 9, %v3586_v40 }
0x1756   :  { %vm3605_vm4 = vcmp.gt.f32.partialorder %v3603_v47, %v3595_v58  ;;  %vm3606_vm13 = vcmp.gt.f32.partialorder %v3604_v54, %v3596_v55  ;;  %v3616_v48 = vadd.f32 %v3614_v53, %v6844_v36  ;;  %v3627_v35 = vadd.f32 %v3626_v0, %v6845_v18 }
0x1757   :  { %v3607_v49 = vsel %vm3605_vm4, %v3603_v47, %v3595_v58  ;;  %v3608_v50 = vsel %vm3606_vm13, %v3604_v54, %v3596_v55  ;;  %v3609_v60 = vsel %vm3605_vm4, 10, %v3597_v1  ;;  %v3610_v11 = vsel %vm3606_vm13, 10, %v3598_v41 }
0x1758   :  { %vm3617_vm14 = vcmp.gt.f32.partialorder %v3615_v39, %v3607_v49  ;;  %vm3618_vm15 = vcmp.gt.f32.partialorder %v3616_v48, %v3608_v50  ;;  %v3628_v63 = vadd.f32 %v3626_v0, %v5614_v14  ;;  %v3639_v30 = vadd.f32 %v3638_v7, %v5469_v52 }
0x1759   :  { %v3619_v56 = vsel %vm3617_vm14, %v3615_v39, %v3607_v49  ;;  %v3620_v62 = vsel %vm3618_vm15, %v3616_v48, %v3608_v50  ;;  %v3621_v15 = vsel %vm3617_vm14, 11, %v3609_v60  ;;  %v3622_v22 = vsel %vm3618_vm15, 11, %v3610_v11  ;;  %v3660_v48 = vpop.permute.xlu1 %3659 }
0x175a   :  { %vm3629_vm2 = vcmp.gt.f32.partialorder %v3627_v35, %v3619_v56  ;;  %vm3630_vm3 = vcmp.gt.f32.partialorder %v3628_v63, %v3620_v62  ;;  %v3640_v53 = vadd.f32 %v3638_v7, %v5580_v46  ;;  %v3650_v47 = vrot.slane %v5999_v57, %v5455_v43 }
0x175b   :  { %v3631_v10 = vsel %vm3629_vm2, %v3627_v35, %v3619_v56  ;;  %v3632_v16 = vsel %vm3630_vm3, %v3628_v63, %v3620_v62  ;;  %v3633_v54 = vsel %vm3629_vm2, 12, %v3621_v15  ;;  %v3634_v61 = vsel %vm3630_vm3, 12, %v3622_v22  ;;  %v3662_v15 = vpop.permute.xlu0 %3661 }
0x175c   :  { %vm3641_vm5 = vcmp.gt.f32.partialorder %v3639_v30, %v3631_v10  ;;  %vm3642_vm12 = vcmp.gt.f32.partialorder %v3640_v53, %v3632_v16  ;;  %v3651_v19 = vadd.f32 %v3650_v47, %v5501_v37  ;;  %v3652_v39 = vadd.f32 %v3650_v47, %v5622_v28 }
0x175d   :  { %v3643_v17 = vsel %vm3641_vm5, %v3639_v30, %v3631_v10  ;;  %v3644_v40 = vsel %vm3642_vm12, %v3640_v53, %v3632_v16  ;;  %v3645_v0 = vsel %vm3641_vm5, 13, %v3633_v54  ;;  %v3646_v58 = vsel %vm3642_vm12, 13, %v3634_v61 }
0x175e   :  { %vm3653_vm6 = vcmp.gt.f32.partialorder %v3651_v19, %v3643_v17  ;;  %vm3654_vm9 = vcmp.gt.f32.partialorder %v3652_v39, %v3644_v40  ;;  %v6060_v7 = vsel %vm3476_vm11, %v5984_v29, %v5989_v2 }
0x175f   :  { %v3655_v55 = vsel %vm3653_vm6, %v3651_v19, %v3643_v17  ;;  %v6062_v1 = vsel %vm3653_vm6, 14, %v3645_v0  ;;  %v6065_v41 = vsel %vm3654_vm9, 14, %v3646_v58  ;;  %v3656_v56 = vsel %vm3654_vm9, %v3652_v39, %v3644_v40 }
0x1760   :  { %6861 = vst [vmem:[#allocation23_spill] sm:$0xff] %v6062_v1  ;;  %6862 = vst [vmem:[#allocation16_spill] sm:$0xff] %v6065_v41  ;;  %v6067_v35 = vadd.f32 %v3660_v48, %v3655_v55  ;;  %v6113_v47 = vadd.f32 %v3662_v15, %v3656_v56  ;;  %v3873_v41 = vpop.permute.xlu0 %3872 }
0x1762   :  { %v3675_v49 = vrot.slane %v6067_v35, %v5430_v42  ;;  %v3685_v50 = vrot.slane %v6067_v35, %v5435_v32  ;;  %v3697_v29 = vrot.slane %v6067_v35, %v5438_v33  ;;  %v3709_v11 = vrot.slane %v6067_v35, %v5441_v34 }
0x1763   :  { %v3745_v10 = vrot.slane %v6067_v35, %v5455_v43  ;;  %v3757_v54 = vrot.slane %v6067_v35, %v6813_v44  ;;  %v3781_v58 = vrot.slane %v6113_v47, %v5435_v32 }
0x1764   :  { %v3677_v60 = vadd.f32 %v3675_v49, %v6822_v26  ;;  %v6077_v2 = vadd.f32 %v3685_v50, %v6824_v13  ;;  %v6086_v30 = vadd.f32 %v3697_v29, %v6826_v59  ;;  %v3721_v26 = vrot.slane %v6067_v35, %v5446_v21 }
0x1765   :  { %v6101_v62 = vadd.f32 %v3709_v11, %v6855_v51  ;;  %v3733_v59 = vrot.slane %v6067_v35, %v5449_v38  ;;  %v3676_v53 = vadd.f32 %v3675_v49, %v6821_v23  ;;  %v6130_v23 = vadd.f32 %v3685_v50, %v6823_v4  ;;  %v6863_v4 = vld [vmem:[#allocation9_spill] sm:$0xff] }
0x1766   :  { %vm3679_vm10 = vcmp.gt.f32.partialorder %v3677_v60, -inf  ;;  %v6118_v51 = vadd.f32 %v3721_v26, %v6830_v3  ;;  %v6151_v39 = vadd.f32 %v3697_v29, %v6863_v4  ;;  %v6156_v44 = vadd.f32 %v3745_v10, %v6859_v27  ;;  %v6864_v27 = vld [vmem:[#allocation10_spill] sm:$0xff] }
0x1767   :  { %v6081_v63 = vsel %vm3679_vm10, %v3677_v60, -inf  ;;  %vm3678_vm1 = vcmp.gt.f32.partialorder %v3676_v53, -inf  ;;  %v6135_v3 = vadd.f32 %v3733_v59, %v6858_v8  ;;  %v3769_v8 = vrot.slane %v6113_v47, %v5430_v42 }
0x1768   :  { %vm3689_vm7 = vcmp.gt.f32.partialorder %v6077_v2, %v6081_v63  ;;  %v6139_v61 = vsel %vm3678_vm1, %v3676_v53, -inf  ;;  %v6177_v0 = vadd.f32 %v3709_v11, %v6864_v27  ;;  %v6182_v42 = vadd.f32 %v3757_v54, %v6860_v9  ;;  %v6865_v9 = vld [vmem:[#allocation11_spill] sm:$0xff] }
0x1769   :  { %v6096_v13 = vsel %vm3689_vm7, %v6077_v2, %v6081_v63  ;;  %vm3688_vm13 = vcmp.gt.f32.partialorder %v6130_v23, %v6139_v61  ;;  %v6203_v49 = vadd.f32 %v3721_v26, %v6865_v9  ;;  %v6208_v32 = vadd.f32 %v3769_v8, %v6838_v24  ;;  %v6866_v24 = vld [vmem:[#allocation12_spill] sm:$0xff] }
0x176a   :  { %vm3701_vm8 = vcmp.gt.f32.partialorder %v6086_v30, %v6096_v13  ;;  %v6165_v17 = vsel %vm3688_vm13, %v6130_v23, %v6139_v61  ;;  %v3793_v50 = vrot.slane %v6113_v47, %v5438_v33  ;;  %v6229_v11 = vadd.f32 %v3733_v59, %v6866_v24 }
0x176b   :  { %v6110_v22 = vsel %vm3701_vm8, %v6086_v30, %v6096_v13  ;;  %vm3700_vm15 = vcmp.gt.f32.partialorder %v6151_v39, %v6165_v17  ;;  %v6234_v33 = vadd.f32 %v3781_v58, %v6840_v31  ;;  %v3805_v26 = vrot.slane %v6113_v47, %v5441_v34  ;;  %v6867_v31 = vld [vmem:[#allocation13_spill] sm:$0xff] }
0x176c   :  { %vm3713_vm0 = vcmp.gt.f32.partialorder %v6101_v62, %v6110_v22  ;;  %v6191_v55 = vsel %vm3700_vm15, %v6151_v39, %v6165_v17  ;;  %v6255_v15 = vadd.f32 %v3745_v10, %v6867_v31  ;;  %v6260_v34 = vadd.f32 %v3793_v50, %v6842_v20  ;;  %v6868_v20 = vld [vmem:[#allocation14_spill] sm:$0xff] }
0x176d   :  { %v6127_v16 = vsel %vm3713_vm0, %v6101_v62, %v6110_v22  ;;  %vm3712_vm3 = vcmp.gt.f32.partialorder %v6177_v0, %v6191_v55  ;;  %v3817_v53 = vrot.slane %v6113_v47, %v5446_v21  ;;  %v6281_v27 = vadd.f32 %v3757_v54, %v6868_v20 }
0x176e   :  { %vm3725_vm4 = vcmp.gt.f32.partialorder %v6118_v51, %v6127_v16  ;;  %v6217_v60 = vsel %vm3712_vm3, %v6177_v0, %v6191_v55  ;;  %v6286_v21 = vadd.f32 %v3805_v26, %v6844_v36  ;;  %v3829_v9 = vrot.slane %v6113_v47, %v5449_v38 }
0x176f   :  { %v6146_v19 = vsel %vm3725_vm4, %v6118_v51, %v6127_v16  ;;  %vm3724_vm12 = vcmp.gt.f32.partialorder %v6203_v49, %v6217_v60  ;;  %v6307_v36 = vadd.f32 %v3769_v8, %v6837_v5  ;;  %v6312_v38 = vadd.f32 %v3817_v53, %v5614_v14 }
0x1770   :  { %vm3737_vm14 = vcmp.gt.f32.partialorder %v6135_v3, %v6146_v19  ;;  %v6243_v56 = vsel %vm3724_vm12, %v6203_v49, %v6217_v60  ;;  %v3841_v31 = vrot.slane %v6113_v47, %v5455_v43  ;;  %v6333_v14 = vadd.f32 %v3781_v58, %v6839_v25 }
0x1771   :  { %v6172_v40 = vsel %vm3737_vm14, %v6135_v3, %v6146_v19  ;;  %vm3736_vm9 = vcmp.gt.f32.partialorder %v6229_v11, %v6243_v56  ;;  %6870 = vst [vmem:[#allocation18_spill] sm:$0xff] %v6312_v38  ;;  %v6338_v43 = vadd.f32 %v3829_v9, %v5580_v46  ;;  %v6357_v46 = vadd.f32 %v3793_v50, %v6849_v45 }
0x1772   :  { %vm6744_vm2 = vcmp.gt.f32.partialorder %v6156_v44, %v6172_v40  ;;  %v6269_v4 = vsel %vm3736_vm9, %v6229_v11, %v6243_v56  ;;  %v6362_v58 = vadd.f32 %v3841_v31, %v5622_v28  ;;  %v6381_v28 = vadd.f32 %v3805_v26, %v6843_v12  ;;  %v6883_v56 = vld [vmem:[#allocation5_spill] sm:$0xff] }
0x1773   :  { %v6198_v48 = vsel %vm6744_vm2, %v6156_v44, %v6172_v40  ;;  %vm6735_vm1 = vcmp.gt.f32.partialorder %v6255_v15, %v6269_v4  ;;  %6872 = vst [vmem:[#allocation31_spill] sm:$0xff] %v6338_v43  ;;  %v6401_v26 = vadd.f32 %v3817_v53, %v6845_v18  ;;  %vm3858_vm2 = vcmp.eq.s32.totalorder %v5636_v6, 7 }
0x1774   :  { %vm6733_vm5 = vcmp.gt.f32.partialorder %v6182_v42, %v6198_v48  ;;  %v6295_v24 = vsel %vm6735_vm1, %v6255_v15, %v6269_v4  ;;  %v6418_v18 = vadd.f32 %v3829_v9, %v5469_v52  ;;  %v6435_v52 = vadd.f32 %v3841_v31, %v5501_v37 }
0x1775   :  { %v6224_v29 = vsel %vm6733_vm5, %v6182_v42, %v6198_v48  ;;  %v6876_v9 = vmov 0  }
0x1776   :  { %vm6731_vm6 = vcmp.gt.f32.partialorder %v6208_v32, %v6224_v29 }
0x1777   :  { %v6250_v59 = vsel %vm6731_vm6, %v6208_v32, %v6224_v29 }
0x1778   :  { %vm6732_vm10 = vcmp.gt.f32.partialorder %v6234_v33, %v6250_v59 }
0x1779   :  { %v6276_v10 = vsel %vm6732_vm10, %v6234_v33, %v6250_v59  ;;  %vm6737_vm10 = vcmp.gt.f32.partialorder %v6281_v27, %v6295_v24 }
0x177a   :  { %vm6734_vm6 = vcmp.gt.f32.partialorder %v6260_v34, %v6276_v10  ;;  %v6321_v20 = vsel %vm6737_vm10, %v6281_v27, %v6295_v24 }
0x177b   :  { %v6302_v54 = vsel %vm6734_vm6, %v6260_v34, %v6276_v10  ;;  %vm6739_vm6 = vcmp.gt.f32.partialorder %v6307_v36, %v6321_v20 }
0x177c   :  { %6869 = vst [vmem:[#allocation29_spill] sm:$0xff] %v6302_v54  ;;  %vm6736_vm5 = vcmp.gt.f32.partialorder %v6286_v21, %v6302_v54  ;;  %v6345_v8 = vsel %vm6739_vm6, %v6307_v36, %v6321_v20 }
0x177d   :  { %v6328_v5 = vsel %vm6736_vm5, %v6286_v21, %v6302_v54  ;;  %vm6742_vm5 = vcmp.gt.f32.partialorder %v6333_v14, %v6345_v8  ;;  %v6875_v54 = vld [vmem:[#allocation8_spill] sm:$0xff] }
0x177e   :  { %6871 = vst [vmem:[#allocation30_spill] sm:$0xff] %v6328_v5  ;;  %vm6738_vm1 = vcmp.gt.f32.partialorder %v6312_v38, %v6328_v5  ;;  %v6369_v1 = vsel %vm6742_vm5, %v6333_v14, %v6345_v8 }
0x177f   :  { %v6352_v25 = vsel %vm6738_vm1, %v6312_v38, %v6328_v5  ;;  %vm3796_vm1 = vcmp.gt.f32.partialorder %v6357_v46, %v6369_v1  ;;  %v3853_v5 = vpop.permute.xlu0 %3852 }
0x1780   :  { %6873 = vst [vmem:[#allocation22_spill] sm:$0xff] %v6352_v25  ;;  %vm6741_vm10 = vcmp.gt.f32.partialorder %v6338_v43, %v6352_v25  ;;  %v6390_v50 = vsel %vm3796_vm1, %v6357_v46, %v6369_v1 }
0x1781   :  { %v6376_v45 = vsel %vm6741_vm10, %v6338_v43, %v6352_v25  ;;  %vm3667_vm10 = vcmp.eq.s32.totalorder %v5636_v6, 6  ;;  %vm3808_vm5 = vcmp.gt.f32.partialorder %v6381_v28, %v6390_v50  ;;  %v3868_v43 = vpop.permute.xlu1 %3867 }
0x1782   :  { %6874 = vst [vmem:[#allocation32_spill] sm:$0xff] %v6376_v45  ;;  %vm6749_vm6 = vcmp.gt.f32.partialorder %v6362_v58, %v6376_v45  ;;  %v6409_v38 = vsel %vm3808_vm5, %v6381_v28, %v6390_v50 }
0x1783   :  { %v3847_v12 = vsel %vm6749_vm6, %v6362_v58, %v6376_v45  ;;  %v3480_v45 = vsel %vm3476_vm11, %v5999_v57, %v6875_v54  ;;  %vm6750_vm6 = vcmp.gt.f32.partialorder %v6401_v26, %v6409_v38  ;;  %v3693_v54 = vsel %vm3689_vm7, 1, %v6876_v9 }
0x1784   :  { %v3857_v25 = vadd.f32 %v3853_v5, %v3847_v12  ;;  %v3671_v53 = vsel %vm3667_vm10, %v6113_v47, %v3480_v45  ;;  %v6428_v5 = vsel %vm6750_vm6, %v6401_v26, %v6409_v38  ;;  %v3705_v2 = vsel %vm3701_vm8, 2, %v3693_v54  ;;  %v6890_v54 = vld [vmem:[#allocation18_spill] sm:$0xff] }
0x1785   :  { %vm6751_vm11 = vcmp.gt.f32.partialorder %v6418_v18, %v6428_v5  ;;  %v3851_v45 = vpop.permute.xlu1 %3850  ;;  %vm3877_vm7 = vcmask 15360   ;;  %v3717_v30 = vsel %vm3713_vm0, 3, %v3705_v2  ;;  %vm6877_vm8 = vcmp.gt.f32.partialorder %v6156_v44, %v6172_v40 }
0x1786   :  { %v3862_v57 = vsel %vm3858_vm2, %v3857_v25, %v3671_v53  ;;  %v6442_v47 = vsel %vm6751_vm11, %v6418_v18, %v6428_v5  ;;  %v3692_v25 = vsel %vm3688_vm13, 1, %v6876_v9  ;;  %vm3879_vm11 = vcmask 14336  }
0x1787   :  { %vm3844_vm6 = vcmp.gt.f32.partialorder %v6435_v52, %v6442_v47  ;;  %v3876_v37 = vadd.f32 %v3873_v41, %v3862_v57  ;;  %v3704_v63 = vsel %vm3700_vm15, 2, %v3692_v25  ;;  %v3670_v41 = vsel %vm3667_vm10, %v6067_v35, %v6060_v7  ;;  %v6891_v25 = vld [vmem:[#allocation30_spill] sm:$0xff] }
0x1788   :  { %v3846_v31 = vsel %vm3844_vm6, %v6435_v52, %v6442_v47  ;;  %v3716_v13 = vsel %vm3712_vm3, 3, %v3704_v63  ;;  %v3729_v7 = vsel %vm3725_vm4, 4, %v3717_v30  ;;  %vm6878_vm0 = vcmp.gt.f32.partialorder %v6255_v15, %v6269_v4 }
0x1789   :  { %v3856_v12 = vadd.f32 %v3851_v45, %v3846_v31  ;;  %v3880_v61 = vsel %vm3879_vm11, %v3876_v37, -inf  ;;  %v3728_v35 = vsel %vm3724_vm12, 4, %v3716_v13  ;;  %v3741_v62 = vsel %vm3737_vm14, 5, %v3729_v7  ;;  %v6898_v45 = vld [vmem:[#allocation32_spill] sm:$0xff] }
0x178a   :  { %v3740_v22 = vsel %vm3736_vm9, 5, %v3728_v35  ;;  %v3753_v51 = vsel %vm6877_vm8, 6, %v3741_v62  ;;  %vm6879_vm4 = vcmp.gt.f32.partialorder %v6182_v42, %v6198_v48  ;;  %vm6880_vm13 = vcmp.gt.f32.partialorder %v6281_v27, %v6295_v24  ;;  %v6884_v42 = vld [vmem:[#allocation6_spill] sm:$0xff]  ;;  %v6903_v35 = vld [vmem:[#allocation16_spill] sm:$0xff] }
0x178b   :  { %v3861_v23 = vsel %vm3858_vm2, %v3856_v12, %v3670_v41  ;;  %v3752_v16 = vsel %vm6878_vm0, 6, %v3740_v22  ;;  %v3765_v3 = vsel %vm6879_vm4, 7, %v3753_v51  ;;  %vm6881_vm14 = vcmp.gt.f32.partialorder %v6208_v32, %v6224_v29 }
0x178c   :  { %v3875_v53 = vadd.f32 %v3868_v43, %v3861_v23  ;;  %v3764_v19 = vsel %vm6880_vm13, 7, %v3752_v16  ;;  %v3777_v44 = vsel %vm6881_vm14, 8, %v3765_v3  ;;  %vm6882_vm15 = vcmp.gt.f32.partialorder %v6307_v36, %v6321_v20 }
0x178d   :  { %v3776_v40 = vsel %vm6882_vm15, 8, %v3764_v19  ;;  %vm6885_vm12 = vcmp.gt.f32.partialorder %v6234_v33, %v6250_v59  ;;  %vm6886_vm9 = vcmp.gt.f32.partialorder %v6333_v14, %v6345_v8  ;;  %vm6887_vm8 = vcmp.gt.f32.partialorder %v6260_v34, %v6276_v10  ;;  %v6888_v59 = vld [vmem:[#allocation29_spill] sm:$0xff] }
0x178e   :  { %v3878_v39 = vsel %vm3877_vm7, %v3875_v53, -inf  ;;  %v3789_v4 = vsel %vm6885_vm12, 9, %v3777_v44  ;;  %v3788_v27 = vsel %vm6886_vm9, 9, %v3776_v40  ;;  %vm6889_vm4 = vcmp.gt.f32.partialorder %v6286_v21, %v6888_v59  ;;  %v6895_v21 = vld [vmem:[#allocation22_spill] sm:$0xff]  ;;  %v6904_v44 = vld [vmem:[#allocation17_spill] sm:$0xff] }
0x178f   :  { %v3881_v17 = vmax.f32 %v3878_v39, %v3880_v61  ;;  %v3801_v36 = vsel %vm6887_vm8, 10, %v3789_v4  ;;  %v3800_v20 = vsel %vm3796_vm1, 10, %v3788_v27  ;;  %vm6892_vm13 = vcmp.gt.f32.partialorder %v6890_v54, %v6891_v25  ;;  %v6909_v25 = vld [vmem:[#allocation15_spill] sm:$0xff] }
0x1790   :  { %v3813_v14 = vsel %vm6889_vm4, 11, %v3801_v36  ;;  %v3812_v8 = vsel %vm3808_vm5, 11, %v3800_v20  ;;  %vm6893_vm14 = vcmp.gt.f32.partialorder %v6401_v26, %v6409_v38  ;;  %vm6897_vm5 = vcmp.gt.f32.partialorder %v6418_v18, %v6428_v5 }
0x1791   :  { %v3882_v43 = vrot.slane %v3881_v17, 4  ;;  %v3825_v34 = vsel %vm6892_vm13, 12, %v3813_v14  ;;  %v3824_v1 = vsel %vm6893_vm14, 12, %v3812_v8  ;;  %vm3920_vm8 = vcmp.gt.s32.totalorder %v5636_v6, 6 }
0x1792   :  { %v3836_v28 = vsel %vm6897_vm5, 13, %v3824_v1  ;;  %vm3942_vm14 = vcmp.eq.s32.totalorder %v6883_v56, 5 }
0x1793   :  { %v3883_v0 = vmax.f32 %v3881_v17, %v3882_v43  ;;  %v3848_v38 = vsel %vm3844_vm6, 14, %v3836_v28  ;;  %vm3905_vm6 = vcmp.eq.s32.totalorder %v6883_v56, %v5636_v6  ;;  %v6902_v17 = vld [vmem:[#allocation23_spill] sm:$0xff] }
0x1795   :  { %v3884_v55 = vrot.slane %v3883_v0, 2 }
0x1797   :  { %v3885_v49 = vmax.f32 %v3883_v0, %v3884_v55 }
0x1799   :  { %v3886_v60 = vrot.slane %v3885_v49, 1 }
0x179b   :  { %v3887_v11 = vmax.f32 %v3885_v49, %v3886_v60 }
0x179d   :  { %vm3888_vm2 = vcmp.eq.f32.partialorder %v3875_v53, %v3887_v11  ;;  %vm3889_vm3 = vcmp.eq.f32.partialorder %v3876_v37, %v3887_v11  ;;  %v6894_v37 = vld [vmem:[#allocation31_spill] sm:$0xff] }
0x179e   :  { %v3890_v15 = vsel %vm3888_vm2, %v6883_v56, 15  ;;  %v3891_v48 = vsel %vm3889_vm3, %v6884_v42, 15  ;;  %vm6896_vm15 = vcmp.gt.f32.partialorder %v6894_v37, %v6895_v21  ;;  %vm6899_vm3 = vcmp.gt.f32.partialorder %v6362_v58, %v6898_v45 }
0x179f   :  { %v3892_v32 = vsel %vm3877_vm7, %v3890_v15, 2147483647  ;;  %v3893_v29 = vsel %vm3879_vm11, %v3891_v48, 2147483647  ;;  %v3837_v31 = vsel %vm6896_vm15, 13, %v3825_v34  ;;  %v6905_v15 = vld [vmem:[#allocation19_spill] sm:$0xff] }
0x17a0   :  { %vm3894_vm10 = vcmp.lt.s32.totalorder %v3892_v32, %v3893_v29  ;;  %v3849_v12 = vsel %vm6899_vm3, 14, %v3837_v31  ;;  %vm3962_vm3 = vcmp.eq.s32.totalorder %v6883_v56, 4 }
0x17a1   :  { %v3895_v24 = vsel %vm3894_vm10, %v3892_v32, %v3893_v29  ;;  %vm3922_vm10 = vcmp.eq.s32.totalorder %v6883_v56, 6 }
0x17a2   :  { %v3896_v33 = vrot.slane %v3895_v24, 4 }
0x17a4   :  { %vm3897_vm0 = vcmp.lt.s32.totalorder %v3895_v24, %v3896_v33 }
0x17a5   :  { %v3898_v57 = vsel %vm3897_vm0, %v3895_v24, %v3896_v33  ;;  %vm6557_vm0 = vmand %vm3922_vm10, %vm3920_vm8 }
0x17a6   :  { %v3899_v9 = vrot.slane %v3898_v57, 2 }
0x17a8   :  { %vm3900_vm1 = vcmp.lt.s32.totalorder %v3898_v57, %v3899_v9 }
0x17a9   :  { %v3901_v10 = vsel %vm3900_vm1, %v3898_v57, %v3899_v9  ;;  %vm3940_vm1 = vcmp.gt.s32.totalorder %v5636_v6, 5  ;;  %v6908_v9 = vld [vmem:[#allocation7_spill] sm:$0xff] }
0x17aa   :  { %v3902_v46 = vrot.slane %v3901_v10, 1  ;;  %vm3945_vm15 = vmand %vm3942_vm14, %vm3940_vm1 }
0x17ac   :  { %vm3903_vm2 = vcmp.lt.s32.totalorder %v3901_v10, %v3902_v46 }
0x17ad   :  { %v3904_v50 = vsel %vm3903_vm2, %v3901_v10, %v3902_v46 }
0x17ae   :  { %vm3907_vm12 = vcmp.eq.s32.totalorder %v6883_v56, %v3904_v50  ;;  %vm3908_vm9 = vcmp.eq.s32.totalorder %v6884_v42, %v3904_v50  ;;  %v3906_v30 = vsel %vm3905_vm6, %v3904_v50, 0  ;;  %vm3982_vm6 = vcmp.eq.s32.totalorder %v6883_v56, 3 }
0x17af   :  { %v3909_v26 = vsel %vm3907_vm12, %v3848_v38, 0  ;;  %v3910_v2 = vsel %vm3908_vm9, %v3849_v12, 0  ;;  %vm3960_vm12 = vcmp.gt.s32.totalorder %v5636_v6, 4 }
0x17b0   :  { %v3911_v63 = vsel %vm3877_vm7, %v3909_v26, 0  ;;  %v3912_v18 = vsel %vm3879_vm11, %v3910_v2, 0  ;;  %vm6579_vm9 = vmand %vm3962_vm3, %vm3960_vm12  ;;  %v6910_v26 = vld [vmem:[#allocation38_spill] sm:$0xff] }
0x17b1   :  { %v3913_v5 = vadd.s32 %v3912_v18, %v3911_v63  ;;  %v6911_v63 = vld [vmem:[#allocation39_spill] sm:$0xff] }
0x17b3   :  { %v3914_v41 = vrot.slane %v3913_v5, 4 }
0x17b5   :  { %v3915_v23 = vadd.s32 %v3914_v41, %v3913_v5 }
0x17b7   :  { %v3916_v61 = vrot.slane %v3915_v23, 2 }
0x17b9   :  { %v3917_v58 = vadd.s32 %v3916_v61, %v3915_v23 }
0x17bb   :  { %v3918_v52 = vrot.slane %v3917_v58, 1 }
0x17bd   :  { %v3919_v47 = vadd.s32 %v3918_v52, %v3917_v58 }
0x17bf   :  { %v3921_v13 = vsel %vm3920_vm8, %v3919_v47, %v3904_v50 }
0x17c0   :  { %v3926_v39 = vsel %vm6557_vm0, %v3921_v13, %v3906_v30  ;;  %vm3927_vm4 = vcmp.eq.s32.totalorder %v6883_v56, %v3921_v13  ;;  %vm3928_vm13 = vcmp.eq.s32.totalorder %v6884_v42, %v3921_v13  ;;  %vm3980_vm0 = vcmp.gt.s32.totalorder %v5636_v6, 3 }
0x17c1   :  { %v3929_v7 = vsel %vm3927_vm4, %v6902_v17, 0  ;;  %v3930_v43 = vsel %vm3928_vm13, %v6903_v35, 0  ;;  %vm3985_vm4 = vmand %vm3982_vm6, %vm3980_vm0 }
0x17c2   :  { %v3931_v62 = vsel %vm3877_vm7, %v3929_v7, 0  ;;  %v3932_v22 = vsel %vm3879_vm11, %v3930_v43, 0  ;;  %v6914_v7 = vld [vmem:[#allocation35_spill] sm:$0xff]  ;;  %v6915_v43 = vld [vmem:[#allocation36_spill] sm:$0xff] }
0x17c3   :  { %v3933_v0 = vadd.s32 %v3932_v22, %v3931_v62 }
0x17c5   :  { %v3934_v55 = vrot.slane %v3933_v0, 4 }
0x17c7   :  { %v3935_v51 = vadd.s32 %v3934_v55, %v3933_v0 }
0x17c9   :  { %v3936_v16 = vrot.slane %v3935_v51, 2 }
0x17cb   :  { %v3937_v49 = vadd.s32 %v3936_v16, %v3935_v51 }
0x17cd   :  { %v3938_v3 = vrot.slane %v3937_v49, 1 }
0x17cf   :  { %v3939_v19 = vadd.s32 %v3938_v3, %v3937_v49 }
0x17d1   :  { %v3941_v60 = vsel %vm3940_vm1, %v3939_v19, %v3921_v13  ;;  %vm4002_vm1 = vcmp.eq.s32.totalorder %v6883_v56, 2 }
0x17d2   :  { %v3946_v11 = vsel %vm3945_vm15, %v3941_v60, %v3926_v39  ;;  %vm3947_vm5 = vcmp.eq.s32.totalorder %v6883_v56, %v3941_v60  ;;  %vm3948_vm2 = vcmp.eq.s32.totalorder %v6884_v42, %v3941_v60  ;;  %vm4000_vm15 = vcmp.gt.s32.totalorder %v5636_v6, 2 }
0x17d3   :  { %v3949_v40 = vsel %vm3947_vm5, %v6904_v44, 0  ;;  %v3950_v48 = vsel %vm3948_vm2, %v6905_v15, 0  ;;  %vm6601_vm5 = vmand %vm4002_vm1, %vm4000_vm15 }
0x17d4   :  { %v3951_v4 = vsel %vm3877_vm7, %v3949_v40, 0  ;;  %v3952_v27 = vsel %vm3879_vm11, %v3950_v48, 0  ;;  %v6916_v40 = vld [vmem:[#allocation33_spill] sm:$0xff]  ;;  %v6917_v48 = vld [vmem:[#allocation34_spill] sm:$0xff] }
0x17d5   :  { %v3953_v32 = vadd.s32 %v3952_v27, %v3951_v4 }
0x17d7   :  { %v3954_v29 = vrot.slane %v3953_v32, 4 }
0x17d9   :  { %v3955_v24 = vadd.s32 %v3954_v29, %v3953_v32 }
0x17db   :  { %v3956_v36 = vrot.slane %v3955_v24, 2 }
0x17dd   :  { %v3957_v20 = vadd.s32 %v3956_v36, %v3955_v24 }
0x17df   :  { %v3958_v33 = vrot.slane %v3957_v20, 1 }
0x17e1   :  { %v3959_v59 = vadd.s32 %v3958_v33, %v3957_v20 }
0x17e3   :  { %v3961_v8 = vsel %vm3960_vm12, %v3959_v59, %v3941_v60  ;;  %vm4022_vm12 = vcmp.eq.s32.totalorder %v6883_v56, 1 }
0x17e4   :  { %v3966_v57 = vsel %vm6579_vm9, %v3961_v8, %v3946_v11  ;;  %vm3967_vm10 = vcmp.eq.s32.totalorder %v6883_v56, %v3961_v8  ;;  %vm3968_vm8 = vcmp.eq.s32.totalorder %v6884_v42, %v3961_v8  ;;  %vm4020_vm9 = vcmp.gt.s32.totalorder %v5636_v6, 1 }
0x17e5   :  { %v3969_v54 = vsel %vm3967_vm10, %v6908_v9, 0  ;;  %v3970_v34 = vsel %vm3968_vm8, %v6909_v25, 0  ;;  %vm4025_vm10 = vmand %vm4022_vm12, %vm4020_vm9 }
0x17e6   :  { %v3971_v1 = vsel %vm3877_vm7, %v3969_v54, 0  ;;  %v3972_v10 = vsel %vm3879_vm11, %v3970_v34, 0 }
0x17e7   :  { %v3973_v46 = vadd.s32 %v3972_v10, %v3971_v1 }
0x17e9   :  { %v3974_v37 = vrot.slane %v3973_v46, 4 }
0x17eb   :  { %v3975_v21 = vadd.s32 %v3974_v37, %v3973_v46 }
0x17ed   :  { %v3976_v31 = vrot.slane %v3975_v21, 2 }
0x17ef   :  { %v3977_v28 = vadd.s32 %v3976_v31, %v3975_v21 }
0x17f1   :  { %v3978_v50 = vrot.slane %v3977_v28, 1 }
0x17f3   :  { %v3979_v45 = vadd.s32 %v3978_v50, %v3977_v28 }
0x17f5   :  { %v3981_v12 = vsel %vm3980_vm0, %v3979_v45, %v3961_v8  ;;  %vm4042_vm0 = vcmp.eq.s32.totalorder %v6883_v56, 0 }
0x17f6   :  { %v3986_v38 = vsel %vm3985_vm4, %v3981_v12, %v3966_v57  ;;  %vm3987_vm13 = vcmp.eq.s32.totalorder %v6883_v56, %v3981_v12  ;;  %vm3988_vm14 = vcmp.eq.s32.totalorder %v6884_v42, %v3981_v12  ;;  %vm4040_vm4 = vcmp.gt.s32.totalorder %v5636_v6, 0 }
0x17f7   :  { %v3989_v2 = vsel %vm3987_vm13, %v6910_v26, 0  ;;  %v3990_v18 = vsel %vm3988_vm14, %v6911_v63, 0  ;;  %vm4045_vm13 = vmand %vm4042_vm0, %vm4040_vm4 }
0x17f8   :  { %v3991_v5 = vsel %vm3877_vm7, %v3989_v2, 0  ;;  %v3992_v41 = vsel %vm3879_vm11, %v3990_v18, 0 }
0x17f9   :  { %v3993_v23 = vadd.s32 %v3992_v41, %v3991_v5 }
0x17fb   :  { %v3994_v61 = vrot.slane %v3993_v23, 4 }
0x17fd   :  { %v3995_v58 = vadd.s32 %v3994_v61, %v3993_v23 }
0x17ff   :  { %v3996_v52 = vrot.slane %v3995_v58, 2 }
0x1801   :  { %v3997_v47 = vadd.s32 %v3996_v52, %v3995_v58 }
0x1803   :  { %v3998_v53 = vrot.slane %v3997_v47, 1 }
0x1805   :  { %v3999_v30 = vadd.s32 %v3998_v53, %v3997_v47 }
0x1807   :  { %v4001_v39 = vsel %vm4000_vm15, %v3999_v30, %v3981_v12 }
0x1808   :  { %v4006_v17 = vsel %vm6601_vm5, %v4001_v39, %v3986_v38  ;;  %vm4007_vm2 = vcmp.eq.s32.totalorder %v6883_v56, %v4001_v39  ;;  %vm4008_vm3 = vcmp.eq.s32.totalorder %v6884_v42, %v4001_v39 }
0x1809   :  { %v4009_v35 = vsel %vm4007_vm2, %v6914_v7, 0  ;;  %v4010_v62 = vsel %vm4008_vm3, %v6915_v43, 0 }
0x180a   :  { %v4011_v22 = vsel %vm3877_vm7, %v4009_v35, 0  ;;  %v4012_v0 = vsel %vm3879_vm11, %v4010_v62, 0 }
0x180b   :  { %v4013_v55 = vadd.s32 %v4012_v0, %v4011_v22 }
0x180d   :  { %v4014_v51 = vrot.slane %v4013_v55, 4 }
0x180f   :  { %v4015_v16 = vadd.s32 %v4014_v51, %v4013_v55 }
0x1811   :  { %v4016_v49 = vrot.slane %v4015_v16, 2 }
0x1813   :  { %v4017_v3 = vadd.s32 %v4016_v49, %v4015_v16 }
0x1815   :  { %v4018_v19 = vrot.slane %v4017_v3, 1 }
0x1817   :  { %v4019_v60 = vadd.s32 %v4018_v19, %v4017_v3 }
0x1819   :  { %v4021_v11 = vsel %vm4020_vm9, %v4019_v60, %v4001_v39 }
0x181a   :  { %v4026_v44 = vsel %vm4025_vm10, %v4021_v11, %v4006_v17  ;;  %vm4027_vm8 = vcmp.eq.s32.totalorder %v6883_v56, %v4021_v11  ;;  %vm4028_vm6 = vcmp.eq.s32.totalorder %v6884_v42, %v4021_v11 }
0x181b   :  { %v4029_v15 = vsel %vm4027_vm8, %v6916_v40, 0  ;;  %v4030_v4 = vsel %vm4028_vm6, %v6917_v48, 0 }
0x181c   :  { %v4031_v27 = vsel %vm3877_vm7, %v4029_v15, 0  ;;  %v4032_v32 = vsel %vm3879_vm11, %v4030_v4, 0 }
0x181d   :  { %v4033_v29 = vadd.s32 %v4032_v32, %v4031_v27 }
0x181f   :  { %v4034_v24 = vrot.slane %v4033_v29, 4 }
0x1821   :  { %v4035_v36 = vadd.s32 %v4034_v24, %v4033_v29 }
0x1823   :  { %v4036_v20 = vrot.slane %v4035_v36, 2 }
0x1825   :  { %v4037_v33 = vadd.s32 %v4036_v20, %v4035_v36 }
0x1827   :  { %v4038_v59 = vrot.slane %v4037_v33, 1 }
0x1829   :  { %v4039_v14 = vadd.s32 %v4038_v59, %v4037_v33 }
0x182b   :  { %v4041_v42 = vsel %vm4040_vm4, %v4039_v14, %v4021_v11 }
0x182c   :  { %v4046_v8 = vsel %vm4045_vm13, %v4041_v42, %v4026_v44 }
0x182d   :  { %4047 = vst.msk [vmem:[%s6651_s24] sm:$0xff] %vm3877_vm7, %v4046_v8 }

</bundles_post_ra>
